<compile_context>
chip_gen: v7x
topology: tpu7x:2x2x1
jax: 0.10.0
libtpu: 0.0.40
codegen_flags: <defaults>
</compile_context>

<pallas_src>
import math
from functools import partial

import jax
import jax.numpy as jnp
from jax.experimental import pallas as pl
from jax.experimental.pallas import tpu as pltpu

EPS = 1e-08
SLOPE = 0.2   # LeakyReLU negative slope


# ----------------------------- Pallas kernels -----------------------------

def _initial_conv_kernel(x_ref, w_ref, b_ref, m_ref, o_ref, xs_ref, *, offsets):
    """Plain 3x3 conv (padding=1) + bias; junk columns masked. Output in wide layout.

    x_ref (1, M_in, C) f32 padded-flat, w_ref (9, C, C) bf16 taps, b_ref (1, C),
    m_ref (M_out, 1) mask, o_ref (1, M_out, C), xs_ref (M_in, C) VMEM scratch.
    """
    m_out = o_ref.shape[1]
    cout = o_ref.shape[2]
    xs_ref[...] = x_ref[0]
    acc = jnp.zeros((m_out, cout), jnp.float32)
    for k, off in enumerate(offsets):
        xk = xs_ref[pl.ds(off, m_out), :].astype(jnp.bfloat16)
        acc = acc + jnp.dot(xk, w_ref[k], preferred_element_type=jnp.float32)
    o_ref[0] = ((acc + b_ref[...]) * m_ref[...]).astype(o_ref.dtype)


def _gen_block_kernel(*refs, offsets, pad_off, has_prev):
    """One full GeneratorBlock (post-upsample) fused into a single kernel.

    refs (inputs, in order):
      x_ref    (1, M_in, Cin)   f32 padded-flat activations
      st_ref   (1, 1, L)        f32 latent style vector
      s1w (L,Cin) s1b (1,Cin)   to_style1
      s2w (L,F)   s2b (1,F)     to_style2
      srw (L,F)   srb (1,F)     RGB to_style
      w1  (9,Cin,F) bf16        conv1 taps;   w1sq (Cin,F) f32 = sum_k w1_k^2
      w2  (9,F,F)   bf16        conv2 taps;   w2sq (F,F)   f32 = sum_k w2_k^2
      wr  (F,rgb)   bf16        1x1 RGB conv
      n1w n1b n2w n2b (1,F)     to_noise1 / to_noise2 linear params
      nz  (1, M_out, 1)         per-pixel noise scalar (already spatially transposed)
      m   (M_out, 1)            valid-pixel mask (junk columns -> 0)
      [prev (1, M_out, rgb)]    previous RGB in wide layout (only if has_prev)
    outputs: xw_ref (1, M_out, F), rgb_ref (1, M_out, rgb)
    scratch: xs_ref (M_in, Cin) f32, y1_ref (M_in, F) f32
    """
    refs = list(refs)
    y1_ref = refs.pop()
    xs_ref = refs.pop()
    rgb_ref = refs.pop()
    xw_ref = refs.pop()
    (x_ref, st_ref,
     s1w_ref, s1b_ref, s2w_ref, s2b_ref, srw_ref, srb_ref,
     w1_ref, w1sq_ref, w2_ref, w2sq_ref, wr_ref,
     n1w_ref, n1b_ref, n2w_ref, n2b_ref,
     nz_ref, m_ref) = refs[:19]
    prev_ref = refs[19] if has_prev else None

    m_out = xw_ref.shape[1]
    f = xw_ref.shape[2]

    # In-kernel style projections (tiny matmuls); s* already include the "+1".
    st = st_ref[0]                                                      # (1, L)
    s1 = jnp.dot(st, s1w_ref[...], preferred_element_type=jnp.float32) + s1b_ref[...] + 1.0
    s2 = jnp.dot(st, s2w_ref[...], preferred_element_type=jnp.float32) + s2b_ref[...] + 1.0
    sr = jnp.dot(st, srw_ref[...], preferred_element_type=jnp.float32) + srb_ref[...] + 1.0

    nz = nz_ref[0]                                                      # (M_out, 1)
    mask = m_ref[...]                                                   # (M_out, 1)

    # ---- conv1: 3x3 modulated conv + demod + noise1 + LeakyReLU ----
    # Modulate the input once (style on input channels == style on the weights).
    xs_ref[...] = x_ref[0] * s1                                         # (M_in, Cin) f32
    acc = jnp.zeros((m_out, f), jnp.float32)
    for k, off in enumerate(offsets):
        xk = xs_ref[pl.ds(off, m_out), :].astype(jnp.bfloat16)
        acc = acc + jnp.dot(xk, w1_ref[k], preferred_element_type=jnp.float32)
    # demod from modulated weights: sum_{c,kh,kw}(w*(s+1))^2 == (s+1)^2 @ sum_k w_k^2
    d1 = jax.lax.rsqrt(jnp.dot(s1 * s1, w1sq_ref[...],
                               preferred_element_type=jnp.float32) + EPS)
    acc = acc * d1 + nz * n1w_ref[...] + n1b_ref[...]
    acc = jnp.where(acc >= 0.0, acc, acc * SLOPE)
    acc = acc * mask                                                    # junk cols -> 0

    # Re-pad conv1's output into the next padded-flat layout entirely in VMEM,
    # folding the style2 modulation into the same write (zeros stay zero).
    y1_ref[...] = jnp.zeros_like(y1_ref)
    y1_ref[pl.ds(pad_off, m_out), :] = acc * s2

    # ---- conv2: 3x3 modulated conv + demod + noise2 + LeakyReLU ----
    acc2 = jnp.zeros((m_out, f), jnp.float32)
    for k, off in enumerate(offsets):
        yk = y1_ref[pl.ds(off, m_out), :].astype(jnp.bfloat16)
        acc2 = acc2 + jnp.dot(yk, w2_ref[k], preferred_element_type=jnp.float32)
    d2 = jax.lax.rsqrt(jnp.dot(s2 * s2, w2sq_ref[...],
                               preferred_element_type=jnp.float32) + EPS)
    acc2 = acc2 * d2 + nz * n2w_ref[...] + n2b_ref[...]
    acc2 = jnp.where(acc2 >= 0.0, acc2, acc2 * SLOPE)
    acc2 = acc2 * mask
    xw_ref[0] = acc2.astype(xw_ref.dtype)

    # ---- RGBBlock: 1x1 modulated conv (no demod, no bias) + prev-RGB accumulation ----
    # TODO(synk): RGB output keeps Cout=3 on the lane dim (masked stores); a lane-dense
    # (B, C, HW) layout would need an in-kernel transpose.
    xr = (acc2 * sr).astype(jnp.bfloat16)
    rgb = jnp.dot(xr, wr_ref[...], preferred_element_type=jnp.float32)
    if has_prev:
        rgb = rgb + prev_ref[0]
    rgb_ref[0] = rgb.astype(rgb_ref.dtype)


# ----------------------------- layout helpers (XLA glue) -----------------------------

def _wide_len(H, W):
    return (H - 1) * (W + 2) + W


def pad_flatten(x):
    """(B, H, W, C) NHWC -> zero-padded, spatially flattened (B, (H+2)*(W+2), C)."""
    B, H, W, C = x.shape
    xp = jnp.pad(x, ((0, 0), (1, 1), (1, 1), (0, 0)))
    return xp.reshape(B, (H + 2) * (W + 2), C)


def wide_to_padflat(xw, H, W):
    """Masked wide conv output -> next conv's padded-flat input with a single pad."""
    Wp = W + 2
    return jnp.pad(xw, ((0, 0), (Wp + 1, W + 3), (0, 0)))


def wide_to_nhwc(xw, H, W):
    B, Mw, C = xw.shape
    Wp = W + 2
    xw = jnp.pad(xw, ((0, 0), (0, H * Wp - Mw), (0, 0)))
    return xw.reshape(B, H, Wp, C)[:, :, :W, :]


def nhwc_to_wide(x):
    B, H, W, C = x.shape
    Wp = W + 2
    xp = jnp.pad(x, ((0, 0), (0, 0), (0, 2), (0, 0))).reshape(B, H * Wp, C)
    return xp[:, :_wide_len(H, W), :]


def wide_mask(H, W):
    Wp = W + 2
    m = (jnp.arange(_wide_len(H, W)) % Wp) < W
    return m.astype(jnp.float32)[:, None]


def upsample2x_bilinear(x):
    """nn.Upsample(scale_factor=2, mode='bilinear', align_corners=False) on NHWC."""
    # TODO(synk): separable 2x interpolation kept as XLA glue; folding the upsample
    # taps into the next block's conv1 input read would save a feature-map HBM pass.
    def up_axis(a, axis):
        n = a.shape[axis]
        idx = jnp.arange(n)
        left = jnp.take(a, jnp.maximum(idx - 1, 0), axis=axis)
        right = jnp.take(a, jnp.minimum(idx + 1, n - 1), axis=axis)
        even = 0.25 * left + 0.75 * a      # output 2j   -> src coord j - 0.25
        odd = 0.75 * a + 0.25 * right      # output 2j+1 -> src coord j + 0.25
        out = jnp.stack([even, odd], axis=axis + 1)
        new_shape = list(a.shape)
        new_shape[axis] = 2 * n
        return out.reshape(new_shape)
    return up_axis(up_axis(x, 1), 2)


# ----------------------------- kernel wrappers -----------------------------

def initial_conv(x_flat, w_taps, bias, *, H, W):
    """Plain 3x3 conv with bias (no style), wide f32 output."""
    B, M_in, C = x_flat.shape
    Wp = W + 2
    M_out = _wide_len(H, W)
    offsets = tuple(kh * Wp + kw for kh in range(3) for kw in range(3))
    mask = wide_mask(H, W)
    return pl.pallas_call(
        partial(_initial_conv_kernel, offsets=offsets),
        grid=(B,),
        in_specs=[
            pl.BlockSpec((1, M_in, C), lambda b: (b, 0, 0)),
            pl.BlockSpec((9, C, C), lambda b: (0, 0, 0)),
            pl.BlockSpec((1, C), lambda b: (0, 0)),
            pl.BlockSpec((M_out, 1), lambda b: (0, 0)),
        ],
        out_specs=pl.BlockSpec((1, M_out, C), lambda b: (b, 0, 0)),
        out_shape=jax.ShapeDtypeStruct((B, M_out, C), jnp.float32),
        scratch_shapes=[pltpu.VMEM((M_in, C), jnp.float32)],
        compiler_params=pltpu.CompilerParams(dimension_semantics=("parallel",)),
    )(x_flat, w_taps, bias.reshape(1, C), mask)


def generator_block(x_flat, istyle, blk, nz, prev_w, *, H, W):
    """One fused GeneratorBlock; returns (xw, rgbw), both wide-layout f32."""
    B, M_in, Cin = x_flat.shape
    L = istyle.shape[-1]
    F = blk['conv1_taps'].shape[2]
    rgb_ch = blk['rgb_w'].shape[1]
    Wp = W + 2
    M_out = _wide_len(H, W)
    assert M_in == (H + 2) * Wp
    offsets = tuple(kh * Wp + kw for kh in range(3) for kw in range(3))
    mask = wide_mask(H, W)

    inputs = [
        x_flat, istyle.reshape(B, 1, L),
        blk['style1_w'], blk['style1_b'].reshape(1, Cin),
        blk['style2_w'], blk['style2_b'].reshape(1, F),
        blk['styler_w'], blk['styler_b'].reshape(1, F),
        blk['conv1_taps'], blk['conv1_w2'],
        blk['conv2_taps'], blk['conv2_w2'],
        blk['rgb_w'],
        blk['noise1_w'].reshape(1, F), blk['noise1_b'].reshape(1, F),
        blk['noise2_w'].reshape(1, F), blk['noise2_b'].reshape(1, F),
        nz, mask,
    ]
    in_specs = [
        pl.BlockSpec((1, M_in, Cin), lambda b: (b, 0, 0)),
        pl.BlockSpec((1, 1, L), lambda b: (b, 0, 0)),
        pl.BlockSpec((L, Cin), lambda b: (0, 0)),
        pl.BlockSpec((1, Cin), lambda b: (0, 0)),
        pl.BlockSpec((L, F), lambda b: (0, 0)),
        pl.BlockSpec((1, F), lambda b: (0, 0)),
        pl.BlockSpec((L, F), lambda b: (0, 0)),
        pl.BlockSpec((1, F), lambda b: (0, 0)),
        pl.BlockSpec((9, Cin, F), lambda b: (0, 0, 0)),   # weights resident across grid
        pl.BlockSpec((Cin, F), lambda b: (0, 0)),
        pl.BlockSpec((9, F, F), lambda b: (0, 0, 0)),
        pl.BlockSpec((F, F), lambda b: (0, 0)),
        pl.BlockSpec((F, rgb_ch), lambda b: (0, 0)),
        pl.BlockSpec((1, F), lambda b: (0, 0)),
        pl.BlockSpec((1, F), lambda b: (0, 0)),
        pl.BlockSpec((1, F), lambda b: (0, 0)),
        pl.BlockSpec((1, F), lambda b: (0, 0)),
        pl.BlockSpec((1, M_out, 1), lambda b: (b, 0, 0)),
        pl.BlockSpec((M_out, 1), lambda b: (0, 0)),
    ]
    has_prev = prev_w is not None
    if has_prev:
        inputs.append(prev_w)
        in_specs.append(pl.BlockSpec((1, M_out, rgb_ch), lambda b: (b, 0, 0)))

    in_bytes = sum(int(a.nbytes) for a in inputs)
    out_bytes = B * M_out * (F + rgb_ch) * 4
    scratch_bytes = M_in * (Cin + F) * 4
    vmem_limit = int(min(100 * 2**20,
                         max(32 * 2**20,
                             2 * (in_bytes + out_bytes) + scratch_bytes + 2 * 2**20)))
    cost = pl.CostEstimate(
        flops=2 * B * M_out * (9 * Cin * F + 9 * F * F + F * rgb_ch),
        transcendentals=0,
        bytes_accessed=in_bytes + out_bytes)

    kernel = partial(_gen_block_kernel, offsets=offsets, pad_off=Wp + 1, has_prev=has_prev)
    # TODO(synk): for large resolutions add spatial (halo) tiling so a block never holds a
    # whole image in VMEM (needed on v7x's 64 MiB); test shapes here fit comfortably.
    xw, rgbw = pl.pallas_call(
        kernel,
        grid=(B,),
        in_specs=in_specs,
        out_specs=[pl.BlockSpec((1, M_out, F), lambda b: (b, 0, 0)),
                   pl.BlockSpec((1, M_out, rgb_ch), lambda b: (b, 0, 0))],
        out_shape=[jax.ShapeDtypeStruct((B, M_out, F), jnp.float32),
                   jax.ShapeDtypeStruct((B, M_out, rgb_ch), jnp.float32)],
        scratch_shapes=[pltpu.VMEM((M_in, Cin), jnp.float32),
                        pltpu.VMEM((M_in, F), jnp.float32)],
        compiler_params=pltpu.CompilerParams(
            dimension_semantics=("parallel",),           # batch items across TensorCores
            vmem_limit_bytes=vmem_limit),
        cost_estimate=cost,
    )(*inputs)
    return xw, rgbw


# ----------------------------- parameters -----------------------------

def _prep_conv_weight(w):
    """torch-layout (Cout, Cin, K, K) -> bf16 taps (K*K, Cin, Cout) + f32 sum_k w^2 (Cin, Cout)."""
    Cout, Cin, K, _ = w.shape
    taps = jnp.transpose(w, (2, 3, 1, 0)).reshape(K * K, Cin, Cout).astype(jnp.bfloat16)
    w2 = jnp.transpose(jnp.sum(w * w, axis=(2, 3)), (1, 0)).astype(jnp.float32)
    return taps, w2


def init_generator_params(key, image_size, latent_dim, network_capacity=4,
                          fmap_max=512, transparent=False):
    num_layers = int(math.log2(image_size) - 1)
    filters = [network_capacity * 2 ** (i + 1) for i in range(num_layers)][::-1]
    filters = [min(fmap_max, f) for f in filters]
    init_channels = filters[0]
    filters = [init_channels] + filters
    in_out = list(zip(filters[:-1], filters[1:]))
    rgb_ch = 4 if transparent else 3

    def normal(k, shape, scale=1.0):
        return scale * jax.random.normal(k, shape, jnp.float32)

    keys = iter(jax.random.split(key, 3 + 13 * len(in_out)))

    init_taps, _ = _prep_conv_weight(
        normal(next(keys), (init_channels, init_channels, 3, 3),
               1.0 / math.sqrt(9 * init_channels)))
    params = {
        'initial_block': normal(next(keys), (1, 4, 4, init_channels)),   # NHWC
        'initial_conv_taps': init_taps,
        'initial_conv_b': normal(next(keys), (init_channels,), 0.1),
        'blocks': [],
    }
    cfg = []
    for ind, (cin, cout) in enumerate(in_out):
        c1_taps, c1_w2 = _prep_conv_weight(
            normal(next(keys), (cout, cin, 3, 3), math.sqrt(2.0 / (cin * 9))))
        c2_taps, c2_w2 = _prep_conv_weight(
            normal(next(keys), (cout, cout, 3, 3), math.sqrt(2.0 / (cout * 9))))
        rgb_taps, _ = _prep_conv_weight(
            normal(next(keys), (rgb_ch, cout, 1, 1), math.sqrt(2.0 / cout)))
        blk = {
            'style1_w': normal(next(keys), (latent_dim, cin), 1.0 / math.sqrt(latent_dim)),
            'style1_b': normal(next(keys), (cin,), 0.1),
            'style2_w': normal(next(keys), (latent_dim, cout), 1.0 / math.sqrt(latent_dim)),
            'style2_b': normal(next(keys), (cout,), 0.1),
            'styler_w': normal(next(keys), (latent_dim, cout), 1.0 / math.sqrt(latent_dim)),
            'styler_b': normal(next(keys), (cout,), 0.1),
            'noise1_w': normal(next(keys), (1, cout)),
            'noise1_b': normal(next(keys), (cout,), 0.1),
            'noise2_w': normal(next(keys), (1, cout)),
            'noise2_b': normal(next(keys), (cout,), 0.1),
            'conv1_taps': c1_taps, 'conv1_w2': c1_w2,
            'conv2_taps': c2_taps, 'conv2_w2': c2_w2,
            'rgb_w': rgb_taps[0],          # (cout, rgb_ch) bf16
        }
        params['blocks'].append(blk)
        cfg.append({'upsample': ind != 0, 'upsample_rgb': ind != num_layers - 1})
    return params, cfg


# ----------------------------- forward pass -----------------------------

def generator_forward(params, cfg, styles, input_noise):
    """styles: (B, num_layers, latent_dim); input_noise: (B, S, S, 1). Returns NCHW rgb."""
    B = styles.shape[0]
    c0 = params['initial_block'].shape[-1]
    H = W = 4
    x0 = jnp.broadcast_to(params['initial_block'], (B, 4, 4, c0))
    # initial plain 3x3 Conv2d (real bias, no demod/noise/activation)
    xw = initial_conv(pad_flatten(x0), params['initial_conv_taps'],
                      params['initial_conv_b'], H=H, W=W)
    rgb = None
    for i, (blk, c) in enumerate(zip(params['blocks'], cfg)):
        istyle = styles[:, i, :]
        if c['upsample']:
            x_nhwc = upsample2x_bilinear(wide_to_nhwc(xw, H, W))
            H, W = x_nhwc.shape[1], x_nhwc.shape[2]
            x_in = pad_flatten(x_nhwc)
        else:
            x_in = wide_to_padflat(xw, H, W)      # wide output -> padded-flat with one pad

        # per-pixel noise scalar; the spatial transpose reproduces lucidrains' permute(0,3,2,1)
        # (valid because H == W for this generator)
        nz = nhwc_to_wide(jnp.transpose(input_noise[:, :H, :W, :], (0, 2, 1, 3)))
        prev_w = nhwc_to_wide(rgb) if rgb is not None else None

        xw, rgbw = generator_block(x_in, istyle, blk, nz, prev_w, H=H, W=W)

        rgb = wide_to_nhwc(rgbw, H, W)
        if c['upsample_rgb']:
            rgb = upsample2x_bilinear(rgb)
    return jnp.transpose(rgb, (0, 3, 1, 2))   # -> NCHW, matching the PyTorch output


# ----------------------------- main -----------------------------

if __name__ == "__main__":
    image_size = 16
    latent_dim = 32
    network_capacity = 4
    batch = 2
    num_layers = int(math.log2(image_size) - 1)

    key = jax.random.PRNGKey(0)
    k_params, k_styles, k_noise = jax.random.split(key, 3)

    params, cfg = init_generator_params(k_params, image_size, latent_dim,
                                        network_capacity=network_capacity)
    styles = jax.random.normal(k_styles, (batch, num_layers, latent_dim), jnp.float32)
    input_noise = jax.random.uniform(k_noise, (batch, image_size, image_size, 1), jnp.float32)

    fwd = jax.jit(lambda s, n: generator_forward(params, cfg, s, n))
    rgb = jax.block_until_ready(fwd(styles, input_noise))

    assert rgb.shape == (batch, 3, image_size, image_size), rgb.shape
    assert bool(jnp.all(jnp.isfinite(rgb)))
    print("KERNEL_OK")
</pallas_src>

<mosaic_0001>
module attributes {stable_mosaic.version = 11 : i64} {
  func.func @_initial_conv_kernel(%arg0: i32, %arg1: memref<1x36x32xf32, #tpu.memory_space<vmem>>, %arg2: memref<9x32x32xbf16, #tpu.memory_space<vmem>>, %arg3: memref<1x32xf32, #tpu.memory_space<vmem>>, %arg4: memref<22x1xf32, #tpu.memory_space<vmem>>, %arg5: memref<1x22x32xf32, #tpu.memory_space<vmem>>, %arg6: memref<36x32xf32, #tpu.memory_space<vmem>>) attributes {dimension_semantics = [#tpu.dimension_semantics<parallel>], iteration_bounds = array<i64: 2>, scalar_prefetch = 0 : i64, scratch_operands = 1 : i64, tpu.core_type = #tpu.core_type<tc>, window_params = [{transform_indices = @transform_0, window_bounds = array<i64: 1, 36, 32>}, {pipeline_mode = #tpu.pipeline_mode<synchronous>, transform_indices = @transform_1, window_bounds = array<i64: 9, 32, 32>}, {pipeline_mode = #tpu.pipeline_mode<synchronous>, transform_indices = @transform_2, window_bounds = array<i64: 1, 32>}, {pipeline_mode = #tpu.pipeline_mode<synchronous>, transform_indices = @transform_3, window_bounds = array<i64: 22, 1>}, {transform_indices = @transform_4, window_bounds = array<i64: 1, 22, 32>}]} {
    %c0 = arith.constant 0 : index
    %c0_0 = arith.constant 0 : index
    %c0_1 = arith.constant 0 : index
    %0 = vector.load %arg1[%c0, %c0_0, %c0_1] : memref<1x36x32xf32, #tpu.memory_space<vmem>>, vector<1x36x32xf32>
    %1 = vector.shape_cast %0 : vector<1x36x32xf32> to vector<36x32xf32>
    %c0_2 = arith.constant 0 : index
    %c0_3 = arith.constant 0 : index
    %2 = vector.load %arg6[%c0_2, %c0_3] : memref<36x32xf32, #tpu.memory_space<vmem>>, vector<36x32xf32>
    tpu.vector_store %arg6[%c0_2, %c0_3], %1 {strides = array<i32>} : memref<36x32xf32, #tpu.memory_space<vmem>>, vector<36x32xf32>,
    %cst = arith.constant 0.000000e+00 : f32
    %3 = vector.broadcast %cst : f32 to vector<22x32xf32>
    %c0_4 = arith.constant 0 : index
    %c0_5 = arith.constant 0 : index
    %4 = vector.load %arg6[%c0_4, %c0_5] : memref<36x32xf32, #tpu.memory_space<vmem>>, vector<22x32xf32>
    %5 = arith.truncf %4 : vector<22x32xf32> to vector<22x32xbf16>
    %c0_6 = arith.constant 0 : index
    %c0_7 = arith.constant 0 : index
    %c0_8 = arith.constant 0 : index
    %6 = vector.load %arg2[%c0_6, %c0_7, %c0_8] : memref<9x32x32xbf16, #tpu.memory_space<vmem>>, vector<1x32x32xbf16>
    %7 = vector.shape_cast %6 : vector<1x32x32xbf16> to vector<32x32xbf16>
    %cst_9 = arith.constant dense<0.000000e+00> : vector<22x32xf32>
    %8 = tpu.matmul %5, %7, %cst_9 {dimension_numbers = #tpu.dot_dimension_numbers<[1], [0], [0], [1], [0, 0, 1, 1], [], []>} : vector<22x32xbf16>, vector<32x32xbf16>, vector<22x32xf32> -> vector<22x32xf32>
    %9 = arith.addf %3, %8 : vector<22x32xf32>
    %c1 = arith.constant 1 : index
    %c0_10 = arith.constant 0 : index
    %10 = vector.load %arg6[%c1, %c0_10] : memref<36x32xf32, #tpu.memory_space<vmem>>, vector<22x32xf32>
    %11 = arith.truncf %10 : vector<22x32xf32> to vector<22x32xbf16>
    %c1_11 = arith.constant 1 : index
    %c0_12 = arith.constant 0 : index
    %c0_13 = arith.constant 0 : index
    %12 = vector.load %arg2[%c1_11, %c0_12, %c0_13] : memref<9x32x32xbf16, #tpu.memory_space<vmem>>, vector<1x32x32xbf16>
    %13 = vector.shape_cast %12 : vector<1x32x32xbf16> to vector<32x32xbf16>
    %cst_14 = arith.constant dense<0.000000e+00> : vector<22x32xf32>
    %14 = tpu.matmul %11, %13, %cst_14 {dimension_numbers = #tpu.dot_dimension_numbers<[1], [0], [0], [1], [0, 0, 1, 1], [], []>} : vector<22x32xbf16>, vector<32x32xbf16>, vector<22x32xf32> -> vector<22x32xf32>
    %15 = arith.addf %9, %14 : vector<22x32xf32>
    %c2 = arith.constant 2 : index
    %c0_15 = arith.constant 0 : index
    %16 = vector.load %arg6[%c2, %c0_15] : memref<36x32xf32, #tpu.memory_space<vmem>>, vector<22x32xf32>
    %17 = arith.truncf %16 : vector<22x32xf32> to vector<22x32xbf16>
    %c2_16 = arith.constant 2 : index
    %c0_17 = arith.constant 0 : index
    %c0_18 = arith.constant 0 : index
    %18 = vector.load %arg2[%c2_16, %c0_17, %c0_18] : memref<9x32x32xbf16, #tpu.memory_space<vmem>>, vector<1x32x32xbf16>
    %19 = vector.shape_cast %18 : vector<1x32x32xbf16> to vector<32x32xbf16>
    %cst_19 = arith.constant dense<0.000000e+00> : vector<22x32xf32>
    %20 = tpu.matmul %17, %19, %cst_19 {dimension_numbers = #tpu.dot_dimension_numbers<[1], [0], [0], [1], [0, 0, 1, 1], [], []>} : vector<22x32xbf16>, vector<32x32xbf16>, vector<22x32xf32> -> vector<22x32xf32>
    %21 = arith.addf %15, %20 : vector<22x32xf32>
    %c6 = arith.constant 6 : index
    %c0_20 = arith.constant 0 : index
    %22 = vector.load %arg6[%c6, %c0_20] : memref<36x32xf32, #tpu.memory_space<vmem>>, vector<22x32xf32>
    %23 = arith.truncf %22 : vector<22x32xf32> to vector<22x32xbf16>
    %c3 = arith.constant 3 : index
    %c0_21 = arith.constant 0 : index
    %c0_22 = arith.constant 0 : index
    %24 = vector.load %arg2[%c3, %c0_21, %c0_22] : memref<9x32x32xbf16, #tpu.memory_space<vmem>>, vector<1x32x32xbf16>
    %25 = vector.shape_cast %24 : vector<1x32x32xbf16> to vector<32x32xbf16>
    %cst_23 = arith.constant dense<0.000000e+00> : vector<22x32xf32>
    %26 = tpu.matmul %23, %25, %cst_23 {dimension_numbers = #tpu.dot_dimension_numbers<[1], [0], [0], [1], [0, 0, 1, 1], [], []>} : vector<22x32xbf16>, vector<32x32xbf16>, vector<22x32xf32> -> vector<22x32xf32>
    %27 = arith.addf %21, %26 : vector<22x32xf32>
    %c7 = arith.constant 7 : index
    %c0_24 = arith.constant 0 : index
    %28 = vector.load %arg6[%c7, %c0_24] : memref<36x32xf32, #tpu.memory_space<vmem>>, vector<22x32xf32>
    %29 = arith.truncf %28 : vector<22x32xf32> to vector<22x32xbf16>
    %c4 = arith.constant 4 : index
    %c0_25 = arith.constant 0 : index
    %c0_26 = arith.constant 0 : index
    %30 = vector.load %arg2[%c4, %c0_25, %c0_26] : memref<9x32x32xbf16, #tpu.memory_space<vmem>>, vector<1x32x32xbf16>
    %31 = vector.shape_cast %30 : vector<1x32x32xbf16> to vector<32x32xbf16>
    %cst_27 = arith.constant dense<0.000000e+00> : vector<22x32xf32>
    %32 = tpu.matmul %29, %31, %cst_27 {dimension_numbers = #tpu.dot_dimension_numbers<[1], [0], [0], [1], [0, 0, 1, 1], [], []>} : vector<22x32xbf16>, vector<32x32xbf16>, vector<22x32xf32> -> vector<22x32xf32>
    %33 = arith.addf %27, %32 : vector<22x32xf32>
    %c8 = arith.constant 8 : index
    %c0_28 = arith.constant 0 : index
    %34 = vector.load %arg6[%c8, %c0_28] : memref<36x32xf32, #tpu.memory_space<vmem>>, vector<22x32xf32>
    %35 = arith.truncf %34 : vector<22x32xf32> to vector<22x32xbf16>
    %c5 = arith.constant 5 : index
    %c0_29 = arith.constant 0 : index
    %c0_30 = arith.constant 0 : index
    %36 = vector.load %arg2[%c5, %c0_29, %c0_30] : memref<9x32x32xbf16, #tpu.memory_space<vmem>>, vector<1x32x32xbf16>
    %37 = vector.shape_cast %36 : vector<1x32x32xbf16> to vector<32x32xbf16>
    %cst_31 = arith.constant dense<0.000000e+00> : vector<22x32xf32>
    %38 = tpu.matmul %35, %37, %cst_31 {dimension_numbers = #tpu.dot_dimension_numbers<[1], [0], [0], [1], [0, 0, 1, 1], [], []>} : vector<22x32xbf16>, vector<32x32xbf16>, vector<22x32xf32> -> vector<22x32xf32>
    %39 = arith.addf %33, %38 : vector<22x32xf32>
    %c12 = arith.constant 12 : index
    %c0_32 = arith.constant 0 : index
    %40 = vector.load %arg6[%c12, %c0_32] : memref<36x32xf32, #tpu.memory_space<vmem>>, vector<22x32xf32>
    %41 = arith.truncf %40 : vector<22x32xf32> to vector<22x32xbf16>
    %c6_33 = arith.constant 6 : index
    %c0_34 = arith.constant 0 : index
    %c0_35 = arith.constant 0 : index
    %42 = vector.load %arg2[%c6_33, %c0_34, %c0_35] : memref<9x32x32xbf16, #tpu.memory_space<vmem>>, vector<1x32x32xbf16>
    %43 = vector.shape_cast %42 : vector<1x32x32xbf16> to vector<32x32xbf16>
    %cst_36 = arith.constant dense<0.000000e+00> : vector<22x32xf32>
    %44 = tpu.matmul %41, %43, %cst_36 {dimension_numbers = #tpu.dot_dimension_numbers<[1], [0], [0], [1], [0, 0, 1, 1], [], []>} : vector<22x32xbf16>, vector<32x32xbf16>, vector<22x32xf32> -> vector<22x32xf32>
    %45 = arith.addf %39, %44 : vector<22x32xf32>
    %c13 = arith.constant 13 : index
    %c0_37 = arith.constant 0 : index
    %46 = vector.load %arg6[%c13, %c0_37] : memref<36x32xf32, #tpu.memory_space<vmem>>, vector<22x32xf32>
    %47 = arith.truncf %46 : vector<22x32xf32> to vector<22x32xbf16>
    %c7_38 = arith.constant 7 : index
    %c0_39 = arith.constant 0 : index
    %c0_40 = arith.constant 0 : index
    %48 = vector.load %arg2[%c7_38, %c0_39, %c0_40] : memref<9x32x32xbf16, #tpu.memory_space<vmem>>, vector<1x32x32xbf16>
    %49 = vector.shape_cast %48 : vector<1x32x32xbf16> to vector<32x32xbf16>
    %cst_41 = arith.constant dense<0.000000e+00> : vector<22x32xf32>
    %50 = tpu.matmul %47, %49, %cst_41 {dimension_numbers = #tpu.dot_dimension_numbers<[1], [0], [0], [1], [0, 0, 1, 1], [], []>} : vector<22x32xbf16>, vector<32x32xbf16>, vector<22x32xf32> -> vector<22x32xf32>
    %51 = arith.addf %45, %50 : vector<22x32xf32>
    %c14 = arith.constant 14 : index
    %c0_42 = arith.constant 0 : index
    %52 = vector.load %arg6[%c14, %c0_42] : memref<36x32xf32, #tpu.memory_space<vmem>>, vector<22x32xf32>
    %53 = arith.truncf %52 : vector<22x32xf32> to vector<22x32xbf16>
    %c8_43 = arith.constant 8 : index
    %c0_44 = arith.constant 0 : index
    %c0_45 = arith.constant 0 : index
    %54 = vector.load %arg2[%c8_43, %c0_44, %c0_45] : memref<9x32x32xbf16, #tpu.memory_space<vmem>>, vector<1x32x32xbf16>
    %55 = vector.shape_cast %54 : vector<1x32x32xbf16> to vector<32x32xbf16>
    %cst_46 = arith.constant dense<0.000000e+00> : vector<22x32xf32>
    %56 = tpu.matmul %53, %55, %cst_46 {dimension_numbers = #tpu.dot_dimension_numbers<[1], [0], [0], [1], [0, 0, 1, 1], [], []>} : vector<22x32xbf16>, vector<32x32xbf16>, vector<22x32xf32> -> vector<22x32xf32>
    %57 = arith.addf %51, %56 : vector<22x32xf32>
    %c0_47 = arith.constant 0 : index
    %c0_48 = arith.constant 0 : index
    %58 = vector.load %arg3[%c0_47, %c0_48] : memref<1x32xf32, #tpu.memory_space<vmem>>, vector<1x32xf32>
    %59 = vector.broadcast %58 : vector<1x32xf32> to vector<22x32xf32>
    %60 = arith.addf %57, %59 : vector<22x32xf32>
    %c0_49 = arith.constant 0 : index
    %c0_50 = arith.constant 0 : index
    %61 = vector.load %arg4[%c0_49, %c0_50] : memref<22x1xf32, #tpu.memory_space<vmem>>, vector<22x1xf32>
    %62 = vector.broadcast %61 : vector<22x1xf32> to vector<22x32xf32>
    %63 = arith.mulf %60, %62 : vector<22x32xf32>
    %c0_51 = arith.constant 0 : index
    %c0_52 = arith.constant 0 : index
    %c0_53 = arith.constant 0 : index
    %64 = vector.load %arg5[%c0_51, %c0_52, %c0_53] : memref<1x22x32xf32, #tpu.memory_space<vmem>>, vector<1x22x32xf32>
    %65 = vector.shape_cast %64 : vector<1x22x32xf32> to vector<22x32xf32>
    %66 = vector.shape_cast %63 : vector<22x32xf32> to vector<1x22x32xf32>
    tpu.vector_store %arg5[%c0_51, %c0_52, %c0_53], %66 {strides = array<i32>} : memref<1x22x32xf32, #tpu.memory_space<vmem>>, vector<1x22x32xf32>,
    return
  }
  func.func @transform_0(%arg0: i32) -> (i32, i32, i32) {
    %c0_i32 = arith.constant 0 : i32
    %c0_i32_0 = arith.constant 0 : i32
    %c0_i32_1 = arith.constant 0 : i32
    return %arg0, %c0_i32, %c0_i32_0 : i32, i32, i32
  }
  func.func @transform_1(%arg0: i32) -> (i32, i32, i32) {
    %c0_i32 = arith.constant 0 : i32
    %c0_i32_0 = arith.constant 0 : i32
    %c0_i32_1 = arith.constant 0 : i32
    %c0_i32_2 = arith.constant 0 : i32
    return %c0_i32, %c0_i32_0, %c0_i32_1 : i32, i32, i32
  }
  func.func @transform_2(%arg0: i32) -> (i32, i32) {
    %c0_i32 = arith.constant 0 : i32
    %c0_i32_0 = arith.constant 0 : i32
    %c0_i32_1 = arith.constant 0 : i32
    return %c0_i32, %c0_i32_0 : i32, i32
  }
  func.func @transform_3(%arg0: i32) -> (i32, i32) {
    %c0_i32 = arith.constant 0 : i32
    %c0_i32_0 = arith.constant 0 : i32
    %c0_i32_1 = arith.constant 0 : i32
    return %c0_i32, %c0_i32_0 : i32, i32
  }
  func.func @transform_4(%arg0: i32) -> (i32, i32, i32) {
    %c0_i32 = arith.constant 0 : i32
    %c0_i32_0 = arith.constant 0 : i32
    %c0_i32_1 = arith.constant 0 : i32
    return %arg0, %c0_i32, %c0_i32_0 : i32, i32, i32
  }
}

module attributes {stable_mosaic.version = 11 : i64} {
  func.func @_gen_block_kernel(%arg0: i32, %arg1: memref<1x36x32xf32, #tpu.memory_space<vmem>>, %arg2: memref<1x1x32xf32, #tpu.memory_space<vmem>>, %arg3: memref<32x32xf32, #tpu.memory_space<vmem>>, %arg4: memref<1x32xf32, #tpu.memory_space<vmem>>, %arg5: memref<32x32xf32, #tpu.memory_space<vmem>>, %arg6: memref<1x32xf32, #tpu.memory_space<vmem>>, %arg7: memref<32x32xf32, #tpu.memory_space<vmem>>, %arg8: memref<1x32xf32, #tpu.memory_space<vmem>>, %arg9: memref<9x32x32xbf16, #tpu.memory_space<vmem>>, %arg10: memref<32x32xf32, #tpu.memory_space<vmem>>, %arg11: memref<9x32x32xbf16, #tpu.memory_space<vmem>>, %arg12: memref<32x32xf32, #tpu.memory_space<vmem>>, %arg13: memref<32x3xbf16, #tpu.memory_space<vmem>>, %arg14: memref<1x32xf32, #tpu.memory_space<vmem>>, %arg15: memref<1x32xf32, #tpu.memory_space<vmem>>, %arg16: memref<1x32xf32, #tpu.memory_space<vmem>>, %arg17: memref<1x32xf32, #tpu.memory_space<vmem>>, %arg18: memref<1x22x1xf32, #tpu.memory_space<vmem>>, %arg19: memref<22x1xf32, #tpu.memory_space<vmem>>, %arg20: memref<1x22x32xf32, #tpu.memory_space<vmem>>, %arg21: memref<1x22x3xf32, #tpu.memory_space<vmem>>, %arg22: memref<36x32xf32, #tpu.memory_space<vmem>>, %arg23: memref<36x32xf32, #tpu.memory_space<vmem>>) attributes {dimension_semantics = [#tpu.dimension_semantics<parallel>], iteration_bounds = array<i64: 2>, scalar_prefetch = 0 : i64, scratch_operands = 2 : i64, tpu.core_type = #tpu.core_type<tc>, window_params = [{transform_indices = @transform_0, window_bounds = array<i64: 1, 36, 32>}, {transform_indices = @transform_1, window_bounds = array<i64: 1, 1, 32>}, {pipeline_mode = #tpu.pipeline_mode<synchronous>, transform_indices = @transform_2, window_bounds = array<i64: 32, 32>}, {pipeline_mode = #tpu.pipeline_mode<synchronous>, transform_indices = @transform_3, window_bounds = array<i64: 1, 32>}, {pipeline_mode = #tpu.pipeline_mode<synchronous>, transform_indices = @transform_4, window_bounds = array<i64: 32, 32>}, {pipeline_mode = #tpu.pipeline_mode<synchronous>, transform_indices = @transform_5, window_bounds = array<i64: 1, 32>}, {pipeline_mode = #tpu.pipeline_mode<synchronous>, transform_indices = @transform_6, window_bounds = array<i64: 32, 32>}, {pipeline_mode = #tpu.pipeline_mode<synchronous>, transform_indices = @transform_7, window_bounds = array<i64: 1, 32>}, {pipeline_mode = #tpu.pipeline_mode<synchronous>, transform_indices = @transform_8, window_bounds = array<i64: 9, 32, 32>}, {pipeline_mode = #tpu.pipeline_mode<synchronous>, transform_indices = @transform_9, window_bounds = array<i64: 32, 32>}, {pipeline_mode = #tpu.pipeline_mode<synchronous>, transform_indices = @transform_10, window_bounds = array<i64: 9, 32, 32>}, {pipeline_mode = #tpu.pipeline_mode<synchronous>, transform_indices = @transform_11, window_bounds = array<i64: 32, 32>}, {pipeline_mode = #tpu.pipeline_mode<synchronous>, transform_indices = @transform_12, window_bounds = array<i64: 32, 3>}, {pipeline_mode = #tpu.pipeline_mode<synchronous>, transform_indices = @transform_13, window_bounds = array<i64: 1, 32>}, {pipeline_mode = #tpu.pipeline_mode<synchronous>, transform_indices = @transform_14, window_bounds = array<i64: 1, 32>}, {pipeline_mode = #tpu.pipeline_mode<synchronous>, transform_indices = @transform_15, window_bounds = array<i64: 1, 32>}, {pipeline_mode = #tpu.pipeline_mode<synchronous>, transform_indices = @transform_16, window_bounds = array<i64: 1, 32>}, {transform_indices = @transform_17, window_bounds = array<i64: 1, 22, 1>}, {pipeline_mode = #tpu.pipeline_mode<synchronous>, transform_indices = @transform_18, window_bounds = array<i64: 22, 1>}, {transform_indices = @transform_19, window_bounds = array<i64: 1, 22, 32>}, {transform_indices = @transform_20, window_bounds = array<i64: 1, 22, 3>}]} {
    %c0 = arith.constant 0 : index
    %c0_0 = arith.constant 0 : index
    %c0_1 = arith.constant 0 : index
    %0 = vector.load %arg2[%c0, %c0_0, %c0_1] : memref<1x1x32xf32, #tpu.memory_space<vmem>>, vector<1x1x32xf32>
    %1 = vector.shape_cast %0 : vector<1x1x32xf32> to vector<1x32xf32>
    %c0_2 = arith.constant 0 : index
    %c0_3 = arith.constant 0 : index
    %2 = vector.load %arg3[%c0_2, %c0_3] : memref<32x32xf32, #tpu.memory_space<vmem>>, vector<32x32xf32>
    %cst = arith.constant dense<0.000000e+00> : vector<1x32xf32>
    %3 = tpu.matmul %1, %2, %cst {dimension_numbers = #tpu.dot_dimension_numbers<[1], [0], [0], [1], [0, 0, 1, 1], [], []>} : vector<1x32xf32>, vector<32x32xf32>, vector<1x32xf32> -> vector<1x32xf32>
    %c0_4 = arith.constant 0 : index
    %c0_5 = arith.constant 0 : index
    %4 = vector.load %arg4[%c0_4, %c0_5] : memref<1x32xf32, #tpu.memory_space<vmem>>, vector<1x32xf32>
    %5 = arith.addf %3, %4 : vector<1x32xf32>
    %cst_6 = arith.constant 1.000000e+00 : f32
    %6 = vector.broadcast %cst_6 : f32 to vector<1x32xf32>
    %7 = arith.addf %5, %6 : vector<1x32xf32>
    %c0_7 = arith.constant 0 : index
    %c0_8 = arith.constant 0 : index
    %8 = vector.load %arg5[%c0_7, %c0_8] : memref<32x32xf32, #tpu.memory_space<vmem>>, vector<32x32xf32>
    %cst_9 = arith.constant dense<0.000000e+00> : vector<1x32xf32>
    %9 = tpu.matmul %1, %8, %cst_9 {dimension_numbers = #tpu.dot_dimension_numbers<[1], [0], [0], [1], [0, 0, 1, 1], [], []>} : vector<1x32xf32>, vector<32x32xf32>, vector<1x32xf32> -> vector<1x32xf32>
    %c0_10 = arith.constant 0 : index
    %c0_11 = arith.constant 0 : index
    %10 = vector.load %arg6[%c0_10, %c0_11] : memref<1x32xf32, #tpu.memory_space<vmem>>, vector<1x32xf32>
    %11 = arith.addf %9, %10 : vector<1x32xf32>
    %cst_12 = arith.constant 1.000000e+00 : f32
    %12 = vector.broadcast %cst_12 : f32 to vector<1x32xf32>
    %13 = arith.addf %11, %12 : vector<1x32xf32>
    %c0_13 = arith.constant 0 : index
    %c0_14 = arith.constant 0 : index
    %14 = vector.load %arg7[%c0_13, %c0_14] : memref<32x32xf32, #tpu.memory_space<vmem>>, vector<32x32xf32>
    %cst_15 = arith.constant dense<0.000000e+00> : vector<1x32xf32>
    %15 = tpu.matmul %1, %14, %cst_15 {dimension_numbers = #tpu.dot_dimension_numbers<[1], [0], [0], [1], [0, 0, 1, 1], [], []>} : vector<1x32xf32>, vector<32x32xf32>, vector<1x32xf32> -> vector<1x32xf32>
    %c0_16 = arith.constant 0 : index
    %c0_17 = arith.constant 0 : index
    %16 = vector.load %arg8[%c0_16, %c0_17] : memref<1x32xf32, #tpu.memory_space<vmem>>, vector<1x32xf32>
    %17 = arith.addf %15, %16 : vector<1x32xf32>
    %cst_18 = arith.constant 1.000000e+00 : f32
    %18 = vector.broadcast %cst_18 : f32 to vector<1x32xf32>
    %19 = arith.addf %17, %18 : vector<1x32xf32>
    %c0_19 = arith.constant 0 : index
    %c0_20 = arith.constant 0 : index
    %c0_21 = arith.constant 0 : index
    %20 = vector.load %arg18[%c0_19, %c0_20, %c0_21] : memref<1x22x1xf32, #tpu.memory_space<vmem>>, vector<1x22x1xf32>
    %21 = vector.shape_cast %20 : vector<1x22x1xf32> to vector<22x1xf32>
    %c0_22 = arith.constant 0 : index
    %c0_23 = arith.constant 0 : index
    %22 = vector.load %arg19[%c0_22, %c0_23] : memref<22x1xf32, #tpu.memory_space<vmem>>, vector<22x1xf32>
    %c0_24 = arith.constant 0 : index
    %c0_25 = arith.constant 0 : index
    %c0_26 = arith.constant 0 : index
    %23 = vector.load %arg1[%c0_24, %c0_25, %c0_26] : memref<1x36x32xf32, #tpu.memory_space<vmem>>, vector<1x36x32xf32>
    %24 = vector.shape_cast %23 : vector<1x36x32xf32> to vector<36x32xf32>
    %25 = vector.broadcast %7 : vector<1x32xf32> to vector<36x32xf32>
    %26 = arith.mulf %24, %25 : vector<36x32xf32>
    %c0_27 = arith.constant 0 : index
    %c0_28 = arith.constant 0 : index
    %27 = vector.load %arg22[%c0_27, %c0_28] : memref<36x32xf32, #tpu.memory_space<vmem>>, vector<36x32xf32>
    tpu.vector_store %arg22[%c0_27, %c0_28], %26 {strides = array<i32>} : memref<36x32xf32, #tpu.memory_space<vmem>>, vector<36x32xf32>,
    %cst_29 = arith.constant 0.000000e+00 : f32
    %28 = vector.broadcast %cst_29 : f32 to vector<22x32xf32>
    %c0_30 = arith.constant 0 : index
    %c0_31 = arith.constant 0 : index
    %29 = vector.load %arg22[%c0_30, %c0_31] : memref<36x32xf32, #tpu.memory_space<vmem>>, vector<22x32xf32>
    %30 = arith.truncf %29 : vector<22x32xf32> to vector<22x32xbf16>
    %c0_32 = arith.constant 0 : index
    %c0_33 = arith.constant 0 : index
    %c0_34 = arith.constant 0 : index
    %31 = vector.load %arg9[%c0_32, %c0_33, %c0_34] : memref<9x32x32xbf16, #tpu.memory_space<vmem>>, vector<1x32x32xbf16>
    %32 = vector.shape_cast %31 : vector<1x32x32xbf16> to vector<32x32xbf16>
    %cst_35 = arith.constant dense<0.000000e+00> : vector<22x32xf32>
    %33 = tpu.matmul %30, %32, %cst_35 {dimension_numbers = #tpu.dot_dimension_numbers<[1], [0], [0], [1], [0, 0, 1, 1], [], []>} : vector<22x32xbf16>, vector<32x32xbf16>, vector<22x32xf32> -> vector<22x32xf32>
    %34 = arith.addf %28, %33 : vector<22x32xf32>
    %c1 = arith.constant 1 : index
    %c0_36 = arith.constant 0 : index
    %35 = vector.load %arg22[%c1, %c0_36] : memref<36x32xf32, #tpu.memory_space<vmem>>, vector<22x32xf32>
    %36 = arith.truncf %35 : vector<22x32xf32> to vector<22x32xbf16>
    %c1_37 = arith.constant 1 : index
    %c0_38 = arith.constant 0 : index
    %c0_39 = arith.constant 0 : index
    %37 = vector.load %arg9[%c1_37, %c0_38, %c0_39] : memref<9x32x32xbf16, #tpu.memory_space<vmem>>, vector<1x32x32xbf16>
    %38 = vector.shape_cast %37 : vector<1x32x32xbf16> to vector<32x32xbf16>
    %cst_40 = arith.constant dense<0.000000e+00> : vector<22x32xf32>
    %39 = tpu.matmul %36, %38, %cst_40 {dimension_numbers = #tpu.dot_dimension_numbers<[1], [0], [0], [1], [0, 0, 1, 1], [], []>} : vector<22x32xbf16>, vector<32x32xbf16>, vector<22x32xf32> -> vector<22x32xf32>
    %40 = arith.addf %34, %39 : vector<22x32xf32>
    %c2 = arith.constant 2 : index
    %c0_41 = arith.constant 0 : index
    %41 = vector.load %arg22[%c2, %c0_41] : memref<36x32xf32, #tpu.memory_space<vmem>>, vector<22x32xf32>
    %42 = arith.truncf %41 : vector<22x32xf32> to vector<22x32xbf16>
    %c2_42 = arith.constant 2 : index
    %c0_43 = arith.constant 0 : index
    %c0_44 = arith.constant 0 : index
    %43 = vector.load %arg9[%c2_42, %c0_43, %c0_44] : memref<9x32x32xbf16, #tpu.memory_space<vmem>>, vector<1x32x32xbf16>
    %44 = vector.shape_cast %43 : vector<1x32x32xbf16> to vector<32x32xbf16>
    %cst_45 = arith.constant dense<0.000000e+00> : vector<22x32xf32>
    %45 = tpu.matmul %42, %44, %cst_45 {dimension_numbers = #tpu.dot_dimension_numbers<[1], [0], [0], [1], [0, 0, 1, 1], [], []>} : vector<22x32xbf16>, vector<32x32xbf16>, vector<22x32xf32> -> vector<22x32xf32>
    %46 = arith.addf %40, %45 : vector<22x32xf32>
    %c6 = arith.constant 6 : index
    %c0_46 = arith.constant 0 : index
    %47 = vector.load %arg22[%c6, %c0_46] : memref<36x32xf32, #tpu.memory_space<vmem>>, vector<22x32xf32>
    %48 = arith.truncf %47 : vector<22x32xf32> to vector<22x32xbf16>
    %c3 = arith.constant 3 : index
    %c0_47 = arith.constant 0 : index
    %c0_48 = arith.constant 0 : index
    %49 = vector.load %arg9[%c3, %c0_47, %c0_48] : memref<9x32x32xbf16, #tpu.memory_space<vmem>>, vector<1x32x32xbf16>
    %50 = vector.shape_cast %49 : vector<1x32x32xbf16> to vector<32x32xbf16>
    %cst_49 = arith.constant dense<0.000000e+00> : vector<22x32xf32>
    %51 = tpu.matmul %48, %50, %cst_49 {dimension_numbers = #tpu.dot_dimension_numbers<[1], [0], [0], [1], [0, 0, 1, 1], [], []>} : vector<22x32xbf16>, vector<32x32xbf16>, vector<22x32xf32> -> vector<22x32xf32>
    %52 = arith.addf %46, %51 : vector<22x32xf32>
    %c7 = arith.constant 7 : index
    %c0_50 = arith.constant 0 : index
    %53 = vector.load %arg22[%c7, %c0_50] : memref<36x32xf32, #tpu.memory_space<vmem>>, vector<22x32xf32>
    %54 = arith.truncf %53 : vector<22x32xf32> to vector<22x32xbf16>
    %c4 = arith.constant 4 : index
    %c0_51 = arith.constant 0 : index
    %c0_52 = arith.constant 0 : index
    %55 = vector.load %arg9[%c4, %c0_51, %c0_52] : memref<9x32x32xbf16, #tpu.memory_space<vmem>>, vector<1x32x32xbf16>
    %56 = vector.shape_cast %55 : vector<1x32x32xbf16> to vector<32x32xbf16>
    %cst_53 = arith.constant dense<0.000000e+00> : vector<22x32xf32>
    %57 = tpu.matmul %54, %56, %cst_53 {dimension_numbers = #tpu.dot_dimension_numbers<[1], [0], [0], [1], [0, 0, 1, 1], [], []>} : vector<22x32xbf16>, vector<32x32xbf16>, vector<22x32xf32> -> vector<22x32xf32>
    %58 = arith.addf %52, %57 : vector<22x32xf32>
    %c8 = arith.constant 8 : index
    %c0_54 = arith.constant 0 : index
    %59 = vector.load %arg22[%c8, %c0_54] : memref<36x32xf32, #tpu.memory_space<vmem>>, vector<22x32xf32>
    %60 = arith.truncf %59 : vector<22x32xf32> to vector<22x32xbf16>
    %c5 = arith.constant 5 : index
    %c0_55 = arith.constant 0 : index
    %c0_56 = arith.constant 0 : index
    %61 = vector.load %arg9[%c5, %c0_55, %c0_56] : memref<9x32x32xbf16, #tpu.memory_space<vmem>>, vector<1x32x32xbf16>
    %62 = vector.shape_cast %61 : vector<1x32x32xbf16> to vector<32x32xbf16>
    %cst_57 = arith.constant dense<0.000000e+00> : vector<22x32xf32>
    %63 = tpu.matmul %60, %62, %cst_57 {dimension_numbers = #tpu.dot_dimension_numbers<[1], [0], [0], [1], [0, 0, 1, 1], [], []>} : vector<22x32xbf16>, vector<32x32xbf16>, vector<22x32xf32> -> vector<22x32xf32>
    %64 = arith.addf %58, %63 : vector<22x32xf32>
    %c12 = arith.constant 12 : index
    %c0_58 = arith.constant 0 : index
    %65 = vector.load %arg22[%c12, %c0_58] : memref<36x32xf32, #tpu.memory_space<vmem>>, vector<22x32xf32>
    %66 = arith.truncf %65 : vector<22x32xf32> to vector<22x32xbf16>
    %c6_59 = arith.constant 6 : index
    %c0_60 = arith.constant 0 : index
    %c0_61 = arith.constant 0 : index
    %67 = vector.load %arg9[%c6_59, %c0_60, %c0_61] : memref<9x32x32xbf16, #tpu.memory_space<vmem>>, vector<1x32x32xbf16>
    %68 = vector.shape_cast %67 : vector<1x32x32xbf16> to vector<32x32xbf16>
    %cst_62 = arith.constant dense<0.000000e+00> : vector<22x32xf32>
    %69 = tpu.matmul %66, %68, %cst_62 {dimension_numbers = #tpu.dot_dimension_numbers<[1], [0], [0], [1], [0, 0, 1, 1], [], []>} : vector<22x32xbf16>, vector<32x32xbf16>, vector<22x32xf32> -> vector<22x32xf32>
    %70 = arith.addf %64, %69 : vector<22x32xf32>
    %c13 = arith.constant 13 : index
    %c0_63 = arith.constant 0 : index
    %71 = vector.load %arg22[%c13, %c0_63] : memref<36x32xf32, #tpu.memory_space<vmem>>, vector<22x32xf32>
    %72 = arith.truncf %71 : vector<22x32xf32> to vector<22x32xbf16>
    %c7_64 = arith.constant 7 : index
    %c0_65 = arith.constant 0 : index
    %c0_66 = arith.constant 0 : index
    %73 = vector.load %arg9[%c7_64, %c0_65, %c0_66] : memref<9x32x32xbf16, #tpu.memory_space<vmem>>, vector<1x32x32xbf16>
    %74 = vector.shape_cast %73 : vector<1x32x32xbf16> to vector<32x32xbf16>
    %cst_67 = arith.constant dense<0.000000e+00> : vector<22x32xf32>
    %75 = tpu.matmul %72, %74, %cst_67 {dimension_numbers = #tpu.dot_dimension_numbers<[1], [0], [0], [1], [0, 0, 1, 1], [], []>} : vector<22x32xbf16>, vector<32x32xbf16>, vector<22x32xf32> -> vector<22x32xf32>
    %76 = arith.addf %70, %75 : vector<22x32xf32>
    %c14 = arith.constant 14 : index
    %c0_68 = arith.constant 0 : index
    %77 = vector.load %arg22[%c14, %c0_68] : memref<36x32xf32, #tpu.memory_space<vmem>>, vector<22x32xf32>
    %78 = arith.truncf %77 : vector<22x32xf32> to vector<22x32xbf16>
    %c8_69 = arith.constant 8 : index
    %c0_70 = arith.constant 0 : index
    %c0_71 = arith.constant 0 : index
    %79 = vector.load %arg9[%c8_69, %c0_70, %c0_71] : memref<9x32x32xbf16, #tpu.memory_space<vmem>>, vector<1x32x32xbf16>
    %80 = vector.shape_cast %79 : vector<1x32x32xbf16> to vector<32x32xbf16>
    %cst_72 = arith.constant dense<0.000000e+00> : vector<22x32xf32>
    %81 = tpu.matmul %78, %80, %cst_72 {dimension_numbers = #tpu.dot_dimension_numbers<[1], [0], [0], [1], [0, 0, 1, 1], [], []>} : vector<22x32xbf16>, vector<32x32xbf16>, vector<22x32xf32> -> vector<22x32xf32>
    %82 = arith.addf %76, %81 : vector<22x32xf32>
    %83 = arith.mulf %7, %7 : vector<1x32xf32>
    %c0_73 = arith.constant 0 : index
    %c0_74 = arith.constant 0 : index
    %84 = vector.load %arg10[%c0_73, %c0_74] : memref<32x32xf32, #tpu.memory_space<vmem>>, vector<32x32xf32>
    %cst_75 = arith.constant dense<0.000000e+00> : vector<1x32xf32>
    %85 = tpu.matmul %83, %84, %cst_75 {dimension_numbers = #tpu.dot_dimension_numbers<[1], [0], [0], [1], [0, 0, 1, 1], [], []>} : vector<1x32xf32>, vector<32x32xf32>, vector<1x32xf32> -> vector<1x32xf32>
    %cst_76 = arith.constant 9.99999993E-9 : f32
    %86 = vector.broadcast %cst_76 : f32 to vector<1x32xf32>
    %87 = arith.addf %85, %86 : vector<1x32xf32>
    %88 = math.rsqrt %87 : vector<1x32xf32>
    %89 = vector.broadcast %88 : vector<1x32xf32> to vector<22x32xf32>
    %90 = arith.mulf %82, %89 : vector<22x32xf32>
    %c0_77 = arith.constant 0 : index
    %c0_78 = arith.constant 0 : index
    %91 = vector.load %arg14[%c0_77, %c0_78] : memref<1x32xf32, #tpu.memory_space<vmem>>, vector<1x32xf32>
    %92 = vector.broadcast %21 : vector<22x1xf32> to vector<22x32xf32>
    %93 = vector.broadcast %91 : vector<1x32xf32> to vector<22x32xf32>
    %94 = arith.mulf %92, %93 : vector<22x32xf32>
    %95 = arith.addf %90, %94 : vector<22x32xf32>
    %c0_79 = arith.constant 0 : index
    %c0_80 = arith.constant 0 : index
    %96 = vector.load %arg15[%c0_79, %c0_80] : memref<1x32xf32, #tpu.memory_space<vmem>>, vector<1x32xf32>
    %97 = vector.broadcast %96 : vector<1x32xf32> to vector<22x32xf32>
    %98 = arith.addf %95, %97 : vector<22x32xf32>
    %cst_81 = arith.constant 0.000000e+00 : f32
    %99 = vector.broadcast %cst_81 : f32 to vector<22x32xf32>
    %100 = arith.cmpf oge, %98, %99 : vector<22x32xf32>
    %cst_82 = arith.constant 2.000000e-01 : f32
    %101 = vector.broadcast %cst_82 : f32 to vector<22x32xf32>
    %102 = arith.mulf %98, %101 : vector<22x32xf32>
    %103 = arith.select %100, %98, %102 : vector<22x32xi1>, vector<22x32xf32>
    %104 = vector.broadcast %22 : vector<22x1xf32> to vector<22x32xf32>
    %105 = arith.mulf %103, %104 : vector<22x32xf32>
    %cst_83 = arith.constant 0.000000e+00 : f32
    %106 = vector.broadcast %cst_83 : f32 to vector<36x32xf32>
    %c0_84 = arith.constant 0 : index
    %c0_85 = arith.constant 0 : index
    %107 = vector.load %arg23[%c0_84, %c0_85] : memref<36x32xf32, #tpu.memory_space<vmem>>, vector<36x32xf32>
    tpu.vector_store %arg23[%c0_84, %c0_85], %106 {strides = array<i32>} : memref<36x32xf32, #tpu.memory_space<vmem>>, vector<36x32xf32>,
    %108 = vector.broadcast %13 : vector<1x32xf32> to vector<22x32xf32>
    %109 = arith.mulf %105, %108 : vector<22x32xf32>
    %c7_86 = arith.constant 7 : index
    %c0_87 = arith.constant 0 : index
    %110 = vector.load %arg23[%c7_86, %c0_87] : memref<36x32xf32, #tpu.memory_space<vmem>>, vector<22x32xf32>
    tpu.vector_store %arg23[%c7_86, %c0_87], %109 {strides = array<i32>} : memref<36x32xf32, #tpu.memory_space<vmem>>, vector<22x32xf32>,
    %cst_88 = arith.constant 0.000000e+00 : f32
    %111 = vector.broadcast %cst_88 : f32 to vector<22x32xf32>
    %c0_89 = arith.constant 0 : index
    %c0_90 = arith.constant 0 : index
    %112 = vector.load %arg23[%c0_89, %c0_90] : memref<36x32xf32, #tpu.memory_space<vmem>>, vector<22x32xf32>
    %113 = arith.truncf %112 : vector<22x32xf32> to vector<22x32xbf16>
    %c0_91 = arith.constant 0 : index
    %c0_92 = arith.constant 0 : index
    %c0_93 = arith.constant 0 : index
    %114 = vector.load %arg11[%c0_91, %c0_92, %c0_93] : memref<9x32x32xbf16, #tpu.memory_space<vmem>>, vector<1x32x32xbf16>
    %115 = vector.shape_cast %114 : vector<1x32x32xbf16> to vector<32x32xbf16>
    %cst_94 = arith.constant dense<0.000000e+00> : vector<22x32xf32>
    %116 = tpu.matmul %113, %115, %cst_94 {dimension_numbers = #tpu.dot_dimension_numbers<[1], [0], [0], [1], [0, 0, 1, 1], [], []>} : vector<22x32xbf16>, vector<32x32xbf16>, vector<22x32xf32> -> vector<22x32xf32>
    %117 = arith.addf %111, %116 : vector<22x32xf32>
    %c1_95 = arith.constant 1 : index
    %c0_96 = arith.constant 0 : index
    %118 = vector.load %arg23[%c1_95, %c0_96] : memref<36x32xf32, #tpu.memory_space<vmem>>, vector<22x32xf32>
    %119 = arith.truncf %118 : vector<22x32xf32> to vector<22x32xbf16>
    %c1_97 = arith.constant 1 : index
    %c0_98 = arith.constant 0 : index
    %c0_99 = arith.constant 0 : index
    %120 = vector.load %arg11[%c1_97, %c0_98, %c0_99] : memref<9x32x32xbf16, #tpu.memory_space<vmem>>, vector<1x32x32xbf16>
    %121 = vector.shape_cast %120 : vector<1x32x32xbf16> to vector<32x32xbf16>
    %cst_100 = arith.constant dense<0.000000e+00> : vector<22x32xf32>
    %122 = tpu.matmul %119, %121, %cst_100 {dimension_numbers = #tpu.dot_dimension_numbers<[1], [0], [0], [1], [0, 0, 1, 1], [], []>} : vector<22x32xbf16>, vector<32x32xbf16>, vector<22x32xf32> -> vector<22x32xf32>
    %123 = arith.addf %117, %122 : vector<22x32xf32>
    %c2_101 = arith.constant 2 : index
    %c0_102 = arith.constant 0 : index
    %124 = vector.load %arg23[%c2_101, %c0_102] : memref<36x32xf32, #tpu.memory_space<vmem>>, vector<22x32xf32>
    %125 = arith.truncf %124 : vector<22x32xf32> to vector<22x32xbf16>
    %c2_103 = arith.constant 2 : index
    %c0_104 = arith.constant 0 : index
    %c0_105 = arith.constant 0 : index
    %126 = vector.load %arg11[%c2_103, %c0_104, %c0_105] : memref<9x32x32xbf16, #tpu.memory_space<vmem>>, vector<1x32x32xbf16>
    %127 = vector.shape_cast %126 : vector<1x32x32xbf16> to vector<32x32xbf16>
    %cst_106 = arith.constant dense<0.000000e+00> : vector<22x32xf32>
    %128 = tpu.matmul %125, %127, %cst_106 {dimension_numbers = #tpu.dot_dimension_numbers<[1], [0], [0], [1], [0, 0, 1, 1], [], []>} : vector<22x32xbf16>, vector<32x32xbf16>, vector<22x32xf32> -> vector<22x32xf32>
    %129 = arith.addf %123, %128 : vector<22x32xf32>
    %c6_107 = arith.constant 6 : index
    %c0_108 = arith.constant 0 : index
    %130 = vector.load %arg23[%c6_107, %c0_108] : memref<36x32xf32, #tpu.memory_space<vmem>>, vector<22x32xf32>
    %131 = arith.truncf %130 : vector<22x32xf32> to vector<22x32xbf16>
    %c3_109 = arith.constant 3 : index
    %c0_110 = arith.constant 0 : index
    %c0_111 = arith.constant 0 : index
    %132 = vector.load %arg11[%c3_109, %c0_110, %c0_111] : memref<9x32x32xbf16, #tpu.memory_space<vmem>>, vector<1x32x32xbf16>
    %133 = vector.shape_cast %132 : vector<1x32x32xbf16> to vector<32x32xbf16>
    %cst_112 = arith.constant dense<0.000000e+00> : vector<22x32xf32>
    %134 = tpu.matmul %131, %133, %cst_112 {dimension_numbers = #tpu.dot_dimension_numbers<[1], [0], [0], [1], [0, 0, 1, 1], [], []>} : vector<22x32xbf16>, vector<32x32xbf16>, vector<22x32xf32> -> vector<22x32xf32>
    %135 = arith.addf %129, %134 : vector<22x32xf32>
    %c7_113 = arith.constant 7 : index
    %c0_114 = arith.constant 0 : index
    %136 = vector.load %arg23[%c7_113, %c0_114] : memref<36x32xf32, #tpu.memory_space<vmem>>, vector<22x32xf32>
    %137 = arith.truncf %136 : vector<22x32xf32> to vector<22x32xbf16>
    %c4_115 = arith.constant 4 : index
    %c0_116 = arith.constant 0 : index
    %c0_117 = arith.constant 0 : index
    %138 = vector.load %arg11[%c4_115, %c0_116, %c0_117] : memref<9x32x32xbf16, #tpu.memory_space<vmem>>, vector<1x32x32xbf16>
    %139 = vector.shape_cast %138 : vector<1x32x32xbf16> to vector<32x32xbf16>
    %cst_118 = arith.constant dense<0.000000e+00> : vector<22x32xf32>
    %140 = tpu.matmul %137, %139, %cst_118 {dimension_numbers = #tpu.dot_dimension_numbers<[1], [0], [0], [1], [0, 0, 1, 1], [], []>} : vector<22x32xbf16>, vector<32x32xbf16>, vector<22x32xf32> -> vector<22x32xf32>
    %141 = arith.addf %135, %140 : vector<22x32xf32>
    %c8_119 = arith.constant 8 : index
    %c0_120 = arith.constant 0 : index
    %142 = vector.load %arg23[%c8_119, %c0_120] : memref<36x32xf32, #tpu.memory_space<vmem>>, vector<22x32xf32>
    %143 = arith.truncf %142 : vector<22x32xf32> to vector<22x32xbf16>
    %c5_121 = arith.constant 5 : index
    %c0_122 = arith.constant 0 : index
    %c0_123 = arith.constant 0 : index
    %144 = vector.load %arg11[%c5_121, %c0_122, %c0_123] : memref<9x32x32xbf16, #tpu.memory_space<vmem>>, vector<1x32x32xbf16>
    %145 = vector.shape_cast %144 : vector<1x32x32xbf16> to vector<32x32xbf16>
    %cst_124 = arith.constant dense<0.000000e+00> : vector<22x32xf32>
    %146 = tpu.matmul %143, %145, %cst_124 {dimension_numbers = #tpu.dot_dimension_numbers<[1], [0], [0], [1], [0, 0, 1, 1], [], []>} : vector<22x32xbf16>, vector<32x32xbf16>, vector<22x32xf32> -> vector<22x32xf32>
    %147 = arith.addf %141, %146 : vector<22x32xf32>
    %c12_125 = arith.constant 12 : index
    %c0_126 = arith.constant 0 : index
    %148 = vector.load %arg23[%c12_125, %c0_126] : memref<36x32xf32, #tpu.memory_space<vmem>>, vector<22x32xf32>
    %149 = arith.truncf %148 : vector<22x32xf32> to vector<22x32xbf16>
    %c6_127 = arith.constant 6 : index
    %c0_128 = arith.constant 0 : index
    %c0_129 = arith.constant 0 : index
    %150 = vector.load %arg11[%c6_127, %c0_128, %c0_129] : memref<9x32x32xbf16, #tpu.memory_space<vmem>>, vector<1x32x32xbf16>
    %151 = vector.shape_cast %150 : vector<1x32x32xbf16> to vector<32x32xbf16>
    %cst_130 = arith.constant dense<0.000000e+00> : vector<22x32xf32>
    %152 = tpu.matmul %149, %151, %cst_130 {dimension_numbers = #tpu.dot_dimension_numbers<[1], [0], [0], [1], [0, 0, 1, 1], [], []>} : vector<22x32xbf16>, vector<32x32xbf16>, vector<22x32xf32> -> vector<22x32xf32>
    %153 = arith.addf %147, %152 : vector<22x32xf32>
    %c13_131 = arith.constant 13 : index
    %c0_132 = arith.constant 0 : index
    %154 = vector.load %arg23[%c13_131, %c0_132] : memref<36x32xf32, #tpu.memory_space<vmem>>, vector<22x32xf32>
    %155 = arith.truncf %154 : vector<22x32xf32> to vector<22x32xbf16>
    %c7_133 = arith.constant 7 : index
    %c0_134 = arith.constant 0 : index
    %c0_135 = arith.constant 0 : index
    %156 = vector.load %arg11[%c7_133, %c0_134, %c0_135] : memref<9x32x32xbf16, #tpu.memory_space<vmem>>, vector<1x32x32xbf16>
    %157 = vector.shape_cast %156 : vector<1x32x32xbf16> to vector<32x32xbf16>
    %cst_136 = arith.constant dense<0.000000e+00> : vector<22x32xf32>
    %158 = tpu.matmul %155, %157, %cst_136 {dimension_numbers = #tpu.dot_dimension_numbers<[1], [0], [0], [1], [0, 0, 1, 1], [], []>} : vector<22x32xbf16>, vector<32x32xbf16>, vector<22x32xf32> -> vector<22x32xf32>
    %159 = arith.addf %153, %158 : vector<22x32xf32>
    %c14_137 = arith.constant 14 : index
    %c0_138 = arith.constant 0 : index
    %160 = vector.load %arg23[%c14_137, %c0_138] : memref<36x32xf32, #tpu.memory_space<vmem>>, vector<22x32xf32>
    %161 = arith.truncf %160 : vector<22x32xf32> to vector<22x32xbf16>
    %c8_139 = arith.constant 8 : index
    %c0_140 = arith.constant 0 : index
    %c0_141 = arith.constant 0 : index
    %162 = vector.load %arg11[%c8_139, %c0_140, %c0_141] : memref<9x32x32xbf16, #tpu.memory_space<vmem>>, vector<1x32x32xbf16>
    %163 = vector.shape_cast %162 : vector<1x32x32xbf16> to vector<32x32xbf16>
    %cst_142 = arith.constant dense<0.000000e+00> : vector<22x32xf32>
    %164 = tpu.matmul %161, %163, %cst_142 {dimension_numbers = #tpu.dot_dimension_numbers<[1], [0], [0], [1], [0, 0, 1, 1], [], []>} : vector<22x32xbf16>, vector<32x32xbf16>, vector<22x32xf32> -> vector<22x32xf32>
    %165 = arith.addf %159, %164 : vector<22x32xf32>
    %166 = arith.mulf %13, %13 : vector<1x32xf32>
    %c0_143 = arith.constant 0 : index
    %c0_144 = arith.constant 0 : index
    %167 = vector.load %arg12[%c0_143, %c0_144] : memref<32x32xf32, #tpu.memory_space<vmem>>, vector<32x32xf32>
    %cst_145 = arith.constant dense<0.000000e+00> : vector<1x32xf32>
    %168 = tpu.matmul %166, %167, %cst_145 {dimension_numbers = #tpu.dot_dimension_numbers<[1], [0], [0], [1], [0, 0, 1, 1], [], []>} : vector<1x32xf32>, vector<32x32xf32>, vector<1x32xf32> -> vector<1x32xf32>
    %cst_146 = arith.constant 9.99999993E-9 : f32
    %169 = vector.broadcast %cst_146 : f32 to vector<1x32xf32>
    %170 = arith.addf %168, %169 : vector<1x32xf32>
    %171 = math.rsqrt %170 : vector<1x32xf32>
    %172 = vector.broadcast %171 : vector<1x32xf32> to vector<22x32xf32>
    %173 = arith.mulf %165, %172 : vector<22x32xf32>
    %c0_147 = arith.constant 0 : index
    %c0_148 = arith.constant 0 : index
    %174 = vector.load %arg16[%c0_147, %c0_148] : memref<1x32xf32, #tpu.memory_space<vmem>>, vector<1x32xf32>
    %175 = vector.broadcast %21 : vector<22x1xf32> to vector<22x32xf32>
    %176 = vector.broadcast %174 : vector<1x32xf32> to vector<22x32xf32>
    %177 = arith.mulf %175, %176 : vector<22x32xf32>
    %178 = arith.addf %173, %177 : vector<22x32xf32>
    %c0_149 = arith.constant 0 : index
    %c0_150 = arith.constant 0 : index
    %179 = vector.load %arg17[%c0_149, %c0_150] : memref<1x32xf32, #tpu.memory_space<vmem>>, vector<1x32xf32>
    %180 = vector.broadcast %179 : vector<1x32xf32> to vector<22x32xf32>
    %181 = arith.addf %178, %180 : vector<22x32xf32>
    %cst_151 = arith.constant 0.000000e+00 : f32
    %182 = vector.broadcast %cst_151 : f32 to vector<22x32xf32>
    %183 = arith.cmpf oge, %181, %182 : vector<22x32xf32>
    %cst_152 = arith.constant 2.000000e-01 : f32
    %184 = vector.broadcast %cst_152 : f32 to vector<22x32xf32>
    %185 = arith.mulf %181, %184 : vector<22x32xf32>
    %186 = arith.select %183, %181, %185 : vector<22x32xi1>, vector<22x32xf32>
    %187 = vector.broadcast %22 : vector<22x1xf32> to vector<22x32xf32>
    %188 = arith.mulf %186, %187 : vector<22x32xf32>
    %c0_153 = arith.constant 0 : index
    %c0_154 = arith.constant 0 : index
    %c0_155 = arith.constant 0 : index
    %189 = vector.load %arg20[%c0_153, %c0_154, %c0_155] : memref<1x22x32xf32, #tpu.memory_space<vmem>>, vector<1x22x32xf32>
    %190 = vector.shape_cast %189 : vector<1x22x32xf32> to vector<22x32xf32>
    %191 = vector.shape_cast %188 : vector<22x32xf32> to vector<1x22x32xf32>
    tpu.vector_store %arg20[%c0_153, %c0_154, %c0_155], %191 {strides = array<i32>} : memref<1x22x32xf32, #tpu.memory_space<vmem>>, vector<1x22x32xf32>,
    %192 = vector.broadcast %19 : vector<1x32xf32> to vector<22x32xf32>
    %193 = arith.mulf %188, %192 : vector<22x32xf32>
    %194 = arith.truncf %193 : vector<22x32xf32> to vector<22x32xbf16>
    %c0_156 = arith.constant 0 : index
    %c0_157 = arith.constant 0 : index
    %195 = vector.load %arg13[%c0_156, %c0_157] : memref<32x3xbf16, #tpu.memory_space<vmem>>, vector<32x3xbf16>
    %cst_158 = arith.constant dense<0.000000e+00> : vector<22x3xf32>
    %196 = tpu.matmul %194, %195, %cst_158 {dimension_numbers = #tpu.dot_dimension_numbers<[1], [0], [0], [1], [0, 0, 1, 1], [], []>} : vector<22x32xbf16>, vector<32x3xbf16>, vector<22x3xf32> -> vector<22x3xf32>
    %c0_159 = arith.constant 0 : index
    %c0_160 = arith.constant 0 : index
    %c0_161 = arith.constant 0 : index
    %197 = vector.load %arg21[%c0_159, %c0_160, %c0_161] : memref<1x22x3xf32, #tpu.memory_space<vmem>>, vector<1x22x3xf32>
    %198 = vector.shape_cast %197 : vector<1x22x3xf32> to vector<22x3xf32>
    %199 = vector.shape_cast %196 : vector<22x3xf32> to vector<1x22x3xf32>
    tpu.vector_store %arg21[%c0_159, %c0_160, %c0_161], %199 {strides = array<i32>} : memref<1x22x3xf32, #tpu.memory_space<vmem>>, vector<1x22x3xf32>,
    return
  }
  func.func @transform_0(%arg0: i32) -> (i32, i32, i32) {
    %c0_i32 = arith.constant 0 : i32
    %c0_i32_0 = arith.constant 0 : i32
    %c0_i32_1 = arith.constant 0 : i32
    return %arg0, %c0_i32, %c0_i32_0 : i32, i32, i32
  }
  func.func @transform_1(%arg0: i32) -> (i32, i32, i32) {
    %c0_i32 = arith.constant 0 : i32
    %c0_i32_0 = arith.constant 0 : i32
    %c0_i32_1 = arith.constant 0 : i32
    return %arg0, %c0_i32, %c0_i32_0 : i32, i32, i32
  }
  func.func @transform_2(%arg0: i32) -> (i32, i32) {
    %c0_i32 = arith.constant 0 : i32
    %c0_i32_0 = arith.constant 0 : i32
    %c0_i32_1 = arith.constant 0 : i32
    return %c0_i32, %c0_i32_0 : i32, i32
  }
  func.func @transform_3(%arg0: i32) -> (i32, i32) {
    %c0_i32 = arith.constant 0 : i32
    %c0_i32_0 = arith.constant 0 : i32
    %c0_i32_1 = arith.constant 0 : i32
    return %c0_i32, %c0_i32_0 : i32, i32
  }
  func.func @transform_4(%arg0: i32) -> (i32, i32) {
    %c0_i32 = arith.constant 0 : i32
    %c0_i32_0 = arith.constant 0 : i32
    %c0_i32_1 = arith.constant 0 : i32
    return %c0_i32, %c0_i32_0 : i32, i32
  }
  func.func @transform_5(%arg0: i32) -> (i32, i32) {
    %c0_i32 = arith.constant 0 : i32
    %c0_i32_0 = arith.constant 0 : i32
    %c0_i32_1 = arith.constant 0 : i32
    return %c0_i32, %c0_i32_0 : i32, i32
  }
  func.func @transform_6(%arg0: i32) -> (i32, i32) {
    %c0_i32 = arith.constant 0 : i32
    %c0_i32_0 = arith.constant 0 : i32
    %c0_i32_1 = arith.constant 0 : i32
    return %c0_i32, %c0_i32_0 : i32, i32
  }
  func.func @transform_7(%arg0: i32) -> (i32, i32) {
    %c0_i32 = arith.constant 0 : i32
    %c0_i32_0 = arith.constant 0 : i32
    %c0_i32_1 = arith.constant 0 : i32
    return %c0_i32, %c0_i32_0 : i32, i32
  }
  func.func @transform_8(%arg0: i32) -> (i32, i32, i32) {
    %c0_i32 = arith.constant 0 : i32
    %c0_i32_0 = arith.constant 0 : i32
    %c0_i32_1 = arith.constant 0 : i32
    %c0_i32_2 = arith.constant 0 : i32
    return %c0_i32, %c0_i32_0, %c0_i32_1 : i32, i32, i32
  }
  func.func @transform_9(%arg0: i32) -> (i32, i32) {
    %c0_i32 = arith.constant 0 : i32
    %c0_i32_0 = arith.constant 0 : i32
    %c0_i32_1 = arith.constant 0 : i32
    return %c0_i32, %c0_i32_0 : i32, i32
  }
  func.func @transform_10(%arg0: i32) -> (i32, i32, i32) {
    %c0_i32 = arith.constant 0 : i32
    %c0_i32_0 = arith.constant 0 : i32
    %c0_i32_1 = arith.constant 0 : i32
    %c0_i32_2 = arith.constant 0 : i32
    return %c0_i32, %c0_i32_0, %c0_i32_1 : i32, i32, i32
  }
  func.func @transform_11(%arg0: i32) -> (i32, i32) {
    %c0_i32 = arith.constant 0 : i32
    %c0_i32_0 = arith.constant 0 : i32
    %c0_i32_1 = arith.constant 0 : i32
    return %c0_i32, %c0_i32_0 : i32, i32
  }
  func.func @transform_12(%arg0: i32) -> (i32, i32) {
    %c0_i32 = arith.constant 0 : i32
    %c0_i32_0 = arith.constant 0 : i32
    %c0_i32_1 = arith.constant 0 : i32
    return %c0_i32, %c0_i32_0 : i32, i32
  }
  func.func @transform_13(%arg0: i32) -> (i32, i32) {
    %c0_i32 = arith.constant 0 : i32
    %c0_i32_0 = arith.constant 0 : i32
    %c0_i32_1 = arith.constant 0 : i32
    return %c0_i32, %c0_i32_0 : i32, i32
  }
  func.func @transform_14(%arg0: i32) -> (i32, i32) {
    %c0_i32 = arith.constant 0 : i32
    %c0_i32_0 = arith.constant 0 : i32
    %c0_i32_1 = arith.constant 0 : i32
    return %c0_i32, %c0_i32_0 : i32, i32
  }
  func.func @transform_15(%arg0: i32) -> (i32, i32) {
    %c0_i32 = arith.constant 0 : i32
    %c0_i32_0 = arith.constant 0 : i32
    %c0_i32_1 = arith.constant 0 : i32
    return %c0_i32, %c0_i32_0 : i32, i32
  }
  func.func @transform_16(%arg0: i32) -> (i32, i32) {
    %c0_i32 = arith.constant 0 : i32
    %c0_i32_0 = arith.constant 0 : i32
    %c0_i32_1 = arith.constant 0 : i32
    return %c0_i32, %c0_i32_0 : i32, i32
  }
  func.func @transform_17(%arg0: i32) -> (i32, i32, i32) {
    %c0_i32 = arith.constant 0 : i32
    %c0_i32_0 = arith.constant 0 : i32
    %c0_i32_1 = arith.constant 0 : i32
    return %arg0, %c0_i32, %c0_i32_0 : i32, i32, i32
  }
  func.func @transform_18(%arg0: i32) -> (i32, i32) {
    %c0_i32 = arith.constant 0 : i32
    %c0_i32_0 = arith.constant 0 : i32
    %c0_i32_1 = arith.constant 0 : i32
    return %c0_i32, %c0_i32_0 : i32, i32
  }
  func.func @transform_19(%arg0: i32) -> (i32, i32, i32) {
    %c0_i32 = arith.constant 0 : i32
    %c0_i32_0 = arith.constant 0 : i32
    %c0_i32_1 = arith.constant 0 : i32
    return %arg0, %c0_i32, %c0_i32_0 : i32, i32, i32
  }
  func.func @transform_20(%arg0: i32) -> (i32, i32, i32) {
    %c0_i32 = arith.constant 0 : i32
    %c0_i32_0 = arith.constant 0 : i32
    %c0_i32_1 = arith.constant 0 : i32
    return %arg0, %c0_i32, %c0_i32_0 : i32, i32, i32
  }
}

module attributes {stable_mosaic.version = 11 : i64} {
  func.func @_gen_block_kernel(%arg0: i32, %arg1: memref<1x100x32xf32, #tpu.memory_space<vmem>>, %arg2: memref<1x1x32xf32, #tpu.memory_space<vmem>>, %arg3: memref<32x32xf32, #tpu.memory_space<vmem>>, %arg4: memref<1x32xf32, #tpu.memory_space<vmem>>, %arg5: memref<32x16xf32, #tpu.memory_space<vmem>>, %arg6: memref<1x16xf32, #tpu.memory_space<vmem>>, %arg7: memref<32x16xf32, #tpu.memory_space<vmem>>, %arg8: memref<1x16xf32, #tpu.memory_space<vmem>>, %arg9: memref<9x32x16xbf16, #tpu.memory_space<vmem>>, %arg10: memref<32x16xf32, #tpu.memory_space<vmem>>, %arg11: memref<9x16x16xbf16, #tpu.memory_space<vmem>>, %arg12: memref<16x16xf32, #tpu.memory_space<vmem>>, %arg13: memref<16x3xbf16, #tpu.memory_space<vmem>>, %arg14: memref<1x16xf32, #tpu.memory_space<vmem>>, %arg15: memref<1x16xf32, #tpu.memory_space<vmem>>, %arg16: memref<1x16xf32, #tpu.memory_space<vmem>>, %arg17: memref<1x16xf32, #tpu.memory_space<vmem>>, %arg18: memref<1x78x1xf32, #tpu.memory_space<vmem>>, %arg19: memref<78x1xf32, #tpu.memory_space<vmem>>, %arg20: memref<1x78x3xf32, #tpu.memory_space<vmem>>, %arg21: memref<1x78x16xf32, #tpu.memory_space<vmem>>, %arg22: memref<1x78x3xf32, #tpu.memory_space<vmem>>, %arg23: memref<100x32xf32, #tpu.memory_space<vmem>>, %arg24: memref<100x16xf32, #tpu.memory_space<vmem>>) attributes {dimension_semantics = [#tpu.dimension_semantics<parallel>], iteration_bounds = array<i64: 2>, scalar_prefetch = 0 : i64, scratch_operands = 2 : i64, tpu.core_type = #tpu.core_type<tc>, window_params = [{transform_indices = @transform_0, window_bounds = array<i64: 1, 100, 32>}, {transform_indices = @transform_1, window_bounds = array<i64: 1, 1, 32>}, {pipeline_mode = #tpu.pipeline_mode<synchronous>, transform_indices = @transform_2, window_bounds = array<i64: 32, 32>}, {pipeline_mode = #tpu.pipeline_mode<synchronous>, transform_indices = @transform_3, window_bounds = array<i64: 1, 32>}, {pipeline_mode = #tpu.pipeline_mode<synchronous>, transform_indices = @transform_4, window_bounds = array<i64: 32, 16>}, {pipeline_mode = #tpu.pipeline_mode<synchronous>, transform_indices = @transform_5, window_bounds = array<i64: 1, 16>}, {pipeline_mode = #tpu.pipeline_mode<synchronous>, transform_indices = @transform_6, window_bounds = array<i64: 32, 16>}, {pipeline_mode = #tpu.pipeline_mode<synchronous>, transform_indices = @transform_7, window_bounds = array<i64: 1, 16>}, {pipeline_mode = #tpu.pipeline_mode<synchronous>, transform_indices = @transform_8, window_bounds = array<i64: 9, 32, 16>}, {pipeline_mode = #tpu.pipeline_mode<synchronous>, transform_indices = @transform_9, window_bounds = array<i64: 32, 16>}, {pipeline_mode = #tpu.pipeline_mode<synchronous>, transform_indices = @transform_10, window_bounds = array<i64: 9, 16, 16>}, {pipeline_mode = #tpu.pipeline_mode<synchronous>, transform_indices = @transform_11, window_bounds = array<i64: 16, 16>}, {pipeline_mode = #tpu.pipeline_mode<synchronous>, transform_indices = @transform_12, window_bounds = array<i64: 16, 3>}, {pipeline_mode = #tpu.pipeline_mode<synchronous>, transform_indices = @transform_13, window_bounds = array<i64: 1, 16>}, {pipeline_mode = #tpu.pipeline_mode<synchronous>, transform_indices = @transform_14, window_bounds = array<i64: 1, 16>}, {pipeline_mode = #tpu.pipeline_mode<synchronous>, transform_indices = @transform_15, window_bounds = array<i64: 1, 16>}, {pipeline_mode = #tpu.pipeline_mode<synchronous>, transform_indices = @transform_16, window_bounds = array<i64: 1, 16>}, {transform_indices = @transform_17, window_bounds = array<i64: 1, 78, 1>}, {pipeline_mode = #tpu.pipeline_mode<synchronous>, transform_indices = @transform_18, window_bounds = array<i64: 78, 1>}, {transform_indices = @transform_19, window_bounds = array<i64: 1, 78, 3>}, {transform_indices = @transform_20, window_bounds = array<i64: 1, 78, 16>}, {transform_indices = @transform_21, window_bounds = array<i64: 1, 78, 3>}]} {
    %c0 = arith.constant 0 : index
    %c0_0 = arith.constant 0 : index
    %c0_1 = arith.constant 0 : index
    %0 = vector.load %arg2[%c0, %c0_0, %c0_1] : memref<1x1x32xf32, #tpu.memory_space<vmem>>, vector<1x1x32xf32>
    %1 = vector.shape_cast %0 : vector<1x1x32xf32> to vector<1x32xf32>
    %c0_2 = arith.constant 0 : index
    %c0_3 = arith.constant 0 : index
    %2 = vector.load %arg3[%c0_2, %c0_3] : memref<32x32xf32, #tpu.memory_space<vmem>>, vector<32x32xf32>
    %cst = arith.constant dense<0.000000e+00> : vector<1x32xf32>
    %3 = tpu.matmul %1, %2, %cst {dimension_numbers = #tpu.dot_dimension_numbers<[1], [0], [0], [1], [0, 0, 1, 1], [], []>} : vector<1x32xf32>, vector<32x32xf32>, vector<1x32xf32> -> vector<1x32xf32>
    %c0_4 = arith.constant 0 : index
    %c0_5 = arith.constant 0 : index
    %4 = vector.load %arg4[%c0_4, %c0_5] : memref<1x32xf32, #tpu.memory_space<vmem>>, vector<1x32xf32>
    %5 = arith.addf %3, %4 : vector<1x32xf32>
    %cst_6 = arith.constant 1.000000e+00 : f32
    %6 = vector.broadcast %cst_6 : f32 to vector<1x32xf32>
    %7 = arith.addf %5, %6 : vector<1x32xf32>
    %c0_7 = arith.constant 0 : index
    %c0_8 = arith.constant 0 : index
    %8 = vector.load %arg5[%c0_7, %c0_8] : memref<32x16xf32, #tpu.memory_space<vmem>>, vector<32x16xf32>
    %cst_9 = arith.constant dense<0.000000e+00> : vector<1x16xf32>
    %9 = tpu.matmul %1, %8, %cst_9 {dimension_numbers = #tpu.dot_dimension_numbers<[1], [0], [0], [1], [0, 0, 1, 1], [], []>} : vector<1x32xf32>, vector<32x16xf32>, vector<1x16xf32> -> vector<1x16xf32>
    %c0_10 = arith.constant 0 : index
    %c0_11 = arith.constant 0 : index
    %10 = vector.load %arg6[%c0_10, %c0_11] : memref<1x16xf32, #tpu.memory_space<vmem>>, vector<1x16xf32>
    %11 = arith.addf %9, %10 : vector<1x16xf32>
    %cst_12 = arith.constant 1.000000e+00 : f32
    %12 = vector.broadcast %cst_12 : f32 to vector<1x16xf32>
    %13 = arith.addf %11, %12 : vector<1x16xf32>
    %c0_13 = arith.constant 0 : index
    %c0_14 = arith.constant 0 : index
    %14 = vector.load %arg7[%c0_13, %c0_14] : memref<32x16xf32, #tpu.memory_space<vmem>>, vector<32x16xf32>
    %cst_15 = arith.constant dense<0.000000e+00> : vector<1x16xf32>
    %15 = tpu.matmul %1, %14, %cst_15 {dimension_numbers = #tpu.dot_dimension_numbers<[1], [0], [0], [1], [0, 0, 1, 1], [], []>} : vector<1x32xf32>, vector<32x16xf32>, vector<1x16xf32> -> vector<1x16xf32>
    %c0_16 = arith.constant 0 : index
    %c0_17 = arith.constant 0 : index
    %16 = vector.load %arg8[%c0_16, %c0_17] : memref<1x16xf32, #tpu.memory_space<vmem>>, vector<1x16xf32>
    %17 = arith.addf %15, %16 : vector<1x16xf32>
    %cst_18 = arith.constant 1.000000e+00 : f32
    %18 = vector.broadcast %cst_18 : f32 to vector<1x16xf32>
    %19 = arith.addf %17, %18 : vector<1x16xf32>
    %c0_19 = arith.constant 0 : index
    %c0_20 = arith.constant 0 : index
    %c0_21 = arith.constant 0 : index
    %20 = vector.load %arg18[%c0_19, %c0_20, %c0_21] : memref<1x78x1xf32, #tpu.memory_space<vmem>>, vector<1x78x1xf32>
    %21 = vector.shape_cast %20 : vector<1x78x1xf32> to vector<78x1xf32>
    %c0_22 = arith.constant 0 : index
    %c0_23 = arith.constant 0 : index
    %22 = vector.load %arg19[%c0_22, %c0_23] : memref<78x1xf32, #tpu.memory_space<vmem>>, vector<78x1xf32>
    %c0_24 = arith.constant 0 : index
    %c0_25 = arith.constant 0 : index
    %c0_26 = arith.constant 0 : index
    %23 = vector.load %arg1[%c0_24, %c0_25, %c0_26] : memref<1x100x32xf32, #tpu.memory_space<vmem>>, vector<1x100x32xf32>
    %24 = vector.shape_cast %23 : vector<1x100x32xf32> to vector<100x32xf32>
    %25 = vector.broadcast %7 : vector<1x32xf32> to vector<100x32xf32>
    %26 = arith.mulf %24, %25 : vector<100x32xf32>
    %c0_27 = arith.constant 0 : index
    %c0_28 = arith.constant 0 : index
    %27 = vector.load %arg23[%c0_27, %c0_28] : memref<100x32xf32, #tpu.memory_space<vmem>>, vector<100x32xf32>
    tpu.vector_store %arg23[%c0_27, %c0_28], %26 {strides = array<i32>} : memref<100x32xf32, #tpu.memory_space<vmem>>, vector<100x32xf32>,
    %cst_29 = arith.constant 0.000000e+00 : f32
    %28 = vector.broadcast %cst_29 : f32 to vector<78x16xf32>
    %c0_30 = arith.constant 0 : index
    %c0_31 = arith.constant 0 : index
    %29 = vector.load %arg23[%c0_30, %c0_31] : memref<100x32xf32, #tpu.memory_space<vmem>>, vector<78x32xf32>
    %30 = arith.truncf %29 : vector<78x32xf32> to vector<78x32xbf16>
    %c0_32 = arith.constant 0 : index
    %c0_33 = arith.constant 0 : index
    %c0_34 = arith.constant 0 : index
    %31 = vector.load %arg9[%c0_32, %c0_33, %c0_34] : memref<9x32x16xbf16, #tpu.memory_space<vmem>>, vector<1x32x16xbf16>
    %32 = vector.shape_cast %31 : vector<1x32x16xbf16> to vector<32x16xbf16>
    %cst_35 = arith.constant dense<0.000000e+00> : vector<78x16xf32>
    %33 = tpu.matmul %30, %32, %cst_35 {dimension_numbers = #tpu.dot_dimension_numbers<[1], [0], [0], [1], [0, 0, 1, 1], [], []>} : vector<78x32xbf16>, vector<32x16xbf16>, vector<78x16xf32> -> vector<78x16xf32>
    %34 = arith.addf %28, %33 : vector<78x16xf32>
    %c1 = arith.constant 1 : index
    %c0_36 = arith.constant 0 : index
    %35 = vector.load %arg23[%c1, %c0_36] : memref<100x32xf32, #tpu.memory_space<vmem>>, vector<78x32xf32>
    %36 = arith.truncf %35 : vector<78x32xf32> to vector<78x32xbf16>
    %c1_37 = arith.constant 1 : index
    %c0_38 = arith.constant 0 : index
    %c0_39 = arith.constant 0 : index
    %37 = vector.load %arg9[%c1_37, %c0_38, %c0_39] : memref<9x32x16xbf16, #tpu.memory_space<vmem>>, vector<1x32x16xbf16>
    %38 = vector.shape_cast %37 : vector<1x32x16xbf16> to vector<32x16xbf16>
    %cst_40 = arith.constant dense<0.000000e+00> : vector<78x16xf32>
    %39 = tpu.matmul %36, %38, %cst_40 {dimension_numbers = #tpu.dot_dimension_numbers<[1], [0], [0], [1], [0, 0, 1, 1], [], []>} : vector<78x32xbf16>, vector<32x16xbf16>, vector<78x16xf32> -> vector<78x16xf32>
    %40 = arith.addf %34, %39 : vector<78x16xf32>
    %c2 = arith.constant 2 : index
    %c0_41 = arith.constant 0 : index
    %41 = vector.load %arg23[%c2, %c0_41] : memref<100x32xf32, #tpu.memory_space<vmem>>, vector<78x32xf32>
    %42 = arith.truncf %41 : vector<78x32xf32> to vector<78x32xbf16>
    %c2_42 = arith.constant 2 : index
    %c0_43 = arith.constant 0 : index
    %c0_44 = arith.constant 0 : index
    %43 = vector.load %arg9[%c2_42, %c0_43, %c0_44] : memref<9x32x16xbf16, #tpu.memory_space<vmem>>, vector<1x32x16xbf16>
    %44 = vector.shape_cast %43 : vector<1x32x16xbf16> to vector<32x16xbf16>
    %cst_45 = arith.constant dense<0.000000e+00> : vector<78x16xf32>
    %45 = tpu.matmul %42, %44, %cst_45 {dimension_numbers = #tpu.dot_dimension_numbers<[1], [0], [0], [1], [0, 0, 1, 1], [], []>} : vector<78x32xbf16>, vector<32x16xbf16>, vector<78x16xf32> -> vector<78x16xf32>
    %46 = arith.addf %40, %45 : vector<78x16xf32>
    %c10 = arith.constant 10 : index
    %c0_46 = arith.constant 0 : index
    %47 = vector.load %arg23[%c10, %c0_46] : memref<100x32xf32, #tpu.memory_space<vmem>>, vector<78x32xf32>
    %48 = arith.truncf %47 : vector<78x32xf32> to vector<78x32xbf16>
    %c3 = arith.constant 3 : index
    %c0_47 = arith.constant 0 : index
    %c0_48 = arith.constant 0 : index
    %49 = vector.load %arg9[%c3, %c0_47, %c0_48] : memref<9x32x16xbf16, #tpu.memory_space<vmem>>, vector<1x32x16xbf16>
    %50 = vector.shape_cast %49 : vector<1x32x16xbf16> to vector<32x16xbf16>
    %cst_49 = arith.constant dense<0.000000e+00> : vector<78x16xf32>
    %51 = tpu.matmul %48, %50, %cst_49 {dimension_numbers = #tpu.dot_dimension_numbers<[1], [0], [0], [1], [0, 0, 1, 1], [], []>} : vector<78x32xbf16>, vector<32x16xbf16>, vector<78x16xf32> -> vector<78x16xf32>
    %52 = arith.addf %46, %51 : vector<78x16xf32>
    %c11 = arith.constant 11 : index
    %c0_50 = arith.constant 0 : index
    %53 = vector.load %arg23[%c11, %c0_50] : memref<100x32xf32, #tpu.memory_space<vmem>>, vector<78x32xf32>
    %54 = arith.truncf %53 : vector<78x32xf32> to vector<78x32xbf16>
    %c4 = arith.constant 4 : index
    %c0_51 = arith.constant 0 : index
    %c0_52 = arith.constant 0 : index
    %55 = vector.load %arg9[%c4, %c0_51, %c0_52] : memref<9x32x16xbf16, #tpu.memory_space<vmem>>, vector<1x32x16xbf16>
    %56 = vector.shape_cast %55 : vector<1x32x16xbf16> to vector<32x16xbf16>
    %cst_53 = arith.constant dense<0.000000e+00> : vector<78x16xf32>
    %57 = tpu.matmul %54, %56, %cst_53 {dimension_numbers = #tpu.dot_dimension_numbers<[1], [0], [0], [1], [0, 0, 1, 1], [], []>} : vector<78x32xbf16>, vector<32x16xbf16>, vector<78x16xf32> -> vector<78x16xf32>
    %58 = arith.addf %52, %57 : vector<78x16xf32>
    %c12 = arith.constant 12 : index
    %c0_54 = arith.constant 0 : index
    %59 = vector.load %arg23[%c12, %c0_54] : memref<100x32xf32, #tpu.memory_space<vmem>>, vector<78x32xf32>
    %60 = arith.truncf %59 : vector<78x32xf32> to vector<78x32xbf16>
    %c5 = arith.constant 5 : index
    %c0_55 = arith.constant 0 : index
    %c0_56 = arith.constant 0 : index
    %61 = vector.load %arg9[%c5, %c0_55, %c0_56] : memref<9x32x16xbf16, #tpu.memory_space<vmem>>, vector<1x32x16xbf16>
    %62 = vector.shape_cast %61 : vector<1x32x16xbf16> to vector<32x16xbf16>
    %cst_57 = arith.constant dense<0.000000e+00> : vector<78x16xf32>
    %63 = tpu.matmul %60, %62, %cst_57 {dimension_numbers = #tpu.dot_dimension_numbers<[1], [0], [0], [1], [0, 0, 1, 1], [], []>} : vector<78x32xbf16>, vector<32x16xbf16>, vector<78x16xf32> -> vector<78x16xf32>
    %64 = arith.addf %58, %63 : vector<78x16xf32>
    %c20 = arith.constant 20 : index
    %c0_58 = arith.constant 0 : index
    %65 = vector.load %arg23[%c20, %c0_58] : memref<100x32xf32, #tpu.memory_space<vmem>>, vector<78x32xf32>
    %66 = arith.truncf %65 : vector<78x32xf32> to vector<78x32xbf16>
    %c6 = arith.constant 6 : index
    %c0_59 = arith.constant 0 : index
    %c0_60 = arith.constant 0 : index
    %67 = vector.load %arg9[%c6, %c0_59, %c0_60] : memref<9x32x16xbf16, #tpu.memory_space<vmem>>, vector<1x32x16xbf16>
    %68 = vector.shape_cast %67 : vector<1x32x16xbf16> to vector<32x16xbf16>
    %cst_61 = arith.constant dense<0.000000e+00> : vector<78x16xf32>
    %69 = tpu.matmul %66, %68, %cst_61 {dimension_numbers = #tpu.dot_dimension_numbers<[1], [0], [0], [1], [0, 0, 1, 1], [], []>} : vector<78x32xbf16>, vector<32x16xbf16>, vector<78x16xf32> -> vector<78x16xf32>
    %70 = arith.addf %64, %69 : vector<78x16xf32>
    %c21 = arith.constant 21 : index
    %c0_62 = arith.constant 0 : index
    %71 = vector.load %arg23[%c21, %c0_62] : memref<100x32xf32, #tpu.memory_space<vmem>>, vector<78x32xf32>
    %72 = arith.truncf %71 : vector<78x32xf32> to vector<78x32xbf16>
    %c7 = arith.constant 7 : index
    %c0_63 = arith.constant 0 : index
    %c0_64 = arith.constant 0 : index
    %73 = vector.load %arg9[%c7, %c0_63, %c0_64] : memref<9x32x16xbf16, #tpu.memory_space<vmem>>, vector<1x32x16xbf16>
    %74 = vector.shape_cast %73 : vector<1x32x16xbf16> to vector<32x16xbf16>
    %cst_65 = arith.constant dense<0.000000e+00> : vector<78x16xf32>
    %75 = tpu.matmul %72, %74, %cst_65 {dimension_numbers = #tpu.dot_dimension_numbers<[1], [0], [0], [1], [0, 0, 1, 1], [], []>} : vector<78x32xbf16>, vector<32x16xbf16>, vector<78x16xf32> -> vector<78x16xf32>
    %76 = arith.addf %70, %75 : vector<78x16xf32>
    %c22 = arith.constant 22 : index
    %c0_66 = arith.constant 0 : index
    %77 = vector.load %arg23[%c22, %c0_66] : memref<100x32xf32, #tpu.memory_space<vmem>>, vector<78x32xf32>
    %78 = arith.truncf %77 : vector<78x32xf32> to vector<78x32xbf16>
    %c8 = arith.constant 8 : index
    %c0_67 = arith.constant 0 : index
    %c0_68 = arith.constant 0 : index
    %79 = vector.load %arg9[%c8, %c0_67, %c0_68] : memref<9x32x16xbf16, #tpu.memory_space<vmem>>, vector<1x32x16xbf16>
    %80 = vector.shape_cast %79 : vector<1x32x16xbf16> to vector<32x16xbf16>
    %cst_69 = arith.constant dense<0.000000e+00> : vector<78x16xf32>
    %81 = tpu.matmul %78, %80, %cst_69 {dimension_numbers = #tpu.dot_dimension_numbers<[1], [0], [0], [1], [0, 0, 1, 1], [], []>} : vector<78x32xbf16>, vector<32x16xbf16>, vector<78x16xf32> -> vector<78x16xf32>
    %82 = arith.addf %76, %81 : vector<78x16xf32>
    %83 = arith.mulf %7, %7 : vector<1x32xf32>
    %c0_70 = arith.constant 0 : index
    %c0_71 = arith.constant 0 : index
    %84 = vector.load %arg10[%c0_70, %c0_71] : memref<32x16xf32, #tpu.memory_space<vmem>>, vector<32x16xf32>
    %cst_72 = arith.constant dense<0.000000e+00> : vector<1x16xf32>
    %85 = tpu.matmul %83, %84, %cst_72 {dimension_numbers = #tpu.dot_dimension_numbers<[1], [0], [0], [1], [0, 0, 1, 1], [], []>} : vector<1x32xf32>, vector<32x16xf32>, vector<1x16xf32> -> vector<1x16xf32>
    %cst_73 = arith.constant 9.99999993E-9 : f32
    %86 = vector.broadcast %cst_73 : f32 to vector<1x16xf32>
    %87 = arith.addf %85, %86 : vector<1x16xf32>
    %88 = math.rsqrt %87 : vector<1x16xf32>
    %89 = vector.broadcast %88 : vector<1x16xf32> to vector<78x16xf32>
    %90 = arith.mulf %82, %89 : vector<78x16xf32>
    %c0_74 = arith.constant 0 : index
    %c0_75 = arith.constant 0 : index
    %91 = vector.load %arg14[%c0_74, %c0_75] : memref<1x16xf32, #tpu.memory_space<vmem>>, vector<1x16xf32>
    %92 = vector.broadcast %21 : vector<78x1xf32> to vector<78x16xf32>
    %93 = vector.broadcast %91 : vector<1x16xf32> to vector<78x16xf32>
    %94 = arith.mulf %92, %93 : vector<78x16xf32>
    %95 = arith.addf %90, %94 : vector<78x16xf32>
    %c0_76 = arith.constant 0 : index
    %c0_77 = arith.constant 0 : index
    %96 = vector.load %arg15[%c0_76, %c0_77] : memref<1x16xf32, #tpu.memory_space<vmem>>, vector<1x16xf32>
    %97 = vector.broadcast %96 : vector<1x16xf32> to vector<78x16xf32>
    %98 = arith.addf %95, %97 : vector<78x16xf32>
    %cst_78 = arith.constant 0.000000e+00 : f32
    %99 = vector.broadcast %cst_78 : f32 to vector<78x16xf32>
    %100 = arith.cmpf oge, %98, %99 : vector<78x16xf32>
    %cst_79 = arith.constant 2.000000e-01 : f32
    %101 = vector.broadcast %cst_79 : f32 to vector<78x16xf32>
    %102 = arith.mulf %98, %101 : vector<78x16xf32>
    %103 = arith.select %100, %98, %102 : vector<78x16xi1>, vector<78x16xf32>
    %104 = vector.broadcast %22 : vector<78x1xf32> to vector<78x16xf32>
    %105 = arith.mulf %103, %104 : vector<78x16xf32>
    %cst_80 = arith.constant 0.000000e+00 : f32
    %106 = vector.broadcast %cst_80 : f32 to vector<100x16xf32>
    %c0_81 = arith.constant 0 : index
    %c0_82 = arith.constant 0 : index
    %107 = vector.load %arg24[%c0_81, %c0_82] : memref<100x16xf32, #tpu.memory_space<vmem>>, vector<100x16xf32>
    tpu.vector_store %arg24[%c0_81, %c0_82], %106 {strides = array<i32>} : memref<100x16xf32, #tpu.memory_space<vmem>>, vector<100x16xf32>,
    %108 = vector.broadcast %13 : vector<1x16xf32> to vector<78x16xf32>
    %109 = arith.mulf %105, %108 : vector<78x16xf32>
    %c11_83 = arith.constant 11 : index
    %c0_84 = arith.constant 0 : index
    %110 = vector.load %arg24[%c11_83, %c0_84] : memref<100x16xf32, #tpu.memory_space<vmem>>, vector<78x16xf32>
    tpu.vector_store %arg24[%c11_83, %c0_84], %109 {strides = array<i32>} : memref<100x16xf32, #tpu.memory_space<vmem>>, vector<78x16xf32>,
    %cst_85 = arith.constant 0.000000e+00 : f32
    %111 = vector.broadcast %cst_85 : f32 to vector<78x16xf32>
    %c0_86 = arith.constant 0 : index
    %c0_87 = arith.constant 0 : index
    %112 = vector.load %arg24[%c0_86, %c0_87] : memref<100x16xf32, #tpu.memory_space<vmem>>, vector<78x16xf32>
    %113 = arith.truncf %112 : vector<78x16xf32> to vector<78x16xbf16>
    %c0_88 = arith.constant 0 : index
    %c0_89 = arith.constant 0 : index
    %c0_90 = arith.constant 0 : index
    %114 = vector.load %arg11[%c0_88, %c0_89, %c0_90] : memref<9x16x16xbf16, #tpu.memory_space<vmem>>, vector<1x16x16xbf16>
    %115 = vector.shape_cast %114 : vector<1x16x16xbf16> to vector<16x16xbf16>
    %cst_91 = arith.constant dense<0.000000e+00> : vector<78x16xf32>
    %116 = tpu.matmul %113, %115, %cst_91 {dimension_numbers = #tpu.dot_dimension_numbers<[1], [0], [0], [1], [0, 0, 1, 1], [], []>} : vector<78x16xbf16>, vector<16x16xbf16>, vector<78x16xf32> -> vector<78x16xf32>
    %117 = arith.addf %111, %116 : vector<78x16xf32>
    %c1_92 = arith.constant 1 : index
    %c0_93 = arith.constant 0 : index
    %118 = vector.load %arg24[%c1_92, %c0_93] : memref<100x16xf32, #tpu.memory_space<vmem>>, vector<78x16xf32>
    %119 = arith.truncf %118 : vector<78x16xf32> to vector<78x16xbf16>
    %c1_94 = arith.constant 1 : index
    %c0_95 = arith.constant 0 : index
    %c0_96 = arith.constant 0 : index
    %120 = vector.load %arg11[%c1_94, %c0_95, %c0_96] : memref<9x16x16xbf16, #tpu.memory_space<vmem>>, vector<1x16x16xbf16>
    %121 = vector.shape_cast %120 : vector<1x16x16xbf16> to vector<16x16xbf16>
    %cst_97 = arith.constant dense<0.000000e+00> : vector<78x16xf32>
    %122 = tpu.matmul %119, %121, %cst_97 {dimension_numbers = #tpu.dot_dimension_numbers<[1], [0], [0], [1], [0, 0, 1, 1], [], []>} : vector<78x16xbf16>, vector<16x16xbf16>, vector<78x16xf32> -> vector<78x16xf32>
    %123 = arith.addf %117, %122 : vector<78x16xf32>
    %c2_98 = arith.constant 2 : index
    %c0_99 = arith.constant 0 : index
    %124 = vector.load %arg24[%c2_98, %c0_99] : memref<100x16xf32, #tpu.memory_space<vmem>>, vector<78x16xf32>
    %125 = arith.truncf %124 : vector<78x16xf32> to vector<78x16xbf16>
    %c2_100 = arith.constant 2 : index
    %c0_101 = arith.constant 0 : index
    %c0_102 = arith.constant 0 : index
    %126 = vector.load %arg11[%c2_100, %c0_101, %c0_102] : memref<9x16x16xbf16, #tpu.memory_space<vmem>>, vector<1x16x16xbf16>
    %127 = vector.shape_cast %126 : vector<1x16x16xbf16> to vector<16x16xbf16>
    %cst_103 = arith.constant dense<0.000000e+00> : vector<78x16xf32>
    %128 = tpu.matmul %125, %127, %cst_103 {dimension_numbers = #tpu.dot_dimension_numbers<[1], [0], [0], [1], [0, 0, 1, 1], [], []>} : vector<78x16xbf16>, vector<16x16xbf16>, vector<78x16xf32> -> vector<78x16xf32>
    %129 = arith.addf %123, %128 : vector<78x16xf32>
    %c10_104 = arith.constant 10 : index
    %c0_105 = arith.constant 0 : index
    %130 = vector.load %arg24[%c10_104, %c0_105] : memref<100x16xf32, #tpu.memory_space<vmem>>, vector<78x16xf32>
    %131 = arith.truncf %130 : vector<78x16xf32> to vector<78x16xbf16>
    %c3_106 = arith.constant 3 : index
    %c0_107 = arith.constant 0 : index
    %c0_108 = arith.constant 0 : index
    %132 = vector.load %arg11[%c3_106, %c0_107, %c0_108] : memref<9x16x16xbf16, #tpu.memory_space<vmem>>, vector<1x16x16xbf16>
    %133 = vector.shape_cast %132 : vector<1x16x16xbf16> to vector<16x16xbf16>
    %cst_109 = arith.constant dense<0.000000e+00> : vector<78x16xf32>
    %134 = tpu.matmul %131, %133, %cst_109 {dimension_numbers = #tpu.dot_dimension_numbers<[1], [0], [0], [1], [0, 0, 1, 1], [], []>} : vector<78x16xbf16>, vector<16x16xbf16>, vector<78x16xf32> -> vector<78x16xf32>
    %135 = arith.addf %129, %134 : vector<78x16xf32>
    %c11_110 = arith.constant 11 : index
    %c0_111 = arith.constant 0 : index
    %136 = vector.load %arg24[%c11_110, %c0_111] : memref<100x16xf32, #tpu.memory_space<vmem>>, vector<78x16xf32>
    %137 = arith.truncf %136 : vector<78x16xf32> to vector<78x16xbf16>
    %c4_112 = arith.constant 4 : index
    %c0_113 = arith.constant 0 : index
    %c0_114 = arith.constant 0 : index
    %138 = vector.load %arg11[%c4_112, %c0_113, %c0_114] : memref<9x16x16xbf16, #tpu.memory_space<vmem>>, vector<1x16x16xbf16>
    %139 = vector.shape_cast %138 : vector<1x16x16xbf16> to vector<16x16xbf16>
    %cst_115 = arith.constant dense<0.000000e+00> : vector<78x16xf32>
    %140 = tpu.matmul %137, %139, %cst_115 {dimension_numbers = #tpu.dot_dimension_numbers<[1], [0], [0], [1], [0, 0, 1, 1], [], []>} : vector<78x16xbf16>, vector<16x16xbf16>, vector<78x16xf32> -> vector<78x16xf32>
    %141 = arith.addf %135, %140 : vector<78x16xf32>
    %c12_116 = arith.constant 12 : index
    %c0_117 = arith.constant 0 : index
    %142 = vector.load %arg24[%c12_116, %c0_117] : memref<100x16xf32, #tpu.memory_space<vmem>>, vector<78x16xf32>
    %143 = arith.truncf %142 : vector<78x16xf32> to vector<78x16xbf16>
    %c5_118 = arith.constant 5 : index
    %c0_119 = arith.constant 0 : index
    %c0_120 = arith.constant 0 : index
    %144 = vector.load %arg11[%c5_118, %c0_119, %c0_120] : memref<9x16x16xbf16, #tpu.memory_space<vmem>>, vector<1x16x16xbf16>
    %145 = vector.shape_cast %144 : vector<1x16x16xbf16> to vector<16x16xbf16>
    %cst_121 = arith.constant dense<0.000000e+00> : vector<78x16xf32>
    %146 = tpu.matmul %143, %145, %cst_121 {dimension_numbers = #tpu.dot_dimension_numbers<[1], [0], [0], [1], [0, 0, 1, 1], [], []>} : vector<78x16xbf16>, vector<16x16xbf16>, vector<78x16xf32> -> vector<78x16xf32>
    %147 = arith.addf %141, %146 : vector<78x16xf32>
    %c20_122 = arith.constant 20 : index
    %c0_123 = arith.constant 0 : index
    %148 = vector.load %arg24[%c20_122, %c0_123] : memref<100x16xf32, #tpu.memory_space<vmem>>, vector<78x16xf32>
    %149 = arith.truncf %148 : vector<78x16xf32> to vector<78x16xbf16>
    %c6_124 = arith.constant 6 : index
    %c0_125 = arith.constant 0 : index
    %c0_126 = arith.constant 0 : index
    %150 = vector.load %arg11[%c6_124, %c0_125, %c0_126] : memref<9x16x16xbf16, #tpu.memory_space<vmem>>, vector<1x16x16xbf16>
    %151 = vector.shape_cast %150 : vector<1x16x16xbf16> to vector<16x16xbf16>
    %cst_127 = arith.constant dense<0.000000e+00> : vector<78x16xf32>
    %152 = tpu.matmul %149, %151, %cst_127 {dimension_numbers = #tpu.dot_dimension_numbers<[1], [0], [0], [1], [0, 0, 1, 1], [], []>} : vector<78x16xbf16>, vector<16x16xbf16>, vector<78x16xf32> -> vector<78x16xf32>
    %153 = arith.addf %147, %152 : vector<78x16xf32>
    %c21_128 = arith.constant 21 : index
    %c0_129 = arith.constant 0 : index
    %154 = vector.load %arg24[%c21_128, %c0_129] : memref<100x16xf32, #tpu.memory_space<vmem>>, vector<78x16xf32>
    %155 = arith.truncf %154 : vector<78x16xf32> to vector<78x16xbf16>
    %c7_130 = arith.constant 7 : index
    %c0_131 = arith.constant 0 : index
    %c0_132 = arith.constant 0 : index
    %156 = vector.load %arg11[%c7_130, %c0_131, %c0_132] : memref<9x16x16xbf16, #tpu.memory_space<vmem>>, vector<1x16x16xbf16>
    %157 = vector.shape_cast %156 : vector<1x16x16xbf16> to vector<16x16xbf16>
    %cst_133 = arith.constant dense<0.000000e+00> : vector<78x16xf32>
    %158 = tpu.matmul %155, %157, %cst_133 {dimension_numbers = #tpu.dot_dimension_numbers<[1], [0], [0], [1], [0, 0, 1, 1], [], []>} : vector<78x16xbf16>, vector<16x16xbf16>, vector<78x16xf32> -> vector<78x16xf32>
    %159 = arith.addf %153, %158 : vector<78x16xf32>
    %c22_134 = arith.constant 22 : index
    %c0_135 = arith.constant 0 : index
    %160 = vector.load %arg24[%c22_134, %c0_135] : memref<100x16xf32, #tpu.memory_space<vmem>>, vector<78x16xf32>
    %161 = arith.truncf %160 : vector<78x16xf32> to vector<78x16xbf16>
    %c8_136 = arith.constant 8 : index
    %c0_137 = arith.constant 0 : index
    %c0_138 = arith.constant 0 : index
    %162 = vector.load %arg11[%c8_136, %c0_137, %c0_138] : memref<9x16x16xbf16, #tpu.memory_space<vmem>>, vector<1x16x16xbf16>
    %163 = vector.shape_cast %162 : vector<1x16x16xbf16> to vector<16x16xbf16>
    %cst_139 = arith.constant dense<0.000000e+00> : vector<78x16xf32>
    %164 = tpu.matmul %161, %163, %cst_139 {dimension_numbers = #tpu.dot_dimension_numbers<[1], [0], [0], [1], [0, 0, 1, 1], [], []>} : vector<78x16xbf16>, vector<16x16xbf16>, vector<78x16xf32> -> vector<78x16xf32>
    %165 = arith.addf %159, %164 : vector<78x16xf32>
    %166 = arith.mulf %13, %13 : vector<1x16xf32>
    %c0_140 = arith.constant 0 : index
    %c0_141 = arith.constant 0 : index
    %167 = vector.load %arg12[%c0_140, %c0_141] : memref<16x16xf32, #tpu.memory_space<vmem>>, vector<16x16xf32>
    %cst_142 = arith.constant dense<0.000000e+00> : vector<1x16xf32>
    %168 = tpu.matmul %166, %167, %cst_142 {dimension_numbers = #tpu.dot_dimension_numbers<[1], [0], [0], [1], [0, 0, 1, 1], [], []>} : vector<1x16xf32>, vector<16x16xf32>, vector<1x16xf32> -> vector<1x16xf32>
    %cst_143 = arith.constant 9.99999993E-9 : f32
    %169 = vector.broadcast %cst_143 : f32 to vector<1x16xf32>
    %170 = arith.addf %168, %169 : vector<1x16xf32>
    %171 = math.rsqrt %170 : vector<1x16xf32>
    %172 = vector.broadcast %171 : vector<1x16xf32> to vector<78x16xf32>
    %173 = arith.mulf %165, %172 : vector<78x16xf32>
    %c0_144 = arith.constant 0 : index
    %c0_145 = arith.constant 0 : index
    %174 = vector.load %arg16[%c0_144, %c0_145] : memref<1x16xf32, #tpu.memory_space<vmem>>, vector<1x16xf32>
    %175 = vector.broadcast %21 : vector<78x1xf32> to vector<78x16xf32>
    %176 = vector.broadcast %174 : vector<1x16xf32> to vector<78x16xf32>
    %177 = arith.mulf %175, %176 : vector<78x16xf32>
    %178 = arith.addf %173, %177 : vector<78x16xf32>
    %c0_146 = arith.constant 0 : index
    %c0_147 = arith.constant 0 : index
    %179 = vector.load %arg17[%c0_146, %c0_147] : memref<1x16xf32, #tpu.memory_space<vmem>>, vector<1x16xf32>
    %180 = vector.broadcast %179 : vector<1x16xf32> to vector<78x16xf32>
    %181 = arith.addf %178, %180 : vector<78x16xf32>
    %cst_148 = arith.constant 0.000000e+00 : f32
    %182 = vector.broadcast %cst_148 : f32 to vector<78x16xf32>
    %183 = arith.cmpf oge, %181, %182 : vector<78x16xf32>
    %cst_149 = arith.constant 2.000000e-01 : f32
    %184 = vector.broadcast %cst_149 : f32 to vector<78x16xf32>
    %185 = arith.mulf %181, %184 : vector<78x16xf32>
    %186 = arith.select %183, %181, %185 : vector<78x16xi1>, vector<78x16xf32>
    %187 = vector.broadcast %22 : vector<78x1xf32> to vector<78x16xf32>
    %188 = arith.mulf %186, %187 : vector<78x16xf32>
    %c0_150 = arith.constant 0 : index
    %c0_151 = arith.constant 0 : index
    %c0_152 = arith.constant 0 : index
    %189 = vector.load %arg21[%c0_150, %c0_151, %c0_152] : memref<1x78x16xf32, #tpu.memory_space<vmem>>, vector<1x78x16xf32>
    %190 = vector.shape_cast %189 : vector<1x78x16xf32> to vector<78x16xf32>
    %191 = vector.shape_cast %188 : vector<78x16xf32> to vector<1x78x16xf32>
    tpu.vector_store %arg21[%c0_150, %c0_151, %c0_152], %191 {strides = array<i32>} : memref<1x78x16xf32, #tpu.memory_space<vmem>>, vector<1x78x16xf32>,
    %192 = vector.broadcast %19 : vector<1x16xf32> to vector<78x16xf32>
    %193 = arith.mulf %188, %192 : vector<78x16xf32>
    %194 = arith.truncf %193 : vector<78x16xf32> to vector<78x16xbf16>
    %c0_153 = arith.constant 0 : index
    %c0_154 = arith.constant 0 : index
    %195 = vector.load %arg13[%c0_153, %c0_154] : memref<16x3xbf16, #tpu.memory_space<vmem>>, vector<16x3xbf16>
    %cst_155 = arith.constant dense<0.000000e+00> : vector<78x3xf32>
    %196 = tpu.matmul %194, %195, %cst_155 {dimension_numbers = #tpu.dot_dimension_numbers<[1], [0], [0], [1], [0, 0, 1, 1], [], []>} : vector<78x16xbf16>, vector<16x3xbf16>, vector<78x3xf32> -> vector<78x3xf32>
    %c0_156 = arith.constant 0 : index
    %c0_157 = arith.constant 0 : index
    %c0_158 = arith.constant 0 : index
    %197 = vector.load %arg20[%c0_156, %c0_157, %c0_158] : memref<1x78x3xf32, #tpu.memory_space<vmem>>, vector<1x78x3xf32>
    %198 = vector.shape_cast %197 : vector<1x78x3xf32> to vector<78x3xf32>
    %199 = arith.addf %196, %198 : vector<78x3xf32>
    %c0_159 = arith.constant 0 : index
    %c0_160 = arith.constant 0 : index
    %c0_161 = arith.constant 0 : index
    %200 = vector.load %arg22[%c0_159, %c0_160, %c0_161] : memref<1x78x3xf32, #tpu.memory_space<vmem>>, vector<1x78x3xf32>
    %201 = vector.shape_cast %200 : vector<1x78x3xf32> to vector<78x3xf32>
    %202 = vector.shape_cast %199 : vector<78x3xf32> to vector<1x78x3xf32>
    tpu.vector_store %arg22[%c0_159, %c0_160, %c0_161], %202 {strides = array<i32>} : memref<1x78x3xf32, #tpu.memory_space<vmem>>, vector<1x78x3xf32>,
    return
  }
  func.func @transform_0(%arg0: i32) -> (i32, i32, i32) {
    %c0_i32 = arith.constant 0 : i32
    %c0_i32_0 = arith.constant 0 : i32
    %c0_i32_1 = arith.constant 0 : i32
    return %arg0, %c0_i32, %c0_i32_0 : i32, i32, i32
  }
  func.func @transform_1(%arg0: i32) -> (i32, i32, i32) {
    %c0_i32 = arith.constant 0 : i32
    %c0_i32_0 = arith.constant 0 : i32
    %c0_i32_1 = arith.constant 0 : i32
    return %arg0, %c0_i32, %c0_i32_0 : i32, i32, i32
  }
  func.func @transform_2(%arg0: i32) -> (i32, i32) {
    %c0_i32 = arith.constant 0 : i32
    %c0_i32_0 = arith.constant 0 : i32
    %c0_i32_1 = arith.constant 0 : i32
    return %c0_i32, %c0_i32_0 : i32, i32
  }
  func.func @transform_3(%arg0: i32) -> (i32, i32) {
    %c0_i32 = arith.constant 0 : i32
    %c0_i32_0 = arith.constant 0 : i32
    %c0_i32_1 = arith.constant 0 : i32
    return %c0_i32, %c0_i32_0 : i32, i32
  }
  func.func @transform_4(%arg0: i32) -> (i32, i32) {
    %c0_i32 = arith.constant 0 : i32
    %c0_i32_0 = arith.constant 0 : i32
    %c0_i32_1 = arith.constant 0 : i32
    return %c0_i32, %c0_i32_0 : i32, i32
  }
  func.func @transform_5(%arg0: i32) -> (i32, i32) {
    %c0_i32 = arith.constant 0 : i32
    %c0_i32_0 = arith.constant 0 : i32
    %c0_i32_1 = arith.constant 0 : i32
    return %c0_i32, %c0_i32_0 : i32, i32
  }
  func.func @transform_6(%arg0: i32) -> (i32, i32) {
    %c0_i32 = arith.constant 0 : i32
    %c0_i32_0 = arith.constant 0 : i32
    %c0_i32_1 = arith.constant 0 : i32
    return %c0_i32, %c0_i32_0 : i32, i32
  }
  func.func @transform_7(%arg0: i32) -> (i32, i32) {
    %c0_i32 = arith.constant 0 : i32
    %c0_i32_0 = arith.constant 0 : i32
    %c0_i32_1 = arith.constant 0 : i32
    return %c0_i32, %c0_i32_0 : i32, i32
  }
  func.func @transform_8(%arg0: i32) -> (i32, i32, i32) {
    %c0_i32 = arith.constant 0 : i32
    %c0_i32_0 = arith.constant 0 : i32
    %c0_i32_1 = arith.constant 0 : i32
    %c0_i32_2 = arith.constant 0 : i32
    return %c0_i32, %c0_i32_0, %c0_i32_1 : i32, i32, i32
  }
  func.func @transform_9(%arg0: i32) -> (i32, i32) {
    %c0_i32 = arith.constant 0 : i32
    %c0_i32_0 = arith.constant 0 : i32
    %c0_i32_1 = arith.constant 0 : i32
    return %c0_i32, %c0_i32_0 : i32, i32
  }
  func.func @transform_10(%arg0: i32) -> (i32, i32, i32) {
    %c0_i32 = arith.constant 0 : i32
    %c0_i32_0 = arith.constant 0 : i32
    %c0_i32_1 = arith.constant 0 : i32
    %c0_i32_2 = arith.constant 0 : i32
    return %c0_i32, %c0_i32_0, %c0_i32_1 : i32, i32, i32
  }
  func.func @transform_11(%arg0: i32) -> (i32, i32) {
    %c0_i32 = arith.constant 0 : i32
    %c0_i32_0 = arith.constant 0 : i32
    %c0_i32_1 = arith.constant 0 : i32
    return %c0_i32, %c0_i32_0 : i32, i32
  }
  func.func @transform_12(%arg0: i32) -> (i32, i32) {
    %c0_i32 = arith.constant 0 : i32
    %c0_i32_0 = arith.constant 0 : i32
    %c0_i32_1 = arith.constant 0 : i32
    return %c0_i32, %c0_i32_0 : i32, i32
  }
  func.func @transform_13(%arg0: i32) -> (i32, i32) {
    %c0_i32 = arith.constant 0 : i32
    %c0_i32_0 = arith.constant 0 : i32
    %c0_i32_1 = arith.constant 0 : i32
    return %c0_i32, %c0_i32_0 : i32, i32
  }
  func.func @transform_14(%arg0: i32) -> (i32, i32) {
    %c0_i32 = arith.constant 0 : i32
    %c0_i32_0 = arith.constant 0 : i32
    %c0_i32_1 = arith.constant 0 : i32
    return %c0_i32, %c0_i32_0 : i32, i32
  }
  func.func @transform_15(%arg0: i32) -> (i32, i32) {
    %c0_i32 = arith.constant 0 : i32
    %c0_i32_0 = arith.constant 0 : i32
    %c0_i32_1 = arith.constant 0 : i32
    return %c0_i32, %c0_i32_0 : i32, i32
  }
  func.func @transform_16(%arg0: i32) -> (i32, i32) {
    %c0_i32 = arith.constant 0 : i32
    %c0_i32_0 = arith.constant 0 : i32
    %c0_i32_1 = arith.constant 0 : i32
    return %c0_i32, %c0_i32_0 : i32, i32
  }
  func.func @transform_17(%arg0: i32) -> (i32, i32, i32) {
    %c0_i32 = arith.constant 0 : i32
    %c0_i32_0 = arith.constant 0 : i32
    %c0_i32_1 = arith.constant 0 : i32
    return %arg0, %c0_i32, %c0_i32_0 : i32, i32, i32
  }
  func.func @transform_18(%arg0: i32) -> (i32, i32) {
    %c0_i32 = arith.constant 0 : i32
    %c0_i32_0 = arith.constant 0 : i32
    %c0_i32_1 = arith.constant 0 : i32
    return %c0_i32, %c0_i32_0 : i32, i32
  }
  func.func @transform_19(%arg0: i32) -> (i32, i32, i32) {
    %c0_i32 = arith.constant 0 : i32
    %c0_i32_0 = arith.constant 0 : i32
    %c0_i32_1 = arith.constant 0 : i32
    return %arg0, %c0_i32, %c0_i32_0 : i32, i32, i32
  }
  func.func @transform_20(%arg0: i32) -> (i32, i32, i32) {
    %c0_i32 = arith.constant 0 : i32
    %c0_i32_0 = arith.constant 0 : i32
    %c0_i32_1 = arith.constant 0 : i32
    return %arg0, %c0_i32, %c0_i32_0 : i32, i32, i32
  }
  func.func @transform_21(%arg0: i32) -> (i32, i32, i32) {
    %c0_i32 = arith.constant 0 : i32
    %c0_i32_0 = arith.constant 0 : i32
    %c0_i32_1 = arith.constant 0 : i32
    return %arg0, %c0_i32, %c0_i32_0 : i32, i32, i32
  }
}

module attributes {stable_mosaic.version = 11 : i64} {
  func.func @_gen_block_kernel(%arg0: i32, %arg1: memref<1x324x16xf32, #tpu.memory_space<vmem>>, %arg2: memref<1x1x32xf32, #tpu.memory_space<vmem>>, %arg3: memref<32x16xf32, #tpu.memory_space<vmem>>, %arg4: memref<1x16xf32, #tpu.memory_space<vmem>>, %arg5: memref<32x8xf32, #tpu.memory_space<vmem>>, %arg6: memref<1x8xf32, #tpu.memory_space<vmem>>, %arg7: memref<32x8xf32, #tpu.memory_space<vmem>>, %arg8: memref<1x8xf32, #tpu.memory_space<vmem>>, %arg9: memref<9x16x8xbf16, #tpu.memory_space<vmem>>, %arg10: memref<16x8xf32, #tpu.memory_space<vmem>>, %arg11: memref<9x8x8xbf16, #tpu.memory_space<vmem>>, %arg12: memref<8x8xf32, #tpu.memory_space<vmem>>, %arg13: memref<8x3xbf16, #tpu.memory_space<vmem>>, %arg14: memref<1x8xf32, #tpu.memory_space<vmem>>, %arg15: memref<1x8xf32, #tpu.memory_space<vmem>>, %arg16: memref<1x8xf32, #tpu.memory_space<vmem>>, %arg17: memref<1x8xf32, #tpu.memory_space<vmem>>, %arg18: memref<1x286x1xf32, #tpu.memory_space<vmem>>, %arg19: memref<286x1xf32, #tpu.memory_space<vmem>>, %arg20: memref<1x286x3xf32, #tpu.memory_space<vmem>>, %arg21: memref<1x286x8xf32, #tpu.memory_space<vmem>>, %arg22: memref<1x286x3xf32, #tpu.memory_space<vmem>>, %arg23: memref<324x16xf32, #tpu.memory_space<vmem>>, %arg24: memref<324x8xf32, #tpu.memory_space<vmem>>) attributes {dimension_semantics = [#tpu.dimension_semantics<parallel>], iteration_bounds = array<i64: 2>, scalar_prefetch = 0 : i64, scratch_operands = 2 : i64, tpu.core_type = #tpu.core_type<tc>, window_params = [{transform_indices = @transform_0, window_bounds = array<i64: 1, 324, 16>}, {transform_indices = @transform_1, window_bounds = array<i64: 1, 1, 32>}, {pipeline_mode = #tpu.pipeline_mode<synchronous>, transform_indices = @transform_2, window_bounds = array<i64: 32, 16>}, {pipeline_mode = #tpu.pipeline_mode<synchronous>, transform_indices = @transform_3, window_bounds = array<i64: 1, 16>}, {pipeline_mode = #tpu.pipeline_mode<synchronous>, transform_indices = @transform_4, window_bounds = array<i64: 32, 8>}, {pipeline_mode = #tpu.pipeline_mode<synchronous>, transform_indices = @transform_5, window_bounds = array<i64: 1, 8>}, {pipeline_mode = #tpu.pipeline_mode<synchronous>, transform_indices = @transform_6, window_bounds = array<i64: 32, 8>}, {pipeline_mode = #tpu.pipeline_mode<synchronous>, transform_indices = @transform_7, window_bounds = array<i64: 1, 8>}, {pipeline_mode = #tpu.pipeline_mode<synchronous>, transform_indices = @transform_8, window_bounds = array<i64: 9, 16, 8>}, {pipeline_mode = #tpu.pipeline_mode<synchronous>, transform_indices = @transform_9, window_bounds = array<i64: 16, 8>}, {pipeline_mode = #tpu.pipeline_mode<synchronous>, transform_indices = @transform_10, window_bounds = array<i64: 9, 8, 8>}, {pipeline_mode = #tpu.pipeline_mode<synchronous>, transform_indices = @transform_11, window_bounds = array<i64: 8, 8>}, {pipeline_mode = #tpu.pipeline_mode<synchronous>, transform_indices = @transform_12, window_bounds = array<i64: 8, 3>}, {pipeline_mode = #tpu.pipeline_mode<synchronous>, transform_indices = @transform_13, window_bounds = array<i64: 1, 8>}, {pipeline_mode = #tpu.pipeline_mode<synchronous>, transform_indices = @transform_14, window_bounds = array<i64: 1, 8>}, {pipeline_mode = #tpu.pipeline_mode<synchronous>, transform_indices = @transform_15, window_bounds = array<i64: 1, 8>}, {pipeline_mode = #tpu.pipeline_mode<synchronous>, transform_indices = @transform_16, window_bounds = array<i64: 1, 8>}, {transform_indices = @transform_17, window_bounds = array<i64: 1, 286, 1>}, {pipeline_mode = #tpu.pipeline_mode<synchronous>, transform_indices = @transform_18, window_bounds = array<i64: 286, 1>}, {transform_indices = @transform_19, window_bounds = array<i64: 1, 286, 3>}, {transform_indices = @transform_20, window_bounds = array<i64: 1, 286, 8>}, {transform_indices = @transform_21, window_bounds = array<i64: 1, 286, 3>}]} {
    %c0 = arith.constant 0 : index
    %c0_0 = arith.constant 0 : index
    %c0_1 = arith.constant 0 : index
    %0 = vector.load %arg2[%c0, %c0_0, %c0_1] : memref<1x1x32xf32, #tpu.memory_space<vmem>>, vector<1x1x32xf32>
    %1 = vector.shape_cast %0 : vector<1x1x32xf32> to vector<1x32xf32>
    %c0_2 = arith.constant 0 : index
    %c0_3 = arith.constant 0 : index
    %2 = vector.load %arg3[%c0_2, %c0_3] : memref<32x16xf32, #tpu.memory_space<vmem>>, vector<32x16xf32>
    %cst = arith.constant dense<0.000000e+00> : vector<1x16xf32>
    %3 = tpu.matmul %1, %2, %cst {dimension_numbers = #tpu.dot_dimension_numbers<[1], [0], [0], [1], [0, 0, 1, 1], [], []>} : vector<1x32xf32>, vector<32x16xf32>, vector<1x16xf32> -> vector<1x16xf32>
    %c0_4 = arith.constant 0 : index
    %c0_5 = arith.constant 0 : index
    %4 = vector.load %arg4[%c0_4, %c0_5] : memref<1x16xf32, #tpu.memory_space<vmem>>, vector<1x16xf32>
    %5 = arith.addf %3, %4 : vector<1x16xf32>
    %cst_6 = arith.constant 1.000000e+00 : f32
    %6 = vector.broadcast %cst_6 : f32 to vector<1x16xf32>
    %7 = arith.addf %5, %6 : vector<1x16xf32>
    %c0_7 = arith.constant 0 : index
    %c0_8 = arith.constant 0 : index
    %8 = vector.load %arg5[%c0_7, %c0_8] : memref<32x8xf32, #tpu.memory_space<vmem>>, vector<32x8xf32>
    %cst_9 = arith.constant dense<0.000000e+00> : vector<1x8xf32>
    %9 = tpu.matmul %1, %8, %cst_9 {dimension_numbers = #tpu.dot_dimension_numbers<[1], [0], [0], [1], [0, 0, 1, 1], [], []>} : vector<1x32xf32>, vector<32x8xf32>, vector<1x8xf32> -> vector<1x8xf32>
    %c0_10 = arith.constant 0 : index
    %c0_11 = arith.constant 0 : index
    %10 = vector.load %arg6[%c0_10, %c0_11] : memref<1x8xf32, #tpu.memory_space<vmem>>, vector<1x8xf32>
    %11 = arith.addf %9, %10 : vector<1x8xf32>
    %cst_12 = arith.constant 1.000000e+00 : f32
    %12 = vector.broadcast %cst_12 : f32 to vector<1x8xf32>
    %13 = arith.addf %11, %12 : vector<1x8xf32>
    %c0_13 = arith.constant 0 : index
    %c0_14 = arith.constant 0 : index
    %14 = vector.load %arg7[%c0_13, %c0_14] : memref<32x8xf32, #tpu.memory_space<vmem>>, vector<32x8xf32>
    %cst_15 = arith.constant dense<0.000000e+00> : vector<1x8xf32>
    %15 = tpu.matmul %1, %14, %cst_15 {dimension_numbers = #tpu.dot_dimension_numbers<[1], [0], [0], [1], [0, 0, 1, 1], [], []>} : vector<1x32xf32>, vector<32x8xf32>, vector<1x8xf32> -> vector<1x8xf32>
    %c0_16 = arith.constant 0 : index
    %c0_17 = arith.constant 0 : index
    %16 = vector.load %arg8[%c0_16, %c0_17] : memref<1x8xf32, #tpu.memory_space<vmem>>, vector<1x8xf32>
    %17 = arith.addf %15, %16 : vector<1x8xf32>
    %cst_18 = arith.constant 1.000000e+00 : f32
    %18 = vector.broadcast %cst_18 : f32 to vector<1x8xf32>
    %19 = arith.addf %17, %18 : vector<1x8xf32>
    %c0_19 = arith.constant 0 : index
    %c0_20 = arith.constant 0 : index
    %c0_21 = arith.constant 0 : index
    %20 = vector.load %arg18[%c0_19, %c0_20, %c0_21] : memref<1x286x1xf32, #tpu.memory_space<vmem>>, vector<1x286x1xf32>
    %21 = vector.shape_cast %20 : vector<1x286x1xf32> to vector<286x1xf32>
    %c0_22 = arith.constant 0 : index
    %c0_23 = arith.constant 0 : index
    %22 = vector.load %arg19[%c0_22, %c0_23] : memref<286x1xf32, #tpu.memory_space<vmem>>, vector<286x1xf32>
    %c0_24 = arith.constant 0 : index
    %c0_25 = arith.constant 0 : index
    %c0_26 = arith.constant 0 : index
    %23 = vector.load %arg1[%c0_24, %c0_25, %c0_26] : memref<1x324x16xf32, #tpu.memory_space<vmem>>, vector<1x324x16xf32>
    %24 = vector.shape_cast %23 : vector<1x324x16xf32> to vector<324x16xf32>
    %25 = vector.broadcast %7 : vector<1x16xf32> to vector<324x16xf32>
    %26 = arith.mulf %24, %25 : vector<324x16xf32>
    %c0_27 = arith.constant 0 : index
    %c0_28 = arith.constant 0 : index
    %27 = vector.load %arg23[%c0_27, %c0_28] : memref<324x16xf32, #tpu.memory_space<vmem>>, vector<324x16xf32>
    tpu.vector_store %arg23[%c0_27, %c0_28], %26 {strides = array<i32>} : memref<324x16xf32, #tpu.memory_space<vmem>>, vector<324x16xf32>,
    %cst_29 = arith.constant 0.000000e+00 : f32
    %28 = vector.broadcast %cst_29 : f32 to vector<286x8xf32>
    %c0_30 = arith.constant 0 : index
    %c0_31 = arith.constant 0 : index
    %29 = vector.load %arg23[%c0_30, %c0_31] : memref<324x16xf32, #tpu.memory_space<vmem>>, vector<286x16xf32>
    %30 = arith.truncf %29 : vector<286x16xf32> to vector<286x16xbf16>
    %c0_32 = arith.constant 0 : index
    %c0_33 = arith.constant 0 : index
    %c0_34 = arith.constant 0 : index
    %31 = vector.load %arg9[%c0_32, %c0_33, %c0_34] : memref<9x16x8xbf16, #tpu.memory_space<vmem>>, vector<1x16x8xbf16>
    %32 = vector.shape_cast %31 : vector<1x16x8xbf16> to vector<16x8xbf16>
    %cst_35 = arith.constant dense<0.000000e+00> : vector<286x8xf32>
    %33 = tpu.matmul %30, %32, %cst_35 {dimension_numbers = #tpu.dot_dimension_numbers<[1], [0], [0], [1], [0, 0, 1, 1], [], []>} : vector<286x16xbf16>, vector<16x8xbf16>, vector<286x8xf32> -> vector<286x8xf32>
    %34 = arith.addf %28, %33 : vector<286x8xf32>
    %c1 = arith.constant 1 : index
    %c0_36 = arith.constant 0 : index
    %35 = vector.load %arg23[%c1, %c0_36] : memref<324x16xf32, #tpu.memory_space<vmem>>, vector<286x16xf32>
    %36 = arith.truncf %35 : vector<286x16xf32> to vector<286x16xbf16>
    %c1_37 = arith.constant 1 : index
    %c0_38 = arith.constant 0 : index
    %c0_39 = arith.constant 0 : index
    %37 = vector.load %arg9[%c1_37, %c0_38, %c0_39] : memref<9x16x8xbf16, #tpu.memory_space<vmem>>, vector<1x16x8xbf16>
    %38 = vector.shape_cast %37 : vector<1x16x8xbf16> to vector<16x8xbf16>
    %cst_40 = arith.constant dense<0.000000e+00> : vector<286x8xf32>
    %39 = tpu.matmul %36, %38, %cst_40 {dimension_numbers = #tpu.dot_dimension_numbers<[1], [0], [0], [1], [0, 0, 1, 1], [], []>} : vector<286x16xbf16>, vector<16x8xbf16>, vector<286x8xf32> -> vector<286x8xf32>
    %40 = arith.addf %34, %39 : vector<286x8xf32>
    %c2 = arith.constant 2 : index
    %c0_41 = arith.constant 0 : index
    %41 = vector.load %arg23[%c2, %c0_41] : memref<324x16xf32, #tpu.memory_space<vmem>>, vector<286x16xf32>
    %42 = arith.truncf %41 : vector<286x16xf32> to vector<286x16xbf16>
    %c2_42 = arith.constant 2 : index
    %c0_43 = arith.constant 0 : index
    %c0_44 = arith.constant 0 : index
    %43 = vector.load %arg9[%c2_42, %c0_43, %c0_44] : memref<9x16x8xbf16, #tpu.memory_space<vmem>>, vector<1x16x8xbf16>
    %44 = vector.shape_cast %43 : vector<1x16x8xbf16> to vector<16x8xbf16>
    %cst_45 = arith.constant dense<0.000000e+00> : vector<286x8xf32>
    %45 = tpu.matmul %42, %44, %cst_45 {dimension_numbers = #tpu.dot_dimension_numbers<[1], [0], [0], [1], [0, 0, 1, 1], [], []>} : vector<286x16xbf16>, vector<16x8xbf16>, vector<286x8xf32> -> vector<286x8xf32>
    %46 = arith.addf %40, %45 : vector<286x8xf32>
    %c18 = arith.constant 18 : index
    %c0_46 = arith.constant 0 : index
    %47 = vector.load %arg23[%c18, %c0_46] : memref<324x16xf32, #tpu.memory_space<vmem>>, vector<286x16xf32>
    %48 = arith.truncf %47 : vector<286x16xf32> to vector<286x16xbf16>
    %c3 = arith.constant 3 : index
    %c0_47 = arith.constant 0 : index
    %c0_48 = arith.constant 0 : index
    %49 = vector.load %arg9[%c3, %c0_47, %c0_48] : memref<9x16x8xbf16, #tpu.memory_space<vmem>>, vector<1x16x8xbf16>
    %50 = vector.shape_cast %49 : vector<1x16x8xbf16> to vector<16x8xbf16>
    %cst_49 = arith.constant dense<0.000000e+00> : vector<286x8xf32>
    %51 = tpu.matmul %48, %50, %cst_49 {dimension_numbers = #tpu.dot_dimension_numbers<[1], [0], [0], [1], [0, 0, 1, 1], [], []>} : vector<286x16xbf16>, vector<16x8xbf16>, vector<286x8xf32> -> vector<286x8xf32>
    %52 = arith.addf %46, %51 : vector<286x8xf32>
    %c19 = arith.constant 19 : index
    %c0_50 = arith.constant 0 : index
    %53 = vector.load %arg23[%c19, %c0_50] : memref<324x16xf32, #tpu.memory_space<vmem>>, vector<286x16xf32>
    %54 = arith.truncf %53 : vector<286x16xf32> to vector<286x16xbf16>
    %c4 = arith.constant 4 : index
    %c0_51 = arith.constant 0 : index
    %c0_52 = arith.constant 0 : index
    %55 = vector.load %arg9[%c4, %c0_51, %c0_52] : memref<9x16x8xbf16, #tpu.memory_space<vmem>>, vector<1x16x8xbf16>
    %56 = vector.shape_cast %55 : vector<1x16x8xbf16> to vector<16x8xbf16>
    %cst_53 = arith.constant dense<0.000000e+00> : vector<286x8xf32>
    %57 = tpu.matmul %54, %56, %cst_53 {dimension_numbers = #tpu.dot_dimension_numbers<[1], [0], [0], [1], [0, 0, 1, 1], [], []>} : vector<286x16xbf16>, vector<16x8xbf16>, vector<286x8xf32> -> vector<286x8xf32>
    %58 = arith.addf %52, %57 : vector<286x8xf32>
    %c20 = arith.constant 20 : index
    %c0_54 = arith.constant 0 : index
    %59 = vector.load %arg23[%c20, %c0_54] : memref<324x16xf32, #tpu.memory_space<vmem>>, vector<286x16xf32>
    %60 = arith.truncf %59 : vector<286x16xf32> to vector<286x16xbf16>
    %c5 = arith.constant 5 : index
    %c0_55 = arith.constant 0 : index
    %c0_56 = arith.constant 0 : index
    %61 = vector.load %arg9[%c5, %c0_55, %c0_56] : memref<9x16x8xbf16, #tpu.memory_space<vmem>>, vector<1x16x8xbf16>
    %62 = vector.shape_cast %61 : vector<1x16x8xbf16> to vector<16x8xbf16>
    %cst_57 = arith.constant dense<0.000000e+00> : vector<286x8xf32>
    %63 = tpu.matmul %60, %62, %cst_57 {dimension_numbers = #tpu.dot_dimension_numbers<[1], [0], [0], [1], [0, 0, 1, 1], [], []>} : vector<286x16xbf16>, vector<16x8xbf16>, vector<286x8xf32> -> vector<286x8xf32>
    %64 = arith.addf %58, %63 : vector<286x8xf32>
    %c36 = arith.constant 36 : index
    %c0_58 = arith.constant 0 : index
    %65 = vector.load %arg23[%c36, %c0_58] : memref<324x16xf32, #tpu.memory_space<vmem>>, vector<286x16xf32>
    %66 = arith.truncf %65 : vector<286x16xf32> to vector<286x16xbf16>
    %c6 = arith.constant 6 : index
    %c0_59 = arith.constant 0 : index
    %c0_60 = arith.constant 0 : index
    %67 = vector.load %arg9[%c6, %c0_59, %c0_60] : memref<9x16x8xbf16, #tpu.memory_space<vmem>>, vector<1x16x8xbf16>
    %68 = vector.shape_cast %67 : vector<1x16x8xbf16> to vector<16x8xbf16>
    %cst_61 = arith.constant dense<0.000000e+00> : vector<286x8xf32>
    %69 = tpu.matmul %66, %68, %cst_61 {dimension_numbers = #tpu.dot_dimension_numbers<[1], [0], [0], [1], [0, 0, 1, 1], [], []>} : vector<286x16xbf16>, vector<16x8xbf16>, vector<286x8xf32> -> vector<286x8xf32>
    %70 = arith.addf %64, %69 : vector<286x8xf32>
    %c37 = arith.constant 37 : index
    %c0_62 = arith.constant 0 : index
    %71 = vector.load %arg23[%c37, %c0_62] : memref<324x16xf32, #tpu.memory_space<vmem>>, vector<286x16xf32>
    %72 = arith.truncf %71 : vector<286x16xf32> to vector<286x16xbf16>
    %c7 = arith.constant 7 : index
    %c0_63 = arith.constant 0 : index
    %c0_64 = arith.constant 0 : index
    %73 = vector.load %arg9[%c7, %c0_63, %c0_64] : memref<9x16x8xbf16, #tpu.memory_space<vmem>>, vector<1x16x8xbf16>
    %74 = vector.shape_cast %73 : vector<1x16x8xbf16> to vector<16x8xbf16>
    %cst_65 = arith.constant dense<0.000000e+00> : vector<286x8xf32>
    %75 = tpu.matmul %72, %74, %cst_65 {dimension_numbers = #tpu.dot_dimension_numbers<[1], [0], [0], [1], [0, 0, 1, 1], [], []>} : vector<286x16xbf16>, vector<16x8xbf16>, vector<286x8xf32> -> vector<286x8xf32>
    %76 = arith.addf %70, %75 : vector<286x8xf32>
    %c38 = arith.constant 38 : index
    %c0_66 = arith.constant 0 : index
    %77 = vector.load %arg23[%c38, %c0_66] : memref<324x16xf32, #tpu.memory_space<vmem>>, vector<286x16xf32>
    %78 = arith.truncf %77 : vector<286x16xf32> to vector<286x16xbf16>
    %c8 = arith.constant 8 : index
    %c0_67 = arith.constant 0 : index
    %c0_68 = arith.constant 0 : index
    %79 = vector.load %arg9[%c8, %c0_67, %c0_68] : memref<9x16x8xbf16, #tpu.memory_space<vmem>>, vector<1x16x8xbf16>
    %80 = vector.shape_cast %79 : vector<1x16x8xbf16> to vector<16x8xbf16>
    %cst_69 = arith.constant dense<0.000000e+00> : vector<286x8xf32>
    %81 = tpu.matmul %78, %80, %cst_69 {dimension_numbers = #tpu.dot_dimension_numbers<[1], [0], [0], [1], [0, 0, 1, 1], [], []>} : vector<286x16xbf16>, vector<16x8xbf16>, vector<286x8xf32> -> vector<286x8xf32>
    %82 = arith.addf %76, %81 : vector<286x8xf32>
    %83 = arith.mulf %7, %7 : vector<1x16xf32>
    %c0_70 = arith.constant 0 : index
    %c0_71 = arith.constant 0 : index
    %84 = vector.load %arg10[%c0_70, %c0_71] : memref<16x8xf32, #tpu.memory_space<vmem>>, vector<16x8xf32>
    %cst_72 = arith.constant dense<0.000000e+00> : vector<1x8xf32>
    %85 = tpu.matmul %83, %84, %cst_72 {dimension_numbers = #tpu.dot_dimension_numbers<[1], [0], [0], [1], [0, 0, 1, 1], [], []>} : vector<1x16xf32>, vector<16x8xf32>, vector<1x8xf32> -> vector<1x8xf32>
    %cst_73 = arith.constant 9.99999993E-9 : f32
    %86 = vector.broadcast %cst_73 : f32 to vector<1x8xf32>
    %87 = arith.addf %85, %86 : vector<1x8xf32>
    %88 = math.rsqrt %87 : vector<1x8xf32>
    %89 = vector.broadcast %88 : vector<1x8xf32> to vector<286x8xf32>
    %90 = arith.mulf %82, %89 : vector<286x8xf32>
    %c0_74 = arith.constant 0 : index
    %c0_75 = arith.constant 0 : index
    %91 = vector.load %arg14[%c0_74, %c0_75] : memref<1x8xf32, #tpu.memory_space<vmem>>, vector<1x8xf32>
    %92 = vector.broadcast %21 : vector<286x1xf32> to vector<286x8xf32>
    %93 = vector.broadcast %91 : vector<1x8xf32> to vector<286x8xf32>
    %94 = arith.mulf %92, %93 : vector<286x8xf32>
    %95 = arith.addf %90, %94 : vector<286x8xf32>
    %c0_76 = arith.constant 0 : index
    %c0_77 = arith.constant 0 : index
    %96 = vector.load %arg15[%c0_76, %c0_77] : memref<1x8xf32, #tpu.memory_space<vmem>>, vector<1x8xf32>
    %97 = vector.broadcast %96 : vector<1x8xf32> to vector<286x8xf32>
    %98 = arith.addf %95, %97 : vector<286x8xf32>
    %cst_78 = arith.constant 0.000000e+00 : f32
    %99 = vector.broadcast %cst_78 : f32 to vector<286x8xf32>
    %100 = arith.cmpf oge, %98, %99 : vector<286x8xf32>
    %cst_79 = arith.constant 2.000000e-01 : f32
    %101 = vector.broadcast %cst_79 : f32 to vector<286x8xf32>
    %102 = arith.mulf %98, %101 : vector<286x8xf32>
    %103 = arith.select %100, %98, %102 : vector<286x8xi1>, vector<286x8xf32>
    %104 = vector.broadcast %22 : vector<286x1xf32> to vector<286x8xf32>
    %105 = arith.mulf %103, %104 : vector<286x8xf32>
    %cst_80 = arith.constant 0.000000e+00 : f32
    %106 = vector.broadcast %cst_80 : f32 to vector<324x8xf32>
    %c0_81 = arith.constant 0 : index
    %c0_82 = arith.constant 0 : index
    %107 = vector.load %arg24[%c0_81, %c0_82] : memref<324x8xf32, #tpu.memory_space<vmem>>, vector<324x8xf32>
    tpu.vector_store %arg24[%c0_81, %c0_82], %106 {strides = array<i32>} : memref<324x8xf32, #tpu.memory_space<vmem>>, vector<324x8xf32>,
    %108 = vector.broadcast %13 : vector<1x8xf32> to vector<286x8xf32>
    %109 = arith.mulf %105, %108 : vector<286x8xf32>
    %c19_83 = arith.constant 19 : index
    %c0_84 = arith.constant 0 : index
    %110 = vector.load %arg24[%c19_83, %c0_84] : memref<324x8xf32, #tpu.memory_space<vmem>>, vector<286x8xf32>
    tpu.vector_store %arg24[%c19_83, %c0_84], %109 {strides = array<i32>} : memref<324x8xf32, #tpu.memory_space<vmem>>, vector<286x8xf32>,
    %cst_85 = arith.constant 0.000000e+00 : f32
    %111 = vector.broadcast %cst_85 : f32 to vector<286x8xf32>
    %c0_86 = arith.constant 0 : index
    %c0_87 = arith.constant 0 : index
    %112 = vector.load %arg24[%c0_86, %c0_87] : memref<324x8xf32, #tpu.memory_space<vmem>>, vector<286x8xf32>
    %113 = arith.truncf %112 : vector<286x8xf32> to vector<286x8xbf16>
    %c0_88 = arith.constant 0 : index
    %c0_89 = arith.constant 0 : index
    %c0_90 = arith.constant 0 : index
    %114 = vector.load %arg11[%c0_88, %c0_89, %c0_90] : memref<9x8x8xbf16, #tpu.memory_space<vmem>>, vector<1x8x8xbf16>
    %115 = vector.shape_cast %114 : vector<1x8x8xbf16> to vector<8x8xbf16>
    %cst_91 = arith.constant dense<0.000000e+00> : vector<286x8xf32>
    %116 = tpu.matmul %113, %115, %cst_91 {dimension_numbers = #tpu.dot_dimension_numbers<[1], [0], [0], [1], [0, 0, 1, 1], [], []>} : vector<286x8xbf16>, vector<8x8xbf16>, vector<286x8xf32> -> vector<286x8xf32>
    %117 = arith.addf %111, %116 : vector<286x8xf32>
    %c1_92 = arith.constant 1 : index
    %c0_93 = arith.constant 0 : index
    %118 = vector.load %arg24[%c1_92, %c0_93] : memref<324x8xf32, #tpu.memory_space<vmem>>, vector<286x8xf32>
    %119 = arith.truncf %118 : vector<286x8xf32> to vector<286x8xbf16>
    %c1_94 = arith.constant 1 : index
    %c0_95 = arith.constant 0 : index
    %c0_96 = arith.constant 0 : index
    %120 = vector.load %arg11[%c1_94, %c0_95, %c0_96] : memref<9x8x8xbf16, #tpu.memory_space<vmem>>, vector<1x8x8xbf16>
    %121 = vector.shape_cast %120 : vector<1x8x8xbf16> to vector<8x8xbf16>
    %cst_97 = arith.constant dense<0.000000e+00> : vector<286x8xf32>
    %122 = tpu.matmul %119, %121, %cst_97 {dimension_numbers = #tpu.dot_dimension_numbers<[1], [0], [0], [1], [0, 0, 1, 1], [], []>} : vector<286x8xbf16>, vector<8x8xbf16>, vector<286x8xf32> -> vector<286x8xf32>
    %123 = arith.addf %117, %122 : vector<286x8xf32>
    %c2_98 = arith.constant 2 : index
    %c0_99 = arith.constant 0 : index
    %124 = vector.load %arg24[%c2_98, %c0_99] : memref<324x8xf32, #tpu.memory_space<vmem>>, vector<286x8xf32>
    %125 = arith.truncf %124 : vector<286x8xf32> to vector<286x8xbf16>
    %c2_100 = arith.constant 2 : index
    %c0_101 = arith.constant 0 : index
    %c0_102 = arith.constant 0 : index
    %126 = vector.load %arg11[%c2_100, %c0_101, %c0_102] : memref<9x8x8xbf16, #tpu.memory_space<vmem>>, vector<1x8x8xbf16>
    %127 = vector.shape_cast %126 : vector<1x8x8xbf16> to vector<8x8xbf16>
    %cst_103 = arith.constant dense<0.000000e+00> : vector<286x8xf32>
    %128 = tpu.matmul %125, %127, %cst_103 {dimension_numbers = #tpu.dot_dimension_numbers<[1], [0], [0], [1], [0, 0, 1, 1], [], []>} : vector<286x8xbf16>, vector<8x8xbf16>, vector<286x8xf32> -> vector<286x8xf32>
    %129 = arith.addf %123, %128 : vector<286x8xf32>
    %c18_104 = arith.constant 18 : index
    %c0_105 = arith.constant 0 : index
    %130 = vector.load %arg24[%c18_104, %c0_105] : memref<324x8xf32, #tpu.memory_space<vmem>>, vector<286x8xf32>
    %131 = arith.truncf %130 : vector<286x8xf32> to vector<286x8xbf16>
    %c3_106 = arith.constant 3 : index
    %c0_107 = arith.constant 0 : index
    %c0_108 = arith.constant 0 : index
    %132 = vector.load %arg11[%c3_106, %c0_107, %c0_108] : memref<9x8x8xbf16, #tpu.memory_space<vmem>>, vector<1x8x8xbf16>
    %133 = vector.shape_cast %132 : vector<1x8x8xbf16> to vector<8x8xbf16>
    %cst_109 = arith.constant dense<0.000000e+00> : vector<286x8xf32>
    %134 = tpu.matmul %131, %133, %cst_109 {dimension_numbers = #tpu.dot_dimension_numbers<[1], [0], [0], [1], [0, 0, 1, 1], [], []>} : vector<286x8xbf16>, vector<8x8xbf16>, vector<286x8xf32> -> vector<286x8xf32>
    %135 = arith.addf %129, %134 : vector<286x8xf32>
    %c19_110 = arith.constant 19 : index
    %c0_111 = arith.constant 0 : index
    %136 = vector.load %arg24[%c19_110, %c0_111] : memref<324x8xf32, #tpu.memory_space<vmem>>, vector<286x8xf32>
    %137 = arith.truncf %136 : vector<286x8xf32> to vector<286x8xbf16>
    %c4_112 = arith.constant 4 : index
    %c0_113 = arith.constant 0 : index
    %c0_114 = arith.constant 0 : index
    %138 = vector.load %arg11[%c4_112, %c0_113, %c0_114] : memref<9x8x8xbf16, #tpu.memory_space<vmem>>, vector<1x8x8xbf16>
    %139 = vector.shape_cast %138 : vector<1x8x8xbf16> to vector<8x8xbf16>
    %cst_115 = arith.constant dense<0.000000e+00> : vector<286x8xf32>
    %140 = tpu.matmul %137, %139, %cst_115 {dimension_numbers = #tpu.dot_dimension_numbers<[1], [0], [0], [1], [0, 0, 1, 1], [], []>} : vector<286x8xbf16>, vector<8x8xbf16>, vector<286x8xf32> -> vector<286x8xf32>
    %141 = arith.addf %135, %140 : vector<286x8xf32>
    %c20_116 = arith.constant 20 : index
    %c0_117 = arith.constant 0 : index
    %142 = vector.load %arg24[%c20_116, %c0_117] : memref<324x8xf32, #tpu.memory_space<vmem>>, vector<286x8xf32>
    %143 = arith.truncf %142 : vector<286x8xf32> to vector<286x8xbf16>
    %c5_118 = arith.constant 5 : index
    %c0_119 = arith.constant 0 : index
    %c0_120 = arith.constant 0 : index
    %144 = vector.load %arg11[%c5_118, %c0_119, %c0_120] : memref<9x8x8xbf16, #tpu.memory_space<vmem>>, vector<1x8x8xbf16>
    %145 = vector.shape_cast %144 : vector<1x8x8xbf16> to vector<8x8xbf16>
    %cst_121 = arith.constant dense<0.000000e+00> : vector<286x8xf32>
    %146 = tpu.matmul %143, %145, %cst_121 {dimension_numbers = #tpu.dot_dimension_numbers<[1], [0], [0], [1], [0, 0, 1, 1], [], []>} : vector<286x8xbf16>, vector<8x8xbf16>, vector<286x8xf32> -> vector<286x8xf32>
    %147 = arith.addf %141, %146 : vector<286x8xf32>
    %c36_122 = arith.constant 36 : index
    %c0_123 = arith.constant 0 : index
    %148 = vector.load %arg24[%c36_122, %c0_123] : memref<324x8xf32, #tpu.memory_space<vmem>>, vector<286x8xf32>
    %149 = arith.truncf %148 : vector<286x8xf32> to vector<286x8xbf16>
    %c6_124 = arith.constant 6 : index
    %c0_125 = arith.constant 0 : index
    %c0_126 = arith.constant 0 : index
    %150 = vector.load %arg11[%c6_124, %c0_125, %c0_126] : memref<9x8x8xbf16, #tpu.memory_space<vmem>>, vector<1x8x8xbf16>
    %151 = vector.shape_cast %150 : vector<1x8x8xbf16> to vector<8x8xbf16>
    %cst_127 = arith.constant dense<0.000000e+00> : vector<286x8xf32>
    %152 = tpu.matmul %149, %151, %cst_127 {dimension_numbers = #tpu.dot_dimension_numbers<[1], [0], [0], [1], [0, 0, 1, 1], [], []>} : vector<286x8xbf16>, vector<8x8xbf16>, vector<286x8xf32> -> vector<286x8xf32>
    %153 = arith.addf %147, %152 : vector<286x8xf32>
    %c37_128 = arith.constant 37 : index
    %c0_129 = arith.constant 0 : index
    %154 = vector.load %arg24[%c37_128, %c0_129] : memref<324x8xf32, #tpu.memory_space<vmem>>, vector<286x8xf32>
    %155 = arith.truncf %154 : vector<286x8xf32> to vector<286x8xbf16>
    %c7_130 = arith.constant 7 : index
    %c0_131 = arith.constant 0 : index
    %c0_132 = arith.constant 0 : index
    %156 = vector.load %arg11[%c7_130, %c0_131, %c0_132] : memref<9x8x8xbf16, #tpu.memory_space<vmem>>, vector<1x8x8xbf16>
    %157 = vector.shape_cast %156 : vector<1x8x8xbf16> to vector<8x8xbf16>
    %cst_133 = arith.constant dense<0.000000e+00> : vector<286x8xf32>
    %158 = tpu.matmul %155, %157, %cst_133 {dimension_numbers = #tpu.dot_dimension_numbers<[1], [0], [0], [1], [0, 0, 1, 1], [], []>} : vector<286x8xbf16>, vector<8x8xbf16>, vector<286x8xf32> -> vector<286x8xf32>
    %159 = arith.addf %153, %158 : vector<286x8xf32>
    %c38_134 = arith.constant 38 : index
    %c0_135 = arith.constant 0 : index
    %160 = vector.load %arg24[%c38_134, %c0_135] : memref<324x8xf32, #tpu.memory_space<vmem>>, vector<286x8xf32>
    %161 = arith.truncf %160 : vector<286x8xf32> to vector<286x8xbf16>
    %c8_136 = arith.constant 8 : index
    %c0_137 = arith.constant 0 : index
    %c0_138 = arith.constant 0 : index
    %162 = vector.load %arg11[%c8_136, %c0_137, %c0_138] : memref<9x8x8xbf16, #tpu.memory_space<vmem>>, vector<1x8x8xbf16>
    %163 = vector.shape_cast %162 : vector<1x8x8xbf16> to vector<8x8xbf16>
    %cst_139 = arith.constant dense<0.000000e+00> : vector<286x8xf32>
    %164 = tpu.matmul %161, %163, %cst_139 {dimension_numbers = #tpu.dot_dimension_numbers<[1], [0], [0], [1], [0, 0, 1, 1], [], []>} : vector<286x8xbf16>, vector<8x8xbf16>, vector<286x8xf32> -> vector<286x8xf32>
    %165 = arith.addf %159, %164 : vector<286x8xf32>
    %166 = arith.mulf %13, %13 : vector<1x8xf32>
    %c0_140 = arith.constant 0 : index
    %c0_141 = arith.constant 0 : index
    %167 = vector.load %arg12[%c0_140, %c0_141] : memref<8x8xf32, #tpu.memory_space<vmem>>, vector<8x8xf32>
    %cst_142 = arith.constant dense<0.000000e+00> : vector<1x8xf32>
    %168 = tpu.matmul %166, %167, %cst_142 {dimension_numbers = #tpu.dot_dimension_numbers<[1], [0], [0], [1], [0, 0, 1, 1], [], []>} : vector<1x8xf32>, vector<8x8xf32>, vector<1x8xf32> -> vector<1x8xf32>
    %cst_143 = arith.constant 9.99999993E-9 : f32
    %169 = vector.broadcast %cst_143 : f32 to vector<1x8xf32>
    %170 = arith.addf %168, %169 : vector<1x8xf32>
    %171 = math.rsqrt %170 : vector<1x8xf32>
    %172 = vector.broadcast %171 : vector<1x8xf32> to vector<286x8xf32>
    %173 = arith.mulf %165, %172 : vector<286x8xf32>
    %c0_144 = arith.constant 0 : index
    %c0_145 = arith.constant 0 : index
    %174 = vector.load %arg16[%c0_144, %c0_145] : memref<1x8xf32, #tpu.memory_space<vmem>>, vector<1x8xf32>
    %175 = vector.broadcast %21 : vector<286x1xf32> to vector<286x8xf32>
    %176 = vector.broadcast %174 : vector<1x8xf32> to vector<286x8xf32>
    %177 = arith.mulf %175, %176 : vector<286x8xf32>
    %178 = arith.addf %173, %177 : vector<286x8xf32>
    %c0_146 = arith.constant 0 : index
    %c0_147 = arith.constant 0 : index
    %179 = vector.load %arg17[%c0_146, %c0_147] : memref<1x8xf32, #tpu.memory_space<vmem>>, vector<1x8xf32>
    %180 = vector.broadcast %179 : vector<1x8xf32> to vector<286x8xf32>
    %181 = arith.addf %178, %180 : vector<286x8xf32>
    %cst_148 = arith.constant 0.000000e+00 : f32
    %182 = vector.broadcast %cst_148 : f32 to vector<286x8xf32>
    %183 = arith.cmpf oge, %181, %182 : vector<286x8xf32>
    %cst_149 = arith.constant 2.000000e-01 : f32
    %184 = vector.broadcast %cst_149 : f32 to vector<286x8xf32>
    %185 = arith.mulf %181, %184 : vector<286x8xf32>
    %186 = arith.select %183, %181, %185 : vector<286x8xi1>, vector<286x8xf32>
    %187 = vector.broadcast %22 : vector<286x1xf32> to vector<286x8xf32>
    %188 = arith.mulf %186, %187 : vector<286x8xf32>
    %c0_150 = arith.constant 0 : index
    %c0_151 = arith.constant 0 : index
    %c0_152 = arith.constant 0 : index
    %189 = vector.load %arg21[%c0_150, %c0_151, %c0_152] : memref<1x286x8xf32, #tpu.memory_space<vmem>>, vector<1x286x8xf32>
    %190 = vector.shape_cast %189 : vector<1x286x8xf32> to vector<286x8xf32>
    %191 = vector.shape_cast %188 : vector<286x8xf32> to vector<1x286x8xf32>
    tpu.vector_store %arg21[%c0_150, %c0_151, %c0_152], %191 {strides = array<i32>} : memref<1x286x8xf32, #tpu.memory_space<vmem>>, vector<1x286x8xf32>,
    %192 = vector.broadcast %19 : vector<1x8xf32> to vector<286x8xf32>
    %193 = arith.mulf %188, %192 : vector<286x8xf32>
    %194 = arith.truncf %193 : vector<286x8xf32> to vector<286x8xbf16>
    %c0_153 = arith.constant 0 : index
    %c0_154 = arith.constant 0 : index
    %195 = vector.load %arg13[%c0_153, %c0_154] : memref<8x3xbf16, #tpu.memory_space<vmem>>, vector<8x3xbf16>
    %cst_155 = arith.constant dense<0.000000e+00> : vector<286x3xf32>
    %196 = tpu.matmul %194, %195, %cst_155 {dimension_numbers = #tpu.dot_dimension_numbers<[1], [0], [0], [1], [0, 0, 1, 1], [], []>} : vector<286x8xbf16>, vector<8x3xbf16>, vector<286x3xf32> -> vector<286x3xf32>
    %c0_156 = arith.constant 0 : index
    %c0_157 = arith.constant 0 : index
    %c0_158 = arith.constant 0 : index
    %197 = vector.load %arg20[%c0_156, %c0_157, %c0_158] : memref<1x286x3xf32, #tpu.memory_space<vmem>>, vector<1x286x3xf32>
    %198 = vector.shape_cast %197 : vector<1x286x3xf32> to vector<286x3xf32>
    %199 = arith.addf %196, %198 : vector<286x3xf32>
    %c0_159 = arith.constant 0 : index
    %c0_160 = arith.constant 0 : index
    %c0_161 = arith.constant 0 : index
    %200 = vector.load %arg22[%c0_159, %c0_160, %c0_161] : memref<1x286x3xf32, #tpu.memory_space<vmem>>, vector<1x286x3xf32>
    %201 = vector.shape_cast %200 : vector<1x286x3xf32> to vector<286x3xf32>
    %202 = vector.shape_cast %199 : vector<286x3xf32> to vector<1x286x3xf32>
    tpu.vector_store %arg22[%c0_159, %c0_160, %c0_161], %202 {strides = array<i32>} : memref<1x286x3xf32, #tpu.memory_space<vmem>>, vector<1x286x3xf32>,
    return
  }
  func.func @transform_0(%arg0: i32) -> (i32, i32, i32) {
    %c0_i32 = arith.constant 0 : i32
    %c0_i32_0 = arith.constant 0 : i32
    %c0_i32_1 = arith.constant 0 : i32
    return %arg0, %c0_i32, %c0_i32_0 : i32, i32, i32
  }
  func.func @transform_1(%arg0: i32) -> (i32, i32, i32) {
    %c0_i32 = arith.constant 0 : i32
    %c0_i32_0 = arith.constant 0 : i32
    %c0_i32_1 = arith.constant 0 : i32
    return %arg0, %c0_i32, %c0_i32_0 : i32, i32, i32
  }
  func.func @transform_2(%arg0: i32) -> (i32, i32) {
    %c0_i32 = arith.constant 0 : i32
    %c0_i32_0 = arith.constant 0 : i32
    %c0_i32_1 = arith.constant 0 : i32
    return %c0_i32, %c0_i32_0 : i32, i32
  }
  func.func @transform_3(%arg0: i32) -> (i32, i32) {
    %c0_i32 = arith.constant 0 : i32
    %c0_i32_0 = arith.constant 0 : i32
    %c0_i32_1 = arith.constant 0 : i32
    return %c0_i32, %c0_i32_0 : i32, i32
  }
  func.func @transform_4(%arg0: i32) -> (i32, i32) {
    %c0_i32 = arith.constant 0 : i32
    %c0_i32_0 = arith.constant 0 : i32
    %c0_i32_1 = arith.constant 0 : i32
    return %c0_i32, %c0_i32_0 : i32, i32
  }
  func.func @transform_5(%arg0: i32) -> (i32, i32) {
    %c0_i32 = arith.constant 0 : i32
    %c0_i32_0 = arith.constant 0 : i32
    %c0_i32_1 = arith.constant 0 : i32
    return %c0_i32, %c0_i32_0 : i32, i32
  }
  func.func @transform_6(%arg0: i32) -> (i32, i32) {
    %c0_i32 = arith.constant 0 : i32
    %c0_i32_0 = arith.constant 0 : i32
    %c0_i32_1 = arith.constant 0 : i32
    return %c0_i32, %c0_i32_0 : i32, i32
  }
  func.func @transform_7(%arg0: i32) -> (i32, i32) {
    %c0_i32 = arith.constant 0 : i32
    %c0_i32_0 = arith.constant 0 : i32
    %c0_i32_1 = arith.constant 0 : i32
    return %c0_i32, %c0_i32_0 : i32, i32
  }
  func.func @transform_8(%arg0: i32) -> (i32, i32, i32) {
    %c0_i32 = arith.constant 0 : i32
    %c0_i32_0 = arith.constant 0 : i32
    %c0_i32_1 = arith.constant 0 : i32
    %c0_i32_2 = arith.constant 0 : i32
    return %c0_i32, %c0_i32_0, %c0_i32_1 : i32, i32, i32
  }
  func.func @transform_9(%arg0: i32) -> (i32, i32) {
    %c0_i32 = arith.constant 0 : i32
    %c0_i32_0 = arith.constant 0 : i32
    %c0_i32_1 = arith.constant 0 : i32
    return %c0_i32, %c0_i32_0 : i32, i32
  }
  func.func @transform_10(%arg0: i32) -> (i32, i32, i32) {
    %c0_i32 = arith.constant 0 : i32
    %c0_i32_0 = arith.constant 0 : i32
    %c0_i32_1 = arith.constant 0 : i32
    %c0_i32_2 = arith.constant 0 : i32
    return %c0_i32, %c0_i32_0, %c0_i32_1 : i32, i32, i32
  }
  func.func @transform_11(%arg0: i32) -> (i32, i32) {
    %c0_i32 = arith.constant 0 : i32
    %c0_i32_0 = arith.constant 0 : i32
    %c0_i32_1 = arith.constant 0 : i32
    return %c0_i32, %c0_i32_0 : i32, i32
  }
  func.func @transform_12(%arg0: i32) -> (i32, i32) {
    %c0_i32 = arith.constant 0 : i32
    %c0_i32_0 = arith.constant 0 : i32
    %c0_i32_1 = arith.constant 0 : i32
    return %c0_i32, %c0_i32_0 : i32, i32
  }
  func.func @transform_13(%arg0: i32) -> (i32, i32) {
    %c0_i32 = arith.constant 0 : i32
    %c0_i32_0 = arith.constant 0 : i32
    %c0_i32_1 = arith.constant 0 : i32
    return %c0_i32, %c0_i32_0 : i32, i32
  }
  func.func @transform_14(%arg0: i32) -> (i32, i32) {
    %c0_i32 = arith.constant 0 : i32
    %c0_i32_0 = arith.constant 0 : i32
    %c0_i32_1 = arith.constant 0 : i32
    return %c0_i32, %c0_i32_0 : i32, i32
  }
  func.func @transform_15(%arg0: i32) -> (i32, i32) {
    %c0_i32 = arith.constant 0 : i32
    %c0_i32_0 = arith.constant 0 : i32
    %c0_i32_1 = arith.constant 0 : i32
    return %c0_i32, %c0_i32_0 : i32, i32
  }
  func.func @transform_16(%arg0: i32) -> (i32, i32) {
    %c0_i32 = arith.constant 0 : i32
    %c0_i32_0 = arith.constant 0 : i32
    %c0_i32_1 = arith.constant 0 : i32
    return %c0_i32, %c0_i32_0 : i32, i32
  }
  func.func @transform_17(%arg0: i32) -> (i32, i32, i32) {
    %c0_i32 = arith.constant 0 : i32
    %c0_i32_0 = arith.constant 0 : i32
    %c0_i32_1 = arith.constant 0 : i32
    return %arg0, %c0_i32, %c0_i32_0 : i32, i32, i32
  }
  func.func @transform_18(%arg0: i32) -> (i32, i32) {
    %c0_i32 = arith.constant 0 : i32
    %c0_i32_0 = arith.constant 0 : i32
    %c0_i32_1 = arith.constant 0 : i32
    return %c0_i32, %c0_i32_0 : i32, i32
  }
  func.func @transform_19(%arg0: i32) -> (i32, i32, i32) {
    %c0_i32 = arith.constant 0 : i32
    %c0_i32_0 = arith.constant 0 : i32
    %c0_i32_1 = arith.constant 0 : i32
    return %arg0, %c0_i32, %c0_i32_0 : i32, i32, i32
  }
  func.func @transform_20(%arg0: i32) -> (i32, i32, i32) {
    %c0_i32 = arith.constant 0 : i32
    %c0_i32_0 = arith.constant 0 : i32
    %c0_i32_1 = arith.constant 0 : i32
    return %arg0, %c0_i32, %c0_i32_0 : i32, i32, i32
  }
  func.func @transform_21(%arg0: i32) -> (i32, i32, i32) {
    %c0_i32 = arith.constant 0 : i32
    %c0_i32_0 = arith.constant 0 : i32
    %c0_i32_1 = arith.constant 0 : i32
    return %arg0, %c0_i32, %c0_i32_0 : i32, i32, i32
  }
}

</mosaic_0001>

<bundles_post_ra>
// kernel: _lambda_.4
= control target key start
LH: loop header
LB: loop body
LE: loop exit
PB: predicated region body
PF: predicated region fallthrough
CT: control target
= control target key end

     0   :  { %s1256_s15 = smov 0   ;;  %s1378_s0 = inlined_call_operand.vmem [shape: f32[2,36,32], index: 0, kind: input, shape index: {}]   ;;  %s1379_s1 = inlined_call_operand.vmem [shape: bf16[9,32,32], index: 1, kind: input, shape index: {}]   ;;  %s1380_s2 = inlined_call_operand.vmem [shape: f32[1,32], index: 2, kind: input, shape index: {}]   ;;  %s1381_s3 = inlined_call_operand.vmem [shape: f32[22,1], index: 3, kind: input, shape index: {}]   ;;  %s1382_s4 = inlined_call_operand.vmem [shape: f32[2,22,32], index: 4, kind: output, shape index: {}]  }
   0x1 LB: > { %s1005_s16 = sadd.s32 4294967295, %s1228_s15   ;;  %p1009_p0 = scmp.ge.s32.totalorder %s1228_s15, 1  ;;  %s1228_s15 = sphi %s1256_s15, %s14_s15  }
   0x2   : > { %p162_p1 = scmp.lt.s32.totalorder %s1228_s15, 3 }
   0x4   : > { %p163_p2 = pnand %p1009_p0, %p162_p1 }
   0x5   : > { %v1204_v0 = vld [vmem:[%s1379_s1 + $0x10] sm:$0xff] (!%p163_p2)   ;;  %p188_p3 = scmp.lt.s32.totalorder (!%p163_p2), %s1005_s16, 1  ;;  %v1205_v1 = vld [vmem:[%s1379_s1] sm:$0xff] (!%p163_p2)   ;;  %v1206_v2 = vld [vmem:[%s1379_s1 + $0x18] sm:$0xff] (!%p163_p2)   ;;  %vm204_vm0 = vcmask (!%p163_p2), 261120   ;;  %v1230_v6 = vmov (!%p163_p2), 0  }
   0x6   : > { %166 = sbr.rel (%p163_p2) target bundleno = 284 (0x11c), region = 36  ;;  %1119 = vmatprep.subr.bf16.mxu0 (!%p163_p2), %v1204_v0  ;;  %1127 = vmatprep.subr.bf16.mxu1 (!%p163_p2), %v1205_v1  ;;  %v1207_v3 = vld [vmem:[%s1379_s1 + $0x8] sm:$0xff] (!%p163_p2)   ;;  %v1208_v4 = vld [vmem:[%s1379_s1 + $0x20] sm:$0xff] (!%p163_p2)   ;;  %v1209_v5 = vld [vmem:[%s1379_s1 + $0x30] sm:$0xff] (!%p163_p2)   ;;  %vm209_vm1 = vcmask (!%p163_p2), 257024   ;;  %vm948_vm2 = vcmask (!%p163_p2), 259072  }
   0x7   : > { %1120 = vmatpush3.bf16.msra.mxu0 (!%p163_p2), %v1204_v0  ;;  %1128 = vmatpush3.bf16.msra.mxu1 (!%p163_p2), %v1205_v1  ;;  %v1210_v21 = vld [vmem:[%s1379_s1 + $0x28] sm:$0xff] (!%p163_p2)   ;;  %v1211_v24 = vld [vmem:[%s1379_s1 + $0x38] sm:$0xff] (!%p163_p2)   ;;  %v1212_v29 = vld [vmem:[%s1379_s1 + $0x40] sm:$0xff] (!%p163_p2)  }
   0x8   : > { %1121 = vmatprep.subr.bf16.mxu0 (!%p163_p2), %v1206_v2  ;;  %1129 = vmatprep.subr.bf16.mxu1 (!%p163_p2), %v1207_v3  ;;  %v1213_v32 = vld [vmem:[%s1379_s1 + $0x50] sm:$0xff] (!%p163_p2)   ;;  %v1214_v39 = vld [vmem:[%s1379_s1 + $0x48] sm:$0xff] (!%p163_p2)   ;;  %v1215_v40 = vld [vmem:[%s1379_s1 + $0x58] sm:$0xff] (!%p163_p2)  }
   0x9   : > { %1202 = vset.pattern.permute.xlu0 (!%p163_p2), %v1230_v6  ;;  %1203 = vset.pattern.permute.xlu1 (!%p163_p2), %v1230_v6  ;;  %v925_v44 = vld [vmem:[%s1381_s3] sm:$0xff] (!%p163_p2)  ;;  %v927_v47 = vld [vmem:[%s1381_s3 + $0x10] sm:$0x3f] (!%p163_p2)  ;;  %v926_v55 = vld [vmem:[%s1381_s3 + $0x8] sm:$0xff] (!%p163_p2) }
   0xa   : > { %v1216_v45 = vld [vmem:[%s1379_s1 + $0x60] sm:$0xff] (!%p163_p2)   ;;  %v1217_v48 = vld [vmem:[%s1379_s1 + $0x70] sm:$0xff] (!%p163_p2)   ;;  %930 = vperm.xlu0 (!%p163_p2), %1202, %v925_v44   ;;  %940 = vperm.xlu1 (!%p163_p2), %1203, %v927_v47   ;;  %v1218_v56 = vld [vmem:[%s1379_s1 + $0x68] sm:$0xff] (!%p163_p2)  }
   0xb   : > { %1122 = vmatpush3.bf16.msra.mxu0 (!%p163_p2), %v1206_v2  ;;  %1130 = vmatpush3.bf16.msra.mxu1 (!%p163_p2), %v1207_v3  ;;  %v1219_v57 = vld [vmem:[%s1379_s1 + $0x78] sm:$0xff] (!%p163_p2)   ;;  %v1220_v61 = vld [vmem:[%s1379_s1 + $0x80] sm:$0xff] (!%p163_p2)   ;;  %v1221_v2 = vld [vmem:[%s1379_s1 + $0x88] sm:$0xff] (!%p163_p2)  }
   0xc   : > { %1135 = vmatprep.subr.bf16.mxu0 (!%p163_p2), %v1208_v4  ;;  %1143 = vmatprep.subr.bf16.mxu1 (!%p163_p2), %v1209_v5 }
   0xd   : > { %s1384_s16 = smov (!%p188_p3, %s1005_s16), 1 }
   0xe   : > { %s1191_s25 = smul.u32 40, %s1384_s16  ;;  %935 = vperm.xlu0 %1202, %v926_v55  }
   0xf   : > { %s1192_s17 = smul.u32 24, %s1384_s16 }
  0x10   : > { %s1288_s6 = scalar_lea.vmem %s1378_s0, %s1191_s25 }
  0x11   : > { %v199_v7 = vld [vmem:[%s1288_s6] sm:$0xff]  ;;  %v200_v8 = vld [vmem:[%s1288_s6 + $0x8] sm:$0xff]  ;;  %v201_v9 = vld [vmem:[%s1288_s6 + $0x10] sm:$0xff]  ;;  %s197_s20 = scalar_lea.vmem %s1382_s4, %s1192_s17 }
  0x12   : > { %205 = vst.msk [vmem:[#allocation2] sm:$0xff] %vm204_vm0, %v199_v7  ;;  %206 = vst.msk [vmem:[#allocation2 + $0x8] sm:$0xff] %vm204_vm0, %v200_v8  ;;  %v202_v10 = vld [vmem:[%s1288_s6 + $0x18] sm:$0xff]  ;;  %v203_v38 = vld [vmem:[%s1288_s6 + $0x20] sm:$0xf] }
  0x13   : > { %207 = vst.msk [vmem:[#allocation2 + $0x10] sm:$0xff] %vm204_vm0, %v201_v9  ;;  %208 = vst.msk [vmem:[#allocation2 + $0x18] sm:$0xff] %vm204_vm0, %v202_v10 }
  0x14   : > { %210 = vst.msk [vmem:[#allocation2 + $0x20] sm:$0xf] %vm209_vm1, %v203_v38 }
  0x19   : > { %v220_v11 = vld [vmem:[#allocation2 + $0x1] sm:$0xff] }
  0x1a   : > { %v221_v12 = vld [vmem:[#allocation2 + $0x9] sm:$0xff]  ;;  %v211_v13 = vld [vmem:[#allocation2] sm:$0xff]  ;;  %v222_v16 = vld [vmem:[#allocation2 + $0x11] sm:$0x3f] }
  0x1b   : > { %v223_v14 = vpack.c.bf16 %v221_v12, %v220_v11  ;;  %v212_v15 = vld [vmem:[#allocation2 + $0x8] sm:$0xff]  ;;  %v213_v17 = vld [vmem:[#allocation2 + $0x10] sm:$0x3f]  ;;  %v224_v19 = vpack.c.bf16 %v222_v16, %v222_v16  ;;  %v443_v31 = vld [vmem:[#allocation2 + $0x16] sm:$0x3f] }
  0x1c   : > { %v214_v18 = vpack.c.bf16 %v212_v15, %v211_v13  ;;  %v215_v20 = vpack.c.bf16 %v213_v17, %v213_v17  ;;  %v362_v22 = vld [vmem:[#allocation2 + $0x2] sm:$0xff]  ;;  %v363_v23 = vld [vmem:[#allocation2 + $0xa] sm:$0xff]  ;;  %v364_v30 = vld [vmem:[#allocation2 + $0x12] sm:$0x3f]  ;;  %v445_v36 = vpack.c.bf16 %v443_v31, %v443_v31 }
  0x1d   : > { %1123 = vmatprep.mubr.msk.bf16.mxu0 %vm204_vm0, %v223_v14  ;;  %v365_v25 = vpack.c.bf16 %v363_v23, %v362_v22  ;;  %v441_v26 = vld [vmem:[#allocation2 + $0x6] sm:$0xff]  ;;  %v1305_v27 = vld [vmem:[#allocation2 + $0xe] sm:$0xff]  ;;  %v366_v33 = vpack.c.bf16 %v364_v30, %v364_v30  ;;  %v522_v43 = vld [vmem:[#allocation2 + $0x17] sm:$0x3f] }
  0x1e   : > { %1131 = vmatprep.mubr.msk.bf16.mxu1 %vm204_vm0, %v214_v18  ;;  %1124 = vmatmul.mubr.msk.bf16.vlgmr.msra.gmra.mrb[0].mxu0 %vm204_vm0, %v224_v19  ;;  %v444_v28 = vpack.c.bf16 %v1305_v27, %v441_v26  ;;  %v520_v34 = vld [vmem:[#allocation2 + $0x7] sm:$0xff]  ;;  %v521_v35 = vld [vmem:[#allocation2 + $0xf] sm:$0xff]  ;;  %v601_v46 = vld [vmem:[#allocation2 + $0x18] sm:$0x3f]  ;;  %v524_v49 = vpack.c.bf16 %v522_v43, %v522_v43 }
  0x1f   : > { %1132 = vmatmul.mubr.msk.bf16.vlgmr.msra.gmra.mrb[0].mxu1 %vm204_vm0, %v215_v20  ;;  %1136 = vmatpush3.bf16.msra.mxu0 %v1208_v4  ;;  %v600_v37 = vld [vmem:[#allocation2 + $0x10] sm:$0xff]  ;;  %v523_v41 = vpack.c.bf16 %v521_v35, %v520_v34  ;;  %v603_v52 = vpack.c.bf16 %v601_v46, %v601_v46  ;;  %v680_v60 = vld [vmem:[#allocation2 + $0x1c] sm:$0x3f] }
  0x20   : > { %1137 = vmatprep.subr.bf16.mxu0 %v1210_v21  ;;  %1144 = vmatpush3.bf16.msra.mxu1 %v1209_v5  ;;  %v602_v42 = vpack.c.bf16 %v600_v37, %v212_v15  ;;  %v678_v50 = vld [vmem:[#allocation2 + $0xc] sm:$0xff]  ;;  %v679_v51 = vld [vmem:[#allocation2 + $0x14] sm:$0xff]  ;;  %v759_v62 = vld [vmem:[#allocation2 + $0x1d] sm:$0x3f]  ;;  %v682_v0 = vpack.c.bf16 %v680_v60, %v680_v60 }
  0x21   : > { %1145 = vmatprep.subr.bf16.mxu1 %v1211_v24  ;;  %1139 = vmatprep.mubr.msk.bf16.mxu0 %vm204_vm0, %v365_v25  ;;  %v757_v53 = vld [vmem:[#allocation2 + $0xd] sm:$0xff]  ;;  %v758_v54 = vld [vmem:[#allocation2 + $0x15] sm:$0xff]  ;;  %v681_v58 = vpack.c.bf16 %v679_v51, %v678_v50  ;;  %v761_v1 = vpack.c.bf16 %v759_v62, %v759_v62  ;;  %v838_v4 = vld [vmem:[#allocation2 + $0x1e] sm:$0x3f] }
  0x22   : > { %1147 = vmatprep.mubr.msk.bf16.mxu1 %vm204_vm0, %v444_v28  ;;  %v760_v59 = vpack.c.bf16 %v758_v54, %v757_v53  ;;  %v837_v63 = vld [vmem:[#allocation2 + $0x16] sm:$0xff]  ;;  %v840_v5 = vpack.c.bf16 %v838_v4, %v838_v4  ;;  %v1080_v60 = vld [vmem:[%s1380_s2] ss:$0 sm:$0xff] }
  0x23   : > { %1138 = vmatpush3.bf16.msra.mxu0 %v1210_v21  ;;  %v839_v3 = vpack.c.bf16 %v837_v63, %v1305_v27 }
  0x24   : > { %1146 = vmatpush3.bf16.msra.mxu1 %v1211_v24  ;;  %1151 = vmatprep.subr.bf16.mxu0 %v1212_v29 }
  0x25   : > { %1159 = vmatprep.subr.bf16.mxu1 %v1213_v32 }
  0x26   : > { %1140 = vmatmul.mubr.msk.bf16.vlgmr.msra.gmra.mrb[4].mxu0 %vm204_vm0, %v366_v33 }
  0x27   : > { %1152 = vmatpush3.bf16.msra.mxu0 %v1212_v29  ;;  %1148 = vmatmul.mubr.msk.bf16.vlgmr.msra.gmra.mrb[4].mxu1 %vm204_vm0, %v445_v36 }
  0x28   : > { %1153 = vmatprep.subr.bf16.mxu0 %v1214_v39  ;;  %1160 = vmatpush3.bf16.msra.mxu1 %v1213_v32 }
  0x29   : > { %1161 = vmatprep.subr.bf16.mxu1 %v1215_v40  ;;  %1155 = vmatprep.mubr.msk.bf16.mxu0 %vm204_vm0, %v523_v41 }
  0x2a   : > { %1163 = vmatprep.mubr.msk.bf16.mxu1 %vm204_vm0, %v602_v42 }
  0x2b   : > { %1154 = vmatpush3.bf16.msra.mxu0 %v1214_v39 }
  0x2c   : > { %1162 = vmatpush3.bf16.msra.mxu1 %v1215_v40  ;;  %1167 = vmatprep.subr.bf16.mxu0 %v1216_v45 }
  0x2d   : > { %1175 = vmatprep.subr.bf16.mxu1 %v1217_v48 }
  0x2e   : > { %1156 = vmatmul.mubr.msk.bf16.vlgmr.msra.gmra.mrb[8].mxu0 %vm204_vm0, %v524_v49 }
  0x2f   : > { %1168 = vmatpush3.bf16.msra.mxu0 %v1216_v45  ;;  %1164 = vmatmul.mubr.msk.bf16.vlgmr.msra.gmra.mrb[8].mxu1 %vm204_vm0, %v603_v52 }
  0x30   : > { %1169 = vmatprep.subr.bf16.mxu0 %v1218_v56  ;;  %1176 = vmatpush3.bf16.msra.mxu1 %v1217_v48 }
  0x31   : > { %1177 = vmatprep.subr.bf16.mxu1 %v1219_v57  ;;  %1171 = vmatprep.mubr.msk.bf16.mxu0 %vm204_vm0, %v681_v58 }
  0x32   : > { %1179 = vmatprep.mubr.msk.bf16.mxu1 %vm204_vm0, %v760_v59 }
  0x33   : > { %1170 = vmatpush3.bf16.msra.mxu0 %v1218_v56 }
  0x34   : > { %1178 = vmatpush3.bf16.msra.mxu1 %v1219_v57  ;;  %1183 = vmatprep.subr.bf16.mxu0 %v1220_v61 }
  0x36   : > { %1172 = vmatmul.mubr.msk.bf16.vlgmr.msra.gmra.mrb[12].mxu0 %vm204_vm0, %v682_v0 }
  0x37   : > { %1184 = vmatpush3.bf16.msra.mxu0 %v1220_v61  ;;  %1180 = vmatmul.mubr.msk.bf16.vlgmr.msra.gmra.mrb[12].mxu1 %vm204_vm0, %v761_v1 }
  0x38   : > { %1185 = vmatprep.subr.bf16.mxu0 %v1221_v2  ;;  %1187 = vmatprep.mubr.msk.bf16.mxu0 %vm204_vm0, %v839_v3 }
  0x3b   : > { %1186 = vmatpush3.bf16.msra.mxu0 %v1221_v2 }
  0x3e   : > { %1188 = vmatmul.mubr.msk.bf16.vlgmr.msra.gmra.mrb[16].mxu0 %vm204_vm0, %v840_v5 }
  0x89   : > { %v931_v61 = vpop.permute.xlu0 %930  ;;  %v941_v2 = vpop.permute.xlu1 %940 }
  0xf1   : > { %v1125_v6 = vpop.f32.mrb[0].mxu0 }
  0xf2   : > { %v1133_v7 = vpop.f32.mrb[0].mxu1  ;;  %v282_v8 = vpop.f32.mrb[1].mxu0 }
  0xf3   : > { %v357_v9 = vadd.f32 %v1133_v7, %v1125_v6  ;;  %v348_v10 = vpop.f32.mrb[1].mxu1  ;;  %v1126_v11 = vpop.f32.mrb[2].mxu0 }
  0xf4   : > { %v349_v12 = vadd.f32 %v348_v10, %v282_v8  ;;  %v1134_v13 = vpop.f32.mrb[2].mxu1  ;;  %v285_v14 = vpop.f32.mrb[3].mxu0 }
  0xf5   : > { %v351_v15 = vpop.f32.mrb[3].mxu1  ;;  %v936_v10 = vpop.permute.xlu0 %935 }
  0xf6   : > { %v352_v16 = vadd.f32 %v351_v15, %v285_v14 }
  0xf9   : > { %v1141_v17 = vpop.f32.mrb[4].mxu0 }
  0xfa   : > { %v440_v18 = vadd.f32 %v1141_v17, %v357_v9  ;;  %v424_v19 = vpop.f32.mrb[5].mxu0  ;;  %v1149_v20 = vpop.f32.mrb[4].mxu1 }
  0xfb   : > { %v438_v21 = vadd.f32 %v424_v19, %v349_v12  ;;  %v1142_v22 = vpop.f32.mrb[6].mxu0  ;;  %v503_v23 = vpop.f32.mrb[5].mxu1 }
  0xfc   : > { %v519_v24 = vadd.f32 %v1149_v20, %v440_v18  ;;  %v427_v25 = vpop.f32.mrb[7].mxu0  ;;  %v1150_v26 = vpop.f32.mrb[6].mxu1 }
  0xfd   : > { %v439_v27 = vadd.f32 %v427_v25, %v352_v16  ;;  %v517_v28 = vadd.f32 %v503_v23, %v438_v21  ;;  %v506_v29 = vpop.f32.mrb[7].mxu1 }
  0xff   : > { %v518_v30 = vadd.f32 %v506_v29, %v439_v27 }
 0x101   : > { %v1157_v31 = vpop.f32.mrb[8].mxu0 }
 0x102   : > { %v598_v32 = vadd.f32 %v1157_v31, %v519_v24  ;;  %v582_v33 = vpop.f32.mrb[9].mxu0  ;;  %v1165_v34 = vpop.f32.mrb[8].mxu1 }
 0x103   : > { %v596_v35 = vadd.f32 %v582_v33, %v517_v28  ;;  %v1158_v36 = vpop.f32.mrb[10].mxu0  ;;  %v661_v37 = vpop.f32.mrb[9].mxu1 }
 0x104   : > { %v677_v38 = vadd.f32 %v1165_v34, %v598_v32  ;;  %v585_v39 = vpop.f32.mrb[11].mxu0  ;;  %v1166_v40 = vpop.f32.mrb[10].mxu1 }
 0x105   : > { %v597_v41 = vadd.f32 %v585_v39, %v518_v30  ;;  %v675_v42 = vadd.f32 %v661_v37, %v596_v35  ;;  %v664_v43 = vpop.f32.mrb[11].mxu1 }
 0x107   : > { %v676_v44 = vadd.f32 %v664_v43, %v597_v41 }
 0x109   : > { %v1173_v45 = vpop.f32.mrb[12].mxu0 }
 0x10a   : > { %v756_v46 = vadd.f32 %v1173_v45, %v677_v38  ;;  %v740_v47 = vpop.f32.mrb[13].mxu0  ;;  %v1181_v48 = vpop.f32.mrb[12].mxu1 }
 0x10b   : > { %v754_v49 = vadd.f32 %v740_v47, %v675_v42  ;;  %v1174_v50 = vpop.f32.mrb[14].mxu0  ;;  %v819_v51 = vpop.f32.mrb[13].mxu1 }
 0x10c   : > { %v835_v52 = vadd.f32 %v1181_v48, %v756_v46  ;;  %v743_v53 = vpop.f32.mrb[15].mxu0  ;;  %v1182_v54 = vpop.f32.mrb[14].mxu1 }
 0x10d   : > { %v755_v55 = vadd.f32 %v743_v53, %v676_v44  ;;  %v833_v56 = vadd.f32 %v819_v51, %v754_v49  ;;  %v822_v57 = vpop.f32.mrb[15].mxu1 }
 0x10f   : > { %v834_v58 = vadd.f32 %v822_v57, %v755_v55 }
 0x111   : > { %v1189_v59 = vpop.f32.mrb[16].mxu0 }
 0x112   : > { %v914_v62 = vadd.f32 %v1189_v59, %v835_v52  ;;  %v898_v63 = vpop.f32.mrb[17].mxu0 }
 0x113   : > { %v912_v0 = vadd.f32 %v898_v63, %v833_v56  ;;  %v1190_v1 = vpop.f32.mrb[18].mxu0 }
 0x114   : > { %v901_v3 = vpop.f32.mrb[19].mxu0  ;;  %v924_v4 = vadd.f32 %v1080_v60, %v914_v62 }
 0x115   : > { %v922_v5 = vadd.f32 %v1080_v60, %v912_v0  ;;  %v913_v6 = vadd.f32 %v901_v3, %v834_v58 }
 0x116   : > { %v945_v7 = vmul.f32 %v941_v2, %v924_v4 }
 0x117   : > { %v943_v8 = vmul.f32 %v931_v61, %v922_v5  ;;  %v923_v9 = vadd.f32 %v1080_v60, %v913_v6 }
 0x118   : > { %949 = vst.msk [vmem:[%s197_s20 + $0x10] sm:$0x3f] %vm948_vm2, %v945_v7 }
 0x119   : > { %v944_v11 = vmul.f32 %v936_v10, %v923_v9  ;;  %946 = vst.msk [vmem:[%s197_s20] sm:$0xff] %vm204_vm0, %v943_v8 }
 0x11b   : > { %947 = vst.msk [vmem:[%s197_s20 + $0x8] sm:$0xff] %vm204_vm0, %v944_v11 }
 0x11c PF: > { %s14_s15 = sadd.s32 1, %s1228_s15  }
 0x11d   : > { %p11_p4 = scmp.ge.s32.totalorder %s14_s15, 4  }
 0x11f   :  { %13 = sbr.rel (!%p11_p4) target bundleno = 1 (0x1), region = 74 }

// kernel: _lambda_.5
= control target key start
LH: loop header
LB: loop body
LE: loop exit
PB: predicated region body
PF: predicated region fallthrough
CT: control target
= control target key end

     0   :  { %s3939_s0 = inlined_call_operand.vmem [shape: f32[2,36,32], index: 0, kind: input, shape index: {}]   ;;  %s3940_s1 = inlined_call_operand.vmem [shape: f32[2,1,32], index: 1, kind: input, shape index: {}]   ;;  %s3941_s2 = inlined_call_operand.vmem [shape: f32[32,32], index: 2, kind: input, shape index: {}]   ;;  %s3942_s3 = inlined_call_operand.vmem [shape: f32[1,32], index: 3, kind: input, shape index: {}]   ;;  %s3943_s4 = inlined_call_operand.vmem [shape: f32[32,32], index: 4, kind: input, shape index: {}]   ;;  %s3944_s5 = inlined_call_operand.vmem [shape: f32[1,32], index: 5, kind: input, shape index: {}]   ;;  %s3945_s6 = inlined_call_operand.vmem [shape: f32[32,32], index: 6, kind: input, shape index: {}]   ;;  %s3946_s7 = inlined_call_operand.vmem [shape: f32[1,32], index: 7, kind: input, shape index: {}]   ;;  %s3947_s8 = inlined_call_operand.vmem [shape: bf16[9,32,32], index: 8, kind: input, shape index: {}]   ;;  %s3948_s9 = inlined_call_operand.vmem [shape: f32[32,32], index: 9, kind: input, shape index: {}]   ;;  %s3949_s10 = inlined_call_operand.vmem [shape: bf16[9,32,32], index: 10, kind: input, shape index: {}]   ;;  %s3950_s11 = inlined_call_operand.vmem [shape: f32[32,32], index: 11, kind: input, shape index: {}]   ;;  %s3951_s12 = inlined_call_operand.vmem [shape: bf16[32,3], index: 12, kind: input, shape index: {}]   ;;  %s3952_s13 = inlined_call_operand.vmem [shape: f32[1,32], index: 13, kind: input, shape index: {}]   ;;  %s3953_s14 = inlined_call_operand.vmem [shape: f32[1,32], index: 14, kind: input, shape index: {}]   ;;  %s3954_s15 = inlined_call_operand.vmem [shape: f32[1,32], index: 15, kind: input, shape index: {}]   ;;  %s3955_s16 = inlined_call_operand.vmem [shape: f32[1,32], index: 16, kind: input, shape index: {}]   ;;  %s3956_s17 = inlined_call_operand.vmem [shape: f32[2,22,1], index: 17, kind: input, shape index: {}]   ;;  %s3957_s18 = inlined_call_operand.vmem [shape: f32[22,1], index: 18, kind: input, shape index: {}]   ;;  %s3958_s19 = inlined_call_operand.vmem [shape: f32[2,22,32], index: 19, kind: output, shape index: {0}]   ;;  %s3959_s20 = inlined_call_operand.vmem [shape: f32[2,22,3], index: 20, kind: output, shape index: {1}]  }
   0x1   :  { %3963 = sst [smem:[#allocation4_spill]] %s3939_s0 }
   0x2   :  { %3964 = sst [smem:[#allocation5_spill]] %s3940_s1  ;;  %s3566_s1 = smov 0  }
   0x3   :  { %3965 = sst [smem:[#allocation6_spill]] %s3941_s2 }
   0x4   :  { %3966 = sst [smem:[#allocation7_spill]] %s3942_s3 }
   0x5   :  { %3967 = sst [smem:[#allocation8_spill]] %s3943_s4 }
   0x6 LB: > { %s2829_s22 = sadd.s32 4294967295, %s3455_s1   ;;  %p2833_p0 = scmp.ge.s32.totalorder %s3455_s1, 1  ;;  %s3455_s1 = sphi %s3566_s1, %s31_s1  }
   0x7   : > { %p583_p1 = scmp.lt.s32.totalorder %s3455_s1, 3 }
   0x9   : > { %p584_p2 = pnand %p2833_p0, %p583_p1 }
   0xa   : > { %s3968_s2 = sld [smem:[#allocation6_spill]] (!%p584_p2)  ;;  %v3457_v3 = vmov (!%p584_p2), 0.0|0.0   ;;  %vm3458_vm0 = vmmov (!%p584_p2), 0   ;;  %v3459_v6 = vmov (!%p584_p2), 0.0   ;;  %p654_p3 = scmp.lt.s32.totalorder (!%p584_p2), %s2829_s22, 1  ;;  %vm684_vm1 = vcmask (!%p584_p2), 261120  }
   0xb   : > { %587 = sbr.rel (%p584_p2) target bundleno = 1136 (0x470), region = 96  ;;  %3297 = vmatprep.subr.bf16.mxu0 (!%p584_p2), %v3457_v3  ;;  %3098 = vmatprep.mubr.msk.f32.mxu0 (!%p584_p2), %vm3458_vm0, %v3459_v6  ;;  %1792 = vst.msk [vmem:[#allocation3] sm:$0xff] (!%p584_p2), %vm684_vm1, %v3459_v6  ;;  %1793 = vst.msk [vmem:[#allocation3 + $0x8] sm:$0xff] (!%p584_p2), %vm684_vm1, %v3459_v6  ;;  %v835_v7 = vld [vmem:[%s3945_s6] sm:$0xff] (!%p584_p2)  ;;  %v836_v9 = vld [vmem:[%s3945_s6 + $0x8] sm:$0xff] (!%p584_p2)  ;;  %s3969_s25 = sld [smem:[#allocation5_spill]] (!%p584_p2)  ;;  %v922_v34 = vlaneseq (!%p584_p2) }
   0xc   : > { %1794 = vst.msk [vmem:[#allocation3 + $0x10] sm:$0xff] (!%p584_p2), %vm684_vm1, %v3459_v6  ;;  %1795 = vst.msk [vmem:[#allocation3 + $0x18] sm:$0xff] (!%p584_p2), %vm684_vm1, %v3459_v6  ;;  %3303 = vmatprep.subr.bf16.mxu1 (!%p584_p2), %v3457_v3  ;;  %3109 = vmatprep.mubr.msk.f32.mxu1 (!%p584_p2), %vm3458_vm0, %v3459_v6  ;;  %v837_v11 = vld [vmem:[%s3945_s6 + $0x10] sm:$0xff] (!%p584_p2)  ;;  %v838_v12 = vld [vmem:[%s3945_s6 + $0x18] sm:$0xff] (!%p584_p2)  ;;  %v3310_v13 = vpack.c.bf16 (!%p584_p2), %v836_v9, %v835_v7  ;;  %s3970_s28 = sld [smem:[#allocation8_spill]] (!%p584_p2)  ;;  %vm935_vm2 = vcmask (!%p584_p2), 257024  }
   0xd   : > { %v3313_v14 = vpack.c.bf16 (!%p584_p2), %v838_v12, %v837_v11  ;;  %v1642_v15 = vld [vmem:[%s3948_s9] sm:$0xff] (!%p584_p2)  ;;  %v1643_v16 = vld [vmem:[%s3948_s9 + $0x8] sm:$0xff] (!%p584_p2)  ;;  %v1644_v18 = vld [vmem:[%s3948_s9 + $0x10] sm:$0xff] (!%p584_p2)  ;;  %1796 = vst.msk [vmem:[#allocation3 + $0x20] sm:$0xf] (!%p584_p2), %vm935_vm2, %v3459_v6  ;;  %v3460_v31 = vmov (!%p584_p2), 0  }
   0xe   : > { %v3316_v17 = vpack.c.bf16 (!%p584_p2), %v1643_v16, %v1642_v15  ;;  %v1645_v19 = vld [vmem:[%s3948_s9 + $0x18] sm:$0xff] (!%p584_p2)  ;;  %v3407_v27 = vld [vmem:[%s3947_s8 + $0x10] sm:$0xff] (!%p584_p2)   ;;  %v3409_v29 = vld [vmem:[%s3947_s8] sm:$0xff] (!%p584_p2)   ;;  %3405 = vset.pattern.permute.xlu0 (!%p584_p2), %v3460_v31  ;;  %3406 = vset.pattern.permute.xlu1 (!%p584_p2), %v3460_v31  ;;  %v923_v37 = vshrl.u32 (!%p584_p2), %v922_v34, 7  ;;  %s3971_s21 = sld [smem:[#allocation7_spill]] (!%p584_p2)  ;;  %vm1806_vm6 = vcmask (!%p584_p2), 259072  }
   0xf   : > { %v3319_v20 = vpack.c.bf16 (!%p584_p2), %v1645_v19, %v1644_v18  ;;  %v3408_v28 = vld [vmem:[%s3947_s8 + $0x18] sm:$0xff] (!%p584_p2)   ;;  %v914_v30 = vld [vmem:[%s3957_s18] sm:$0xff] (!%p584_p2)  ;;  %v915_v33 = vld [vmem:[%s3957_s18 + $0x8] sm:$0xff] (!%p584_p2)  ;;  %vm2718_vm10 = vcmask (!%p584_p2), 21504   ;;  %vm2715_vm11 = vcmask (!%p584_p2), 23552  }
  0x10   : > { %v679_v0 = vld [vmem:[%s3968_s2] sm:$0xff] (!%p584_p2)  ;;  %v680_v1 = vld [vmem:[%s3968_s2 + $0x8] sm:$0xff] (!%p584_p2)  ;;  %v681_v2 = vld [vmem:[%s3968_s2 + $0x10] sm:$0xff] (!%p584_p2)  ;;  %1776 = vperm.xlu1 (!%p584_p2), %3406, %v914_v30   ;;  %v3689_v42 = vsub.s32 (!%p584_p2), 0, %v923_v37 }
  0x11   : > { %v3298_v4 = vpack.c.bf16 (!%p584_p2), %v680_v1, %v679_v0  ;;  %v682_v5 = vld [vmem:[%s3968_s2 + $0x18] sm:$0xff] (!%p584_p2)  ;;  %v916_v36 = vld [vmem:[%s3957_s18 + $0x10] sm:$0x3f] (!%p584_p2)  ;;  %v3412_v11 = vld [vmem:[%s3947_s8 + $0x28] sm:$0xff] (!%p584_p2)  }
  0x12   : > { %v3301_v8 = vpack.c.bf16 %v682_v5, %v681_v2  ;;  %s3974_s22 = smov (!%p654_p3, %s2829_s22), 1  ;;  %v759_v21 = vld [vmem:[%s3970_s28] sm:$0xff]  ;;  %v760_v22 = vld [vmem:[%s3970_s28 + $0x8] sm:$0xff]  ;;  %v761_v24 = vld [vmem:[%s3970_s28 + $0x10] sm:$0xff] }
  0x13   : > { %3299 = vmatpush3.bf16.msra.mxu0 %v3298_v4  ;;  %s661_s3 = scalar_lea.vmem %s3969_s25, %s3974_s22  ;;  %v3304_v23 = vpack.c.bf16 %v760_v22, %v759_v21  ;;  %v762_v25 = vld [vmem:[%s3970_s28 + $0x18] sm:$0xff]  ;;  %s3667_s29 = smul.u32 24, %s3974_s22  ;;  %v3410_v2 = vld [vmem:[%s3947_s8 + $0x8] sm:$0xff]   ;;  %v3411_v5 = vld [vmem:[%s3947_s8 + $0x20] sm:$0xff]  }
  0x14   : > { %3300 = vmatprep.subr.bf16.mxu0 %v3457_v3  ;;  %v678_v10 = vld [vmem:[%s661_s3] sm:$0x1]  ;;  %v3307_v26 = vpack.c.bf16 %v762_v25, %v761_v24  ;;  %1781 = vperm.xlu1 %3406, %v915_v33   ;;  %s3391_s4 = smul.u32 40, %s3974_s22  ;;  %s3972_s3 = sld [smem:[#allocation4_spill]]  ;;  %v3414_v18 = vld [vmem:[%s3947_s8 + $0x38] sm:$0xff]   ;;  %v3416_v25 = vld [vmem:[%s3947_s8 + $0x48] sm:$0xff]  }
  0x15   : > { %3305 = vmatpush3.bf16.msra.mxu1 %v3304_v23  ;;  %s666_s24 = scalar_lea.vmem %s3956_s17, %s3667_s29  ;;  %v683_v39 = vld [vmem:[%s3971_s21] sm:$0x1]  ;;  %v3418_v31 = vld [vmem:[%s3947_s8 + $0x58] sm:$0xff]   ;;  %s671_s21 = scalar_lea.vmem %s3958_s19, %s3667_s29 }
  0x16   : > { %3306 = vmatprep.subr.bf16.mxu1 %v3457_v3  ;;  %v911_v32 = vld [vmem:[%s666_s24] sm:$0xff]  ;;  %v912_v35 = vld [vmem:[%s666_s24 + $0x8] sm:$0xff]  ;;  %v913_v38 = vld [vmem:[%s666_s24 + $0x10] sm:$0x3f] }
  0x17   : > { %3302 = vmatpush3.bf16.msra.mxu0 %v3301_v8  ;;  %1730 = vperm.xlu0 %3405, %v911_v32   ;;  %v3419_v33 = vld [vmem:[%s3947_s8 + $0x60] sm:$0xff]  }
  0x18   : > { %3309 = vmatprep.subr.bf16.mxu0 %v3457_v3  ;;  %1786 = vperm.xlu1 %3406, %v916_v36  }
  0x19   : > { %3308 = vmatpush3.bf16.msra.mxu1 %v3307_v26 }
  0x1a   : > { %3099 = vmatmul.mubr.msk.f32.vlgmr.msra.gmra.mrb[0].mxu0 %vm684_vm1, %v678_v10  ;;  %3123 = vmatprep.subr.bf16.mxu1 %v3407_v27  ;;  %s658_s2 = scalar_lea.vmem %s3972_s3, %s3391_s4  ;;  %s676_s3 = scalar_lea.vmem %s3959_s20, %s3667_s29 }
  0x1b   : > { %3311 = vmatpush3.bf16.msra.mxu0 %v3310_v13  ;;  %3120 = vmatprep.mubr.msk.f32.mxu0 %vm3458_vm0, %v3459_v6  ;;  %v917_v45 = vld [vmem:[%s658_s2] sm:$0xff]  ;;  %v918_v46 = vld [vmem:[%s658_s2 + $0x8] sm:$0xff]  ;;  %v919_v47 = vld [vmem:[%s658_s2 + $0x10] sm:$0xff] }
  0x1c   : > { %3312 = vmatprep.subr.bf16.mxu0 %v3457_v3  ;;  %3110 = vmatmul.mubr.msk.f32.vlgmr.msra.gmra.mrb[0].mxu1 %vm684_vm1, %v678_v10  ;;  %v920_v48 = vld [vmem:[%s658_s2 + $0x18] sm:$0xff]  ;;  %v921_v49 = vld [vmem:[%s658_s2 + $0x20] sm:$0xf]  ;;  %v3413_v13 = vld [vmem:[%s3947_s8 + $0x30] sm:$0xff]  }
  0x1d   : > { %3124 = vmatpush3.bf16.msra.mxu1 %v3407_v27  ;;  %1735 = vperm.xlu0 %3405, %v912_v35   ;;  %v3417_v27 = vld [vmem:[%s3947_s8 + $0x50] sm:$0xff]  }
  0x1e   : > { %3125 = vmatprep.subr.bf16.mxu1 %v3408_v28 }
  0x1f   : > { %3314 = vmatpush3.bf16.msra.mxu0 %v3313_v14 }
  0x20   : > { %3315 = vmatprep.subr.bf16.mxu0 %v3457_v3 }
  0x21   : > { %3126 = vmatpush3.bf16.msra.mxu1 %v3408_v28  ;;  %1740 = vperm.xlu0 %3405, %v913_v38   ;;  %v3420_v38 = vld [vmem:[%s3947_s8 + $0x68] sm:$0xff]  }
  0x22   : > { %3121 = vmatmul.mubr.msk.f32.vlgmr.msra.gmra.mrb[2].mxu0 %vm684_vm1, %v678_v10  ;;  %3131 = vmatprep.subr.bf16.mxu1 %v3409_v29 }
  0x23   : > { %3203 = vmatprep.mubr.msk.f32.mxu0 %vm3458_vm0, %v3459_v6  ;;  %3317 = vmatpush3.bf16.msra.mxu0 %v3316_v17 }
  0x24   : > { %3318 = vmatprep.subr.bf16.mxu0 %v3457_v3 }
  0x27   : > { %3320 = vmatpush3.bf16.msra.mxu0 %v3319_v20  ;;  %v3415_v20 = vld [vmem:[%s3947_s8 + $0x40] sm:$0xff]  }
  0xed   : > { %v754_v40 = vpop.f32.mrb[0].mxu0 }
  0xee   : > { %v755_v41 = vadd.f32 %v754_v40, %v683_v39  ;;  %v3100_v43 = vpop.f32.mrb[1].mxu0  ;;  %v3421_v40 = vld [vmem:[%s3947_s8 + $0x70] sm:$0xff]  }
  0xf0   : > { %v758_v44 = vadd.f32 1.0, %v755_v41 }
  0xf2   : > { %v925_v50 = vrot.slane %v758_v44, %v3689_v42  ;;  %v1641_v51 = vmul.f32 %v758_v44, %v758_v44 }
  0xf4   : > { %v926_v52 = vmul.f32 %v925_v50, %v917_v45  ;;  %v927_v53 = vmul.f32 %v925_v50, %v918_v46  ;;  %v928_v54 = vmul.f32 %v925_v50, %v919_v47  ;;  %v929_v55 = vmul.f32 %v925_v50, %v920_v48  ;;  %3204 = vmatmul.mubr.msk.f32.vlgmr.msra.gmra.mrb[4].mxu0 %vm684_vm1, %v1641_v51  ;;  %v3422_v46 = vld [vmem:[%s3947_s8 + $0x78] sm:$0xff]   ;;  %v3423_v48 = vld [vmem:[%s3947_s8 + $0x80] sm:$0xff]  }
  0xf5   : > { %v930_v56 = vmul.f32 %v925_v50, %v921_v49  ;;  %v3693_v57 = vpop.f32.mrb[2].mxu0  ;;  %v830_v49 = vpop.f32.mrb[0].mxu1 }
  0xf6   : > { %931 = vst.msk [vmem:[#allocation2] sm:$0xff] %vm684_vm1, %v926_v52  ;;  %932 = vst.msk [vmem:[#allocation2 + $0x8] sm:$0xff] %vm684_vm1, %v927_v53  ;;  %v3122_v58 = vpop.f32.mrb[3].mxu0  ;;  %v3111_v51 = vpop.f32.mrb[1].mxu1 }
  0xf7   : > { %933 = vst.msk [vmem:[#allocation2 + $0x10] sm:$0xff] %vm684_vm1, %v928_v54  ;;  %934 = vst.msk [vmem:[#allocation2 + $0x18] sm:$0xff] %vm684_vm1, %v929_v55  ;;  %v3424_v54 = vld [vmem:[%s3947_s8 + $0x88] sm:$0xff]   ;;  %v2513_v58 = vld [vmem:[%s3950_s11] sm:$0xff] }
  0xf8   : > { %936 = vst.msk [vmem:[#allocation2 + $0x20] sm:$0xf] %vm935_vm2, %v930_v56  ;;  %v763_v56 = vld [vmem:[%s3944_s5] sm:$0x1] }
  0xfd   : > { %v946_v59 = vld [vmem:[#allocation2 + $0x1] sm:$0xff] }
  0xfe   : > { %v947_v60 = vld [vmem:[#allocation2 + $0x9] sm:$0xff]  ;;  %v948_v61 = vld [vmem:[#allocation2 + $0x11] sm:$0x3f]  ;;  %v937_v0 = vld [vmem:[#allocation2] sm:$0xff] }
  0xff   : > { %v949_v62 = vpack.c.bf16 %v947_v60, %v946_v59  ;;  %v950_v63 = vpack.c.bf16 %v948_v61, %v948_v61  ;;  %v938_v1 = vld [vmem:[#allocation2 + $0x8] sm:$0xff]  ;;  %v939_v7 = vld [vmem:[#allocation2 + $0x10] sm:$0x3f]  ;;  %v1169_v21 = vld [vmem:[#allocation2 + $0x16] sm:$0x3f]  ;;  %v831_v61 = vadd.f32 %v830_v49, %v763_v56 }
 0x100   : > { %v940_v4 = vpack.c.bf16 %v938_v1, %v937_v0  ;;  %v1088_v8 = vld [vmem:[#allocation2 + $0x2] sm:$0xff]  ;;  %v1089_v9 = vld [vmem:[#allocation2 + $0xa] sm:$0xff]  ;;  %v941_v10 = vpack.c.bf16 %v939_v7, %v939_v7  ;;  %v1090_v14 = vld [vmem:[#allocation2 + $0x12] sm:$0x3f]  ;;  %v1171_v24 = vpack.c.bf16 %v1169_v21, %v1169_v21 }
 0x101   : > { %3127 = vmatprep.mubr.msk.bf16.mxu1 %vm684_vm1, %v949_v62  ;;  %v1091_v12 = vpack.c.bf16 %v1089_v9, %v1088_v8  ;;  %v1167_v15 = vld [vmem:[#allocation2 + $0x6] sm:$0xff]  ;;  %v3717_v16 = vld [vmem:[#allocation2 + $0xe] sm:$0xff]  ;;  %v1092_v17 = vpack.c.bf16 %v1090_v14, %v1090_v14  ;;  %v1248_v28 = vld [vmem:[#allocation2 + $0x17] sm:$0x3f] }
 0x102   : > { %3128 = vmatmul.mubr.msk.bf16.vlgmr.msra.gmra.mrb[4].mxu1 %vm684_vm1, %v950_v63  ;;  %v1170_v19 = vpack.c.bf16 %v3717_v16, %v1167_v15  ;;  %v1246_v22 = vld [vmem:[#allocation2 + $0x7] sm:$0xff]  ;;  %v1247_v23 = vld [vmem:[#allocation2 + $0xf] sm:$0xff]  ;;  %v1250_v30 = vpack.c.bf16 %v1248_v28, %v1248_v28  ;;  %v1327_v34 = vld [vmem:[#allocation2 + $0x18] sm:$0x3f] }
 0x103   : > { %3132 = vmatpush3.bf16.msra.mxu1 %v3409_v29  ;;  %3135 = vmatprep.mubr.msk.bf16.mxu1 %vm684_vm1, %v940_v4  ;;  %v1249_v26 = vpack.c.bf16 %v1247_v23, %v1246_v22  ;;  %v1326_v29 = vld [vmem:[#allocation2 + $0x10] sm:$0xff]  ;;  %v1329_v37 = vpack.c.bf16 %v1327_v34, %v1327_v34  ;;  %v1406_v41 = vld [vmem:[#allocation2 + $0x1c] sm:$0x3f]  ;;  %v2514_v59 = vld [vmem:[%s3950_s11 + $0x8] sm:$0xff] }
 0x104   : > { %3133 = vmatprep.subr.bf16.mxu1 %v3410_v2  ;;  %v1328_v32 = vpack.c.bf16 %v1326_v29, %v938_v1  ;;  %v1404_v35 = vld [vmem:[#allocation2 + $0xc] sm:$0xff]  ;;  %v1405_v36 = vld [vmem:[#allocation2 + $0x14] sm:$0xff]  ;;  %v1408_v45 = vpack.c.bf16 %v1406_v41, %v1406_v41  ;;  %v1485_v50 = vld [vmem:[#allocation2 + $0x1d] sm:$0x3f]  ;;  %v3322_v62 = vpack.c.bf16 %v2514_v59, %v2513_v58 }
 0x105   : > { %v1407_v39 = vpack.c.bf16 %v1405_v36, %v1404_v35  ;;  %v1483_v43 = vld [vmem:[#allocation2 + $0xd] sm:$0xff]  ;;  %v1484_v44 = vld [vmem:[#allocation2 + $0x15] sm:$0xff]  ;;  %v1487_v53 = vpack.c.bf16 %v1485_v50, %v1485_v50  ;;  %v1564_v60 = vld [vmem:[#allocation2 + $0x1e] sm:$0x3f] }
 0x106   : > { %v1486_v47 = vpack.c.bf16 %v1484_v44, %v1483_v43  ;;  %v1563_v52 = vld [vmem:[#allocation2 + $0x16] sm:$0xff]  ;;  %v1566_v63 = vpack.c.bf16 %v1564_v60, %v1564_v60  ;;  %v2910_v15 = vld [vmem:[%s3952_s13] ss:$0 sm:$0xff] }
 0x107   : > { %3134 = vmatpush3.bf16.msra.mxu1 %v3410_v2  ;;  %v1565_v55 = vpack.c.bf16 %v1563_v52, %v3717_v16  ;;  %v2515_v0 = vld [vmem:[%s3950_s11 + $0x10] sm:$0xff]  ;;  %v2516_v1 = vld [vmem:[%s3950_s11 + $0x18] sm:$0xff]  ;;  %v834_v2 = vadd.f32 1.0, %v831_v61  ;;  %v3428_v61 = vld [vmem:[%s3949_s10 + $0x8] sm:$0xff]  }
 0x108   : > { %3139 = vmatprep.subr.bf16.mxu1 %v3411_v5  ;;  %v3325_v4 = vpack.c.bf16 %v2516_v1, %v2515_v0  ;;  %v3425_v7 = vld [vmem:[%s3949_s10 + $0x10] sm:$0xff]   ;;  %v3426_v8 = vld [vmem:[%s3949_s10 + $0x18] sm:$0xff]  }
 0x109   : > { %3206 = vmatprep.subr.bf16.mxu0 %v3425_v7 }
 0x10a   : > { %3207 = vmatpush3.bf16.msra.mxu0 %v3425_v7 }
 0x10b   : > { %3208 = vmatprep.subr.bf16.mxu0 %v3426_v8 }
 0x10e   : > { %3136 = vmatmul.mubr.msk.bf16.vlgmr.msra.gmra.mrb[4].mxu1 %vm684_vm1, %v941_v10  ;;  %3209 = vmatpush3.bf16.msra.mxu0 %v3426_v8  ;;  %v3431_v8 = vld [vmem:[%s3949_s10 + $0x30] sm:$0xff]  }
 0x10f   : > { %3140 = vmatpush3.bf16.msra.mxu1 %v3411_v5  ;;  %3143 = vmatprep.mubr.msk.bf16.mxu1 %vm684_vm1, %v1091_v12  ;;  %v2512_v5 = vmul.f32 %v834_v2, %v834_v2 }
 0x110   : > { %3141 = vmatprep.subr.bf16.mxu1 %v3412_v11 }
 0x113   : > { %3142 = vmatpush3.bf16.msra.mxu1 %v3412_v11  ;;  %v3799_v11 = vpop.permute.xlu0 %1730 }
 0x114   : > { %3147 = vmatprep.subr.bf16.mxu1 %v3413_v13  ;;  %v1749_v23 = vmul.f32 %v2910_v15, %v3799_v11 }
 0x117   : > { %v3801_v12 = vpop.permute.xlu0 %1735 }
 0x118   : > { %v1750_v29 = vmul.f32 %v2910_v15, %v3801_v12 }
 0x11a   : > { %3144 = vmatmul.mubr.msk.bf16.vlgmr.msra.gmra.mrb[4].mxu1 %vm684_vm1, %v1092_v17 }
 0x11b   : > { %3148 = vmatpush3.bf16.msra.mxu1 %v3413_v13  ;;  %3151 = vmatprep.mubr.msk.bf16.mxu1 %vm684_vm1, %v1170_v19  ;;  %v3803_v13 = vpop.permute.xlu1 %1776  ;;  %v3808_v16 = vpop.permute.xlu0 %1740 }
 0x11c   : > { %3149 = vmatprep.subr.bf16.mxu1 %v3414_v18  ;;  %v1751_v17 = vmul.f32 %v2910_v15, %v3808_v16 }
 0x11f   : > { %3150 = vmatpush3.bf16.msra.mxu1 %v3414_v18  ;;  %v3812_v22 = vpop.permute.xlu1 %1781 }
 0x120   : > { %3155 = vmatprep.subr.bf16.mxu1 %v3415_v20 }
 0x123   : > { %v3819_v35 = vpop.permute.xlu1 %1786 }
 0x126   : > { %3152 = vmatmul.mubr.msk.bf16.vlgmr.msra.gmra.mrb[4].mxu1 %vm684_vm1, %v1171_v24  ;;  %v2911_v24 = vld [vmem:[%s3953_s14] ss:$0 sm:$0xff] }
 0x127   : > { %3156 = vmatpush3.bf16.msra.mxu1 %v3415_v20  ;;  %3159 = vmatprep.mubr.msk.bf16.mxu1 %vm684_vm1, %v1249_v26 }
 0x128   : > { %3157 = vmatprep.subr.bf16.mxu1 %v3416_v25 }
 0x12b   : > { %3158 = vmatpush3.bf16.msra.mxu1 %v3416_v25 }
 0x12c   : > { %3163 = vmatprep.subr.bf16.mxu1 %v3417_v27 }
 0x132   : > { %3160 = vmatmul.mubr.msk.bf16.vlgmr.msra.gmra.mrb[4].mxu1 %vm684_vm1, %v1250_v30 }
 0x133   : > { %3164 = vmatpush3.bf16.msra.mxu1 %v3417_v27  ;;  %3167 = vmatprep.mubr.msk.bf16.mxu1 %vm684_vm1, %v1328_v32 }
 0x134   : > { %3165 = vmatprep.subr.bf16.mxu1 %v3418_v31 }
 0x137   : > { %3166 = vmatpush3.bf16.msra.mxu1 %v3418_v31 }
 0x138   : > { %3171 = vmatprep.subr.bf16.mxu1 %v3419_v33 }
 0x13e   : > { %3168 = vmatmul.mubr.msk.bf16.vlgmr.msra.gmra.mrb[4].mxu1 %vm684_vm1, %v1329_v37 }
 0x13f   : > { %3172 = vmatpush3.bf16.msra.mxu1 %v3419_v33  ;;  %3175 = vmatprep.mubr.msk.bf16.mxu1 %vm684_vm1, %v1407_v39 }
 0x140   : > { %3173 = vmatprep.subr.bf16.mxu1 %v3420_v38 }
 0x143   : > { %3174 = vmatpush3.bf16.msra.mxu1 %v3420_v38 }
 0x144   : > { %3179 = vmatprep.subr.bf16.mxu1 %v3421_v40 }
 0x14a   : > { %3176 = vmatmul.mubr.msk.bf16.vlgmr.msra.gmra.mrb[4].mxu1 %vm684_vm1, %v1408_v45 }
 0x14b   : > { %3180 = vmatpush3.bf16.msra.mxu1 %v3421_v40  ;;  %3183 = vmatprep.mubr.msk.bf16.mxu1 %vm684_vm1, %v1486_v47  ;;  %v1800_v40 = vrot.slane %v834_v2, %v3689_v42 }
 0x14c   : > { %3181 = vmatprep.subr.bf16.mxu1 %v3422_v46 }
 0x14f   : > { %3182 = vmatpush3.bf16.msra.mxu1 %v3422_v46 }
 0x150   : > { %3187 = vmatprep.subr.bf16.mxu1 %v3423_v48 }
 0x156   : > { %3184 = vmatmul.mubr.msk.bf16.vlgmr.msra.gmra.mrb[4].mxu1 %vm684_vm1, %v1487_v53 }
 0x157   : > { %3188 = vmatpush3.bf16.msra.mxu1 %v3423_v48  ;;  %3191 = vmatprep.mubr.msk.bf16.mxu1 %vm684_vm1, %v1565_v55 }
 0x158   : > { %3189 = vmatprep.subr.bf16.mxu1 %v3424_v54 }
 0x15b   : > { %3190 = vmatpush3.bf16.msra.mxu1 %v3424_v54 }
 0x15c   : > { %3321 = vmatprep.subr.bf16.mxu1 %v3457_v3 }
 0x162   : > { %3192 = vmatmul.mubr.msk.bf16.vlgmr.msra.gmra.mrb[4].mxu1 %vm684_vm1, %v1566_v63  ;;  %v3429_v63 = vld [vmem:[%s3949_s10 + $0x20] sm:$0xff]  }
 0x163   : > { %3323 = vmatpush3.bf16.msra.mxu1 %v3322_v62  ;;  %3286 = vmatprep.mubr.msk.f32.mxu1 %vm3458_vm0, %v3459_v6 }
 0x164   : > { %3324 = vmatprep.subr.bf16.mxu1 %v3457_v3  ;;  %v3796_v3 = vld [vmem:[%s3949_s10] sm:$0xff]  }
 0x165   : > { %3214 = vmatprep.subr.bf16.mxu0 %v3796_v3 }
 0x167   : > { %3326 = vmatpush3.bf16.msra.mxu1 %v3325_v4 }
 0x16a   : > { %3287 = vmatmul.mubr.msk.f32.vlgmr.msra.gmra.mrb[2].mxu1 %vm684_vm1, %v2512_v5  ;;  %v3430_v5 = vld [vmem:[%s3949_s10 + $0x28] sm:$0xff]  }
 0x1c7   : > { %v1715_v9 = vpop.f32.mrb[4].mxu0 }
 0x1c8   : > { %v3205_v10 = vpop.f32.mrb[5].mxu0  ;;  %v1716_v6 = vadd.f32 1e-08, %v1715_v9 }
 0x1ca   : > { %3445 = vrsqrt.f32 %v1716_v6 }
 0x1d4   : > { %v3446_v14 = vpop.eup %3445 }
 0x1d5   : > { %v1723_v18 = vrot.slane %v3446_v14, %v3689_v42  ;;  %v3432_v14 = vld [vmem:[%s3949_s10 + $0x38] sm:$0xff]  }
 0x235   : > { %v3193_v19 = vpop.f32.mrb[4].mxu1 }
 0x236   : > { %v1726_v20 = vmul.f32 %v3193_v19, %v1723_v18  ;;  %v1624_v21 = vpop.f32.mrb[5].mxu1 }
 0x237   : > { %v1724_v25 = vmul.f32 %v1723_v18, %v1624_v21  ;;  %v3194_v26 = vpop.f32.mrb[6].mxu1 }
 0x238   : > { %v1754_v27 = vadd.f32 %v1751_v17, %v1726_v20  ;;  %v1627_v28 = vpop.f32.mrb[7].mxu1  ;;  %v3433_v17 = vld [vmem:[%s3949_s10 + $0x40] sm:$0xff]  }
 0x239   : > { %v1752_v30 = vadd.f32 %v1749_v23, %v1724_v25  ;;  %v1725_v31 = vmul.f32 %v1723_v18, %v1627_v28  ;;  %v3434_v23 = vld [vmem:[%s3949_s10 + $0x48] sm:$0xff]   ;;  %v3435_v25 = vld [vmem:[%s3949_s10 + $0x50] sm:$0xff]  }
 0x23a   : > { %v1764_v32 = vadd.f32 %v2911_v24, %v1754_v27 }
 0x23b   : > { %v1762_v33 = vadd.f32 %v2911_v24, %v1752_v30  ;;  %v1753_v34 = vadd.f32 %v1750_v29, %v1725_v31  ;;  %v3436_v29 = vld [vmem:[%s3949_s10 + $0x58] sm:$0xff]   ;;  %v3437_v31 = vld [vmem:[%s3949_s10 + $0x60] sm:$0xff]  }
 0x23c   : > { %vm1767_vm3 = vcmp.ge.f32.partialorder %v1764_v32, 0.0  ;;  %v1770_v36 = vmul.f32 0.2, %v1764_v32 }
 0x23d   : > { %vm1765_vm4 = vcmp.ge.f32.partialorder %v1762_v33, 0.0  ;;  %v1768_v37 = vmul.f32 0.2, %v1762_v33  ;;  %v1763_v38 = vadd.f32 %v2911_v24, %v1753_v34  ;;  %v3821_v39 = vpop.f32.mrb[2].mxu1 }
 0x23e   : > { %v1773_v41 = vsel %vm1767_vm3, %v1764_v32, %v1770_v36  ;;  %v3288_v43 = vpop.f32.mrb[3].mxu1 }
 0x23f   : > { %v1771_v44 = vsel %vm1765_vm4, %v1762_v33, %v1768_v37  ;;  %vm1766_vm5 = vcmp.ge.f32.partialorder %v1763_v38, 0.0  ;;  %v1769_v45 = vmul.f32 0.2, %v1763_v38  ;;  %v1791_v46 = vmul.f32 %v3819_v35, %v1773_v41  ;;  %v3438_v37 = vld [vmem:[%s3949_s10 + $0x68] sm:$0xff]  }
 0x240   : > { %v1789_v47 = vmul.f32 %v3803_v13, %v1771_v44 }
 0x241   : > { %v1772_v48 = vsel %vm1766_vm5, %v1763_v38, %v1769_v45  ;;  %v1803_v49 = vmul.f32 %v1800_v40, %v1791_v46  ;;  %v3440_v46 = vld [vmem:[%s3949_s10 + $0x78] sm:$0xff]  }
 0x242   : > { %v1801_v50 = vmul.f32 %v1800_v40, %v1789_v47  ;;  %v1790_v51 = vmul.f32 %v3812_v22, %v1772_v48  ;;  %v3441_v48 = vld [vmem:[%s3949_s10 + $0x80] sm:$0xff]  }
 0x243   : > { %1807 = vst.msk [vmem:[#allocation3 + $0x17] sm:$0x3f] %vm1806_vm6, %v1803_v49  ;;  %v2356_v49 = vld [vmem:[#allocation3 + $0x1d] sm:$0x3f] }
 0x244   : > { %1804 = vst.msk [vmem:[#allocation3 + $0x7] sm:$0xff] %vm684_vm1, %v1801_v50  ;;  %v1802_v52 = vmul.f32 %v1800_v40, %v1790_v51  ;;  %v3439_v40 = vld [vmem:[%s3949_s10 + $0x70] sm:$0xff]   ;;  %v2358_v50 = vpack.c.bf16 %v2356_v49, %v2356_v49 }
 0x246   : > { %1805 = vst.msk [vmem:[#allocation3 + $0xf] sm:$0xff] %vm684_vm1, %v1802_v52  ;;  %v3442_v52 = vld [vmem:[%s3949_s10 + $0x88] sm:$0xff]  }
 0x24a   : > { %v2119_v26 = vld [vmem:[#allocation3 + $0x17] sm:$0x3f] }
 0x24b   : > { %v1817_v53 = vld [vmem:[#allocation3 + $0x1] sm:$0xff]  ;;  %v2121_v28 = vpack.c.bf16 %v2119_v26, %v2119_v26  ;;  %v2198_v32 = vld [vmem:[#allocation3 + $0x18] sm:$0x3f] }
 0x24c   : > { %v1808_v60 = vld [vmem:[#allocation3] sm:$0xff]  ;;  %v2200_v36 = vpack.c.bf16 %v2198_v32, %v2198_v32 }
 0x24d   : > { %v1818_v54 = vld [vmem:[#allocation3 + $0x9] sm:$0xff]  ;;  %v1819_v55 = vld [vmem:[#allocation3 + $0x11] sm:$0x3f]  ;;  %v2277_v41 = vld [vmem:[#allocation3 + $0x1c] sm:$0x3f] }
 0x24e   : > { %v1809_v56 = vld [vmem:[#allocation3 + $0x8] sm:$0xff]  ;;  %v1820_v58 = vpack.c.bf16 %v1818_v54, %v1817_v53  ;;  %v1821_v59 = vpack.c.bf16 %v1819_v55, %v1819_v55  ;;  %v1810_v0 = vld [vmem:[#allocation3 + $0x10] sm:$0x3f]  ;;  %v2040_v18 = vld [vmem:[#allocation3 + $0x16] sm:$0x3f]  ;;  %v2279_v45 = vpack.c.bf16 %v2277_v41, %v2277_v41 }
 0x24f   : > { %v1811_v62 = vpack.c.bf16 %v1809_v56, %v1808_v60  ;;  %v1960_v1 = vld [vmem:[#allocation3 + $0xa] sm:$0xff]  ;;  %v1812_v2 = vpack.c.bf16 %v1810_v0, %v1810_v0  ;;  %v1959_v4 = vld [vmem:[#allocation3 + $0x2] sm:$0xff]  ;;  %v1961_v9 = vld [vmem:[#allocation3 + $0x12] sm:$0x3f]  ;;  %v2042_v20 = vpack.c.bf16 %v2040_v18, %v2040_v18 }
 0x250   : > { %3210 = vmatprep.mubr.msk.bf16.mxu0 %vm684_vm1, %v1820_v58  ;;  %v1962_v7 = vpack.c.bf16 %v1960_v1, %v1959_v4  ;;  %v3848_v10 = vld [vmem:[#allocation3 + $0xe] sm:$0xff]  ;;  %v2038_v6 = vld [vmem:[#allocation3 + $0x6] sm:$0xff]  ;;  %v2434_v51 = vld [vmem:[#allocation3 + $0x16] sm:$0xff] }
 0x251   : > { %3211 = vmatmul.mubr.msk.bf16.vlgmr.msra.gmra.mrb[8].mxu0 %vm684_vm1, %v1821_v59  ;;  %v2041_v15 = vpack.c.bf16 %v3848_v10, %v2038_v6  ;;  %v2118_v19 = vld [vmem:[#allocation3 + $0xf] sm:$0xff]  ;;  %v2117_v21 = vld [vmem:[#allocation3 + $0x7] sm:$0xff]  ;;  %v2436_v53 = vpack.c.bf16 %v2434_v51, %v3848_v10  ;;  %v2435_v54 = vld [vmem:[#allocation3 + $0x1e] sm:$0x3f]  ;;  %v2587_v59 = vadd.f32 1e-08, %v3821_v39 }
 0x252   : > { %3215 = vmatpush3.bf16.msra.mxu0 %v3796_v3  ;;  %3218 = vmatprep.mubr.msk.bf16.mxu0 %vm684_vm1, %v1811_v62  ;;  %v1963_v3 = vpack.c.bf16 %v1961_v9, %v1961_v9  ;;  %v2120_v24 = vpack.c.bf16 %v2118_v19, %v2117_v21  ;;  %v2197_v27 = vld [vmem:[#allocation3 + $0x10] sm:$0xff]  ;;  %v2437_v55 = vpack.c.bf16 %v2435_v54, %v2435_v54  ;;  %v3444_v58 = vld [vmem:[%s3951_s12 + $0x8] sm:$0xff]   ;;  %v2981_v62 = vld [vmem:[%s3954_s15] ss:$0 sm:$0xff] }
 0x253   : > { %3216 = vmatprep.subr.bf16.mxu0 %v3428_v61  ;;  %v2199_v30 = vpack.c.bf16 %v2197_v27, %v1809_v56  ;;  %v2275_v33 = vld [vmem:[#allocation3 + $0xc] sm:$0xff]  ;;  %v2276_v34 = vld [vmem:[#allocation3 + $0x14] sm:$0xff]  ;;  %3447 = vrsqrt.f32 %v2587_v59  ;;  %v2605_v39 = vmul.f32 %v2981_v62, %v3799_v11  ;;  %v2606_v6 = vmul.f32 %v2981_v62, %v3801_v12 }
 0x254   : > { %v2278_v38 = vpack.c.bf16 %v2276_v34, %v2275_v33  ;;  %v2354_v43 = vld [vmem:[#allocation3 + $0xd] sm:$0xff]  ;;  %v2355_v44 = vld [vmem:[#allocation3 + $0x15] sm:$0xff] }
 0x255   : > { %v2357_v47 = vpack.c.bf16 %v2355_v44, %v2354_v43  ;;  %v3443_v56 = vld [vmem:[%s3951_s12] sm:$0xff]  }
 0x256   : > { %3217 = vmatpush3.bf16.msra.mxu0 %v3428_v61  ;;  %3289 = vmatprep.subr.bf16.mxu1 %v3443_v56  ;;  %v839_v61 = vld [vmem:[%s3946_s7] sm:$0x1] }
 0x257   : > { %3222 = vmatprep.subr.bf16.mxu0 %v3429_v63  ;;  %3290 = vmatpush3.bf16.msra.mxu1 %v3443_v56  ;;  %v907_v1 = vadd.f32 %v3693_v57, %v839_v61 }
 0x258   : > { %3291 = vmatprep.subr.bf16.mxu1 %v3444_v58 }
 0x259   : > { %v910_v57 = vadd.f32 1.0, %v907_v1 }
 0x25b   : > { %3292 = vmatpush3.bf16.msra.mxu1 %v3444_v58  ;;  %v2639_v21 = vrot.slane %v910_v57, %v3689_v42 }
 0x25d   : > { %3219 = vmatmul.mubr.msk.bf16.vlgmr.msra.gmra.mrb[8].mxu0 %vm684_vm1, %v1812_v2  ;;  %v3448_v60 = vpop.eup %3447  ;;  %v2607_v2 = vmul.f32 %v2981_v62, %v3808_v16 }
 0x25e   : > { %3223 = vmatpush3.bf16.msra.mxu0 %v3429_v63  ;;  %3226 = vmatprep.mubr.msk.bf16.mxu0 %vm684_vm1, %v1962_v7  ;;  %v2594_v63 = vrot.slane %v3448_v60, %v3689_v42  ;;  %v2982_v7 = vld [vmem:[%s3955_s16] ss:$0 sm:$0xff] }
 0x25f   : > { %3224 = vmatprep.subr.bf16.mxu0 %v3430_v5 }
 0x262   : > { %3225 = vmatpush3.bf16.msra.mxu0 %v3430_v5 }
 0x263   : > { %3230 = vmatprep.subr.bf16.mxu0 %v3431_v8 }
 0x269   : > { %3227 = vmatmul.mubr.msk.bf16.vlgmr.msra.gmra.mrb[8].mxu0 %vm684_vm1, %v1963_v3 }
 0x26a   : > { %3231 = vmatpush3.bf16.msra.mxu0 %v3431_v8  ;;  %3234 = vmatprep.mubr.msk.bf16.mxu0 %vm684_vm1, %v2041_v15 }
 0x26b   : > { %3232 = vmatprep.subr.bf16.mxu0 %v3432_v14 }
 0x26e   : > { %3233 = vmatpush3.bf16.msra.mxu0 %v3432_v14 }
 0x26f   : > { %3238 = vmatprep.subr.bf16.mxu0 %v3433_v17 }
 0x275   : > { %3235 = vmatmul.mubr.msk.bf16.vlgmr.msra.gmra.mrb[8].mxu0 %vm684_vm1, %v2042_v20 }
 0x276   : > { %3239 = vmatpush3.bf16.msra.mxu0 %v3433_v17  ;;  %3242 = vmatprep.mubr.msk.bf16.mxu0 %vm684_vm1, %v2120_v24 }
 0x277   : > { %3240 = vmatprep.subr.bf16.mxu0 %v3434_v23 }
 0x27a   : > { %3241 = vmatpush3.bf16.msra.mxu0 %v3434_v23 }
 0x27b   : > { %3246 = vmatprep.subr.bf16.mxu0 %v3435_v25 }
 0x281   : > { %3243 = vmatmul.mubr.msk.bf16.vlgmr.msra.gmra.mrb[8].mxu0 %vm684_vm1, %v2121_v28 }
 0x282   : > { %3247 = vmatpush3.bf16.msra.mxu0 %v3435_v25  ;;  %3250 = vmatprep.mubr.msk.bf16.mxu0 %vm684_vm1, %v2199_v30 }
 0x283   : > { %3248 = vmatprep.subr.bf16.mxu0 %v3436_v29 }
 0x286   : > { %3249 = vmatpush3.bf16.msra.mxu0 %v3436_v29 }
 0x287   : > { %3254 = vmatprep.subr.bf16.mxu0 %v3437_v31 }
 0x28d   : > { %3251 = vmatmul.mubr.msk.bf16.vlgmr.msra.gmra.mrb[8].mxu0 %vm684_vm1, %v2200_v36 }
 0x28e   : > { %3255 = vmatpush3.bf16.msra.mxu0 %v3437_v31  ;;  %3258 = vmatprep.mubr.msk.bf16.mxu0 %vm684_vm1, %v2278_v38 }
 0x28f   : > { %3256 = vmatprep.subr.bf16.mxu0 %v3438_v37 }
 0x292   : > { %3257 = vmatpush3.bf16.msra.mxu0 %v3438_v37 }
 0x293   : > { %3262 = vmatprep.subr.bf16.mxu0 %v3439_v40 }
 0x299   : > { %3259 = vmatmul.mubr.msk.bf16.vlgmr.msra.gmra.mrb[8].mxu0 %vm684_vm1, %v2279_v45 }
 0x29a   : > { %3263 = vmatpush3.bf16.msra.mxu0 %v3439_v40  ;;  %3266 = vmatprep.mubr.msk.bf16.mxu0 %vm684_vm1, %v2357_v47 }
 0x29b   : > { %3264 = vmatprep.subr.bf16.mxu0 %v3440_v46 }
 0x29e   : > { %3265 = vmatpush3.bf16.msra.mxu0 %v3440_v46 }
 0x29f   : > { %3270 = vmatprep.subr.bf16.mxu0 %v3441_v48 }
 0x2a5   : > { %3267 = vmatmul.mubr.msk.bf16.vlgmr.msra.gmra.mrb[8].mxu0 %vm684_vm1, %v2358_v50 }
 0x2a6   : > { %3271 = vmatpush3.bf16.msra.mxu0 %v3441_v48  ;;  %3274 = vmatprep.mubr.msk.bf16.mxu0 %vm684_vm1, %v2436_v53 }
 0x2a7   : > { %3272 = vmatprep.subr.bf16.mxu0 %v3442_v52 }
 0x2aa   : > { %3273 = vmatpush3.bf16.msra.mxu0 %v3442_v52 }
 0x2b1   : > { %3275 = vmatmul.mubr.msk.bf16.vlgmr.msra.gmra.mrb[8].mxu0 %vm684_vm1, %v2437_v55 }
 0x384   : > { %v3276_v0 = vpop.f32.mrb[8].mxu0 }
 0x385   : > { %v2597_v4 = vmul.f32 %v3276_v0, %v2594_v63  ;;  %v2495_v5 = vpop.f32.mrb[9].mxu0 }
 0x386   : > { %v2595_v8 = vmul.f32 %v2594_v63, %v2495_v5  ;;  %v3277_v9 = vpop.f32.mrb[10].mxu0 }
 0x387   : > { %v2610_v10 = vadd.f32 %v2607_v2, %v2597_v4  ;;  %v2498_v3 = vpop.f32.mrb[11].mxu0 }
 0x388   : > { %v2608_v14 = vadd.f32 %v2605_v39, %v2595_v8  ;;  %v2596_v15 = vmul.f32 %v2594_v63, %v2498_v3 }
 0x389   : > { %v2620_v17 = vadd.f32 %v2982_v7, %v2610_v10 }
 0x38a   : > { %v2618_v16 = vadd.f32 %v2982_v7, %v2608_v14  ;;  %v2609_v18 = vadd.f32 %v2606_v6, %v2596_v15 }
 0x38b   : > { %vm2623_vm7 = vcmp.ge.f32.partialorder %v2620_v17, 0.0  ;;  %v2626_v19 = vmul.f32 0.2, %v2620_v17 }
 0x38c   : > { %vm2621_vm8 = vcmp.ge.f32.partialorder %v2618_v16, 0.0  ;;  %v2624_v11 = vmul.f32 0.2, %v2618_v16  ;;  %v2619_v20 = vadd.f32 %v2982_v7, %v2609_v18 }
 0x38d   : > { %v2629_v23 = vsel %vm2623_vm7, %v2620_v17, %v2626_v19 }
 0x38e   : > { %v2632_v12 = vmul.f32 %v2629_v23, %v3819_v35  ;;  %v2627_v24 = vsel %vm2621_vm8, %v2618_v16, %v2624_v11  ;;  %vm2622_vm9 = vcmp.ge.f32.partialorder %v2619_v20, 0.0  ;;  %v2625_v25 = vmul.f32 0.2, %v2619_v20 }
 0x38f   : > { %v2630_v26 = vmul.f32 %v2627_v24, %v3803_v13 }
 0x390   : > { %2635 = vst.msk [vmem:[%s671_s21 + $0x10] sm:$0x3f] %vm1806_vm6, %v2632_v12  ;;  %v2642_v27 = vmul.f32 %v2639_v21, %v2632_v12  ;;  %v2628_v28 = vsel %vm2622_vm9, %v2619_v20, %v2625_v25 }
 0x391   : > { %2633 = vst.msk [vmem:[%s671_s21] sm:$0xff] %vm684_vm1, %v2630_v26  ;;  %v2631_v29 = vmul.f32 %v2628_v28, %v3812_v22  ;;  %v2640_v30 = vmul.f32 %v2639_v21, %v2630_v26 }
 0x392   : > { %v2644_v35 = vpack.c.bf16 %v2642_v27, %v2642_v27 }
 0x393   : > { %2634 = vst.msk [vmem:[%s671_s21 + $0x8] sm:$0xff] %vm684_vm1, %v2631_v29  ;;  %v2641_v42 = vmul.f32 %v2639_v21, %v2631_v29 }
 0x395   : > { %v2643_v31 = vpack.c.bf16 %v2641_v42, %v2640_v30 }
 0x397   : > { %3293 = vmatprep.mubr.msk.bf16.mxu1 %vm684_vm1, %v2643_v31 }
 0x398   : > { %3294 = vmatmul.mubr.msk.bf16.vlgmr.msra.gmra.mrb[8].mxu1 %vm684_vm1, %v2644_v35 }
 0x46b   : > { %v3295_v13 = vpop.f32.mrb[8].mxu1 }
 0x46c   : > { %2719 = vst.msk [vmem:[%s676_s3 + $0x10] sm:$0x3f] %vm2718_vm10, %v3295_v13  ;;  %v2701_v32 = vpop.f32.mrb[9].mxu1 }
 0x46d   : > { %2716 = vst.msk [vmem:[%s676_s3] sm:$0xff] %vm2715_vm11, %v2701_v32  ;;  %v3296_v22 = vpop.f32.mrb[10].mxu1 }
 0x46e   : > { %v2704_v33 = vpop.f32.mrb[11].mxu1 }
 0x46f   : > { %2717 = vst.msk [vmem:[%s676_s3 + $0x8] sm:$0xff] %vm2715_vm11, %v2704_v33 }
 0x470 PF: > { %s31_s1 = sadd.s32 1, %s3455_s1  }
 0x471   : > { %p28_p4 = scmp.ge.s32.totalorder %s31_s1, 4  }
 0x473   :  { %30 = sbr.rel (!%p28_p4) target bundleno = 6 (0x6), region = 160 }

// kernel: _lambda_.6
= control target key start
LH: loop header
LB: loop body
LE: loop exit
PB: predicated region body
PF: predicated region fallthrough
CT: control target
= control target key end

     0   :  { %s6273_s0 = inlined_call_operand.vmem [shape: f32[2,100,32], index: 0, kind: input, shape index: {}]   ;;  %s6274_s1 = inlined_call_operand.vmem [shape: f32[2,1,32], index: 1, kind: input, shape index: {}]   ;;  %s6275_s2 = inlined_call_operand.vmem [shape: f32[32,32], index: 2, kind: input, shape index: {}]   ;;  %s6276_s3 = inlined_call_operand.vmem [shape: f32[1,32], index: 3, kind: input, shape index: {}]   ;;  %s6277_s4 = inlined_call_operand.vmem [shape: f32[32,16], index: 4, kind: input, shape index: {}]   ;;  %s6278_s5 = inlined_call_operand.vmem [shape: f32[1,16], index: 5, kind: input, shape index: {}]   ;;  %s6279_s6 = inlined_call_operand.vmem [shape: f32[32,16], index: 6, kind: input, shape index: {}]   ;;  %s6280_s7 = inlined_call_operand.vmem [shape: f32[1,16], index: 7, kind: input, shape index: {}]   ;;  %s6281_s8 = inlined_call_operand.vmem [shape: bf16[9,32,16], index: 8, kind: input, shape index: {}]   ;;  %s6282_s9 = inlined_call_operand.vmem [shape: f32[32,16], index: 9, kind: input, shape index: {}]   ;;  %s6283_s10 = inlined_call_operand.vmem [shape: bf16[9,16,16], index: 10, kind: input, shape index: {}]   ;;  %s6284_s11 = inlined_call_operand.vmem [shape: f32[16,16], index: 11, kind: input, shape index: {}]   ;;  %s6285_s12 = inlined_call_operand.vmem [shape: bf16[16,3], index: 12, kind: input, shape index: {}]   ;;  %s6286_s13 = inlined_call_operand.vmem [shape: f32[1,16], index: 13, kind: input, shape index: {}]   ;;  %s6287_s14 = inlined_call_operand.vmem [shape: f32[1,16], index: 14, kind: input, shape index: {}]   ;;  %s6288_s15 = inlined_call_operand.vmem [shape: f32[1,16], index: 15, kind: input, shape index: {}]   ;;  %s6289_s16 = inlined_call_operand.vmem [shape: f32[1,16], index: 16, kind: input, shape index: {}]   ;;  %s6290_s17 = inlined_call_operand.vmem [shape: f32[2,78,1], index: 17, kind: input, shape index: {}]   ;;  %s6291_s18 = inlined_call_operand.vmem [shape: f32[78,1], index: 18, kind: input, shape index: {}]   ;;  %s6292_s19 = inlined_call_operand.vmem [shape: f32[2,78,3], index: 19, kind: input, shape index: {}]   ;;  %s6293_s20 = inlined_call_operand.vmem [shape: f32[2,78,16], index: 20, kind: output, shape index: {0}]   ;;  %s6294_s21 = inlined_call_operand.vmem [shape: f32[2,78,3], index: 21, kind: output, shape index: {1}]  }
   0x1   :  { %6297 = sst [smem:[#allocation4_spill]] %s6273_s0 }
   0x2   :  { %6298 = sst [smem:[#allocation5_spill]] %s6274_s1 }
   0x3   :  { %6299 = sst [smem:[#allocation6_spill]] %s6275_s2  ;;  %s5350_s2 = smov 0  }
   0x4   :  { %6300 = sst [smem:[#allocation7_spill]] %s6276_s3 }
   0x5   :  { %6301 = sst [smem:[#allocation8_spill]] %s6277_s4 }
   0x6   :  { %6302 = sst [smem:[#allocation9_spill]] %s6278_s5 }
   0x7 LB: > { %s4008_s25 = sadd.s32 4294967295, %s5234_s2   ;;  %p4012_p0 = scmp.ge.s32.totalorder %s5234_s2, 1  ;;  %s5234_s2 = sphi %s5350_s2, %s32_s2  }
   0x8   : > { %p618_p1 = scmp.lt.s32.totalorder %s5234_s2, 3 }
   0xa   : > { %p619_p2 = pnand %p4012_p0, %p618_p1 }
   0xb   : > { %s6303_s3 = sld [smem:[#allocation6_spill]] (!%p619_p2)  ;;  %v5236_v3 = vmov (!%p619_p2), 0.0|0.0   ;;  %vm5237_vm0 = vmmov (!%p619_p2), 0   ;;  %v5238_v6 = vmov (!%p619_p2), 0.0   ;;  %p696_p3 = scmp.lt.s32.totalorder (!%p619_p2), %s4008_s25, 1  ;;  %vm731_vm1 = vcmask (!%p619_p2), 261120  }
   0xc   : > { %622 = sbr.rel (%p619_p2) target bundleno = 1598 (0x63e), region = 100  ;;  %4833 = vmatprep.subr.bf16.mxu0 (!%p619_p2), %v5236_v3  ;;  %4354 = vmatprep.mubr.msk.f32.mxu0 (!%p619_p2), %vm5237_vm0, %v5238_v6  ;;  %s6304_s1 = sld [smem:[#allocation5_spill]] (!%p619_p2)  ;;  %v882_v11 = vld [vmem:[%s6279_s6] sm:$0xff] (!%p619_p2)  ;;  %v883_v13 = vld [vmem:[%s6279_s6 + $0x8] sm:$0xff] (!%p619_p2)  ;;  %v884_v17 = vld [vmem:[%s6279_s6 + $0x10] sm:$0xff] (!%p619_p2)  ;;  %v991_v23 = vlaneseq (!%p619_p2)  ;;  %vm1020_vm2 = vcmask (!%p619_p2), 257024  }
   0xd   : > { %4839 = vmatprep.subr.bf16.mxu1 (!%p619_p2), %v5236_v3  ;;  %4365 = vmatprep.mubr.msk.f32.mxu1 (!%p619_p2), %vm5237_vm0, %v5238_v6  ;;  %s6305_s28 = sld [smem:[#allocation8_spill]] (!%p619_p2)  ;;  %v4846_v14 = vpack.c.bf16 (!%p619_p2), %v883_v13, %v882_v11  ;;  %v885_v19 = vld [vmem:[%s6279_s6 + $0x18] sm:$0xff] (!%p619_p2)  ;;  %v5196_v21 = vld [vmem:[%s6281_s8 + $0x10] sm:$0xff] (!%p619_p2)   ;;  %s6306_s27 = sld [smem:[#allocation7_spill]] (!%p619_p2)  ;;  %v2172_v58 = vld [vmem:[%s6282_s9] sm:$0xff] (!%p619_p2)  ;;  %vm2448_vm3 = vcmask (!%p619_p2), 130048  }
   0xe   : > { %v4849_v20 = vpack.c.bf16 (!%p619_p2), %v885_v19, %v884_v17  ;;  %v5197_v22 = vld [vmem:[%s6281_s8 + $0x18] sm:$0xff] (!%p619_p2)   ;;  %v992_v24 = vshrl.u32 (!%p619_p2), %v991_v23, 7  ;;  %s6307_s4 = sld [smem:[#allocation4_spill]] (!%p619_p2)  ;;  %v2173_v59 = vld [vmem:[%s6282_s9 + $0x8] sm:$0xff] (!%p619_p2)  ;;  %2449 = vst.msk [vmem:[#allocation3] sm:$0xff] (!%p619_p2), %vm2448_vm3, %v5238_v6  ;;  %2450 = vst.msk [vmem:[#allocation3 + $0x8] sm:$0xff] (!%p619_p2), %vm2448_vm3, %v5238_v6 }
   0xf   : > { %2451 = vst.msk [vmem:[#allocation3 + $0x10] sm:$0xff] (!%p619_p2), %vm2448_vm3, %v5238_v6  ;;  %2452 = vst.msk [vmem:[#allocation3 + $0x18] sm:$0xff] (!%p619_p2), %vm2448_vm3, %v5238_v6  ;;  %s6308_s26 = sld [smem:[#allocation9_spill]] (!%p619_p2)  ;;  %vm2461_vm4 = vcmask (!%p619_p2), 125952   ;;  %vm2486_vm15 = vcmask (!%p619_p2), 128000  }
  0x10   : > { %v5438_v28 = vsub.s32 (!%p619_p2), 0, %v992_v24  ;;  %v5201_v24 = vld [vmem:[%s6281_s8 + $0x28] sm:$0xff] (!%p619_p2)   ;;  %2453 = vst.msk [vmem:[#allocation3 + $0x20] sm:$0xff] (!%p619_p2), %vm2448_vm3, %v5238_v6  ;;  %2454 = vst.msk [vmem:[#allocation3 + $0x28] sm:$0xff] (!%p619_p2), %vm2448_vm3, %v5238_v6 }
  0x11   : > { %v726_v0 = vld [vmem:[%s6303_s3] sm:$0xff] (!%p619_p2)  ;;  %v727_v1 = vld [vmem:[%s6303_s3 + $0x8] sm:$0xff] (!%p619_p2)  ;;  %v728_v2 = vld [vmem:[%s6303_s3 + $0x10] sm:$0xff] (!%p619_p2)  ;;  %2455 = vst.msk [vmem:[#allocation3 + $0x30] sm:$0xff] (!%p619_p2), %vm2448_vm3, %v5238_v6 }
  0x12   : > { %v4834_v4 = vpack.c.bf16 (!%p619_p2), %v727_v1, %v726_v0  ;;  %v729_v5 = vld [vmem:[%s6303_s3 + $0x18] sm:$0xff] (!%p619_p2)  ;;  %v5198_v1 = vld [vmem:[%s6281_s8] sm:$0xff] (!%p619_p2)   ;;  %2456 = vst.msk [vmem:[#allocation3 + $0x38] sm:$0xff] (!%p619_p2), %vm2448_vm3, %v5238_v6  ;;  %2457 = vst.msk [vmem:[#allocation3 + $0x40] sm:$0xff] (!%p619_p2), %vm2448_vm3, %v5238_v6 }
  0x13   : > { %v4837_v7 = vpack.c.bf16 %v729_v5, %v728_v2  ;;  %s6310_s25 = smov (!%p696_p3, %s4008_s25), 1  ;;  %v806_v9 = vld [vmem:[%s6305_s28] sm:$0xff]  ;;  %v807_v10 = vld [vmem:[%s6305_s28 + $0x8] sm:$0xff]  ;;  %v808_v15 = vld [vmem:[%s6305_s28 + $0x10] sm:$0xff]  ;;  %2458 = vst.msk [vmem:[#allocation3 + $0x48] sm:$0xff] %vm2448_vm3, %v5238_v6 }
  0x14   : > { %4835 = vmatpush3.bf16.msra.mxu0 %v4834_v4  ;;  %s703_s24 = scalar_lea.vmem %s6304_s1, %s6310_s25  ;;  %v4840_v12 = vpack.c.bf16 %v807_v10, %v806_v9  ;;  %v809_v16 = vld [vmem:[%s6305_s28 + $0x18] sm:$0xff]  ;;  %s5180_s1 = smul.u32 104, %s6310_s25  ;;  %v730_v25 = vld [vmem:[%s6306_s27] sm:$0x1]  ;;  %v4852_v4 = vpack.c.bf16 %v2173_v59, %v2172_v58  ;;  %v2174_v5 = vld [vmem:[%s6282_s9 + $0x10] sm:$0xff]  ;;  %2459 = vst.msk [vmem:[#allocation3 + $0x50] sm:$0xff] %vm2448_vm3, %v5238_v6 }
  0x15   : > { %4836 = vmatprep.subr.bf16.mxu0 %v5236_v3  ;;  %v725_v8 = vld [vmem:[%s703_s24] sm:$0x1]  ;;  %v4843_v18 = vpack.c.bf16 %v809_v16, %v808_v15  ;;  %2460 = vst.msk [vmem:[#allocation3 + $0x58] sm:$0xff] %vm2448_vm3, %v5238_v6 }
  0x16   : > { %4841 = vmatpush3.bf16.msra.mxu1 %v4840_v12  ;;  %s700_s30 = scalar_lea.vmem %s6307_s4, %s5180_s1  ;;  %v5204_v59 = vld [vmem:[%s6281_s8 + $0x40] sm:$0xff]   ;;  %2462 = vst.msk [vmem:[#allocation3 + $0x60] sm:$0xf] %vm2461_vm4, %v5238_v6 }
  0x17   : > { %4842 = vmatprep.subr.bf16.mxu1 %v5236_v3  ;;  %v978_v31 = vld [vmem:[%s700_s30] sm:$0xff]  ;;  %v979_v32 = vld [vmem:[%s700_s30 + $0x8] sm:$0xff]  ;;  %v980_v33 = vld [vmem:[%s700_s30 + $0x10] sm:$0xff] }
  0x18   : > { %4838 = vmatpush3.bf16.msra.mxu0 %v4837_v7  ;;  %v982_v34 = vld [vmem:[%s700_s30 + $0x20] sm:$0xff]  ;;  %v983_v35 = vld [vmem:[%s700_s30 + $0x28] sm:$0xff]  ;;  %v984_v36 = vld [vmem:[%s700_s30 + $0x30] sm:$0xff] }
  0x19   : > { %4845 = vmatprep.subr.bf16.mxu0 %v5236_v3  ;;  %v981_v38 = vld [vmem:[%s700_s30 + $0x18] sm:$0xff]  ;;  %v986_v40 = vld [vmem:[%s700_s30 + $0x40] sm:$0xff]  ;;  %v987_v41 = vld [vmem:[%s700_s30 + $0x48] sm:$0xff] }
  0x1a   : > { %4844 = vmatpush3.bf16.msra.mxu1 %v4843_v18  ;;  %v985_v39 = vld [vmem:[%s700_s30 + $0x38] sm:$0xff]  ;;  %v988_v42 = vld [vmem:[%s700_s30 + $0x50] sm:$0xff]  ;;  %v990_v48 = vld [vmem:[%s700_s30 + $0x60] sm:$0xf] }
  0x1b   : > { %4355 = vmatmul.mubr.msk.f32.vlgmr.msra.gmra.mrb[0].mxu0 %vm731_vm1, %v725_v8  ;;  %4860 = vmatprep.subr.bf16.mxu1 %v5238_v6  ;;  %v989_v43 = vld [vmem:[%s700_s30 + $0x58] sm:$0xff]  ;;  %s5632_s30 = smul.u32 80, %s6310_s25 }
  0x1c   : > { %4376 = vmatprep.mubr.msk.f32.mxu0 %vm5237_vm0, %v5238_v6  ;;  %4847 = vmatpush3.bf16.msra.mxu0 %v4846_v14  ;;  %v2175_v7 = vld [vmem:[%s6282_s9 + $0x18] sm:$0xff] }
  0x1d   : > { %4848 = vmatprep.subr.bf16.mxu0 %v5236_v3  ;;  %4366 = vmatmul.mubr.msk.f32.vlgmr.msra.gmra.mrb[0].mxu1 %vm731_vm1, %v725_v8  ;;  %v4855_v11 = vpack.c.bf16 %v2175_v7, %v2174_v5  ;;  %s5670_s22 = scalar_lea.vmem %s6290_s17, %s5632_s30  ;;  %s6240_s25 = scalar_lea.vmem %s6294_s21, %s5632_s30 }
  0x1e   : > { %4862 = vmatpush3.bf16.msra.mxu1 %v5196_v21  ;;  %4391 = vmatprep.mubr.msk.bf16.mxu1 %vm5237_vm0, %v5238_v6 }
  0x1f   : > { %4861 = vmatprep.subr.bf16.mxu1 %v5238_v6 }
  0x20   : > { %4850 = vmatpush3.bf16.msra.mxu0 %v4849_v20 }
  0x21   : > { %4379 = vmatprep.subr.bf16.mxu0 %v5238_v6 }
  0x22   : > { %4863 = vmatpush3.bf16.msra.mxu1 %v5197_v22 }
  0x23   : > { %4377 = vmatmul.mubr.msk.f32.vlgmr.msra.gmra.mrb[2].mxu0 %vm731_vm1, %v725_v8  ;;  %4403 = vmatprep.subr.bf16.mxu1 %v5238_v6  ;;  %v5199_v8 = vld [vmem:[%s6281_s8 + $0x8] sm:$0xff]  }
  0x24   : > { %4380 = vmatpush3.bf16.msra.mxu0 %v5196_v21  ;;  %4383 = vmatprep.mubr.msk.bf16.mxu0 %vm5237_vm0, %v5238_v6 }
  0x25   : > { %4381 = vmatprep.subr.bf16.mxu0 %v5238_v6 }
  0x28   : > { %4382 = vmatpush3.bf16.msra.mxu0 %v5197_v22  ;;  %v5200_v22 = vld [vmem:[%s6281_s8 + $0x20] sm:$0xff]  }
  0x29   : > { %4851 = vmatprep.subr.bf16.mxu0 %v5236_v3 }
  0xee   : > { %v801_v26 = vpop.f32.mrb[0].mxu0 }
  0xef   : > { %v802_v27 = vadd.f32 %v801_v26, %v730_v25  ;;  %v4356_v29 = vpop.f32.mrb[1].mxu0 }
  0xf1   : > { %v5440_v30 = vadd.f32 1.0, %v802_v27 }
  0xf3   : > { %v994_v37 = vrot.slane %v5440_v30, %v5438_v28  ;;  %v2171_v18 = vmul.f32 %v5440_v30, %v5440_v30 }
  0xf5   : > { %v995_v44 = vmul.f32 %v994_v37, %v978_v31  ;;  %v996_v45 = vmul.f32 %v994_v37, %v979_v32  ;;  %v997_v46 = vmul.f32 %v994_v37, %v980_v33  ;;  %v999_v47 = vmul.f32 %v994_v37, %v982_v34 }
  0xf6   : > { %v1000_v49 = vmul.f32 %v994_v37, %v983_v35  ;;  %v1001_v50 = vmul.f32 %v994_v37, %v984_v36  ;;  %v998_v51 = vmul.f32 %v994_v37, %v981_v38  ;;  %v1002_v52 = vmul.f32 %v994_v37, %v985_v39 }
  0xf7   : > { %1008 = vst.msk [vmem:[#allocation2] sm:$0xff] %vm731_vm1, %v995_v44  ;;  %1009 = vst.msk [vmem:[#allocation2 + $0x8] sm:$0xff] %vm731_vm1, %v996_v45  ;;  %v1003_v53 = vmul.f32 %v994_v37, %v986_v40  ;;  %v1004_v54 = vmul.f32 %v994_v37, %v987_v41  ;;  %v1005_v55 = vmul.f32 %v994_v37, %v988_v42  ;;  %v5202_v40 = vld [vmem:[%s6281_s8 + $0x30] sm:$0xff]   ;;  %v5203_v42 = vld [vmem:[%s6281_s8 + $0x38] sm:$0xff]  }
  0xf8   : > { %1010 = vst.msk [vmem:[#allocation2 + $0x10] sm:$0xff] %vm731_vm1, %v997_v46  ;;  %1012 = vst.msk [vmem:[#allocation2 + $0x20] sm:$0xff] %vm731_vm1, %v999_v47  ;;  %v1006_v56 = vmul.f32 %v994_v37, %v989_v43  ;;  %v1007_v57 = vmul.f32 %v994_v37, %v990_v48  ;;  %v5536_v46 = vpop.f32.mrb[0].mxu1 }
  0xf9   : > { %1013 = vst.msk [vmem:[#allocation2 + $0x28] sm:$0xff] %vm731_vm1, %v1000_v49  ;;  %1014 = vst.msk [vmem:[#allocation2 + $0x30] sm:$0xff] %vm731_vm1, %v1001_v50  ;;  %v4367_v49 = vpop.f32.mrb[1].mxu1 }
  0xfa   : > { %1011 = vst.msk [vmem:[#allocation2 + $0x18] sm:$0xff] %vm731_vm1, %v998_v51  ;;  %1015 = vst.msk [vmem:[#allocation2 + $0x38] sm:$0xff] %vm731_vm1, %v1002_v52  ;;  %v5539_v51 = vpop.f32.mrb[2].mxu0 }
  0xfb   : > { %1016 = vst.msk [vmem:[#allocation2 + $0x40] sm:$0xff] %vm731_vm1, %v1003_v53  ;;  %1017 = vst.msk [vmem:[#allocation2 + $0x48] sm:$0xff] %vm731_vm1, %v1004_v54  ;;  %v4378_v52 = vpop.f32.mrb[3].mxu0 }
  0xfc   : > { %1018 = vst.msk [vmem:[#allocation2 + $0x50] sm:$0xff] %vm731_vm1, %v1005_v55  ;;  %1019 = vst.msk [vmem:[#allocation2 + $0x58] sm:$0xff] %vm731_vm1, %v1006_v56  ;;  %v959_v52 = vld [vmem:[%s5670_s22 + $0x8] sm:$0xff] }
  0xfd   : > { %1021 = vst.msk [vmem:[#allocation2 + $0x60] sm:$0xf] %vm1020_vm2, %v1007_v57 }
  0xfe   : > { %v1041_v60 = vld [vmem:[#allocation2 + $0x1] sm:$0xff] }
  0xff   : > { %v1042_v61 = vld [vmem:[#allocation2 + $0x9] sm:$0xff]  ;;  %v1022_v20 = vld [vmem:[#allocation2] sm:$0xff] }
 0x100   : > { %v1051_v62 = vpack.c.bf16 %v1042_v61, %v1041_v60  ;;  %v1045_v63 = vld [vmem:[#allocation2 + $0x21] sm:$0xff]  ;;  %v1046_v0 = vld [vmem:[#allocation2 + $0x29] sm:$0xff] }
 0x101   : > { %v1053_v2 = vpack.c.bf16 %v1046_v0, %v1045_v63  ;;  %v1043_v9 = vld [vmem:[#allocation2 + $0x11] sm:$0xff]  ;;  %v1044_v10 = vld [vmem:[#allocation2 + $0x19] sm:$0xff]  ;;  %v1023_v21 = vld [vmem:[#allocation2 + $0x8] sm:$0xff] }
 0x102   : > { %4384 = vmatmul.mubr.msk.bf16.vlgmr.msra.gmra.mrb[4].mxu0 %vm731_vm1, %v1051_v62  ;;  %v1047_v12 = vld [vmem:[#allocation2 + $0x31] sm:$0xff]  ;;  %v1048_v13 = vld [vmem:[#allocation2 + $0x39] sm:$0xff]  ;;  %v1052_v14 = vpack.c.bf16 %v1044_v10, %v1043_v9  ;;  %v1049_v16 = vld [vmem:[#allocation2 + $0x41] sm:$0xff]  ;;  %v1032_v23 = vpack.c.bf16 %v1023_v21, %v1022_v20 }
 0x103   : > { %4392 = vmatmul.mubr.msk.bf16.vlgmr.msra.gmra.mrb[4].mxu1 %vm731_vm1, %v1053_v2  ;;  %4387 = vmatprep.mubr.msk.bf16.mxu0 %vm5237_vm0, %v5238_v6  ;;  %v1054_v15 = vpack.c.bf16 %v1048_v13, %v1047_v12  ;;  %v1050_v17 = vld [vmem:[#allocation2 + $0x49] sm:$0x3f]  ;;  %v1024_v25 = vld [vmem:[#allocation2 + $0x10] sm:$0xff]  ;;  %v1025_v26 = vld [vmem:[#allocation2 + $0x18] sm:$0xff] }
 0x104   : > { %4404 = vmatpush3.bf16.msra.mxu1 %v5198_v1  ;;  %4395 = vmatprep.mubr.msk.bf16.mxu1 %vm5237_vm0, %v5238_v6  ;;  %v1055_v19 = vpack.c.bf16 %v1050_v17, %v1049_v16  ;;  %v1033_v27 = vpack.c.bf16 %v1025_v26, %v1024_v25  ;;  %v1026_v29 = vld [vmem:[#allocation2 + $0x20] sm:$0xff]  ;;  %v1027_v30 = vld [vmem:[#allocation2 + $0x28] sm:$0xff]  ;;  %v1028_v32 = vld [vmem:[#allocation2 + $0x30] sm:$0xff] }
 0x105   : > { %4853 = vmatpush3.bf16.msra.mxu0 %v4852_v4  ;;  %4405 = vmatprep.subr.bf16.mxu1 %v5238_v6  ;;  %v1034_v31 = vpack.c.bf16 %v1027_v30, %v1026_v29  ;;  %v1029_v33 = vld [vmem:[#allocation2 + $0x38] sm:$0xff]  ;;  %v1030_v35 = vld [vmem:[#allocation2 + $0x40] sm:$0xff]  ;;  %v1031_v36 = vld [vmem:[#allocation2 + $0x48] sm:$0x3f] }
 0x106   : > { %4854 = vmatprep.subr.bf16.mxu0 %v5236_v3  ;;  %v1035_v34 = vpack.c.bf16 %v1029_v33, %v1028_v32  ;;  %v1036_v37 = vpack.c.bf16 %v1031_v36, %v1030_v35  ;;  %v1261_v38 = vld [vmem:[#allocation2 + $0x2] sm:$0xff]  ;;  %v1262_v39 = vld [vmem:[#allocation2 + $0xa] sm:$0xff]  ;;  %v1263_v43 = vld [vmem:[#allocation2 + $0x12] sm:$0xff] }
 0x107   : > { %v1271_v41 = vpack.c.bf16 %v1262_v39, %v1261_v38  ;;  %v1264_v44 = vld [vmem:[#allocation2 + $0x1a] sm:$0xff]  ;;  %v1265_v47 = vld [vmem:[#allocation2 + $0x22] sm:$0xff]  ;;  %v1266_v48 = vld [vmem:[#allocation2 + $0x2a] sm:$0xff]  ;;  %v1401_v60 = vpack.c.bf16 %v1263_v43, %v1262_v39 }
 0x108   : > { %4406 = vmatpush3.bf16.msra.mxu1 %v5199_v8  ;;  %v1272_v45 = vpack.c.bf16 %v1264_v44, %v1263_v43  ;;  %v1273_v50 = vpack.c.bf16 %v1266_v48, %v1265_v47  ;;  %v1267_v53 = vld [vmem:[#allocation2 + $0x32] sm:$0xff]  ;;  %v1268_v54 = vld [vmem:[#allocation2 + $0x3a] sm:$0xff]  ;;  %v1269_v56 = vld [vmem:[#allocation2 + $0x42] sm:$0xff]  ;;  %v1402_v62 = vpack.c.bf16 %v1265_v47, %v1264_v44 }
 0x109   : > { %4856 = vmatpush3.bf16.msra.mxu0 %v4855_v11  ;;  %4427 = vmatprep.subr.bf16.mxu1 %v5238_v6  ;;  %v1274_v55 = vpack.c.bf16 %v1268_v54, %v1267_v53  ;;  %v1270_v57 = vld [vmem:[#allocation2 + $0x4a] sm:$0x3f]  ;;  %v1403_v63 = vpack.c.bf16 %v1267_v53, %v1266_v48  ;;  %v1404_v0 = vpack.c.bf16 %v1269_v56, %v1268_v54  ;;  %v1400_v2 = vld [vmem:[#allocation2 + $0x52] sm:$0x3f]  ;;  %v5207_v10 = vld [vmem:[%s6281_s8 + $0x58] sm:$0xff]   ;;  %v5239_v48 = vmov 0  }
 0x10a   : > { %4388 = vmatmul.mubr.msk.bf16.gmra.mrb[8].mxu0 %vm731_vm1, %v1052_v14  ;;  %4606 = vmatprep.subr.bf16.mxu0 %v5238_v6  ;;  %v1275_v58 = vpack.c.bf16 %v1270_v57, %v1269_v56  ;;  %v5205_v61 = vld [vmem:[%s6281_s8 + $0x48] sm:$0xff]   ;;  %v1522_v7 = vld [vmem:[#allocation2 + $0x13] sm:$0xff]  ;;  %v1523_v11 = vld [vmem:[#allocation2 + $0x1b] sm:$0xff] }
 0x10b   : > { %4396 = vmatmul.mubr.msk.bf16.gmra.mrb[8].mxu1 %vm731_vm1, %v1054_v15  ;;  %4603 = vmatprep.mubr.msk.f32.mxu0 %vm5237_vm0, %v5238_v6  ;;  %v1399_v1 = vld [vmem:[#allocation2 + $0x4a] sm:$0xff]  ;;  %v1526_v15 = vld [vmem:[#allocation2 + $0x33] sm:$0xff]  ;;  %v1527_v17 = vld [vmem:[#allocation2 + $0x3b] sm:$0xff] }
 0x10c   : > { %4399 = vmatprep.mubr.msk.bf16.mxu1 %vm5237_vm0, %v5238_v6  ;;  %v1405_v4 = vpack.c.bf16 %v1400_v2, %v1399_v1  ;;  %v1521_v5 = vld [vmem:[#allocation2 + $0xb] sm:$0xff]  ;;  %v1524_v12 = vld [vmem:[#allocation2 + $0x23] sm:$0xff]  ;;  %v1530_v21 = vld [vmem:[#allocation2 + $0x53] sm:$0x3f]  ;;  %5194 = vset.pattern.permute.xlu0 %v5239_v48 }
 0x10d   : > { %v5206_v8 = vld [vmem:[%s6281_s8 + $0x50] sm:$0xff]   ;;  %v1531_v9 = vpack.c.bf16 %v1522_v7, %v1521_v5  ;;  %v1532_v13 = vpack.c.bf16 %v1524_v12, %v1523_v11  ;;  %v5208_v25 = vld [vmem:[%s6281_s8 + $0x60] sm:$0xff]   ;;  %5195 = vset.pattern.permute.xlu1 %v5239_v48  ;;  %v963_v2 = vld [vmem:[%s5670_s22 + $0x28] sm:$0xff] }
 0x10e   : > { %v1525_v14 = vld [vmem:[#allocation2 + $0x2b] sm:$0xff]  ;;  %v1653_v29 = vld [vmem:[#allocation2 + $0x1c] sm:$0xff]  ;;  %v5617_v33 = vld [vmem:[#allocation2 + $0x34] sm:$0xff] }
 0x10f   : > { %v1533_v16 = vpack.c.bf16 %v1526_v15, %v1525_v14  ;;  %v1529_v20 = vld [vmem:[#allocation2 + $0x4b] sm:$0xff]  ;;  %v5624_v35 = vld [vmem:[#allocation2 + $0x3c] sm:$0xff] }
 0x110   : > { %v5608_v30 = vld [vmem:[#allocation2 + $0x24] sm:$0xff]  ;;  %v5615_v32 = vld [vmem:[#allocation2 + $0x2c] sm:$0xff]  ;;  %v971_v5 = vld [vmem:[%s6291_s18 + $0x18] sm:$0xff] }
 0x111   : > { %v5626_v36 = vld [vmem:[#allocation2 + $0x44] sm:$0xff]  ;;  %v960_v47 = vld [vmem:[%s5670_s22 + $0x10] sm:$0xff]  ;;  %v1792_v1 = vpack.c.bf16 %v5615_v32, %v5608_v30  ;;  %v975_v14 = vld [vmem:[%s6291_s18 + $0x38] sm:$0xff] }
 0x112   : > { %4604 = vmatmul.mubr.msk.f32.vlgmr.msra.gmra.mrb[12].mxu0 %vm731_vm1, %v2171_v18  ;;  %v1528_v18 = vld [vmem:[#allocation2 + $0x43] sm:$0xff]  ;;  %2277 = vperm.xlu1 %5195, %v960_v47   ;;  %v5210_v56 = vld [vmem:[%s6281_s8 + $0x70] sm:$0xff]  }
 0x113   : > { %4400 = vmatmul.mubr.msk.bf16.gmra.mrb[12].mxu1 %vm731_vm1, %v1055_v19  ;;  %4608 = vmatprep.mubr.msk.bf16.mxu0 %vm5237_vm0, %v5238_v6  ;;  %v1534_v19 = vpack.c.bf16 %v1528_v18, %v1527_v17  ;;  %v968_v54 = vld [vmem:[%s6291_s18] sm:$0xff]  ;;  %v973_v11 = vld [vmem:[%s6291_s18 + $0x28] sm:$0xff]  ;;  %v974_v12 = vld [vmem:[%s6291_s18 + $0x30] sm:$0xff] }
 0x114   : > { %4407 = vmatprep.mubr.msk.bf16.mxu1 %vm5237_vm0, %v5238_v6  ;;  %v972_v7 = vld [vmem:[%s6291_s18 + $0x20] sm:$0xff]  ;;  %v967_v18 = vld [vmem:[%s5670_s22 + $0x48] sm:$0x3f]  ;;  %v2044_v48 = vld [vmem:[#allocation2 + $0x2e] sm:$0xff] }
 0x115   : > { %v976_v15 = vld [vmem:[%s6291_s18 + $0x40] sm:$0xff] }
 0x116   : > { %2390 = vperm.xlu1 %5195, %v968_v54   ;;  %v1790_v17 = vld [vmem:[#allocation2 + $0x5c] sm:$0x3f]  ;;  %v2043_v47 = vld [vmem:[#allocation2 + $0x26] sm:$0xff] }
 0x117   : > { %v2046_v54 = vld [vmem:[#allocation2 + $0x3e] sm:$0xff] }
 0x11b   : > { %4408 = vmatmul.mubr.msk.bf16.vlgmr.msra.gmra.mrb[16].mxu1 %vm731_vm1, %v1032_v23  ;;  %v1651_v23 = vld [vmem:[#allocation2 + $0xc] sm:$0xff] }
 0x11c   : > { %4428 = vmatpush3.bf16.msra.mxu1 %v5200_v22  ;;  %4411 = vmatprep.mubr.msk.bf16.mxu1 %vm5237_vm0, %v5238_v6  ;;  %v1535_v22 = vpack.c.bf16 %v1530_v21, %v1529_v20  ;;  %v1911_v21 = vld [vmem:[#allocation2 + $0x15] sm:$0xff] }
 0x11d   : > { %4429 = vmatprep.subr.bf16.mxu1 %v5238_v6 }
 0x120   : > { %4430 = vmatpush3.bf16.msra.mxu1 %v5201_v24  ;;  %v5595_v24 = vld [vmem:[#allocation2 + $0x14] sm:$0xff] }
 0x121   : > { %4451 = vmatprep.subr.bf16.mxu1 %v5238_v6  ;;  %v1661_v26 = vpack.c.bf16 %v5595_v24, %v1651_v23  ;;  %v1791_v57 = vpack.c.bf16 %v1653_v29, %v5595_v24  ;;  %v5212_v23 = vld [vmem:[%s6281_s8 + $0x80] sm:$0xff]  }
 0x123   : > { %4412 = vmatmul.mubr.msk.bf16.gmra.mrb[20].mxu1 %vm731_vm1, %v1033_v27  ;;  %v5209_v27 = vld [vmem:[%s6281_s8 + $0x68] sm:$0xff]  }
 0x124   : > { %4415 = vmatprep.mubr.msk.bf16.mxu1 %vm5237_vm0, %v5238_v6 }
 0x12b   : > { %4416 = vmatmul.mubr.msk.bf16.gmra.mrb[4].mxu1 %vm731_vm1, %v1034_v31  ;;  %v1662_v31 = vpack.c.bf16 %v5608_v30, %v1653_v29  ;;  %v1915_v30 = vld [vmem:[#allocation2 + $0x35] sm:$0xff] }
 0x12c   : > { %4419 = vmatprep.mubr.msk.bf16.mxu1 %vm5237_vm0, %v5238_v6 }
 0x133   : > { %4420 = vmatmul.mubr.msk.bf16.gmra.mrb[8].mxu1 %vm731_vm1, %v1035_v34  ;;  %v1663_v34 = vpack.c.bf16 %v5617_v33, %v5615_v32 }
 0x134   : > { %4423 = vmatprep.mubr.msk.bf16.mxu1 %vm5237_vm0, %v5238_v6 }
 0x13b   : > { %4424 = vmatmul.mubr.msk.bf16.gmra.mrb[12].mxu1 %vm731_vm1, %v1036_v37  ;;  %v1664_v37 = vpack.c.bf16 %v5626_v36, %v5624_v35 }
 0x13c   : > { %4431 = vmatprep.mubr.msk.bf16.mxu1 %vm5237_vm0, %v5238_v6 }
 0x143   : > { %4432 = vmatmul.mubr.msk.bf16.vlgmr.msra.gmra.mrb[16].mxu1 %vm731_vm1, %v1271_v41  ;;  %v1660_v41 = vld [vmem:[#allocation2 + $0x54] sm:$0x3f] }
 0x144   : > { %4452 = vmatpush3.bf16.msra.mxu1 %v5202_v40  ;;  %4435 = vmatprep.mubr.msk.bf16.mxu1 %vm5237_vm0, %v5238_v6  ;;  %v5662_v40 = vld [vmem:[#allocation2 + $0x4c] sm:$0xff] }
 0x145   : > { %4453 = vmatprep.subr.bf16.mxu1 %v5238_v6  ;;  %v1665_v44 = vpack.c.bf16 %v1660_v41, %v5662_v40  ;;  %v2041_v41 = vld [vmem:[#allocation2 + $0x16] sm:$0xff] }
 0x148   : > { %4454 = vmatpush3.bf16.msra.mxu1 %v5203_v42 }
 0x149   : > { %4475 = vmatprep.subr.bf16.mxu1 %v5238_v6 }
 0x14b   : > { %4436 = vmatmul.mubr.msk.bf16.gmra.mrb[20].mxu1 %vm731_vm1, %v1272_v45  ;;  %v958_v45 = vld [vmem:[%s5670_s22] sm:$0xff] }
 0x14c   : > { %4439 = vmatprep.mubr.msk.bf16.mxu1 %vm5237_vm0, %v5238_v6  ;;  %2267 = vperm.xlu0 %5194, %v958_v45  }
 0x150   : > { %2272 = vperm.xlu0 %5194, %v959_v52   ;;  %v2045_v52 = vld [vmem:[#allocation2 + $0x36] sm:$0xff] }
 0x153   : > { %4440 = vmatmul.mubr.msk.bf16.gmra.mrb[4].mxu1 %vm731_vm1, %v1273_v50 }
 0x154   : > { %4443 = vmatprep.mubr.msk.bf16.mxu1 %vm5237_vm0, %v5238_v6 }
 0x15b   : > { %4444 = vmatmul.mubr.msk.bf16.gmra.mrb[8].mxu1 %vm731_vm1, %v1274_v55 }
 0x15c   : > { %4447 = vmatprep.mubr.msk.bf16.mxu1 %vm5237_vm0, %v5238_v6 }
 0x163   : > { %4448 = vmatmul.mubr.msk.bf16.gmra.mrb[12].mxu1 %vm731_vm1, %v1275_v58  ;;  %v961_v58 = vld [vmem:[%s5670_s22 + $0x18] sm:$0xff] }
 0x164   : > { %4455 = vmatprep.mubr.msk.bf16.mxu1 %vm5237_vm0, %v5238_v6  ;;  %2282 = vperm.xlu0 %5194, %v961_v58  }
 0x16b   : > { %4456 = vmatmul.mubr.msk.bf16.vlgmr.msra.gmra.mrb[16].mxu1 %vm731_vm1, %v1401_v60  ;;  %v5211_v60 = vld [vmem:[%s6281_s8 + $0x78] sm:$0xff]  }
 0x16c   : > { %4476 = vmatpush3.bf16.msra.mxu1 %v5204_v59  ;;  %4459 = vmatprep.mubr.msk.bf16.mxu1 %vm5237_vm0, %v5238_v6  ;;  %v962_v59 = vld [vmem:[%s5670_s22 + $0x20] sm:$0xff] }
 0x16d   : > { %4477 = vmatprep.subr.bf16.mxu1 %v5238_v6  ;;  %2287 = vperm.xlu1 %5195, %v962_v59   ;;  %v810_v59 = vld [vmem:[%s6308_s26] sm:$0x1]  ;;  %s6141_s26 = scalar_lea.vmem %s6293_s20, %s5632_s30 }
 0x170   : > { %4478 = vmatpush3.bf16.msra.mxu1 %v5205_v61 }
 0x171   : > { %4499 = vmatprep.subr.bf16.mxu1 %v5238_v6 }
 0x173   : > { %4460 = vmatmul.mubr.msk.bf16.gmra.mrb[20].mxu1 %vm731_vm1, %v1402_v62 }
 0x174   : > { %4463 = vmatprep.mubr.msk.bf16.mxu1 %vm5237_vm0, %v5238_v6 }
 0x17b   : > { %4464 = vmatmul.mubr.msk.bf16.gmra.mrb[4].mxu1 %vm731_vm1, %v1403_v63  ;;  %v969_v63 = vld [vmem:[%s6291_s18 + $0x8] sm:$0xff] }
 0x17c   : > { %4467 = vmatprep.mubr.msk.bf16.mxu1 %vm5237_vm0, %v5238_v6  ;;  %2395 = vperm.xlu0 %5194, %v969_v63   ;;  %v878_v63 = vadd.f32 %v5536_v46, %v810_v59 }
 0x180   : > { %2292 = vperm.xlu0 %5194, %v963_v2  }
 0x183   : > { %4468 = vmatmul.mubr.msk.bf16.gmra.mrb[8].mxu1 %vm731_vm1, %v1404_v0  ;;  %v970_v0 = vld [vmem:[%s6291_s18 + $0x10] sm:$0xff] }
 0x184   : > { %4471 = vmatprep.mubr.msk.bf16.mxu1 %vm5237_vm0, %v5238_v6  ;;  %2400 = vperm.xlu1 %5195, %v970_v0  }
 0x185   : > { %2405 = vperm.xlu0 %5194, %v971_v5  }
 0x18b   : > { %4472 = vmatmul.mubr.msk.bf16.gmra.mrb[12].mxu1 %vm731_vm1, %v1405_v4  ;;  %v964_v4 = vld [vmem:[%s5670_s22 + $0x30] sm:$0xff] }
 0x18c   : > { %4479 = vmatprep.mubr.msk.bf16.mxu1 %vm5237_vm0, %v5238_v6  ;;  %2297 = vperm.xlu1 %5195, %v964_v4   ;;  %v5214_v4 = vld [vmem:[%s6283_s10 + $0x8] sm:$0xff]  }
 0x18d   : > { %4607 = vmatpush3.bf16.msra.mxu0 %v5214_v4 }
 0x18e   : > { %4628 = vmatprep.subr.bf16.mxu0 %v5238_v6 }
 0x190   : > { %2410 = vperm.xlu1 %5195, %v972_v7  }
 0x193   : > { %4480 = vmatmul.mubr.msk.bf16.vlgmr.msra.gmra.mrb[16].mxu1 %vm731_vm1, %v1531_v9  ;;  %v965_v9 = vld [vmem:[%s5670_s22 + $0x38] sm:$0xff] }
 0x194   : > { %4500 = vmatpush3.bf16.msra.mxu1 %v5206_v8  ;;  %4483 = vmatprep.mubr.msk.bf16.mxu1 %vm5237_vm0, %v5238_v6  ;;  %v1793_v8 = vpack.c.bf16 %v5624_v35, %v5617_v33  ;;  %v1917_v33 = vld [vmem:[#allocation2 + $0x45] sm:$0xff] }
 0x195   : > { %4501 = vmatprep.subr.bf16.mxu1 %v5238_v6  ;;  %2302 = vperm.xlu0 %5194, %v965_v9  }
 0x198   : > { %4502 = vmatpush3.bf16.msra.mxu1 %v5207_v10  ;;  %v966_v10 = vld [vmem:[%s5670_s22 + $0x40] sm:$0xff]  ;;  %s6233_s22 = scalar_lea.vmem %s6292_s19, %s5632_s30 }
 0x199   : > { %4523 = vmatprep.subr.bf16.mxu1 %v5238_v6  ;;  %2307 = vperm.xlu1 %5195, %v966_v10  }
 0x19a   : > { %2415 = vperm.xlu0 %5194, %v973_v11  }
 0x19b   : > { %4484 = vmatmul.mubr.msk.bf16.gmra.mrb[20].mxu1 %vm731_vm1, %v1532_v13  ;;  %v1794_v13 = vpack.c.bf16 %v5662_v40, %v5626_v36  ;;  %v1920_v36 = vld [vmem:[#allocation2 + $0x5d] sm:$0x3f]  ;;  %v3567_v40 = vld [vmem:[%s6284_s11 + $0x8] sm:$0xff] }
 0x19c   : > { %4487 = vmatprep.mubr.msk.bf16.mxu1 %vm5237_vm0, %v5238_v6 }
 0x19d   : > { %2420 = vperm.xlu1 %5195, %v974_v12  }
 0x19e   : > { %2425 = vperm.xlu0 %5194, %v975_v14  }
 0x1a1   : > { %2430 = vperm.xlu1 %5195, %v976_v15  }
 0x1a2   : > { %2312 = vperm.xlu0 %5194, %v967_v18  }
 0x1a3   : > { %4488 = vmatmul.mubr.msk.bf16.gmra.mrb[4].mxu1 %vm731_vm1, %v1533_v16  ;;  %v1789_v16 = vld [vmem:[#allocation2 + $0x54] sm:$0xff] }
 0x1a4   : > { %4491 = vmatprep.mubr.msk.bf16.mxu1 %vm5237_vm0, %v5238_v6  ;;  %v1795_v20 = vpack.c.bf16 %v1790_v17, %v1789_v16 }
 0x1ab   : > { %4492 = vmatmul.mubr.msk.bf16.gmra.mrb[8].mxu1 %vm731_vm1, %v1534_v19  ;;  %v977_v19 = vld [vmem:[%s6291_s18 + $0x48] sm:$0x3f] }
 0x1ac   : > { %4495 = vmatprep.mubr.msk.bf16.mxu1 %vm5237_vm0, %v5238_v6  ;;  %2435 = vperm.xlu1 %5195, %v977_v19  }
 0x1b3   : > { %4496 = vmatmul.mubr.msk.bf16.gmra.mrb[12].mxu1 %vm731_vm1, %v1535_v22  ;;  %v1912_v22 = vld [vmem:[#allocation2 + $0x1d] sm:$0xff] }
 0x1b4   : > { %4503 = vmatprep.mubr.msk.bf16.mxu1 %vm5237_vm0, %v5238_v6  ;;  %v1921_v24 = vpack.c.bf16 %v1912_v22, %v1911_v21 }
 0x1bb   : > { %4504 = vmatmul.mubr.msk.bf16.vlgmr.msra.gmra.mrb[16].mxu1 %vm731_vm1, %v1661_v26  ;;  %v1913_v26 = vld [vmem:[#allocation2 + $0x25] sm:$0xff] }
 0x1bc   : > { %4524 = vmatpush3.bf16.msra.mxu1 %v5208_v25  ;;  %4507 = vmatprep.mubr.msk.bf16.mxu1 %vm5237_vm0, %v5238_v6  ;;  %v5213_v25 = vld [vmem:[%s6281_s8 + $0x88] sm:$0xff]  }
 0x1bd   : > { %4525 = vmatprep.subr.bf16.mxu1 %v5238_v6 }
 0x1c0   : > { %4526 = vmatpush3.bf16.msra.mxu1 %v5209_v27  ;;  %v1914_v27 = vld [vmem:[#allocation2 + $0x2d] sm:$0xff] }
 0x1c1   : > { %4547 = vmatprep.subr.bf16.mxu1 %v5238_v6  ;;  %v1922_v29 = vpack.c.bf16 %v1914_v27, %v1913_v26 }
 0x1c3   : > { %4508 = vmatmul.mubr.msk.bf16.gmra.mrb[20].mxu1 %vm731_vm1, %v1662_v31  ;;  %v1916_v31 = vld [vmem:[#allocation2 + $0x3d] sm:$0xff] }
 0x1c4   : > { %4511 = vmatprep.mubr.msk.bf16.mxu1 %vm5237_vm0, %v5238_v6  ;;  %v1923_v32 = vpack.c.bf16 %v1916_v31, %v1915_v30 }
 0x1cb   : > { %4512 = vmatmul.mubr.msk.bf16.gmra.mrb[4].mxu1 %vm731_vm1, %v1663_v34  ;;  %v1918_v34 = vld [vmem:[#allocation2 + $0x4d] sm:$0xff]  ;;  %v5809_v46 = vpop.permute.xlu0 %2267 }
 0x1cc   : > { %4515 = vmatprep.mubr.msk.bf16.mxu1 %vm5237_vm0, %v5238_v6  ;;  %v1924_v35 = vpack.c.bf16 %v1918_v34, %v1917_v33 }
 0x1cf   : > { %v5811_v5 = vpop.permute.xlu0 %2272 }
 0x1d3   : > { %4516 = vmatmul.mubr.msk.bf16.gmra.mrb[8].mxu1 %vm731_vm1, %v1664_v37 }
 0x1d4   : > { %4519 = vmatprep.mubr.msk.bf16.mxu1 %vm5237_vm0, %v5238_v6 }
 0x1d5   : > { %v5636_v38 = vpop.f32.mrb[4].mxu0 }
 0x1d6   : > { %v4385_v39 = vpop.f32.mrb[5].mxu0 }
 0x1d7   : > { %v5664_v42 = vpop.f32.mrb[6].mxu0  ;;  %v3566_v39 = vld [vmem:[%s6284_s11] sm:$0xff] }
 0x1d8   : > { %v4386_v43 = vpop.f32.mrb[7].mxu0 }
 0x1d9   : > { %v2042_v43 = vld [vmem:[#allocation2 + $0x1e] sm:$0xff] }
 0x1da   : > { %v2051_v45 = vpack.c.bf16 %v2042_v43, %v2041_v41 }
 0x1db   : > { %4520 = vmatmul.mubr.msk.bf16.gmra.mrb[12].mxu1 %vm731_vm1, %v1665_v44  ;;  %v4858_v44 = vpack.c.bf16 %v3567_v40, %v3566_v39 }
 0x1dc   : > { %4527 = vmatprep.mubr.msk.bf16.mxu1 %vm5237_vm0, %v5238_v6 }
 0x1dd   : > { %v5678_v49 = vpop.f32.mrb[8].mxu0 }
 0x1de   : > { %v4389_v50 = vpop.f32.mrb[9].mxu0 }
 0x1df   : > { %v5681_v53 = vpop.f32.mrb[10].mxu0  ;;  %v2052_v50 = vpack.c.bf16 %v2044_v48, %v2043_v47 }
 0x1e0   : > { %v4390_v55 = vpop.f32.mrb[11].mxu0 }
 0x1e1   : > { %v2053_v55 = vpack.c.bf16 %v2046_v54, %v2045_v52 }
 0x1e3   : > { %4528 = vmatmul.mubr.msk.bf16.vlgmr.msra.gmra.mrb[16].mxu1 %vm731_vm1, %v1791_v57  ;;  %v2048_v57 = vld [vmem:[#allocation2 + $0x4e] sm:$0xff]  ;;  %v5816_v9 = vpop.permute.xlu0 %2282 }
 0x1e4   : > { %4548 = vmatpush3.bf16.msra.mxu1 %v5210_v56  ;;  %4531 = vmatprep.mubr.msk.bf16.mxu1 %vm5237_vm0, %v5238_v6  ;;  %v2047_v56 = vld [vmem:[#allocation2 + $0x46] sm:$0xff] }
 0x1e5   : > { %v5698_v61 = vpop.f32.mrb[12].mxu0  ;;  %4549 = vmatprep.subr.bf16.mxu1 %v5238_v6  ;;  %v2054_v58 = vpack.c.bf16 %v2048_v57, %v2047_v56 }
 0x1e6   : > { %v4605_v62 = vpop.f32.mrb[13].mxu0  ;;  %v2246_v7 = vadd.f32 1e-08, %v5698_v61 }
 0x1e7   : > { %v2050_v62 = vld [vmem:[#allocation2 + $0x5e] sm:$0x3f] }
 0x1e8   : > { %4550 = vmatpush3.bf16.msra.mxu1 %v5211_v60  ;;  %v2049_v60 = vld [vmem:[#allocation2 + $0x56] sm:$0xff]  ;;  %5224 = vrsqrt.f32 %v2246_v7 }
 0x1e9   : > { %4571 = vmatprep.subr.bf16.mxu1 %v5238_v6  ;;  %v2055_v0 = vpack.c.bf16 %v2050_v62, %v2049_v60 }
 0x1eb   : > { %4532 = vmatmul.mubr.msk.bf16.gmra.mrb[20].mxu1 %vm731_vm1, %v1792_v1  ;;  %v881_v1 = vadd.f32 1.0, %v878_v63 }
 0x1ec   : > { %4535 = vmatprep.mubr.msk.bf16.mxu1 %vm5237_vm0, %v5238_v6 }
 0x1ed   : > { %v3565_v2 = vmul.f32 %v881_v1, %v881_v1  ;;  %v5858_v43 = vrot.slane %v881_v1, %v5438_v28 }
 0x1f2   : > { %v5225_v12 = vpop.eup %5224 }
 0x1f3   : > { %4536 = vmatmul.mubr.msk.bf16.gmra.mrb[4].mxu1 %vm731_vm1, %v1793_v8  ;;  %v5814_v8 = vpop.permute.xlu1 %2277  ;;  %v5830_v61 = vrot.slane %v5225_v12, %v5438_v28 }
 0x1f4   : > { %4539 = vmatprep.mubr.msk.bf16.mxu1 %vm5237_vm0, %v5238_v6 }
 0x1f7   : > { %v5818_v10 = vpop.permute.xlu1 %2390 }
 0x1fb   : > { %4540 = vmatmul.mubr.msk.bf16.gmra.mrb[8].mxu1 %vm731_vm1, %v1794_v13  ;;  %v5820_v11 = vpop.permute.xlu0 %2395  ;;  %v5825_v13 = vld [vmem:[%s6286_s13] ss:$0 sm:$0xff]  ;;  %v5827_v14 = vpop.permute.xlu1 %2287 }
 0x1fc   : > { %4543 = vmatprep.mubr.msk.bf16.mxu1 %vm5237_vm0, %v5238_v6  ;;  %v2321_v16 = vmul.f32 %v5825_v13, %v5809_v46  ;;  %v2324_v52 = vmul.f32 %v5825_v13, %v5816_v9  ;;  %v2325_v60 = vmul.f32 %v5825_v13, %v5827_v14 }
 0x1ff   : > { %v5834_v17 = vpop.permute.xlu0 %2292 }
 0x200   : > { %v2326_v7 = vmul.f32 %v5825_v13, %v5834_v17 }
 0x203   : > { %4544 = vmatmul.mubr.msk.bf16.gmra.mrb[12].mxu1 %vm731_vm1, %v1795_v20 }
 0x204   : > { %4551 = vmatprep.mubr.msk.bf16.mxu1 %vm5237_vm0, %v5238_v6 }
 0x20b   : > { %4552 = vmatmul.mubr.msk.bf16.vlgmr.msra.gmra.mrb[16].mxu1 %vm731_vm1, %v1921_v24  ;;  %v5842_v24 = vld [vmem:[%s6287_s14] ss:$0 sm:$0xff] }
 0x20c   : > { %4572 = vmatpush3.bf16.msra.mxu1 %v5212_v23  ;;  %4555 = vmatprep.mubr.msk.bf16.mxu1 %vm5237_vm0, %v5238_v6 }
 0x20d   : > { %4573 = vmatprep.subr.bf16.mxu1 %v5238_v6 }
 0x210   : > { %4574 = vmatpush3.bf16.msra.mxu1 %v5213_v25  ;;  %v2322_v25 = vmul.f32 %v5825_v13, %v5811_v5 }
 0x211   : > { %4857 = vmatprep.subr.bf16.mxu1 %v5236_v3  ;;  %v1919_v3 = vld [vmem:[#allocation2 + $0x55] sm:$0xff] }
 0x212   : > { %v1925_v37 = vpack.c.bf16 %v1920_v36, %v1919_v3  ;;  %v2323_v3 = vmul.f32 %v5825_v13, %v5814_v8 }
 0x213   : > { %4556 = vmatmul.mubr.msk.bf16.gmra.mrb[20].mxu1 %vm731_vm1, %v1922_v29  ;;  %v5847_v29 = vpop.permute.xlu1 %2400 }
 0x214   : > { %4559 = vmatprep.mubr.msk.bf16.mxu1 %vm5237_vm0, %v5238_v6 }
 0x21b   : > { %4560 = vmatmul.mubr.msk.bf16.gmra.mrb[4].mxu1 %vm731_vm1, %v1923_v32 }
 0x21c   : > { %4563 = vmatprep.mubr.msk.bf16.mxu1 %vm5237_vm0, %v5238_v6 }
 0x223   : > { %4564 = vmatmul.mubr.msk.bf16.gmra.mrb[8].mxu1 %vm731_vm1, %v1924_v35 }
 0x224   : > { %4567 = vmatprep.mubr.msk.bf16.mxu1 %vm5237_vm0, %v5238_v6 }
 0x22b   : > { %4568 = vmatmul.mubr.msk.bf16.gmra.mrb[12].mxu1 %vm731_vm1, %v1925_v37 }
 0x22c   : > { %4575 = vmatprep.mubr.msk.bf16.mxu1 %vm5237_vm0, %v5238_v6 }
 0x233   : > { %4576 = vmatmul.mubr.msk.bf16.vlgmr.msra.gmra.mrb[16].mxu1 %vm731_vm1, %v2051_v45 }
 0x234   : > { %4579 = vmatprep.mubr.msk.bf16.mxu1 %vm5237_vm0, %v5238_v6  ;;  %4859 = vmatpush3.bf16.msra.mxu1 %v4858_v44  ;;  %v5860_v44 = vpop.permute.xlu1 %2297 }
 0x235   : > { %4811 = vmatprep.subr.bf16.mxu1 %v5238_v6 }
 0x238   : > { %v5877_v1 = vpop.permute.xlu1 %2410 }
 0x23b   : > { %4580 = vmatmul.mubr.msk.bf16.gmra.mrb[20].mxu1 %vm731_vm1, %v2052_v50 }
 0x23c   : > { %4583 = vmatprep.mubr.msk.bf16.mxu1 %vm5237_vm0, %v5238_v6 }
 0x243   : > { %4584 = vmatmul.mubr.msk.bf16.gmra.mrb[4].mxu1 %vm731_vm1, %v2053_v55 }
 0x244   : > { %4587 = vmatprep.mubr.msk.bf16.mxu1 %vm5237_vm0, %v5238_v6 }
 0x24b   : > { %4588 = vmatmul.mubr.msk.bf16.gmra.mrb[8].mxu1 %vm731_vm1, %v2054_v58 }
 0x24c   : > { %4591 = vmatprep.mubr.msk.bf16.mxu1 %vm5237_vm0, %v5238_v6 }
 0x253   : > { %4592 = vmatmul.mubr.msk.bf16.gmra.mrb[12].mxu1 %vm731_vm1, %v2055_v0 }
 0x254   : > { %4808 = vmatprep.mubr.msk.f32.mxu1 %vm5237_vm0, %v5238_v6 }
 0x25b   : > { %4809 = vmatmul.mubr.msk.f32.vlgmr.msra.gmra.mrb[2].mxu1 %vm2448_vm3, %v3565_v2 }
 0x25c   : > { %4813 = vmatprep.mubr.msk.bf16.mxu1 %vm5237_vm0, %v5238_v6 }
 0x306   : > { %v2122_v15 = vpop.f32.mrb[16].mxu1 }
 0x307   : > { %v4864_v18 = vadd.f32 %v2122_v15, %v5636_v38  ;;  %v4577_v19 = vpop.f32.mrb[17].mxu1  ;;  %v5849_v38 = vpop.permute.xlu0 %2405 }
 0x308   : > { %v2125_v20 = vpop.f32.mrb[18].mxu1 }
 0x309   : > { %v2254_v21 = vmul.f32 %v4864_v18, %v5830_v61  ;;  %v4865_v22 = vadd.f32 %v2125_v20, %v5664_v42  ;;  %v4578_v23 = vpop.f32.mrb[19].mxu1 }
 0x30b   : > { %v2331_v26 = vadd.f32 %v2321_v16, %v2254_v21  ;;  %v2255_v27 = vmul.f32 %v4865_v22, %v5830_v61  ;;  %v5864_v47 = vpop.permute.xlu0 %2302 }
 0x30d   : > { %v2348_v30 = vadd.f32 %v5842_v24, %v2331_v26  ;;  %v2332_v31 = vadd.f32 %v2322_v25, %v2255_v27  ;;  %v2505_v25 = vld [vmem:[#allocation3 + $0x1] sm:$0xff] }
 0x30e   : > { %v2130_v42 = vpop.f32.mrb[20].mxu1 }
 0x30f   : > { %vm2358_vm5 = vcmp.ge.f32.partialorder %v2348_v30, 0.0  ;;  %v2368_v32 = vmul.f32 0.2, %v2348_v30  ;;  %v2349_v33 = vadd.f32 %v5842_v24, %v2332_v31  ;;  %v4866_v34 = vadd.f32 %v2130_v42, %v5678_v49  ;;  %v4581_v35 = vpop.f32.mrb[21].mxu1  ;;  %v5883_v12 = vpop.permute.xlu0 %2415 }
 0x310   : > { %v2133_v36 = vpop.f32.mrb[22].mxu1 }
 0x311   : > { %v2378_v37 = vsel %vm2358_vm5, %v2348_v30, %v2368_v32  ;;  %vm2359_vm6 = vcmp.ge.f32.partialorder %v2349_v33, 0.0  ;;  %v2369_v39 = vmul.f32 0.2, %v2349_v33  ;;  %v2256_v40 = vmul.f32 %v4866_v34, %v5830_v61  ;;  %v4582_v41 = vpop.f32.mrb[23].mxu1  ;;  %v5894_v34 = vpop.permute.xlu1 %2307 }
 0x312   : > { %v2438_v45 = vmul.f32 %v5818_v10, %v2378_v37  ;;  %v4867_v49 = vadd.f32 %v2133_v36, %v5681_v53 }
 0x313   : > { %v2379_v48 = vsel %vm2359_vm6, %v2349_v33, %v2369_v39  ;;  %v2333_v50 = vadd.f32 %v2323_v3, %v2256_v40  ;;  %v5215_v33 = vld [vmem:[%s6283_s10] sm:$0xff]   ;;  %v5897_v36 = vpop.permute.xlu0 %2425 }
 0x314   : > { %v2467_v54 = vmul.f32 %v5858_v43, %v2438_v45  ;;  %v2439_v55 = vmul.f32 %v5820_v11, %v2379_v48  ;;  %v2257_v56 = vmul.f32 %v4867_v49, %v5830_v61  ;;  %v2327_v45 = vmul.f32 %v5825_v13, %v5860_v44 }
 0x315   : > { %v2350_v57 = vadd.f32 %v5842_v24, %v2333_v50 }
 0x316   : > { %2477 = vst.msk [vmem:[#allocation3 + $0xb] sm:$0xff] %vm2448_vm3, %v2467_v54  ;;  %v2468_v58 = vmul.f32 %v5858_v43, %v2439_v55  ;;  %v2334_v53 = vadd.f32 %v2324_v52, %v2257_v56  ;;  %v2138_v59 = vpop.f32.mrb[4].mxu1  ;;  %v2328_v52 = vmul.f32 %v5825_v13, %v5864_v47 }
 0x317   : > { %vm2360_vm7 = vcmp.ge.f32.partialorder %v2350_v57, 0.0  ;;  %v2370_v62 = vmul.f32 0.2, %v2350_v57  ;;  %v2258_v63 = vmul.f32 %v5830_v61, %v2138_v59  ;;  %v4585_v0 = vpop.f32.mrb[5].mxu1 }
 0x318   : > { %2478 = vst.msk [vmem:[#allocation3 + $0x13] sm:$0xff] %vm2448_vm3, %v2468_v58  ;;  %v2351_v2 = vadd.f32 %v5842_v24, %v2334_v53  ;;  %v2141_v4 = vpop.f32.mrb[6].mxu1  ;;  %v5919_v0 = vpop.permute.xlu0 %2312 }
 0x319   : > { %v2380_v15 = vsel %vm2360_vm7, %v2350_v57, %v2370_v62  ;;  %v2335_v16 = vadd.f32 %v2325_v60, %v2258_v63  ;;  %v2259_v18 = vmul.f32 %v5830_v61, %v2141_v4  ;;  %v4586_v19 = vpop.f32.mrb[7].mxu1  ;;  %v5917_v63 = vpop.permute.xlu1 %2420 }
 0x31a   : > { %v2440_v20 = vmul.f32 %v5847_v29, %v2380_v15  ;;  %vm2361_vm8 = vcmp.ge.f32.partialorder %v2351_v2, 0.0  ;;  %v2371_v21 = vmul.f32 0.2, %v2351_v2  ;;  %v2329_v19 = vmul.f32 %v5825_v13, %v5894_v34 }
 0x31b   : > { %v2352_v22 = vadd.f32 %v5842_v24, %v2335_v16  ;;  %v2336_v23 = vadd.f32 %v2326_v7, %v2259_v18 }
 0x31c   : > { %v2469_v26 = vmul.f32 %v5858_v43, %v2440_v20  ;;  %v2381_v27 = vsel %vm2361_vm8, %v2351_v2, %v2371_v21 }
 0x31d   : > { %v2441_v30 = vmul.f32 %v5849_v38, %v2381_v27  ;;  %vm2362_vm9 = vcmp.ge.f32.partialorder %v2352_v22, 0.0  ;;  %v2372_v31 = vmul.f32 0.2, %v2352_v22  ;;  %v2353_v42 = vadd.f32 %v5842_v24, %v2336_v23  ;;  %v2506_v32 = vld [vmem:[#allocation3 + $0x9] sm:$0xff] }
 0x31e   : > { %2479 = vst.msk [vmem:[#allocation3 + $0x1b] sm:$0xff] %vm2448_vm3, %v2469_v26  ;;  %v2146_v35 = vpop.f32.mrb[8].mxu1  ;;  %v2515_v3 = vpack.c.bf16 %v2506_v32, %v2505_v25  ;;  %v2330_v23 = vmul.f32 %v5825_v13, %v5919_v0 }
 0x31f   : > { %v2470_v37 = vmul.f32 %v5858_v43, %v2441_v30  ;;  %v2382_v39 = vsel %vm2362_vm9, %v2352_v22, %v2372_v31  ;;  %vm2363_vm10 = vcmp.ge.f32.partialorder %v2353_v42, 0.0  ;;  %v2373_v40 = vmul.f32 0.2, %v2353_v42  ;;  %v4589_v41 = vpop.f32.mrb[9].mxu1  ;;  %v2507_v4 = vld [vmem:[#allocation3 + $0x11] sm:$0xff] }
 0x320   : > { %v2442_v49 = vmul.f32 %v5877_v1, %v2382_v39  ;;  %v2260_v48 = vmul.f32 %v5830_v61, %v2146_v35  ;;  %v2149_v50 = vpop.f32.mrb[10].mxu1  ;;  %4609 = vmatmul.mubr.msk.bf16.vlgmr.msra.gmra.mrb[16].mxu0 %vm2448_vm3, %v2515_v3  ;;  %v5934_v35 = vpop.permute.xlu1 %2430 }
 0x321   : > { %2480 = vst.msk [vmem:[#allocation3 + $0x23] sm:$0xff] %vm2448_vm3, %v2470_v37  ;;  %v2383_v54 = vsel %vm2363_vm10, %v2353_v42, %v2373_v40  ;;  %v2261_v55 = vmul.f32 %v5830_v61, %v2149_v50  ;;  %4629 = vmatpush3.bf16.msra.mxu0 %v5215_v33  ;;  %v4590_v56 = vpop.f32.mrb[11].mxu1  ;;  %4612 = vmatprep.mubr.msk.bf16.mxu0 %vm5237_vm0, %v5238_v6 }
 0x322   : > { %v2471_v57 = vmul.f32 %v5858_v43, %v2442_v49  ;;  %v2443_v58 = vmul.f32 %v5883_v12, %v2383_v54  ;;  %v2337_v53 = vadd.f32 %v2327_v45, %v2260_v48  ;;  %4650 = vmatprep.subr.bf16.mxu0 %v5238_v6 }
 0x323   : > { %v2338_v59 = vadd.f32 %v2328_v52, %v2261_v55 }
 0x324   : > { %2481 = vst.msk [vmem:[#allocation3 + $0x2b] sm:$0xff] %vm2448_vm3, %v2471_v57  ;;  %v2472_v60 = vmul.f32 %v5858_v43, %v2443_v58  ;;  %v2354_v62 = vadd.f32 %v5842_v24, %v2337_v53  ;;  %v5946_v56 = vpop.permute.xlu1 %2435 }
 0x325   : > { %v2355_v2 = vadd.f32 %v5842_v24, %v2338_v59  ;;  %v2508_v7 = vld [vmem:[#allocation3 + $0x19] sm:$0xff] }
 0x326   : > { %2482 = vst.msk [vmem:[#allocation3 + $0x33] sm:$0xff] %vm2448_vm3, %v2472_v60  ;;  %vm2364_vm11 = vcmp.ge.f32.partialorder %v2354_v62, 0.0  ;;  %v2374_v15 = vmul.f32 0.2, %v2354_v62  ;;  %v2154_v16 = vpop.f32.mrb[12].mxu1  ;;  %v2516_v18 = vpack.c.bf16 %v2508_v7, %v2507_v4 }
 0x327   : > { %vm2365_vm12 = vcmp.ge.f32.partialorder %v2355_v2, 0.0  ;;  %v2375_v20 = vmul.f32 0.2, %v2355_v2  ;;  %v2262_v21 = vmul.f32 %v5830_v61, %v2154_v16  ;;  %v4593_v22 = vpop.f32.mrb[13].mxu1  ;;  %v5216_v16 = vld [vmem:[%s6283_s10 + $0x10] sm:$0xff]  }
 0x328   : > { %v2384_v25 = vsel %vm2364_vm11, %v2354_v62, %v2374_v15  ;;  %v2157_v26 = vpop.f32.mrb[14].mxu1  ;;  %4613 = vmatmul.mubr.msk.bf16.gmra.mrb[20].mxu0 %vm2448_vm3, %v2516_v18  ;;  %v2509_v45 = vld [vmem:[#allocation3 + $0x21] sm:$0xff] }
 0x329   : > { %v2444_v27 = vmul.f32 %v5917_v63, %v2384_v25  ;;  %v2385_v30 = vsel %vm2365_vm12, %v2355_v2, %v2375_v20  ;;  %v2339_v31 = vadd.f32 %v2329_v19, %v2262_v21  ;;  %v2263_v42 = vmul.f32 %v5830_v61, %v2157_v26  ;;  %v4594_v32 = vpop.f32.mrb[15].mxu1  ;;  %4616 = vmatprep.mubr.msk.bf16.mxu0 %vm5237_vm0, %v5238_v6  ;;  %v2488_v15 = vld [vmem:[#allocation3] sm:$0xff]  ;;  %v2491_v19 = vld [vmem:[#allocation3 + $0x18] sm:$0xff]  ;;  %v2490_v20 = vld [vmem:[#allocation3 + $0x10] sm:$0xff] }
 0x32a   : > { %v2445_v33 = vmul.f32 %v5897_v36, %v2385_v30  ;;  %v2499_v21 = vpack.c.bf16 %v2491_v19, %v2490_v20  ;;  %v2958_v19 = vld [vmem:[#allocation3 + $0x23] sm:$0xff]  ;;  %v2957_v20 = vld [vmem:[#allocation3 + $0x1b] sm:$0xff] }
 0x32b   : > { %v2473_v13 = vmul.f32 %v5858_v43, %v2444_v27  ;;  %v2356_v3 = vadd.f32 %v5842_v24, %v2339_v31  ;;  %v2340_v37 = vadd.f32 %v2330_v23, %v2263_v42  ;;  %v2510_v39 = vld [vmem:[#allocation3 + $0x29] sm:$0xff]  ;;  %v2492_v23 = vld [vmem:[#allocation3 + $0x20] sm:$0xff] }
 0x32c   : > { %v2474_v40 = vmul.f32 %v5858_v43, %v2445_v33  ;;  %v2517_v48 = vpack.c.bf16 %v2510_v39, %v2509_v45  ;;  %v2493_v22 = vld [vmem:[#allocation3 + $0x28] sm:$0xff]  ;;  %v2714_v39 = vld [vmem:[#allocation3 + $0x1a] sm:$0xff] }
 0x32d   : > { %2483 = vst.msk [vmem:[#allocation3 + $0x3b] sm:$0xff] %vm2448_vm3, %v2473_v13  ;;  %vm2366_vm13 = vcmp.ge.f32.partialorder %v2356_v3, 0.0  ;;  %v2376_v61 = vmul.f32 0.2, %v2356_v3  ;;  %v2357_v41 = vadd.f32 %v5842_v24, %v2340_v37  ;;  %v2511_v60 = vld [vmem:[#allocation3 + $0x31] sm:$0xff]  ;;  %v2500_v25 = vpack.c.bf16 %v2493_v22, %v2492_v23  ;;  %v2711_v33 = vld [vmem:[#allocation3 + $0x2] sm:$0xff] }
 0x32e   : > { %2484 = vst.msk [vmem:[#allocation3 + $0x43] sm:$0xff] %vm2448_vm3, %v2474_v40  ;;  %v5942_v49 = vpop.f32.mrb[2].mxu1  ;;  %v2494_v27 = vld [vmem:[#allocation3 + $0x30] sm:$0xff]  ;;  %v2715_v45 = vld [vmem:[#allocation3 + $0x22] sm:$0xff] }
 0x32f   : > { %v2386_v50 = vsel %vm2366_vm13, %v2356_v3, %v2376_v61  ;;  %vm2367_vm14 = vcmp.ge.f32.partialorder %v2357_v41, 0.0  ;;  %v2377_v52 = vmul.f32 0.2, %v2357_v41  ;;  %v4810_v54 = vpop.f32.mrb[3].mxu1  ;;  %v2712_v13 = vld [vmem:[#allocation3 + $0xa] sm:$0xff]  ;;  %v2713_v40 = vld [vmem:[#allocation3 + $0x12] sm:$0xff] }
 0x330   : > { %v2446_v55 = vmul.f32 %v5934_v35, %v2386_v50  ;;  %4617 = vmatmul.mubr.msk.bf16.gmra.mrb[24].mxu0 %vm2448_vm3, %v2517_v48  ;;  %v5217_v3 = vld [vmem:[%s6283_s10 + $0x18] sm:$0xff]   ;;  %v2721_v37 = vpack.c.bf16 %v2712_v13, %v2711_v33  ;;  %v2722_v61 = vpack.c.bf16 %v2714_v39, %v2713_v40 }
 0x331   : > { %v2387_v57 = vsel %vm2367_vm14, %v2357_v41, %v2377_v52  ;;  %4620 = vmatprep.mubr.msk.bf16.mxu0 %vm5237_vm0, %v5238_v6  ;;  %v2716_v41 = vld [vmem:[#allocation3 + $0x2a] sm:$0xff]  ;;  %v2717_v52 = vld [vmem:[#allocation3 + $0x32] sm:$0xff] }
 0x332   : > { %v2475_v24 = vmul.f32 %v5858_v43, %v2446_v55  ;;  %v2447_v58 = vmul.f32 %v5946_v56, %v2387_v57  ;;  %v2723_v48 = vpack.c.bf16 %v2716_v41, %v2715_v45  ;;  %v2960_v22 = vld [vmem:[#allocation3 + $0x33] sm:$0xff]  ;;  %v2959_v23 = vld [vmem:[#allocation3 + $0x2b] sm:$0xff] }
 0x333   : > { %v3078_v33 = vld [vmem:[#allocation3 + $0x14] sm:$0xff] }
 0x334   : > { %2485 = vst.msk [vmem:[#allocation3 + $0x4b] sm:$0xff] %vm2448_vm3, %v2475_v24  ;;  %v2476_v53 = vmul.f32 %v5858_v43, %v2447_v58  ;;  %v2512_v59 = vld [vmem:[#allocation3 + $0x39] sm:$0xff]  ;;  %v2489_v43 = vld [vmem:[#allocation3 + $0x8] sm:$0xff] }
 0x335   : > { %v2518_v62 = vpack.c.bf16 %v2512_v59, %v2511_v60  ;;  %v2513_v4 = vld [vmem:[#allocation3 + $0x41] sm:$0xff]  ;;  %v2498_v18 = vpack.c.bf16 %v2489_v43, %v2488_v15  ;;  %v2495_v26 = vld [vmem:[#allocation3 + $0x38] sm:$0xff]  ;;  %v2844_v59 = vpack.c.bf16 %v2715_v45, %v2714_v39  ;;  %v2845_v60 = vpack.c.bf16 %v2717_v52, %v2716_v41  ;;  %v2955_v43 = vld [vmem:[#allocation3 + $0xb] sm:$0xff] }
 0x336   : > { %2487 = vst.msk [vmem:[#allocation3 + $0x53] sm:$0x3f] %vm2486_vm15, %v2476_v53  ;;  %v2501_v30 = vpack.c.bf16 %v2495_v26, %v2494_v27  ;;  %v2496_v42 = vld [vmem:[#allocation3 + $0x40] sm:$0xff]  ;;  %v5218_v58 = vld [vmem:[%s6283_s10 + $0x20] sm:$0xff]   ;;  %v2843_v53 = vpack.c.bf16 %v2713_v40, %v2712_v13  ;;  %v3077_v13 = vld [vmem:[#allocation3 + $0xc] sm:$0xff] }
 0x337   : > { %v2718_v50 = vld [vmem:[#allocation3 + $0x3a] sm:$0xff]  ;;  %v2719_v57 = vld [vmem:[#allocation3 + $0x42] sm:$0xff]  ;;  %v3081_v45 = vld [vmem:[#allocation3 + $0x2c] sm:$0xff] }
 0x338   : > { %4621 = vmatmul.mubr.msk.bf16.gmra.mrb[28].mxu0 %vm2448_vm3, %v2518_v62  ;;  %v2724_v54 = vpack.c.bf16 %v2718_v50, %v2717_v52  ;;  %v2846_v62 = vpack.c.bf16 %v2719_v57, %v2718_v50  ;;  %v2956_v15 = vld [vmem:[#allocation3 + $0x13] sm:$0xff]  ;;  %v2962_v26 = vld [vmem:[#allocation3 + $0x43] sm:$0xff]  ;;  %v2961_v27 = vld [vmem:[#allocation3 + $0x3b] sm:$0xff] }
 0x339   : > { %4624 = vmatprep.mubr.msk.bf16.mxu0 %vm5237_vm0, %v5238_v6  ;;  %v3080_v39 = vld [vmem:[#allocation3 + $0x24] sm:$0xff]  ;;  %v3079_v40 = vld [vmem:[#allocation3 + $0x1c] sm:$0xff]  ;;  %v3082_v41 = vld [vmem:[#allocation3 + $0x34] sm:$0xff] }
 0x33a   : > { %v3083_v52 = vld [vmem:[#allocation3 + $0x3c] sm:$0xff] }
 0x33b   : > { %v2514_v2 = vld [vmem:[#allocation3 + $0x49] sm:$0x3f] }
 0x33c   : > { %v2519_v7 = vpack.c.bf16 %v2514_v2, %v2513_v4  ;;  %v2497_v31 = vld [vmem:[#allocation3 + $0x48] sm:$0x3f] }
 0x33d   : > { %v2502_v32 = vpack.c.bf16 %v2497_v31, %v2496_v42  ;;  %v2720_v55 = vld [vmem:[#allocation3 + $0x4a] sm:$0x3f]  ;;  %v2842_v2 = vld [vmem:[#allocation3 + $0x52] sm:$0x3f] }
 0x33e   : > { %v2725_v24 = vpack.c.bf16 %v2720_v55, %v2719_v57  ;;  %v2841_v4 = vld [vmem:[#allocation3 + $0x4a] sm:$0xff]  ;;  %v2964_v31 = vld [vmem:[#allocation3 + $0x53] sm:$0x3f] }
 0x33f   : > { %v2963_v42 = vld [vmem:[#allocation3 + $0x4b] sm:$0xff]  ;;  %v3086_v57 = vld [vmem:[#allocation3 + $0x54] sm:$0x3f] }
 0x340   : > { %4625 = vmatmul.mubr.msk.bf16.gmra.mrb[32].mxu0 %vm2448_vm3, %v2519_v7  ;;  %v2847_v7 = vpack.c.bf16 %v2842_v2, %v2841_v4  ;;  %v3084_v50 = vld [vmem:[#allocation3 + $0x44] sm:$0xff]  ;;  %v3085_v55 = vld [vmem:[#allocation3 + $0x4c] sm:$0xff]  ;;  %v3207_v2 = vld [vmem:[#allocation3 + $0x54] sm:$0xff] }
 0x341   : > { %4630 = vmatprep.mubr.msk.bf16.mxu0 %vm5237_vm0, %v5238_v6  ;;  %v3208_v4 = vld [vmem:[#allocation3 + $0x5c] sm:$0x3f] }
 0x348   : > { %4631 = vmatmul.mubr.msk.bf16.vlgmr.msra.gmra.mrb[16].mxu0 %vm2448_vm3, %v2498_v18  ;;  %v2965_v18 = vpack.c.bf16 %v2956_v15, %v2955_v43  ;;  %v3322_v15 = vld [vmem:[#allocation3 + $0x1d] sm:$0xff]  ;;  %v3321_v43 = vld [vmem:[#allocation3 + $0x15] sm:$0xff] }
 0x349   : > { %4651 = vmatpush3.bf16.msra.mxu0 %v5216_v16  ;;  %4634 = vmatprep.mubr.msk.bf16.mxu0 %vm5237_vm0, %v5238_v6  ;;  %v5219_v16 = vld [vmem:[%s6283_s10 + $0x28] sm:$0xff]  }
 0x34a   : > { %4672 = vmatprep.subr.bf16.mxu0 %v5238_v6 }
 0x350   : > { %4635 = vmatmul.mubr.msk.bf16.gmra.mrb[20].mxu0 %vm2448_vm3, %v2499_v21  ;;  %v2966_v21 = vpack.c.bf16 %v2958_v19, %v2957_v20  ;;  %v3324_v19 = vld [vmem:[#allocation3 + $0x2d] sm:$0xff]  ;;  %v3323_v20 = vld [vmem:[#allocation3 + $0x25] sm:$0xff] }
 0x351   : > { %4638 = vmatprep.mubr.msk.bf16.mxu0 %vm5237_vm0, %v5238_v6 }
 0x358   : > { %4639 = vmatmul.mubr.msk.bf16.gmra.mrb[24].mxu0 %vm2448_vm3, %v2500_v25  ;;  %v2967_v25 = vpack.c.bf16 %v2960_v22, %v2959_v23  ;;  %v3326_v22 = vld [vmem:[#allocation3 + $0x3d] sm:$0xff]  ;;  %v3325_v23 = vld [vmem:[#allocation3 + $0x35] sm:$0xff] }
 0x359   : > { %4642 = vmatprep.mubr.msk.bf16.mxu0 %vm5237_vm0, %v5238_v6 }
 0x360   : > { %4643 = vmatmul.mubr.msk.bf16.gmra.mrb[28].mxu0 %vm2448_vm3, %v2501_v30  ;;  %v2968_v30 = vpack.c.bf16 %v2962_v26, %v2961_v27  ;;  %v3328_v26 = vld [vmem:[#allocation3 + $0x4d] sm:$0xff]  ;;  %v3327_v27 = vld [vmem:[#allocation3 + $0x45] sm:$0xff] }
 0x361   : > { %4646 = vmatprep.mubr.msk.bf16.mxu0 %vm5237_vm0, %v5238_v6 }
 0x368   : > { %4647 = vmatmul.mubr.msk.bf16.gmra.mrb[32].mxu0 %vm2448_vm3, %v2502_v32  ;;  %v2969_v32 = vpack.c.bf16 %v2964_v31, %v2963_v42  ;;  %v3329_v31 = vld [vmem:[#allocation3 + $0x55] sm:$0xff]  ;;  %v3330_v42 = vld [vmem:[#allocation3 + $0x5d] sm:$0x3f] }
 0x369   : > { %4652 = vmatprep.mubr.msk.bf16.mxu0 %vm5237_vm0, %v5238_v6 }
 0x370   : > { %4653 = vmatmul.mubr.msk.bf16.vlgmr.msra.gmra.mrb[16].mxu0 %vm2448_vm3, %v2721_v37  ;;  %v3087_v37 = vpack.c.bf16 %v3078_v33, %v3077_v13  ;;  %v3443_v13 = vld [vmem:[#allocation3 + $0x16] sm:$0xff] }
 0x371   : > { %4673 = vmatpush3.bf16.msra.mxu0 %v5217_v3  ;;  %4656 = vmatprep.mubr.msk.bf16.mxu0 %vm5237_vm0, %v5238_v6  ;;  %v5220_v3 = vld [vmem:[%s6283_s10 + $0x30] sm:$0xff]  }
 0x372   : > { %4694 = vmatprep.subr.bf16.mxu0 %v5238_v6 }
 0x378   : > { %4657 = vmatmul.mubr.msk.bf16.gmra.mrb[20].mxu0 %vm2448_vm3, %v2722_v61  ;;  %v3088_v61 = vpack.c.bf16 %v3080_v39, %v3079_v40 }
 0x379   : > { %4660 = vmatprep.mubr.msk.bf16.mxu0 %vm5237_vm0, %v5238_v6 }
 0x380   : > { %4661 = vmatmul.mubr.msk.bf16.gmra.mrb[24].mxu0 %vm2448_vm3, %v2723_v48  ;;  %v3089_v48 = vpack.c.bf16 %v3082_v41, %v3081_v45 }
 0x381   : > { %4664 = vmatprep.mubr.msk.bf16.mxu0 %vm5237_vm0, %v5238_v6 }
 0x388   : > { %4665 = vmatmul.mubr.msk.bf16.gmra.mrb[28].mxu0 %vm2448_vm3, %v2724_v54  ;;  %v3090_v54 = vpack.c.bf16 %v3084_v50, %v3083_v52 }
 0x389   : > { %4668 = vmatprep.mubr.msk.bf16.mxu0 %vm5237_vm0, %v5238_v6 }
 0x390   : > { %4669 = vmatmul.mubr.msk.bf16.gmra.mrb[32].mxu0 %vm2448_vm3, %v2725_v24  ;;  %v3091_v24 = vpack.c.bf16 %v3086_v57, %v3085_v55 }
 0x391   : > { %4674 = vmatprep.mubr.msk.bf16.mxu0 %vm5237_vm0, %v5238_v6 }
 0x398   : > { %4675 = vmatmul.mubr.msk.bf16.vlgmr.msra.gmra.mrb[16].mxu0 %vm2448_vm3, %v2843_v53  ;;  %v3209_v53 = vpack.c.bf16 %v3079_v40, %v3078_v33  ;;  %v3444_v33 = vld [vmem:[#allocation3 + $0x1e] sm:$0xff] }
 0x399   : > { %4695 = vmatpush3.bf16.msra.mxu0 %v5218_v58  ;;  %4678 = vmatprep.mubr.msk.bf16.mxu0 %vm5237_vm0, %v5238_v6  ;;  %v5221_v58 = vld [vmem:[%s6283_s10 + $0x38] sm:$0xff]  }
 0x39a   : > { %4716 = vmatprep.subr.bf16.mxu0 %v5238_v6 }
 0x3a0   : > { %4679 = vmatmul.mubr.msk.bf16.gmra.mrb[20].mxu0 %vm2448_vm3, %v2844_v59  ;;  %v3210_v59 = vpack.c.bf16 %v3081_v45, %v3080_v39  ;;  %v3445_v39 = vld [vmem:[#allocation3 + $0x26] sm:$0xff] }
 0x3a1   : > { %4682 = vmatprep.mubr.msk.bf16.mxu0 %vm5237_vm0, %v5238_v6 }
 0x3a8   : > { %4683 = vmatmul.mubr.msk.bf16.gmra.mrb[24].mxu0 %vm2448_vm3, %v2845_v60  ;;  %v3211_v60 = vpack.c.bf16 %v3083_v52, %v3082_v41  ;;  %v3447_v41 = vld [vmem:[#allocation3 + $0x36] sm:$0xff] }
 0x3a9   : > { %4686 = vmatprep.mubr.msk.bf16.mxu0 %vm5237_vm0, %v5238_v6 }
 0x3b0   : > { %4687 = vmatmul.mubr.msk.bf16.gmra.mrb[28].mxu0 %vm2448_vm3, %v2846_v62  ;;  %v3212_v62 = vpack.c.bf16 %v3085_v55, %v3084_v50  ;;  %v3449_v50 = vld [vmem:[#allocation3 + $0x46] sm:$0xff]  ;;  %v3452_v55 = vld [vmem:[#allocation3 + $0x5e] sm:$0x3f] }
 0x3b1   : > { %4690 = vmatprep.mubr.msk.bf16.mxu0 %vm5237_vm0, %v5238_v6 }
 0x3b8   : > { %4691 = vmatmul.mubr.msk.bf16.gmra.mrb[32].mxu0 %vm2448_vm3, %v2847_v7  ;;  %v3213_v7 = vpack.c.bf16 %v3208_v4, %v3207_v2 }
 0x3b9   : > { %4696 = vmatprep.mubr.msk.bf16.mxu0 %vm5237_vm0, %v5238_v6 }
 0x3c0   : > { %4697 = vmatmul.mubr.msk.bf16.vlgmr.msra.gmra.mrb[16].mxu0 %vm2448_vm3, %v2965_v18  ;;  %v3331_v18 = vpack.c.bf16 %v3322_v15, %v3321_v43  ;;  %v6128_v43 = vld [vmem:[%s6289_s16] ss:$0 sm:$0xff] }
 0x3c1   : > { %4717 = vmatpush3.bf16.msra.mxu0 %v5219_v16  ;;  %4700 = vmatprep.mubr.msk.bf16.mxu0 %vm5237_vm0, %v5238_v6  ;;  %v5222_v16 = vld [vmem:[%s6283_s10 + $0x40] sm:$0xff]  }
 0x3c2   : > { %4738 = vmatprep.subr.bf16.mxu0 %v5238_v6 }
 0x3c8   : > { %4701 = vmatmul.mubr.msk.bf16.gmra.mrb[20].mxu0 %vm2448_vm3, %v2966_v21  ;;  %v3332_v21 = vpack.c.bf16 %v3324_v19, %v3323_v20 }
 0x3c9   : > { %4704 = vmatprep.mubr.msk.bf16.mxu0 %vm5237_vm0, %v5238_v6 }
 0x3d0   : > { %4705 = vmatmul.mubr.msk.bf16.gmra.mrb[24].mxu0 %vm2448_vm3, %v2967_v25  ;;  %v3333_v25 = vpack.c.bf16 %v3326_v22, %v3325_v23 }
 0x3d1   : > { %4708 = vmatprep.mubr.msk.bf16.mxu0 %vm5237_vm0, %v5238_v6 }
 0x3d8   : > { %4709 = vmatmul.mubr.msk.bf16.gmra.mrb[28].mxu0 %vm2448_vm3, %v2968_v30  ;;  %v3334_v30 = vpack.c.bf16 %v3328_v26, %v3327_v27 }
 0x3d9   : > { %4712 = vmatprep.mubr.msk.bf16.mxu0 %vm5237_vm0, %v5238_v6 }
 0x3e0   : > { %4713 = vmatmul.mubr.msk.bf16.gmra.mrb[32].mxu0 %vm2448_vm3, %v2969_v32  ;;  %v3335_v32 = vpack.c.bf16 %v3330_v42, %v3329_v31 }
 0x3e1   : > { %4718 = vmatprep.mubr.msk.bf16.mxu0 %vm5237_vm0, %v5238_v6 }
 0x3e8   : > { %4719 = vmatmul.mubr.msk.bf16.vlgmr.msra.gmra.mrb[16].mxu0 %vm2448_vm3, %v3087_v37  ;;  %v3446_v37 = vld [vmem:[#allocation3 + $0x2e] sm:$0xff] }
 0x3e9   : > { %4739 = vmatpush3.bf16.msra.mxu0 %v5220_v3  ;;  %4722 = vmatprep.mubr.msk.bf16.mxu0 %vm5237_vm0, %v5238_v6  ;;  %v3453_v3 = vpack.c.bf16 %v3444_v33, %v3443_v13  ;;  %v3454_v40 = vpack.c.bf16 %v3446_v37, %v3445_v39 }
 0x3ea   : > { %4760 = vmatprep.subr.bf16.mxu0 %v5238_v6 }
 0x3f0   : > { %4723 = vmatmul.mubr.msk.bf16.gmra.mrb[20].mxu0 %vm2448_vm3, %v3088_v61  ;;  %v3448_v61 = vld [vmem:[#allocation3 + $0x3e] sm:$0xff] }
 0x3f1   : > { %4726 = vmatprep.mubr.msk.bf16.mxu0 %vm5237_vm0, %v5238_v6  ;;  %v3455_v45 = vpack.c.bf16 %v3448_v61, %v3447_v41 }
 0x3f8   : > { %4727 = vmatmul.mubr.msk.bf16.gmra.mrb[24].mxu0 %vm2448_vm3, %v3089_v48  ;;  %v3450_v48 = vld [vmem:[#allocation3 + $0x4e] sm:$0xff] }
 0x3f9   : > { %4730 = vmatprep.mubr.msk.bf16.mxu0 %vm5237_vm0, %v5238_v6  ;;  %v3456_v52 = vpack.c.bf16 %v3450_v48, %v3449_v50 }
 0x400   : > { %4731 = vmatmul.mubr.msk.bf16.gmra.mrb[28].mxu0 %vm2448_vm3, %v3090_v54  ;;  %v3451_v54 = vld [vmem:[#allocation3 + $0x56] sm:$0xff] }
 0x401   : > { %4734 = vmatprep.mubr.msk.bf16.mxu0 %vm5237_vm0, %v5238_v6  ;;  %v3457_v57 = vpack.c.bf16 %v3452_v55, %v3451_v54 }
 0x408   : > { %4735 = vmatmul.mubr.msk.bf16.gmra.mrb[32].mxu0 %vm2448_vm3, %v3091_v24  ;;  %v5223_v24 = vld [vmem:[%s6285_s12] sm:$0xff]  }
 0x409   : > { %4740 = vmatprep.mubr.msk.bf16.mxu0 %vm5237_vm0, %v5238_v6  ;;  %4812 = vmatpush3.bf16.msra.mxu1 %v5223_v24 }
 0x410   : > { %4741 = vmatmul.mubr.msk.bf16.vlgmr.msra.gmra.mrb[16].mxu0 %vm2448_vm3, %v3209_v53 }
 0x411   : > { %4761 = vmatpush3.bf16.msra.mxu0 %v5221_v58  ;;  %4744 = vmatprep.mubr.msk.bf16.mxu0 %vm5237_vm0, %v5238_v6  ;;  %v3638_v58 = vadd.f32 1e-08, %v5942_v49 }
 0x412   : > { %4782 = vmatprep.subr.bf16.mxu0 %v5238_v6 }
 0x413   : > { %5226 = vrsqrt.f32 %v3638_v58 }
 0x418   : > { %4745 = vmatmul.mubr.msk.bf16.gmra.mrb[20].mxu0 %vm2448_vm3, %v3210_v59  ;;  %v6113_v59 = vld [vmem:[%s6288_s15] ss:$0 sm:$0xff] }
 0x419   : > { %4748 = vmatprep.mubr.msk.bf16.mxu0 %vm5237_vm0, %v5238_v6  ;;  %v3663_v4 = vmul.f32 %v6113_v59, %v5809_v46  ;;  %v3665_v26 = vmul.f32 %v6113_v59, %v5814_v8  ;;  %v3666_v13 = vmul.f32 %v6113_v59, %v5816_v9  ;;  %v3667_v50 = vmul.f32 %v6113_v59, %v5827_v14 }
 0x41d   : > { %v5227_v53 = vpop.eup %5226 }
 0x420   : > { %4749 = vmatmul.mubr.msk.bf16.gmra.mrb[24].mxu0 %vm2448_vm3, %v3211_v60  ;;  %v886_v60 = vld [vmem:[%s6280_s7] sm:$0x1] }
 0x421   : > { %4752 = vmatprep.mubr.msk.bf16.mxu0 %vm5237_vm0, %v5238_v6  ;;  %v954_v15 = vadd.f32 %v5539_v51, %v886_v60  ;;  %v3668_v60 = vmul.f32 %v6113_v59, %v5834_v17 }
 0x423   : > { %v957_v23 = vadd.f32 1.0, %v954_v15 }
 0x428   : > { %4753 = vmatmul.mubr.msk.bf16.gmra.mrb[28].mxu0 %vm2448_vm3, %v3212_v62  ;;  %v6119_v62 = vrot.slane %v5227_v53, %v5438_v28 }
 0x429   : > { %4756 = vmatprep.mubr.msk.bf16.mxu0 %vm5237_vm0, %v5238_v6 }
 0x430   : > { %4757 = vmatmul.mubr.msk.bf16.gmra.mrb[32].mxu0 %vm2448_vm3, %v3213_v7 }
 0x431   : > { %4762 = vmatprep.mubr.msk.bf16.mxu0 %vm5237_vm0, %v5238_v6 }
 0x438   : > { %4763 = vmatmul.mubr.msk.bf16.vlgmr.msra.gmra.mrb[16].mxu0 %vm2448_vm3, %v3331_v18  ;;  %v3664_v18 = vmul.f32 %v6113_v59, %v5811_v5 }
 0x439   : > { %4783 = vmatpush3.bf16.msra.mxu0 %v5222_v16  ;;  %4766 = vmatprep.mubr.msk.bf16.mxu0 %vm5237_vm0, %v5238_v6 }
 0x440   : > { %4767 = vmatmul.mubr.msk.bf16.gmra.mrb[20].mxu0 %vm2448_vm3, %v3332_v21 }
 0x441   : > { %4770 = vmatprep.mubr.msk.bf16.mxu0 %vm5237_vm0, %v5238_v6 }
 0x448   : > { %4771 = vmatmul.mubr.msk.bf16.gmra.mrb[24].mxu0 %vm2448_vm3, %v3333_v25 }
 0x449   : > { %4774 = vmatprep.mubr.msk.bf16.mxu0 %vm5237_vm0, %v5238_v6 }
 0x450   : > { %4775 = vmatmul.mubr.msk.bf16.gmra.mrb[28].mxu0 %vm2448_vm3, %v3334_v30 }
 0x451   : > { %4778 = vmatprep.mubr.msk.bf16.mxu0 %vm5237_vm0, %v5238_v6 }
 0x458   : > { %4779 = vmatmul.mubr.msk.bf16.gmra.mrb[32].mxu0 %vm2448_vm3, %v3335_v32  ;;  %v6145_v32 = vrot.slane %v957_v23, %v5438_v28 }
 0x459   : > { %4784 = vmatprep.mubr.msk.bf16.mxu0 %vm5237_vm0, %v5238_v6 }
 0x460   : > { %4785 = vmatmul.mubr.msk.bf16.vlgmr.msra.gmra.mrb[16].mxu0 %vm2448_vm3, %v3453_v3 }
 0x461   : > { %4788 = vmatprep.mubr.msk.bf16.mxu0 %vm5237_vm0, %v5238_v6 }
 0x468   : > { %4789 = vmatmul.mubr.msk.bf16.gmra.mrb[20].mxu0 %vm2448_vm3, %v3454_v40 }
 0x469   : > { %4792 = vmatprep.mubr.msk.bf16.mxu0 %vm5237_vm0, %v5238_v6 }
 0x470   : > { %4793 = vmatmul.mubr.msk.bf16.gmra.mrb[24].mxu0 %vm2448_vm3, %v3455_v45 }
 0x471   : > { %4796 = vmatprep.mubr.msk.bf16.mxu0 %vm5237_vm0, %v5238_v6 }
 0x478   : > { %4797 = vmatmul.mubr.msk.bf16.gmra.mrb[28].mxu0 %vm2448_vm3, %v3456_v52 }
 0x479   : > { %4800 = vmatprep.mubr.msk.bf16.mxu0 %vm5237_vm0, %v5238_v6 }
 0x480   : > { %4801 = vmatmul.mubr.msk.bf16.gmra.mrb[32].mxu0 %vm2448_vm3, %v3457_v57 }
 0x533   : > { %v3516_v2 = vpop.f32.mrb[16].mxu0 }
 0x534   : > { %v3646_v49 = vmul.f32 %v6119_v62, %v3516_v2  ;;  %v4786_v7 = vpop.f32.mrb[17].mxu0 }
 0x535   : > { %v3519_v16 = vpop.f32.mrb[18].mxu0 }
 0x536   : > { %v3673_v19 = vadd.f32 %v3663_v4, %v3646_v49  ;;  %v3647_v20 = vmul.f32 %v6119_v62, %v3519_v16  ;;  %v4787_v21 = vpop.f32.mrb[19].mxu0 }
 0x538   : > { %v3690_v46 = vadd.f32 %v6128_v43, %v3673_v19  ;;  %v3674_v22 = vadd.f32 %v3664_v18, %v3647_v20  ;;  %v3669_v20 = vmul.f32 %v6113_v59, %v5860_v44 }
 0x53a   : > { %vm3700_vm1 = vcmp.ge.f32.partialorder %v3690_v46, 0.0  ;;  %v3710_v25 = vmul.f32 0.2, %v3690_v46  ;;  %v3691_v51 = vadd.f32 %v6128_v43, %v3674_v22 }
 0x53b   : > { %v3524_v27 = vpop.f32.mrb[20].mxu0 }
 0x53c   : > { %v3720_v5 = vsel %vm3700_vm1, %v3690_v46, %v3710_v25  ;;  %vm3701_vm2 = vcmp.ge.f32.partialorder %v3691_v51, 0.0  ;;  %v3711_v30 = vmul.f32 0.2, %v3691_v51  ;;  %v3648_v31 = vmul.f32 %v6119_v62, %v3524_v27  ;;  %v4790_v42 = vpop.f32.mrb[21].mxu0 }
 0x53d   : > { %v3730_v33 = vmul.f32 %v3720_v5, %v5818_v10  ;;  %v3527_v8 = vpop.f32.mrb[22].mxu0  ;;  %v3670_v27 = vmul.f32 %v6113_v59, %v5864_v47 }
 0x53e   : > { %v3721_v3 = vsel %vm3701_vm2, %v3691_v51, %v3711_v30  ;;  %v3675_v37 = vadd.f32 %v3665_v26, %v3648_v31  ;;  %v3649_v39 = vmul.f32 %v6119_v62, %v3527_v8  ;;  %v4791_v40 = vpop.f32.mrb[23].mxu0 }
 0x53f   : > { %3740 = vst.msk [vmem:[%s6141_s26] sm:$0xff] %vm2448_vm3, %v3730_v33  ;;  %v3754_v61 = vmul.f32 %v6145_v32, %v3730_v33  ;;  %v3731_v41 = vmul.f32 %v3721_v3, %v5820_v11 }
 0x540   : > { %v3692_v28 = vadd.f32 %v6128_v43, %v3675_v37  ;;  %v3676_v45 = vadd.f32 %v3666_v13, %v3649_v39  ;;  %v3671_v37 = vmul.f32 %v6113_v59, %v5894_v34 }
 0x541   : > { %3741 = vst.msk [vmem:[%s6141_s26 + $0x8] sm:$0xff] %vm2448_vm3, %v3731_v41  ;;  %v3755_v10 = vmul.f32 %v6145_v32, %v3731_v41 }
 0x542   : > { %vm3702_vm4 = vcmp.ge.f32.partialorder %v3692_v28, 0.0  ;;  %v3712_v9 = vmul.f32 0.2, %v3692_v28  ;;  %v3693_v48 = vadd.f32 %v6128_v43, %v3676_v45 }
 0x543   : > { %v3532_v52 = vpop.f32.mrb[24].mxu0  ;;  %v3764_v54 = vpack.c.bf16 %v3755_v10, %v3754_v61 }
 0x544   : > { %v3722_v55 = vsel %vm3702_vm4, %v3692_v28, %v3712_v9  ;;  %vm3703_vm5 = vcmp.ge.f32.partialorder %v3693_v48, 0.0  ;;  %v3713_v11 = vmul.f32 0.2, %v3693_v48  ;;  %v3650_v57 = vmul.f32 %v6119_v62, %v3532_v52  ;;  %v4794_v24 = vpop.f32.mrb[25].mxu0 }
 0x545   : > { %v3732_v58 = vmul.f32 %v3722_v55, %v5847_v29  ;;  %v3535_v53 = vpop.f32.mrb[26].mxu0  ;;  %4814 = vmatmul.mubr.msk.bf16.vlgmr.msra.gmra.mrb[24].mxu1 %vm2448_vm3, %v3764_v54  ;;  %v3672_v9 = vmul.f32 %v6113_v59, %v5919_v0 }
 0x546   : > { %v3723_v2 = vsel %vm3703_vm5, %v3693_v48, %v3713_v11  ;;  %v3677_v14 = vadd.f32 %v3667_v50, %v3650_v57  ;;  %v3651_v4 = vmul.f32 %v6119_v62, %v3535_v53  ;;  %v4795_v49 = vpop.f32.mrb[27].mxu0  ;;  %4817 = vmatprep.mubr.msk.bf16.mxu1 %vm5237_vm0, %v5238_v6 }
 0x547   : > { %3742 = vst.msk [vmem:[%s6141_s26 + $0x10] sm:$0xff] %vm2448_vm3, %v3732_v58  ;;  %v3733_v7 = vmul.f32 %v3723_v2, %v5849_v38  ;;  %v3756_v29 = vmul.f32 %v6145_v32, %v3732_v58 }
 0x548   : > { %v3694_v15 = vadd.f32 %v6128_v43, %v3677_v14  ;;  %v3678_v16 = vadd.f32 %v3668_v60, %v3651_v4 }
 0x549   : > { %3743 = vst.msk [vmem:[%s6141_s26 + $0x18] sm:$0xff] %vm2448_vm3, %v3733_v7  ;;  %v3757_v17 = vmul.f32 %v6145_v32, %v3733_v7 }
 0x54a   : > { %vm3704_vm6 = vcmp.ge.f32.partialorder %v3694_v15, 0.0  ;;  %v3714_v18 = vmul.f32 0.2, %v3694_v15  ;;  %v3695_v19 = vadd.f32 %v6128_v43, %v3678_v16 }
 0x54b   : > { %v3540_v21 = vpop.f32.mrb[28].mxu0  ;;  %v3765_v46 = vpack.c.bf16 %v3757_v17, %v3756_v29  ;;  %v3774_v17 = vld [vmem:[%s6233_s22 + $0x18] sm:$0xff] }
 0x54c   : > { %v3724_v38 = vsel %vm3704_vm6, %v3694_v15, %v3714_v18  ;;  %vm3705_vm7 = vcmp.ge.f32.partialorder %v3695_v19, 0.0  ;;  %v3715_v22 = vmul.f32 0.2, %v3695_v19  ;;  %v3652_v23 = vmul.f32 %v6119_v62, %v3540_v21  ;;  %v4798_v25 = vpop.f32.mrb[29].mxu0  ;;  %v3773_v15 = vld [vmem:[%s6233_s22 + $0x10] sm:$0xff] }
 0x54d   : > { %v3734_v51 = vmul.f32 %v3724_v38, %v5877_v1  ;;  %v3543_v26 = vpop.f32.mrb[30].mxu0  ;;  %4818 = vmatmul.mubr.msk.bf16.gmra.mrb[28].mxu1 %vm2448_vm3, %v3765_v46  ;;  %v3775_v38 = vld [vmem:[%s6233_s22 + $0x20] sm:$0xff] }
 0x54e   : > { %v3725_v5 = vsel %vm3705_vm7, %v3695_v19, %v3715_v22  ;;  %v3679_v44 = vadd.f32 %v3669_v20, %v3652_v23  ;;  %v3653_v30 = vmul.f32 %v6119_v62, %v3543_v26  ;;  %v4799_v31 = vpop.f32.mrb[31].mxu0  ;;  %4821 = vmatprep.mubr.msk.bf16.mxu1 %vm5237_vm0, %v5238_v6  ;;  %v3776_v23 = vld [vmem:[%s6233_s22 + $0x28] sm:$0xff] }
 0x54f   : > { %3744 = vst.msk [vmem:[%s6141_s26 + $0x20] sm:$0xff] %vm2448_vm3, %v3734_v51  ;;  %v3735_v42 = vmul.f32 %v3725_v5, %v5883_v12  ;;  %v3758_v1 = vmul.f32 %v6145_v32, %v3734_v51  ;;  %v3778_v31 = vld [vmem:[%s6233_s22 + $0x38] sm:$0xff] }
 0x550   : > { %v3696_v33 = vadd.f32 %v6128_v43, %v3679_v44  ;;  %v3680_v8 = vadd.f32 %v3670_v27, %v3653_v30  ;;  %v3777_v44 = vld [vmem:[%s6233_s22 + $0x30] sm:$0xff] }
 0x551   : > { %3745 = vst.msk [vmem:[%s6141_s26 + $0x28] sm:$0xff] %vm2448_vm3, %v3735_v42  ;;  %v3759_v47 = vmul.f32 %v6145_v32, %v3735_v42 }
 0x552   : > { %vm3706_vm8 = vcmp.ge.f32.partialorder %v3696_v33, 0.0  ;;  %v3716_v13 = vmul.f32 0.2, %v3696_v33  ;;  %v3697_v3 = vadd.f32 %v6128_v43, %v3680_v8 }
 0x553   : > { %v3548_v39 = vpop.f32.mrb[32].mxu0  ;;  %v3766_v40 = vpack.c.bf16 %v3759_v47, %v3758_v1 }
 0x554   : > { %v3726_v12 = vsel %vm3706_vm8, %v3696_v33, %v3716_v13  ;;  %vm3707_vm9 = vcmp.ge.f32.partialorder %v3697_v3, 0.0  ;;  %v3717_v61 = vmul.f32 0.2, %v3697_v3  ;;  %v3654_v41 = vmul.f32 %v6119_v62, %v3548_v39  ;;  %v4802_v28 = vpop.f32.mrb[33].mxu0  ;;  %v3779_v13 = vld [vmem:[%s6233_s22 + $0x40] sm:$0xff] }
 0x555   : > { %v3736_v45 = vmul.f32 %v3726_v12, %v5917_v63  ;;  %v3551_v10 = vpop.f32.mrb[34].mxu0  ;;  %4822 = vmatmul.mubr.msk.bf16.gmra.mrb[32].mxu1 %vm2448_vm3, %v3766_v40 }
 0x556   : > { %v3727_v48 = vsel %vm3707_vm9, %v3697_v3, %v3717_v61  ;;  %v3681_v34 = vadd.f32 %v3671_v37, %v3654_v41  ;;  %v3655_v50 = vmul.f32 %v6119_v62, %v3551_v10  ;;  %v4803_v52 = vpop.f32.mrb[35].mxu0  ;;  %4825 = vmatprep.mubr.msk.bf16.mxu1 %vm5237_vm0, %v5238_v6  ;;  %v3780_v37 = vld [vmem:[%s6233_s22 + $0x48] sm:$0x3f] }
 0x557   : > { %3746 = vst.msk [vmem:[%s6141_s26 + $0x30] sm:$0xff] %vm2448_vm3, %v3736_v45  ;;  %v3737_v54 = vmul.f32 %v3727_v48, %v5897_v36  ;;  %v3760_v63 = vmul.f32 %v6145_v32, %v3736_v45 }
 0x558   : > { %v3698_v55 = vadd.f32 %v6128_v43, %v3681_v34  ;;  %v3682_v11 = vadd.f32 %v3672_v9, %v3655_v50 }
 0x559   : > { %3747 = vst.msk [vmem:[%s6141_s26 + $0x38] sm:$0xff] %vm2448_vm3, %v3737_v54  ;;  %v3761_v0 = vmul.f32 %v6145_v32, %v3737_v54 }
 0x55a   : > { %vm3708_vm10 = vcmp.ge.f32.partialorder %v3698_v55, 0.0  ;;  %v3718_v59 = vmul.f32 0.2, %v3698_v55  ;;  %v3699_v62 = vadd.f32 %v6128_v43, %v3682_v11 }
 0x55b   : > { %v3767_v57 = vpack.c.bf16 %v3761_v0, %v3760_v63 }
 0x55c   : > { %v3728_v24 = vsel %vm3708_vm10, %v3698_v55, %v3718_v59  ;;  %vm3709_vm11 = vcmp.ge.f32.partialorder %v3699_v62, 0.0  ;;  %v3719_v36 = vmul.f32 0.2, %v3699_v62 }
 0x55d   : > { %v3738_v58 = vmul.f32 %v3728_v24, %v5934_v35  ;;  %4826 = vmatmul.mubr.msk.bf16.gmra.mrb[36].mxu1 %vm2448_vm3, %v3767_v57 }
 0x55e   : > { %v3729_v53 = vsel %vm3709_vm11, %v3699_v62, %v3719_v36  ;;  %4829 = vmatprep.mubr.msk.bf16.mxu1 %vm5237_vm0, %v5238_v6  ;;  %v3771_v6 = vld [vmem:[%s6233_s22] sm:$0xff]  ;;  %vm3875_vm0 = vcmask 23552  }
 0x55f   : > { %3748 = vst.msk [vmem:[%s6141_s26 + $0x40] sm:$0xff] %vm2448_vm3, %v3738_v58  ;;  %v3739_v60 = vmul.f32 %v3729_v53, %v5946_v56  ;;  %v3762_v43 = vmul.f32 %v6145_v32, %v3738_v58  ;;  %v3772_v56 = vld [vmem:[%s6233_s22 + $0x8] sm:$0xff] }
 0x561   : > { %3749 = vst.msk [vmem:[%s6141_s26 + $0x48] sm:$0x3f] %vm2486_vm15, %v3739_v60  ;;  %v3763_v2 = vmul.f32 %v6145_v32, %v3739_v60 }
 0x563   : > { %v3768_v14 = vpack.c.bf16 %v3763_v2, %v3762_v43 }
 0x565   : > { %4830 = vmatmul.mubr.msk.bf16.gmra.mrb[40].mxu1 %vm2448_vm3, %v3768_v14  ;;  %vm3885_vm3 = vcmask 21504  }
 0x618   : > { %v3836_v35 = vpop.f32.mrb[24].mxu1 }
 0x619   : > { %v3837_v32 = vadd.f32 %v3836_v35, %v3771_v6  ;;  %v4815_v4 = vpop.f32.mrb[25].mxu1 }
 0x61a   : > { %v3839_v49 = vpop.f32.mrb[26].mxu1 }
 0x61b   : > { %3876 = vst.msk [vmem:[%s6240_s25] sm:$0xff] %vm3875_vm0, %v3837_v32  ;;  %v3840_v7 = vadd.f32 %v3839_v49, %v3772_v56  ;;  %v4816_v29 = vpop.f32.mrb[27].mxu1 }
 0x61d   : > { %3877 = vst.msk [vmem:[%s6240_s25 + $0x8] sm:$0xff] %vm3875_vm0, %v3840_v7 }
 0x620   : > { %v3844_v16 = vpop.f32.mrb[28].mxu1 }
 0x621   : > { %v3845_v18 = vadd.f32 %v3844_v16, %v3773_v15  ;;  %v4819_v19 = vpop.f32.mrb[29].mxu1 }
 0x622   : > { %v3847_v20 = vpop.f32.mrb[30].mxu1 }
 0x623   : > { %3878 = vst.msk [vmem:[%s6240_s25 + $0x10] sm:$0xff] %vm3875_vm0, %v3845_v18  ;;  %v3848_v21 = vadd.f32 %v3847_v20, %v3774_v17  ;;  %v4820_v46 = vpop.f32.mrb[31].mxu1 }
 0x625   : > { %3879 = vst.msk [vmem:[%s6240_s25 + $0x18] sm:$0xff] %vm3875_vm0, %v3848_v21 }
 0x628   : > { %v3852_v22 = vpop.f32.mrb[32].mxu1 }
 0x629   : > { %v3853_v25 = vadd.f32 %v3852_v22, %v3775_v38  ;;  %v4823_v51 = vpop.f32.mrb[33].mxu1 }
 0x62a   : > { %v3855_v26 = vpop.f32.mrb[34].mxu1 }
 0x62b   : > { %3880 = vst.msk [vmem:[%s6240_s25 + $0x20] sm:$0xff] %vm3875_vm0, %v3853_v25  ;;  %v3856_v27 = vadd.f32 %v3855_v26, %v3776_v23  ;;  %v4824_v5 = vpop.f32.mrb[35].mxu1 }
 0x62d   : > { %3881 = vst.msk [vmem:[%s6240_s25 + $0x28] sm:$0xff] %vm3875_vm0, %v3856_v27 }
 0x630   : > { %v3860_v30 = vpop.f32.mrb[36].mxu1 }
 0x631   : > { %v3861_v42 = vadd.f32 %v3860_v30, %v3777_v44  ;;  %v4827_v1 = vpop.f32.mrb[37].mxu1 }
 0x632   : > { %v3863_v33 = vpop.f32.mrb[38].mxu1 }
 0x633   : > { %3882 = vst.msk [vmem:[%s6240_s25 + $0x30] sm:$0xff] %vm3875_vm0, %v3861_v42  ;;  %v3864_v8 = vadd.f32 %v3863_v33, %v3778_v31  ;;  %v4828_v47 = vpop.f32.mrb[39].mxu1 }
 0x635   : > { %3883 = vst.msk [vmem:[%s6240_s25 + $0x38] sm:$0xff] %vm3875_vm0, %v3864_v8 }
 0x638   : > { %v3868_v3 = vpop.f32.mrb[40].mxu1 }
 0x639   : > { %v3869_v39 = vadd.f32 %v3868_v3, %v3779_v13  ;;  %v4831_v40 = vpop.f32.mrb[41].mxu1 }
 0x63a   : > { %v3871_v12 = vpop.f32.mrb[42].mxu1 }
 0x63b   : > { %3884 = vst.msk [vmem:[%s6240_s25 + $0x40] sm:$0xff] %vm3875_vm0, %v3869_v39  ;;  %v3872_v61 = vadd.f32 %v3871_v12, %v3780_v37  ;;  %v4832_v41 = vpop.f32.mrb[43].mxu1 }
 0x63d   : > { %3886 = vst.msk [vmem:[%s6240_s25 + $0x48] sm:$0x3f] %vm3885_vm3, %v3872_v61 }
 0x63e PF: > { %s32_s2 = sadd.s32 1, %s5234_s2  }
 0x63f   : > { %p29_p4 = scmp.ge.s32.totalorder %s32_s2, 4  }
 0x641   :  { %31 = sbr.rel (!%p29_p4) target bundleno = 7 (0x7), region = 167 }

// kernel: _lambda_.7
= control target key start
LH: loop header
LB: loop body
LE: loop exit
PB: predicated region body
PF: predicated region fallthrough
CT: control target
= control target key end

     0   :  { %s13353_s0 = inlined_call_operand.vmem [shape: f32[2,324,16], index: 0, kind: input, shape index: {}]   ;;  %s13354_s1 = inlined_call_operand.vmem [shape: f32[2,1,32], index: 1, kind: input, shape index: {}]   ;;  %s13355_s2 = inlined_call_operand.vmem [shape: f32[32,16], index: 2, kind: input, shape index: {}]   ;;  %s13356_s3 = inlined_call_operand.vmem [shape: f32[1,16], index: 3, kind: input, shape index: {}]   ;;  %s13357_s4 = inlined_call_operand.vmem [shape: f32[32,8], index: 4, kind: input, shape index: {}]   ;;  %s13358_s5 = inlined_call_operand.vmem [shape: f32[1,8], index: 5, kind: input, shape index: {}]   ;;  %s13359_s6 = inlined_call_operand.vmem [shape: f32[32,8], index: 6, kind: input, shape index: {}]   ;;  %s13360_s7 = inlined_call_operand.vmem [shape: f32[1,8], index: 7, kind: input, shape index: {}]   ;;  %s13361_s8 = inlined_call_operand.vmem [shape: bf16[9,16,8], index: 8, kind: input, shape index: {}]   ;;  %s13362_s9 = inlined_call_operand.vmem [shape: f32[16,8], index: 9, kind: input, shape index: {}]   ;;  %s13363_s10 = inlined_call_operand.vmem [shape: bf16[9,8,8], index: 10, kind: input, shape index: {}]   ;;  %s13364_s11 = inlined_call_operand.vmem [shape: f32[8,8], index: 11, kind: input, shape index: {}]   ;;  %s13365_s12 = inlined_call_operand.vmem [shape: bf16[8,3], index: 12, kind: input, shape index: {}]   ;;  %s13366_s13 = inlined_call_operand.vmem [shape: f32[1,8], index: 13, kind: input, shape index: {}]   ;;  %s13367_s14 = inlined_call_operand.vmem [shape: f32[1,8], index: 14, kind: input, shape index: {}]   ;;  %s13368_s15 = inlined_call_operand.vmem [shape: f32[1,8], index: 15, kind: input, shape index: {}]   ;;  %s13369_s16 = inlined_call_operand.vmem [shape: f32[1,8], index: 16, kind: input, shape index: {}]   ;;  %s13370_s17 = inlined_call_operand.vmem [shape: f32[2,286,1], index: 17, kind: input, shape index: {}]   ;;  %s13371_s18 = inlined_call_operand.vmem [shape: f32[286,1], index: 18, kind: input, shape index: {}]   ;;  %s13372_s19 = inlined_call_operand.vmem [shape: f32[2,286,3], index: 19, kind: input, shape index: {}]   ;;  %s13373_s20 = inlined_call_operand.hbm [shape: f32[2,286,8], index: 20, kind: output, shape index: {0}]   ;;  %s13374_s21 = inlined_call_operand.vmem [shape: f32[2,286,3], index: 21, kind: output, shape index: {1}]  }
   0x1   :  { %13452 = sst [smem:[#allocation88_spill]] %s13353_s0 }
   0x2   :  { %13453 = sst [smem:[#allocation89_spill]] %s13354_s1 }
   0x3   :  { %13454 = sst [smem:[#allocation90_spill]] %s13355_s2 }
   0x4   :  { %13455 = sst [smem:[#allocation91_spill]] %s13356_s3 }
   0x5   :  { %13456 = sst [smem:[#allocation92_spill]] %s13357_s4 }
   0x6   :  { %13457 = sst [smem:[#allocation93_spill]] %s13358_s5 }
   0x7   :  { %13458 = sst [smem:[#allocation94_spill]] %s13374_s21 }
   0x8   :  { %27 = vsyncpa [#allocation5], 0 }
   0x9   :  { %29 = vsyncpa [#allocation5 + $0x1], 0  ;;  %s11103_s2 = smov 0   ;;  %s11105_s25 = smov 0  }
   0xa   :  { %s11107_s26 = smov 0   ;;  %s11109_s27 = smov 0  }
   0xb LB: > { %13459 = sst [smem:[#allocation7_spill]] %s10972_s2  ;;  %s11124_s3 = sadd.s32 4294967295, %s10984_s27   ;;  %s10984_s27 = sphi %s11109_s27, %s13668_s27   ;;  %s10980_s26 = sphi %s11107_s26, %s13670_s26   ;;  %s10976_s25 = sphi %s11105_s25, %s13672_s25   ;;  %s10972_s2 = sphi %s11103_s2, %s13671_s2  }
   0xc   : > { %13460 = sst [smem:[#allocation8_spill]] %s10980_s26  ;;  %s8706_s28 = sadd.s32 4294967294, %s10984_s27  }
   0xd   : > { %13461 = sst [smem:[#allocation9_spill]] %s10984_s27  ;;  %s11128_s29 = sadd.s32 1, %s10984_s27  }
   0xe   : > { %13462 = sst [smem:[#allocation10_spill]] %s11128_s29  ;;  %s482_s0 = sadd.s32 1, %s10980_s26 }
   0xf   : > { %s479_s4 = ssub.s32 %s10984_s27, %s11128_s29  ;;  %p492_p0 = scmp.ne.s32.totalorder %s10980_s26, %s10976_s25 }
  0x10   : > { %p480_p1 = scmp.eq.s32.totalorder %s479_s4, 0  ;;  %p493_p2 = scmp.eq.s32.totalorder %s11124_s3, 1 }
  0x11   : > { %p498_p3 = scmp.ne.s32.totalorder %s10976_s25, %s10972_s2  ;;  %p499_p4 = scmp.eq.s32.totalorder %s8706_s28, 1 }
  0x12   : > { %s11139_s30 = scalar_select %p480_p1, %s10980_s26, %s482_s0  }
  0x13   : > { %p11141_p5 = por %p493_p2, %p492_p0  ;;  %p11145_p6 = por %p499_p4, %p498_p3 }
  0x14   : > { %13463 = sst [smem:[#allocation11_spill]] %s11139_s30  ;;  %p8709_p7 = scmp.ge.s32.totalorder %s10984_s27, 1 }
  0x15   : > { %s13465_s22 = scalar_select %p11145_p6, 1, 0 }
  0x16   : > { %p621_p8 = scmp.lt.s32.totalorder %s10984_s27, 3 }
  0x17   : > { %13466 = sst [smem:[#allocation12_spill]] %s13465_s22 }
  0x18   : > { %p622_p9 = pnand %p8709_p7, %p621_p8 }
  0x1a   : > { %625 = sbr.rel (%p622_p9) target bundleno = 2181 (0x885), region = 100 }
  0x21   : > { %s13467_s24 = sld [smem:[#allocation90_spill]]  ;;  %v10986_v3 = vmov 0.0|0.0   ;;  %vm10987_vm0 = vmmov 0   ;;  %v13384_v6 = vmov 0.0   ;;  %p699_p10 = scmp.lt.s32.totalorder %s11124_s3, 1  ;;  %vm729_vm1 = vcmask 261120  }
  0x22   : > { %10249 = vmatprep.subr.bf16.mxu0 %v10986_v3  ;;  %9490 = vmatprep.mubr.msk.f32.mxu0 %vm10987_vm0, %v13384_v6  ;;  %s13468_s26 = sld [smem:[#allocation89_spill]]  ;;  %s13469_s4 = sld [smem:[#allocation92_spill]]  ;;  %v880_v11 = vld [vmem:[%s13359_s6] sm:$0xff]  ;;  %v881_v13 = vld [vmem:[%s13359_s6 + $0x8] sm:$0xff]  ;;  %v882_v17 = vld [vmem:[%s13359_s6 + $0x10] sm:$0xff]  ;;  %v1069_v23 = vlaneseq  ;;  %vm1114_vm2 = vcmask 130048  }
  0x23   : > { %10255 = vmatprep.subr.bf16.mxu1 %v10986_v3  ;;  %9501 = vmatprep.mubr.msk.f32.mxu1 %vm10987_vm0, %v13384_v6  ;;  %s11169_s30 = scalar_select %p699_p10, %s11124_s3, 1  ;;  %v10262_v16 = vpack.c.bf16 %v881_v13, %v880_v11  ;;  %v883_v18 = vld [vmem:[%s13359_s6 + $0x18] sm:$0xff]  ;;  %v10909_v21 = vld [vmem:[%s13361_s8 + $0x8] sm:$0xff]   ;;  %v11210_v22 = vld [vmem:[%s13361_s8] sm:$0xff]   ;;  %vm1155_vm3 = vcmask 125952   ;;  %vm4797_vm4 = vcmask 64512  }
  0x24   : > { %v10265_v20 = vpack.c.bf16 %v883_v18, %v882_v17  ;;  %v1070_v24 = vshrl.u32 %v1069_v23, 7  ;;  %s13470_s22 = sld [smem:[#allocation91_spill]]  ;;  %s13471_s0 = sld [smem:[#allocation88_spill]]  ;;  %4798 = vst.msk [vmem:[#allocation3] sm:$0xff] %vm4797_vm4, %v13384_v6  ;;  %4799 = vst.msk [vmem:[#allocation3 + $0x8] sm:$0xff] %vm4797_vm4, %v13384_v6  ;;  %vm5082_vm5 = vcmask 1043456  }
  0x25   : > { %4800 = vst.msk [vmem:[#allocation3 + $0x10] sm:$0xff] %vm4797_vm4, %v13384_v6  ;;  %4801 = vst.msk [vmem:[#allocation3 + $0x18] sm:$0xff] %vm4797_vm4, %v13384_v6  ;;  %s13489_s28 = sld [smem:[#allocation93_spill]] }
  0x26   : > { %v11222_v28 = vsub.s32 0, %v1070_v24  ;;  %4802 = vst.msk [vmem:[#allocation3 + $0x20] sm:$0xff] %vm4797_vm4, %v13384_v6  ;;  %4803 = vst.msk [vmem:[#allocation3 + $0x28] sm:$0xff] %vm4797_vm4, %v13384_v6 }
  0x27   : > { %v724_v0 = vld [vmem:[%s13467_s24] sm:$0xff]  ;;  %v725_v1 = vld [vmem:[%s13467_s24 + $0x8] sm:$0xff]  ;;  %v726_v2 = vld [vmem:[%s13467_s24 + $0x10] sm:$0xff]  ;;  %4804 = vst.msk [vmem:[#allocation3 + $0x30] sm:$0xff] %vm4797_vm4, %v13384_v6 }
  0x28   : > { %v10250_v4 = vpack.c.bf16 %v725_v1, %v724_v0  ;;  %v727_v5 = vld [vmem:[%s13467_s24 + $0x18] sm:$0xff]  ;;  %s706_s29 = scalar_lea.vmem %s13468_s26, %s11169_s30  ;;  %v804_v9 = vld [vmem:[%s13469_s4] sm:$0xff]  ;;  %v805_v10 = vld [vmem:[%s13469_s4 + $0x8] sm:$0xff]  ;;  %s10859_s26 = smul.u32 328, %s11169_s30  ;;  %13472 = vst [vmem:[#allocation13_spill] sm:$0xff] %v11222_v28 }
  0x29   : > { %v10253_v7 = vpack.c.bf16 %v727_v5, %v726_v2  ;;  %v723_v8 = vld [vmem:[%s706_s29] sm:$0x1]  ;;  %v10256_v12 = vpack.c.bf16 %v805_v10, %v804_v9  ;;  %v806_v14 = vld [vmem:[%s13469_s4 + $0x10] sm:$0xff]  ;;  %v807_v15 = vld [vmem:[%s13469_s4 + $0x18] sm:$0xff]  ;;  %4805 = vst.msk [vmem:[#allocation3 + $0x38] sm:$0xff] %vm4797_vm4, %v13384_v6 }
  0x2a   : > { %10251 = vmatpush3.bf16.msra.mxu0 %v10250_v4  ;;  %v10259_v19 = vpack.c.bf16 %v807_v15, %v806_v14  ;;  %v728_v25 = vld [vmem:[%s13470_s22] sm:$0x1]  ;;  %s11220_s27 = scalar_lea.vmem %s13471_s0, %s10859_s26  ;;  %s11527_s26 = smul.u32 288, %s11169_s30  ;;  %4806 = vst.msk [vmem:[#allocation3 + $0x40] sm:$0xff] %vm4797_vm4, %v13384_v6  ;;  %4807 = vst.msk [vmem:[#allocation3 + $0x48] sm:$0xff] %vm4797_vm4, %v13384_v6 }
  0x2b   : > { %10252 = vmatprep.subr.bf16.mxu0 %v10986_v3  ;;  %10257 = vmatpush3.bf16.msra.mxu1 %v10256_v12  ;;  %v1028_v30 = vld [vmem:[%s11220_s27] sm:$0xff]  ;;  %v1029_v31 = vld [vmem:[%s11220_s27 + $0x8] sm:$0xff]  ;;  %v1030_v32 = vld [vmem:[%s11220_s27 + $0x10] sm:$0xff]  ;;  %4808 = vst.msk [vmem:[#allocation3 + $0x50] sm:$0xff] %vm4797_vm4, %v13384_v6  ;;  %s10861_s30 = smul.u32 4608, %s11124_s3  ;;  %s10990_s3 = smov [#allocation4]  }
  0x2c   : > { %10258 = vmatprep.subr.bf16.mxu1 %v10986_v3  ;;  %v1044_v33 = vld [vmem:[%s11220_s27 + $0x80] sm:$0xff]  ;;  %v1045_v35 = vld [vmem:[%s11220_s27 + $0x88] sm:$0xff]  ;;  %v1046_v36 = vld [vmem:[%s11220_s27 + $0x90] sm:$0xff]  ;;  %s11535_s22 = scalar_lea.vmem %s13370_s17, %s11527_s26  ;;  %4809 = vst.msk [vmem:[#allocation3 + $0x58] sm:$0xff] %vm4797_vm4, %v13384_v6  ;;  %s10926_s1 = sshll.u32 %s10990_s3, 4  ;;  %s10927_s1 = int_to_ptr.vmem [resolvable:$false] %s10926_s1 }
  0x2d   : > { %v1031_v37 = vld [vmem:[%s11220_s27 + $0x18] sm:$0xff]  ;;  %v1032_v38 = vld [vmem:[%s11220_s27 + $0x20] sm:$0xff]  ;;  %v1033_v41 = vld [vmem:[%s11220_s27 + $0x28] sm:$0xff]  ;;  %4810 = vst.msk [vmem:[#allocation3 + $0x60] sm:$0xff] %vm4797_vm4, %v13384_v6 }
  0x2e   : > { %10254 = vmatpush3.bf16.msra.mxu0 %v10253_v7  ;;  %v1047_v39 = vld [vmem:[%s11220_s27 + $0x98] sm:$0xff]  ;;  %v1048_v40 = vld [vmem:[%s11220_s27 + $0xa0] sm:$0xff]  ;;  %v1034_v42 = vld [vmem:[%s11220_s27 + $0x30] sm:$0xff]  ;;  %4811 = vst.msk [vmem:[#allocation3 + $0x68] sm:$0xff] %vm4797_vm4, %v13384_v6 }
  0x2f   : > { %10261 = vmatprep.subr.bf16.mxu0 %v10986_v3  ;;  %10260 = vmatpush3.bf16.msra.mxu1 %v10259_v19  ;;  %v1049_v44 = vld [vmem:[%s11220_s27 + $0xa8] sm:$0xff]  ;;  %v1050_v45 = vld [vmem:[%s11220_s27 + $0xb0] sm:$0xff]  ;;  %v1035_v46 = vld [vmem:[%s11220_s27 + $0x38] sm:$0xff]  ;;  %4812 = vst.msk [vmem:[#allocation3 + $0x70] sm:$0xff] %vm4797_vm4, %v13384_v6 }
  0x30   : > { %10270 = vmatprep.subr.bf16.mxu1 %v10909_v21  ;;  %v1036_v47 = vld [vmem:[%s11220_s27 + $0x40] sm:$0xff]  ;;  %v1051_v48 = vld [vmem:[%s11220_s27 + $0xb8] sm:$0xff]  ;;  %v1037_v50 = vld [vmem:[%s11220_s27 + $0x48] sm:$0xff]  ;;  %4813 = vst.msk [vmem:[#allocation3 + $0x78] sm:$0xff] %vm4797_vm4, %v13384_v6 }
  0x31   : > { %9491 = vmatmul.mubr.msk.f32.vlgmr.msra.gmra.mrb[0].mxu0 %vm729_vm1, %v723_v8  ;;  %v1052_v49 = vld [vmem:[%s11220_s27 + $0xc0] sm:$0xff]  ;;  %v1038_v55 = vld [vmem:[%s11220_s27 + $0x50] sm:$0xff]  ;;  %v1053_v56 = vld [vmem:[%s11220_s27 + $0xc8] sm:$0xff]  ;;  %4814 = vst.msk [vmem:[#allocation3 + $0x80] sm:$0xff] %vm4797_vm4, %v13384_v6 }
  0x32   : > { %9512 = vmatprep.mubr.msk.f32.mxu0 %vm10987_vm0, %v13384_v6  ;;  %10263 = vmatpush3.bf16.msra.mxu0 %v10262_v16  ;;  %v1054_v57 = vld [vmem:[%s11220_s27 + $0xd0] sm:$0xff]  ;;  %v1039_v62 = vld [vmem:[%s11220_s27 + $0x58] sm:$0xff]  ;;  %v1040_v63 = vld [vmem:[%s11220_s27 + $0x60] sm:$0xff]  ;;  %4815 = vst.msk [vmem:[#allocation3 + $0x88] sm:$0xff] %vm4797_vm4, %v13384_v6 }
  0x33   : > { %10264 = vmatprep.subr.bf16.mxu0 %v10986_v3  ;;  %9502 = vmatmul.mubr.msk.f32.vlgmr.msra.gmra.mrb[0].mxu1 %vm729_vm1, %v723_v8  ;;  %v1055_v0 = vld [vmem:[%s11220_s27 + $0xd8] sm:$0xff]  ;;  %v1056_v5 = vld [vmem:[%s11220_s27 + $0xe0] sm:$0xff]  ;;  %v1041_v7 = vld [vmem:[%s11220_s27 + $0x68] sm:$0xff]  ;;  %4816 = vst.msk [vmem:[#allocation3 + $0x90] sm:$0xff] %vm4797_vm4, %v13384_v6 }
  0x34   : > { %10271 = vmatpush3.bf16.msra.mxu1 %v10909_v21  ;;  %v1057_v13 = vld [vmem:[%s11220_s27 + $0xe8] sm:$0xff]  ;;  %v1058_v14 = vld [vmem:[%s11220_s27 + $0xf0] sm:$0xff]  ;;  %v1043_v15 = vld [vmem:[%s11220_s27 + $0x78] sm:$0xff]  ;;  %4817 = vst.msk [vmem:[#allocation3 + $0x98] sm:$0xff] %vm4797_vm4, %v13384_v6 }
  0x35   : > { %9553 = vmatprep.subr.bf16.mxu1 %v11210_v22  ;;  %v1061_v23 = vld [vmem:[%s11220_s27 + $0x108] sm:$0xff]  ;;  %4818 = vst.msk [vmem:[#allocation3 + $0xa0] sm:$0xff] %vm4797_vm4, %v13384_v6  ;;  %4819 = vst.msk [vmem:[#allocation3 + $0xa8] sm:$0xff] %vm4797_vm4, %v13384_v6 }
  0x36   : > { %10266 = vmatpush3.bf16.msra.mxu0 %v10265_v20  ;;  %v1059_v20 = vld [vmem:[%s11220_s27 + $0xf8] sm:$0xff]  ;;  %4820 = vst.msk [vmem:[#allocation3 + $0xb0] sm:$0xff] %vm4797_vm4, %v13384_v6  ;;  %4821 = vst.msk [vmem:[#allocation3 + $0xb8] sm:$0xff] %vm4797_vm4, %v13384_v6 }
  0x37   : > { %9515 = vmatprep.subr.bf16.mxu0 %v10909_v21  ;;  %4822 = vst.msk [vmem:[#allocation3 + $0xc0] sm:$0xff] %vm4797_vm4, %v13384_v6  ;;  %4823 = vst.msk [vmem:[#allocation3 + $0xc8] sm:$0xff] %vm4797_vm4, %v13384_v6 }
  0x38   : > { %4824 = vst.msk [vmem:[#allocation3 + $0xd0] sm:$0xff] %vm4797_vm4, %v13384_v6  ;;  %4825 = vst.msk [vmem:[#allocation3 + $0xd8] sm:$0xff] %vm4797_vm4, %v13384_v6 }
  0x39   : > { %9513 = vmatmul.mubr.msk.f32.vlgmr.msra.gmra.mrb[2].mxu0 %vm729_vm1, %v723_v8  ;;  %v1042_v8 = vld [vmem:[%s11220_s27 + $0x70] sm:$0xff]  ;;  %4826 = vst.msk [vmem:[#allocation3 + $0xe0] sm:$0xff] %vm4797_vm4, %v13384_v6  ;;  %4827 = vst.msk [vmem:[#allocation3 + $0xe8] sm:$0xff] %vm4797_vm4, %v13384_v6 }
  0x3a   : > { %9516 = vmatpush3.bf16.msra.mxu0 %v10909_v21  ;;  %v1060_v21 = vld [vmem:[%s11220_s27 + $0x100] sm:$0xff]  ;;  %4828 = vst.msk [vmem:[#allocation3 + $0xf0] sm:$0xff] %vm4797_vm4, %v13384_v6  ;;  %4829 = vst.msk [vmem:[#allocation3 + $0xf8] sm:$0xff] %vm4797_vm4, %v13384_v6 }
  0x3b   : > { %10267 = vmatprep.subr.bf16.mxu0 %v10986_v3  ;;  %4830 = vst.msk [vmem:[#allocation3 + $0x100] sm:$0xff] %vm4797_vm4, %v13384_v6  ;;  %4831 = vst.msk [vmem:[#allocation3 + $0x108] sm:$0xff] %vm4797_vm4, %v13384_v6 }
  0x3c   : > { %4832 = vst.msk [vmem:[#allocation3 + $0x110] sm:$0xff] %vm4797_vm4, %v13384_v6  ;;  %4833 = vst.msk [vmem:[#allocation3 + $0x118] sm:$0xff] %vm4797_vm4, %v13384_v6 }
  0x3d   : > { %4834 = vst.msk [vmem:[#allocation3 + $0x120] sm:$0xff] %vm4797_vm4, %v13384_v6  ;;  %4835 = vst.msk [vmem:[#allocation3 + $0x128] sm:$0xff] %vm4797_vm4, %v13384_v6 }
  0x3e   : > { %4836 = vst.msk [vmem:[#allocation3 + $0x130] sm:$0xff] %vm4797_vm4, %v13384_v6  ;;  %4837 = vst.msk [vmem:[#allocation3 + $0x138] sm:$0xff] %vm4797_vm4, %v13384_v6 }
 0x104   : > { %v799_v26 = vpop.f32.mrb[0].mxu0 }
 0x105   : > { %v800_v27 = vadd.f32 %v799_v26, %v728_v25  ;;  %v9492_v29 = vpop.f32.mrb[1].mxu0 }
 0x106   : > { %v1062_v29 = vld [vmem:[%s11220_s27 + $0x110] sm:$0xff] }
 0x107   : > { %v11228_v34 = vadd.f32 1.0, %v800_v27 }
 0x109   : > { %v11240_v43 = vrot.slane %v11228_v34, %v11222_v28 }
 0x10b   : > { %v1073_v51 = vmul.f32 %v11240_v43, %v1028_v30  ;;  %v1074_v52 = vmul.f32 %v11240_v43, %v1029_v31  ;;  %v1075_v53 = vmul.f32 %v11240_v43, %v1030_v32  ;;  %v1089_v54 = vmul.f32 %v11240_v43, %v1044_v33  ;;  %v1063_v30 = vld [vmem:[%s11220_s27 + $0x118] sm:$0xff]  ;;  %v1064_v31 = vld [vmem:[%s11220_s27 + $0x120] sm:$0xff] }
 0x10c   : > { %v1090_v58 = vmul.f32 %v11240_v43, %v1045_v35  ;;  %v1091_v59 = vmul.f32 %v11240_v43, %v1046_v36  ;;  %v1076_v60 = vmul.f32 %v11240_v43, %v1031_v37  ;;  %v1077_v61 = vmul.f32 %v11240_v43, %v1032_v38  ;;  %v1065_v37 = vld [vmem:[%s11220_s27 + $0x128] sm:$0xff]  ;;  %v1066_v38 = vld [vmem:[%s11220_s27 + $0x130] sm:$0xff] }
 0x10d   : > { %1115 = vst.msk [vmem:[#allocation2] sm:$0xff] %vm1114_vm2, %v1073_v51  ;;  %1116 = vst.msk [vmem:[#allocation2 + $0x8] sm:$0xff] %vm1114_vm2, %v1074_v52  ;;  %v1092_v1 = vmul.f32 %v11240_v43, %v1047_v39  ;;  %v1093_v2 = vmul.f32 %v11240_v43, %v1048_v40  ;;  %v1078_v3 = vmul.f32 %v11240_v43, %v1033_v41  ;;  %v1067_v39 = vld [vmem:[%s11220_s27 + $0x138] sm:$0xff] }
 0x10e   : > { %1117 = vst.msk [vmem:[#allocation2 + $0x10] sm:$0xff] %vm1114_vm2, %v1075_v53  ;;  %1131 = vst.msk [vmem:[#allocation2 + $0x80] sm:$0xff] %vm1114_vm2, %v1089_v54  ;;  %v1079_v4 = vmul.f32 %v11240_v43, %v1034_v42  ;;  %v1094_v9 = vmul.f32 %v11240_v43, %v1049_v44  ;;  %v1095_v10 = vmul.f32 %v11240_v43, %v1050_v45  ;;  %v1068_v45 = vld [vmem:[%s11220_s27 + $0x140] sm:$0xf]  ;;  %v4056_v53 = vld [vmem:[%s13362_s9 + $0x8] sm:$0xff]  ;;  %s13187_s27 = scalar_lea.hbm %s13373_s20, %s10861_s30 }
 0x10f   : > { %1132 = vst.msk [vmem:[#allocation2 + $0x88] sm:$0xff] %vm1114_vm2, %v1090_v58  ;;  %1133 = vst.msk [vmem:[#allocation2 + $0x90] sm:$0xff] %vm1114_vm2, %v1091_v59  ;;  %v1080_v11 = vmul.f32 %v11240_v43, %v1035_v46  ;;  %v1081_v12 = vmul.f32 %v11240_v43, %v1036_v47  ;;  %v1096_v16 = vmul.f32 %v11240_v43, %v1051_v48 }
 0x110   : > { %1118 = vst.msk [vmem:[#allocation2 + $0x18] sm:$0xff] %vm1114_vm2, %v1076_v60  ;;  %1119 = vst.msk [vmem:[#allocation2 + $0x20] sm:$0xff] %vm1114_vm2, %v1077_v61  ;;  %v1097_v17 = vmul.f32 %v11240_v43, %v1052_v49  ;;  %v1082_v18 = vmul.f32 %v11240_v43, %v1037_v50  ;;  %v1083_v19 = vmul.f32 %v11240_v43, %v1038_v55  ;;  %v4055_v49 = vld [vmem:[%s13362_s9] sm:$0xff] }
 0x111   : > { %1134 = vst.msk [vmem:[#allocation2 + $0x98] sm:$0xff] %vm1114_vm2, %v1092_v1  ;;  %1135 = vst.msk [vmem:[#allocation2 + $0xa0] sm:$0xff] %vm1114_vm2, %v1093_v2  ;;  %v1098_v24 = vmul.f32 %v11240_v43, %v1053_v56  ;;  %v1099_v25 = vmul.f32 %v11240_v43, %v1054_v57  ;;  %v1084_v26 = vmul.f32 %v11240_v43, %v1039_v62 }
 0x112   : > { %1120 = vst.msk [vmem:[#allocation2 + $0x28] sm:$0xff] %vm1114_vm2, %v1078_v3  ;;  %1121 = vst.msk [vmem:[#allocation2 + $0x30] sm:$0xff] %vm1114_vm2, %v1079_v4  ;;  %v1085_v27 = vmul.f32 %v11240_v43, %v1040_v63  ;;  %v1100_v32 = vmul.f32 %v11240_v43, %v1055_v0  ;;  %v1101_v33 = vmul.f32 %v11240_v43, %v1056_v5 }
 0x113   : > { %1136 = vst.msk [vmem:[#allocation2 + $0xa8] sm:$0xff] %vm1114_vm2, %v1094_v9  ;;  %1137 = vst.msk [vmem:[#allocation2 + $0xb0] sm:$0xff] %vm1114_vm2, %v1095_v10  ;;  %v1086_v35 = vmul.f32 %v11240_v43, %v1041_v7  ;;  %v1087_v36 = vmul.f32 %v11240_v43, %v1042_v8  ;;  %v1102_v40 = vmul.f32 %v11240_v43, %v1057_v13 }
 0x114   : > { %1122 = vst.msk [vmem:[#allocation2 + $0x38] sm:$0xff] %vm1114_vm2, %v1080_v11  ;;  %1123 = vst.msk [vmem:[#allocation2 + $0x40] sm:$0xff] %vm1114_vm2, %v1081_v12  ;;  %v1103_v41 = vmul.f32 %v11240_v43, %v1058_v14  ;;  %v1088_v42 = vmul.f32 %v11240_v43, %v1043_v15  ;;  %v1104_v44 = vmul.f32 %v11240_v43, %v1059_v20  ;;  %v1213_v51 = vld [vmem:[#allocation2 + $0x1] sm:$0xff]  ;;  %v11364_v11 = vld [vmem:[%s13361_s8 + $0x10] sm:$0xff]  }
 0x115   : > { %1138 = vst.msk [vmem:[#allocation2 + $0xb8] sm:$0xff] %vm1114_vm2, %v1096_v16  ;;  %1139 = vst.msk [vmem:[#allocation2 + $0xc0] sm:$0xff] %vm1114_vm2, %v1097_v17  ;;  %v1105_v46 = vmul.f32 %v11240_v43, %v1060_v21  ;;  %v1106_v47 = vmul.f32 %v11240_v43, %v1061_v23  ;;  %v1107_v48 = vmul.f32 %v11240_v43, %v1062_v29  ;;  %v1214_v52 = vld [vmem:[#allocation2 + $0x9] sm:$0xff] }
 0x116   : > { %1124 = vst.msk [vmem:[#allocation2 + $0x48] sm:$0xff] %vm1114_vm2, %v1082_v18  ;;  %1125 = vst.msk [vmem:[#allocation2 + $0x50] sm:$0xff] %vm1114_vm2, %v1083_v19  ;;  %v1108_v50 = vmul.f32 %v11240_v43, %v1063_v30  ;;  %v1109_v54 = vmul.f32 %v11240_v43, %v1064_v31  ;;  %v1110_v55 = vmul.f32 %v11240_v43, %v1065_v37  ;;  %v1229_v59 = vld [vmem:[#allocation2 + $0x81] sm:$0xff]  ;;  %v1230_v60 = vld [vmem:[#allocation2 + $0x89] sm:$0xff] }
 0x117   : > { %1140 = vst.msk [vmem:[#allocation2 + $0xc8] sm:$0xff] %vm1114_vm2, %v1098_v24  ;;  %1141 = vst.msk [vmem:[#allocation2 + $0xd0] sm:$0xff] %vm1114_vm2, %v1099_v25  ;;  %v1111_v56 = vmul.f32 %v11240_v43, %v1066_v38  ;;  %v1112_v57 = vmul.f32 %v11240_v43, %v1067_v39  ;;  %v1249_v58 = vpack.c.bf16 %v1214_v52, %v1213_v51  ;;  %v1215_v61 = vld [vmem:[#allocation2 + $0x11] sm:$0xff]  ;;  %v1216_v0 = vld [vmem:[#allocation2 + $0x19] sm:$0xff] }
 0x118   : > { %1126 = vst.msk [vmem:[#allocation2 + $0x58] sm:$0xff] %vm1114_vm2, %v1084_v26  ;;  %1127 = vst.msk [vmem:[#allocation2 + $0x60] sm:$0xff] %vm1114_vm2, %v1085_v27  ;;  %v1113_v62 = vmul.f32 %v11240_v43, %v1068_v45  ;;  %v1257_v63 = vpack.c.bf16 %v1230_v60, %v1229_v59  ;;  %v1231_v1 = vld [vmem:[#allocation2 + $0x91] sm:$0xff]  ;;  %v1232_v2 = vld [vmem:[#allocation2 + $0x99] sm:$0xff]  ;;  %v1250_v3 = vpack.c.bf16 %v1216_v0, %v1215_v61 }
 0x119   : > { %1142 = vst.msk [vmem:[#allocation2 + $0xd8] sm:$0xff] %vm1114_vm2, %v1100_v32  ;;  %1143 = vst.msk [vmem:[#allocation2 + $0xe0] sm:$0xff] %vm1114_vm2, %v1101_v33  ;;  %9517 = vmatprep.mubr.msk.bf16.mxu0 %vm1114_vm2, %v1249_v58  ;;  %v1258_v4 = vpack.c.bf16 %v1232_v2, %v1231_v1  ;;  %v1217_v5 = vld [vmem:[#allocation2 + $0x21] sm:$0xff]  ;;  %v1218_v7 = vld [vmem:[#allocation2 + $0x29] sm:$0xff]  ;;  %v10268_v43 = vpack.c.bf16 %v4056_v53, %v4055_v49  ;;  %v4054_v53 = vmul.f32 %v11228_v34, %v11228_v34 }
 0x11a   : > { %1128 = vst.msk [vmem:[#allocation2 + $0x68] sm:$0xff] %vm1114_vm2, %v1086_v35  ;;  %1129 = vst.msk [vmem:[#allocation2 + $0x70] sm:$0xff] %vm1114_vm2, %v1087_v36  ;;  %v1233_v8 = vld [vmem:[#allocation2 + $0xa1] sm:$0xff]  ;;  %9533 = vmatprep.mubr.msk.bf16.mxu1 %vm1114_vm2, %v1257_v63  ;;  %v1251_v9 = vpack.c.bf16 %v1218_v7, %v1217_v5  ;;  %v1234_v10 = vld [vmem:[#allocation2 + $0xa9] sm:$0xff]  ;;  %9518 = vmatmul.mubr.msk.bf16.vlgmr.msra.gmra.mrb[4].mxu0 %vm1114_vm2, %v1250_v3 }
 0x11b   : > { %1144 = vst.msk [vmem:[#allocation2 + $0xe8] sm:$0xff] %vm1114_vm2, %v1102_v40  ;;  %1145 = vst.msk [vmem:[#allocation2 + $0xf0] sm:$0xff] %vm1114_vm2, %v1103_v41  ;;  %9534 = vmatmul.mubr.msk.bf16.vlgmr.msra.gmra.mrb[4].mxu1 %vm1114_vm2, %v1258_v4  ;;  %v1259_v12 = vpack.c.bf16 %v1234_v10, %v1233_v8  ;;  %v1219_v13 = vld [vmem:[#allocation2 + $0x31] sm:$0xff]  ;;  %v1220_v14 = vld [vmem:[#allocation2 + $0x39] sm:$0xff]  ;;  %10269 = vmatpush3.bf16.msra.mxu0 %v10268_v43 }
 0x11c   : > { %1130 = vst.msk [vmem:[#allocation2 + $0x78] sm:$0xff] %vm1114_vm2, %v1088_v42  ;;  %1146 = vst.msk [vmem:[#allocation2 + $0xf8] sm:$0xff] %vm1114_vm2, %v1104_v44  ;;  %9554 = vmatpush3.bf16.msra.mxu1 %v11210_v22  ;;  %9521 = vmatprep.mubr.msk.bf16.mxu0 %vm1114_vm2, %v1251_v9  ;;  %v1235_v15 = vld [vmem:[#allocation2 + $0xb1] sm:$0xff]  ;;  %v1236_v16 = vld [vmem:[#allocation2 + $0xb9] sm:$0xff]  ;;  %v1252_v21 = vpack.c.bf16 %v1220_v14, %v1219_v13 }
 0x11d   : > { %1147 = vst.msk [vmem:[#allocation2 + $0x100] sm:$0xff] %vm1114_vm2, %v1105_v46  ;;  %1148 = vst.msk [vmem:[#allocation2 + $0x108] sm:$0xff] %vm1114_vm2, %v1106_v47  ;;  %9537 = vmatprep.mubr.msk.bf16.mxu1 %vm1114_vm2, %v1259_v12  ;;  %v1221_v17 = vld [vmem:[#allocation2 + $0x41] sm:$0xff]  ;;  %9591 = vmatprep.subr.bf16.mxu1 %v11364_v11  ;;  %v1222_v18 = vld [vmem:[#allocation2 + $0x49] sm:$0xff]  ;;  %v1260_v23 = vpack.c.bf16 %v1236_v16, %v1235_v15 }
 0x11e   : > { %1149 = vst.msk [vmem:[#allocation2 + $0x110] sm:$0xff] %vm1114_vm2, %v1107_v48  ;;  %1150 = vst.msk [vmem:[#allocation2 + $0x118] sm:$0xff] %vm1114_vm2, %v1108_v50  ;;  %v1237_v19 = vld [vmem:[#allocation2 + $0xc1] sm:$0xff]  ;;  %v1238_v20 = vld [vmem:[#allocation2 + $0xc9] sm:$0xff]  ;;  %v1253_v24 = vpack.c.bf16 %v1222_v18, %v1221_v17 }
 0x11f   : > { %1151 = vst.msk [vmem:[#allocation2 + $0x120] sm:$0xff] %vm1114_vm2, %v1109_v54  ;;  %1152 = vst.msk [vmem:[#allocation2 + $0x128] sm:$0xff] %vm1114_vm2, %v1110_v55  ;;  %v1261_v25 = vpack.c.bf16 %v1238_v20, %v1237_v19  ;;  %v1223_v22 = vld [vmem:[#allocation2 + $0x51] sm:$0xff]  ;;  %v1224_v26 = vld [vmem:[#allocation2 + $0x59] sm:$0xff] }
 0x120   : > { %1153 = vst.msk [vmem:[#allocation2 + $0x130] sm:$0xff] %vm1114_vm2, %v1111_v56  ;;  %1154 = vst.msk [vmem:[#allocation2 + $0x138] sm:$0xff] %vm1114_vm2, %v1112_v57  ;;  %v1239_v27 = vld [vmem:[#allocation2 + $0xd1] sm:$0xff]  ;;  %v1240_v29 = vld [vmem:[#allocation2 + $0xd9] sm:$0xff]  ;;  %v1254_v35 = vpack.c.bf16 %v1224_v26, %v1223_v22  ;;  %v11407_v26 = vpop.f32.mrb[0].mxu1 }
 0x121   : > { %1156 = vst.msk [vmem:[#allocation2 + $0x140] sm:$0xf] %vm1155_vm3, %v1113_v62  ;;  %v1225_v30 = vld [vmem:[#allocation2 + $0x61] sm:$0xff]  ;;  %v1226_v31 = vld [vmem:[#allocation2 + $0x69] sm:$0xff]  ;;  %v1262_v36 = vpack.c.bf16 %v1240_v29, %v1239_v27  ;;  %v1160_v57 = vld [vmem:[#allocation2 + $0x18] sm:$0xff]  ;;  %v9503_v29 = vpop.f32.mrb[1].mxu1 }
 0x122   : > { %9522 = vmatmul.mubr.msk.bf16.gmra.mrb[8].mxu0 %vm1114_vm2, %v1252_v21  ;;  %v1241_v32 = vld [vmem:[#allocation2 + $0xe1] sm:$0xff]  ;;  %v1242_v33 = vld [vmem:[#allocation2 + $0xe9] sm:$0xff]  ;;  %v1255_v37 = vpack.c.bf16 %v1226_v31, %v1225_v30  ;;  %v11393_v61 = vld [vmem:[%s13361_s8 + $0x18] sm:$0xff]   ;;  %v11410_v31 = vpop.f32.mrb[2].mxu0 }
 0x123   : > { %9538 = vmatmul.mubr.msk.bf16.gmra.mrb[8].mxu1 %vm1114_vm2, %v1260_v23  ;;  %9525 = vmatprep.mubr.msk.bf16.mxu0 %vm1114_vm2, %v1253_v24  ;;  %v1263_v38 = vpack.c.bf16 %v1242_v33, %v1241_v32  ;;  %v1227_v39 = vld [vmem:[#allocation2 + $0x71] sm:$0xff]  ;;  %v1228_v40 = vld [vmem:[#allocation2 + $0x79] sm:$0xff]  ;;  %v1158_v52 = vld [vmem:[#allocation2 + $0x8] sm:$0xff]  ;;  %13473 = vst [vmem:[#allocation14_spill] sm:$0xff] %v11410_v31  ;;  %v9514_v32 = vpop.f32.mrb[3].mxu0 }
 0x124   : > { %9541 = vmatprep.mubr.msk.bf16.mxu1 %vm1114_vm2, %v1261_v25  ;;  %v1243_v41 = vld [vmem:[#allocation2 + $0xf1] sm:$0xff]  ;;  %v1244_v42 = vld [vmem:[#allocation2 + $0xf9] sm:$0xff]  ;;  %v1245_v44 = vld [vmem:[#allocation2 + $0x101] sm:$0xff]  ;;  %v1256_v46 = vpack.c.bf16 %v1228_v40, %v1227_v39 }
 0x125   : > { %v1246_v45 = vld [vmem:[#allocation2 + $0x109] sm:$0xff]  ;;  %v1264_v47 = vpack.c.bf16 %v1244_v42, %v1243_v41  ;;  %v1247_v49 = vld [vmem:[#allocation2 + $0x111] sm:$0xff]  ;;  %v1248_v50 = vld [vmem:[#allocation2 + $0x119] sm:$0x3f] }
 0x126   : > { %v1265_v48 = vpack.c.bf16 %v1246_v45, %v1245_v44  ;;  %v1157_v51 = vld [vmem:[#allocation2] sm:$0xff]  ;;  %v1266_v54 = vpack.c.bf16 %v1248_v50, %v1247_v49  ;;  %v1159_v56 = vld [vmem:[#allocation2 + $0x10] sm:$0xff]  ;;  %v1162_v59 = vld [vmem:[#allocation2 + $0x28] sm:$0xff] }
 0x127   : > { %v1193_v55 = vpack.c.bf16 %v1158_v52, %v1157_v51  ;;  %v1161_v58 = vld [vmem:[#allocation2 + $0x20] sm:$0xff]  ;;  %v1194_v60 = vpack.c.bf16 %v1160_v57, %v1159_v56  ;;  %v1163_v34 = vld [vmem:[#allocation2 + $0x30] sm:$0xff]  ;;  %v1164_v63 = vld [vmem:[#allocation2 + $0x38] sm:$0xff] }
 0x128   : > { %v1195_v62 = vpack.c.bf16 %v1162_v59, %v1161_v58  ;;  %v1165_v0 = vld [vmem:[#allocation2 + $0x40] sm:$0xff]  ;;  %v1166_v1 = vld [vmem:[#allocation2 + $0x48] sm:$0xff]  ;;  %v1196_v2 = vpack.c.bf16 %v1164_v63, %v1163_v34  ;;  %v1167_v4 = vld [vmem:[#allocation2 + $0x50] sm:$0xff] }
 0x129   : > { %v1197_v3 = vpack.c.bf16 %v1166_v1, %v1165_v0  ;;  %v1168_v5 = vld [vmem:[#allocation2 + $0x58] sm:$0xff]  ;;  %v1169_v7 = vld [vmem:[#allocation2 + $0x60] sm:$0xff]  ;;  %v1170_v8 = vld [vmem:[#allocation2 + $0x68] sm:$0xff] }
 0x12a   : > { %9526 = vmatmul.mubr.msk.bf16.gmra.mrb[12].mxu0 %vm1114_vm2, %v1254_v35  ;;  %v1198_v43 = vpack.c.bf16 %v1168_v5, %v1167_v4  ;;  %v1199_v9 = vpack.c.bf16 %v1170_v8, %v1169_v7  ;;  %v1171_v10 = vld [vmem:[#allocation2 + $0x70] sm:$0xff]  ;;  %v1173_v12 = vld [vmem:[#allocation2 + $0x80] sm:$0xff]  ;;  %v1174_v13 = vld [vmem:[#allocation2 + $0x88] sm:$0xff] }
 0x12b   : > { %9542 = vmatmul.mubr.msk.bf16.gmra.mrb[12].mxu1 %vm1114_vm2, %v1262_v36  ;;  %9529 = vmatprep.mubr.msk.bf16.mxu0 %vm1114_vm2, %v1255_v37  ;;  %v1201_v15 = vpack.c.bf16 %v1174_v13, %v1173_v12  ;;  %v1175_v16 = vld [vmem:[#allocation2 + $0x90] sm:$0xff]  ;;  %v1176_v17 = vld [vmem:[#allocation2 + $0x98] sm:$0xff]  ;;  %v1177_v18 = vld [vmem:[#allocation2 + $0xa0] sm:$0xff] }
 0x12c   : > { %9545 = vmatprep.mubr.msk.bf16.mxu1 %vm1114_vm2, %v1263_v38  ;;  %v1178_v19 = vld [vmem:[#allocation2 + $0xa8] sm:$0xff]  ;;  %v1202_v20 = vpack.c.bf16 %v1176_v17, %v1175_v16  ;;  %v1179_v23 = vld [vmem:[#allocation2 + $0xb0] sm:$0xff]  ;;  %v1180_v24 = vld [vmem:[#allocation2 + $0xb8] sm:$0xff] }
 0x12d   : > { %v1203_v21 = vpack.c.bf16 %v1178_v19, %v1177_v18  ;;  %v1181_v25 = vld [vmem:[#allocation2 + $0xc0] sm:$0xff]  ;;  %v1182_v22 = vld [vmem:[#allocation2 + $0xc8] sm:$0xff]  ;;  %v1204_v27 = vpack.c.bf16 %v1180_v24, %v1179_v23  ;;  %v1183_v33 = vld [vmem:[#allocation2 + $0xd0] sm:$0xff] }
 0x12e   : > { %v1205_v30 = vpack.c.bf16 %v1182_v22, %v1181_v25  ;;  %v1184_v35 = vld [vmem:[#allocation2 + $0xd8] sm:$0xff]  ;;  %v1185_v36 = vld [vmem:[#allocation2 + $0xe0] sm:$0xff]  ;;  %v1186_v37 = vld [vmem:[#allocation2 + $0xe8] sm:$0xff] }
 0x12f   : > { %v1206_v38 = vpack.c.bf16 %v1184_v35, %v1183_v33  ;;  %v1207_v39 = vpack.c.bf16 %v1186_v37, %v1185_v36  ;;  %v1187_v40 = vld [vmem:[#allocation2 + $0xf0] sm:$0xff]  ;;  %v1188_v41 = vld [vmem:[#allocation2 + $0xf8] sm:$0xff]  ;;  %v1189_v42 = vld [vmem:[#allocation2 + $0x100] sm:$0xff] }
 0x130   : > { %v1190_v44 = vld [vmem:[#allocation2 + $0x108] sm:$0xff]  ;;  %v1208_v45 = vpack.c.bf16 %v1188_v41, %v1187_v40  ;;  %v11424_v58 = vld [vmem:[%s13361_s8 + $0x20] sm:$0xff]   ;;  %v1758_v8 = vld [vmem:[#allocation2 + $0x72] sm:$0xff] }
 0x131   : > { %v1744_v49 = vld [vmem:[#allocation2 + $0x2] sm:$0xff]  ;;  %v1745_v50 = vld [vmem:[#allocation2 + $0xa] sm:$0xff]  ;;  %v1762_v13 = vld [vmem:[#allocation2 + $0x92] sm:$0xff] }
 0x132   : > { %9530 = vmatmul.mubr.msk.bf16.gmra.mrb[16].mxu0 %vm1114_vm2, %v1256_v46  ;;  %v1209_v46 = vpack.c.bf16 %v1190_v44, %v1189_v42  ;;  %v1780_v52 = vpack.c.bf16 %v1745_v50, %v1744_v49  ;;  %v1749_v56 = vld [vmem:[#allocation2 + $0x2a] sm:$0xff]  ;;  %v1752_v34 = vld [vmem:[#allocation2 + $0x42] sm:$0xff]  ;;  %v1766_v19 = vld [vmem:[#allocation2 + $0xb2] sm:$0xff] }
 0x133   : > { %9546 = vmatmul.mubr.msk.bf16.gmra.mrb[16].mxu1 %vm1114_vm2, %v1264_v47  ;;  %9861 = vmatprep.mubr.msk.f32.mxu0 %vm10987_vm0, %v13384_v6  ;;  %v1191_v47 = vld [vmem:[#allocation2 + $0x110] sm:$0xff]  ;;  %v1756_v4 = vld [vmem:[#allocation2 + $0x62] sm:$0xff]  ;;  %v1775_v36 = vld [vmem:[#allocation2 + $0xfa] sm:$0xff] }
 0x134   : > { %9549 = vmatprep.mubr.msk.bf16.mxu1 %vm1114_vm2, %v1265_v48  ;;  %v1192_v48 = vld [vmem:[#allocation2 + $0x118] sm:$0x3f]  ;;  %v1753_v63 = vld [vmem:[#allocation2 + $0x4a] sm:$0xff]  ;;  %v1772_v29 = vld [vmem:[#allocation2 + $0xe2] sm:$0xff] }
 0x135   : > { %v1210_v51 = vpack.c.bf16 %v1192_v48, %v1191_v47  ;;  %v1784_v1 = vpack.c.bf16 %v1753_v63, %v1752_v34  ;;  %v1757_v5 = vld [vmem:[#allocation2 + $0x6a] sm:$0xff]  ;;  %v1770_v22 = vld [vmem:[#allocation2 + $0xd2] sm:$0xff]  ;;  %v1776_v37 = vld [vmem:[#allocation2 + $0x102] sm:$0xff] }
 0x136   : > { %v1786_v7 = vpack.c.bf16 %v1757_v5, %v1756_v4  ;;  %v1765_v16 = vld [vmem:[#allocation2 + $0xaa] sm:$0xff]  ;;  %v1774_v35 = vld [vmem:[#allocation2 + $0xf2] sm:$0xff]  ;;  %v1779_v42 = vld [vmem:[#allocation2 + $0x11a] sm:$0x3f] }
 0x137   : > { %v1769_v23 = vld [vmem:[#allocation2 + $0xca] sm:$0xff]  ;;  %v1778_v41 = vld [vmem:[#allocation2 + $0x112] sm:$0xff]  ;;  %v2405_v5 = vld [vmem:[#allocation2 + $0x1b] sm:$0xff] }
 0x138   : > { %v1797_v44 = vpack.c.bf16 %v1779_v42, %v1778_v41  ;;  %v2404_v4 = vld [vmem:[#allocation2 + $0x13] sm:$0xff]  ;;  %v2426_v42 = vld [vmem:[#allocation2 + $0xc3] sm:$0xff] }
 0x13a   : > { %9862 = vmatmul.mubr.msk.f32.vlgmr.msra.gmra.mrb[20].mxu0 %vm1114_vm2, %v4054_v53  ;;  %v1746_v53 = vld [vmem:[#allocation2 + $0x12] sm:$0xff] }
 0x13b   : > { %9550 = vmatmul.mubr.msk.bf16.gmra.mrb[20].mxu1 %vm1114_vm2, %v1266_v54  ;;  %v1747_v54 = vld [vmem:[#allocation2 + $0x1a] sm:$0xff] }
 0x13c   : > { %9555 = vmatprep.mubr.msk.bf16.mxu1 %vm1114_vm2, %v1193_v55  ;;  %v1748_v55 = vld [vmem:[#allocation2 + $0x22] sm:$0xff]  ;;  %v11419_v57 = vpack.c.bf16 %v1747_v54, %v1746_v53 }
 0x13d   : > { %v11426_v59 = vpack.c.bf16 %v1749_v56, %v1748_v55 }
 0x143   : > { %9556 = vmatmul.mubr.msk.bf16.vlgmr.msra.gmra.mrb[24].mxu1 %vm1114_vm2, %v1194_v60  ;;  %v1750_v60 = vld [vmem:[#allocation2 + $0x32] sm:$0xff] }
 0x144   : > { %9592 = vmatpush3.bf16.msra.mxu1 %v11364_v11  ;;  %9559 = vmatprep.mubr.msk.bf16.mxu1 %vm1114_vm2, %v1195_v62  ;;  %v1172_v11 = vld [vmem:[#allocation2 + $0x78] sm:$0xff] }
 0x145   : > { %9629 = vmatprep.subr.bf16.mxu1 %v11393_v61  ;;  %v1200_v14 = vpack.c.bf16 %v1172_v11, %v1171_v10  ;;  %v1751_v62 = vld [vmem:[#allocation2 + $0x3a] sm:$0xff]  ;;  %v1761_v10 = vld [vmem:[#allocation2 + $0x8a] sm:$0xff] }
 0x146   : > { %v1783_v0 = vpack.c.bf16 %v1751_v62, %v1750_v60  ;;  %v2107_v60 = vld [vmem:[#allocation2 + $0x11a] sm:$0xff] }
 0x147   : > { %v2126_v63 = vpack.c.bf16 %v2107_v60, %v1778_v41  ;;  %v2429_v60 = vld [vmem:[#allocation2 + $0xdb] sm:$0xff] }
 0x14b   : > { %9560 = vmatmul.mubr.msk.bf16.gmra.mrb[28].mxu1 %vm1114_vm2, %v1196_v2  ;;  %v1754_v2 = vld [vmem:[#allocation2 + $0x52] sm:$0xff] }
 0x14c   : > { %9563 = vmatprep.mubr.msk.bf16.mxu1 %vm1114_vm2, %v1197_v3  ;;  %v1755_v3 = vld [vmem:[#allocation2 + $0x5a] sm:$0xff] }
 0x153   : > { %9564 = vmatmul.mubr.msk.bf16.gmra.mrb[32].mxu1 %vm1114_vm2, %v1198_v43  ;;  %v1759_v43 = vld [vmem:[#allocation2 + $0x7a] sm:$0xff] }
 0x154   : > { %9567 = vmatprep.mubr.msk.bf16.mxu1 %vm1114_vm2, %v1199_v9  ;;  %v1760_v9 = vld [vmem:[#allocation2 + $0x82] sm:$0xff]  ;;  %v1787_v11 = vpack.c.bf16 %v1759_v43, %v1758_v8  ;;  %v2407_v43 = vld [vmem:[#allocation2 + $0x2b] sm:$0xff] }
 0x155   : > { %v1788_v12 = vpack.c.bf16 %v1761_v10, %v1760_v9  ;;  %v2406_v8 = vld [vmem:[#allocation2 + $0x23] sm:$0xff]  ;;  %v2408_v9 = vld [vmem:[#allocation2 + $0x33] sm:$0xff]  ;;  %v2409_v10 = vld [vmem:[#allocation2 + $0x3b] sm:$0xff] }
 0x15b   : > { %9568 = vmatmul.mubr.msk.bf16.gmra.mrb[36].mxu1 %vm1114_vm2, %v1200_v14  ;;  %v1763_v14 = vld [vmem:[#allocation2 + $0x9a] sm:$0xff] }
 0x15c   : > { %9571 = vmatprep.mubr.msk.bf16.mxu1 %vm1114_vm2, %v1201_v15  ;;  %v1764_v15 = vld [vmem:[#allocation2 + $0xa2] sm:$0xff]  ;;  %v1789_v17 = vpack.c.bf16 %v1763_v14, %v1762_v13  ;;  %v2442_v13 = vpack.c.bf16 %v2409_v10, %v2408_v9 }
 0x15d   : > { %v1790_v18 = vpack.c.bf16 %v1765_v16, %v1764_v15  ;;  %v2410_v14 = vld [vmem:[#allocation2 + $0x43] sm:$0xff]  ;;  %v2411_v15 = vld [vmem:[#allocation2 + $0x4b] sm:$0xff]  ;;  %v2412_v16 = vld [vmem:[#allocation2 + $0x53] sm:$0xff] }
 0x15e   : > { %v956_v9 = vld [vmem:[%s11535_s22] sm:$0xff] }
 0x15f   : > { %v2434_v10 = vld [vmem:[#allocation2 + $0x103] sm:$0xff] }
 0x163   : > { %9572 = vmatmul.mubr.msk.bf16.gmra.mrb[4].mxu1 %vm1114_vm2, %v1202_v20  ;;  %v1767_v20 = vld [vmem:[#allocation2 + $0xba] sm:$0xff] }
 0x164   : > { %9575 = vmatprep.mubr.msk.bf16.mxu1 %vm1114_vm2, %v1203_v21  ;;  %v1768_v21 = vld [vmem:[#allocation2 + $0xc2] sm:$0xff]  ;;  %v1791_v24 = vpack.c.bf16 %v1767_v20, %v1766_v19 }
 0x165   : > { %v1792_v25 = vpack.c.bf16 %v1769_v23, %v1768_v21  ;;  %v2414_v20 = vld [vmem:[#allocation2 + $0x63] sm:$0xff]  ;;  %v2415_v21 = vld [vmem:[#allocation2 + $0x6b] sm:$0xff]  ;;  %v2416_v23 = vld [vmem:[#allocation2 + $0x73] sm:$0xff] }
 0x16b   : > { %9576 = vmatmul.mubr.msk.bf16.gmra.mrb[8].mxu1 %vm1114_vm2, %v1204_v27  ;;  %v1771_v27 = vld [vmem:[#allocation2 + $0xda] sm:$0xff] }
 0x16c   : > { %9579 = vmatprep.mubr.msk.bf16.mxu1 %vm1114_vm2, %v1205_v30  ;;  %v1773_v30 = vld [vmem:[#allocation2 + $0xea] sm:$0xff]  ;;  %v1793_v32 = vpack.c.bf16 %v1771_v27, %v1770_v22 }
 0x16d   : > { %v1794_v33 = vpack.c.bf16 %v1773_v30, %v1772_v29  ;;  %v2418_v27 = vld [vmem:[#allocation2 + $0x83] sm:$0xff]  ;;  %v2419_v29 = vld [vmem:[#allocation2 + $0x8b] sm:$0xff]  ;;  %v2420_v30 = vld [vmem:[#allocation2 + $0x93] sm:$0xff] }
 0x173   : > { %9580 = vmatmul.mubr.msk.bf16.gmra.mrb[12].mxu1 %vm1114_vm2, %v1206_v38  ;;  %v1777_v38 = vld [vmem:[#allocation2 + $0x10a] sm:$0xff] }
 0x174   : > { %9583 = vmatprep.mubr.msk.bf16.mxu1 %vm1114_vm2, %v1207_v39  ;;  %v1795_v39 = vpack.c.bf16 %v1775_v36, %v1774_v35  ;;  %v1796_v40 = vpack.c.bf16 %v1777_v38, %v1776_v37  ;;  %v2422_v36 = vld [vmem:[#allocation2 + $0xa3] sm:$0xff]  ;;  %v2423_v37 = vld [vmem:[#allocation2 + $0xab] sm:$0xff]  ;;  %v2424_v38 = vld [vmem:[#allocation2 + $0xb3] sm:$0xff] }
 0x17b   : > { %9584 = vmatmul.mubr.msk.bf16.gmra.mrb[16].mxu1 %vm1114_vm2, %v1208_v45  ;;  %v10914_v45 = vld [vmem:[%s13361_s8 + $0x28] sm:$0xff]  }
 0x17c   : > { %9587 = vmatprep.mubr.msk.bf16.mxu1 %vm1114_vm2, %v1209_v46 }
 0x183   : > { %9588 = vmatmul.mubr.msk.bf16.gmra.mrb[20].mxu1 %vm1114_vm2, %v1210_v51 }
 0x184   : > { %9593 = vmatprep.mubr.msk.bf16.mxu1 %vm1114_vm2, %v1780_v52 }
 0x18b   : > { %9594 = vmatmul.mubr.msk.bf16.vlgmr.msra.gmra.mrb[24].mxu1 %vm1114_vm2, %v11419_v57 }
 0x18c   : > { %9630 = vmatpush3.bf16.msra.mxu1 %v11393_v61  ;;  %9597 = vmatprep.mubr.msk.bf16.mxu1 %vm1114_vm2, %v11426_v59  ;;  %v1785_v61 = vpack.c.bf16 %v1755_v3, %v1754_v2  ;;  %v2109_v2 = vld [vmem:[#allocation2 + $0x12a] sm:$0x3f] }
 0x18d   : > { %9667 = vmatprep.subr.bf16.mxu1 %v11424_v58 }
 0x193   : > { %9598 = vmatmul.mubr.msk.bf16.gmra.mrb[28].mxu1 %vm1114_vm2, %v1783_v0 }
 0x194   : > { %9601 = vmatprep.mubr.msk.bf16.mxu1 %vm1114_vm2, %v1784_v1 }
 0x19b   : > { %9602 = vmatmul.mubr.msk.bf16.gmra.mrb[32].mxu1 %vm1114_vm2, %v1785_v61 }
 0x19c   : > { %9605 = vmatprep.mubr.msk.bf16.mxu1 %vm1114_vm2, %v1786_v7 }
 0x1a3   : > { %9606 = vmatmul.mubr.msk.bf16.gmra.mrb[36].mxu1 %vm1114_vm2, %v1787_v11 }
 0x1a4   : > { %9609 = vmatprep.mubr.msk.bf16.mxu1 %vm1114_vm2, %v1788_v12 }
 0x1ab   : > { %9610 = vmatmul.mubr.msk.bf16.gmra.mrb[4].mxu1 %vm1114_vm2, %v1789_v17 }
 0x1ac   : > { %9613 = vmatprep.mubr.msk.bf16.mxu1 %vm1114_vm2, %v1790_v18 }
 0x1b3   : > { %9614 = vmatmul.mubr.msk.bf16.gmra.mrb[8].mxu1 %vm1114_vm2, %v1791_v24 }
 0x1b4   : > { %9617 = vmatprep.mubr.msk.bf16.mxu1 %vm1114_vm2, %v1792_v25 }
 0x1bb   : > { %9618 = vmatmul.mubr.msk.bf16.gmra.mrb[12].mxu1 %vm1114_vm2, %v1793_v32 }
 0x1bc   : > { %9621 = vmatprep.mubr.msk.bf16.mxu1 %vm1114_vm2, %v1794_v33 }
 0x1c3   : > { %9622 = vmatmul.mubr.msk.bf16.gmra.mrb[16].mxu1 %vm1114_vm2, %v1795_v39 }
 0x1c4   : > { %9625 = vmatprep.mubr.msk.bf16.mxu1 %vm1114_vm2, %v1796_v40 }
 0x1cb   : > { %9626 = vmatmul.mubr.msk.bf16.gmra.mrb[20].mxu1 %vm1114_vm2, %v1797_v44  ;;  %v2427_v44 = vld [vmem:[#allocation2 + $0xcb] sm:$0xff] }
 0x1cc   : > { %9631 = vmatprep.mubr.msk.bf16.mxu1 %vm1114_vm2, %v11419_v57 }
 0x1d3   : > { %9632 = vmatmul.mubr.msk.bf16.vlgmr.msra.gmra.mrb[24].mxu1 %vm1114_vm2, %v11426_v59 }
 0x1d4   : > { %9668 = vmatpush3.bf16.msra.mxu1 %v11424_v58  ;;  %9635 = vmatprep.mubr.msk.bf16.mxu1 %vm1114_vm2, %v1783_v0 }
 0x1d5   : > { %9705 = vmatprep.subr.bf16.mxu1 %v10914_v45 }
 0x1db   : > { %9636 = vmatmul.mubr.msk.bf16.gmra.mrb[28].mxu1 %vm1114_vm2, %v1784_v1  ;;  %v2108_v1 = vld [vmem:[#allocation2 + $0x122] sm:$0xff] }
 0x1dc   : > { %9639 = vmatprep.mubr.msk.bf16.mxu1 %vm1114_vm2, %v1785_v61  ;;  %v2127_v61 = vpack.c.bf16 %v2109_v2, %v2108_v1  ;;  %v2430_v2 = vld [vmem:[#allocation2 + $0xe3] sm:$0xff] }
 0x1e3   : > { %9640 = vmatmul.mubr.msk.bf16.gmra.mrb[32].mxu1 %vm1114_vm2, %v1786_v7  ;;  %v2440_v7 = vpack.c.bf16 %v2405_v5, %v2404_v4  ;;  %v2432_v4 = vld [vmem:[#allocation2 + $0xf3] sm:$0xff]  ;;  %v2433_v5 = vld [vmem:[#allocation2 + $0xfb] sm:$0xff] }
 0x1e4   : > { %9643 = vmatprep.mubr.msk.bf16.mxu1 %vm1114_vm2, %v1787_v11  ;;  %v2441_v11 = vpack.c.bf16 %v2407_v43, %v2406_v8  ;;  %v10989_v8 = vmov 0   ;;  %v958_v43 = vld [vmem:[%s11535_s22 + $0x10] sm:$0xff] }
 0x1e5   : > { %10908 = vset.pattern.permute.xlu1 %v10989_v8  ;;  %10907 = vset.pattern.permute.xlu0 %v10989_v8  ;;  %v966_v8 = vld [vmem:[%s11535_s22 + $0x50] sm:$0xff] }
 0x1e6   : > { %4184 = vperm.xlu1 %10908, %v958_v43   ;;  %4174 = vperm.xlu0 %10907, %v956_v9   ;;  %v2744_v43 = vld [vmem:[#allocation2 + $0x64] sm:$0xff]  ;;  %v2745_v9 = vld [vmem:[#allocation2 + $0x6c] sm:$0xff] }
 0x1eb   : > { %9644 = vmatmul.mubr.msk.bf16.gmra.mrb[36].mxu1 %vm1114_vm2, %v1788_v12  ;;  %v11511_v12 = vld [vmem:[%s13361_s8 + $0x30] sm:$0xff]  }
 0x1ec   : > { %9647 = vmatprep.mubr.msk.bf16.mxu1 %vm1114_vm2, %v1789_v17  ;;  %v2413_v17 = vld [vmem:[#allocation2 + $0x5b] sm:$0xff] }
 0x1ed   : > { %v11464_v46 = vpop.f32.mrb[4].mxu0  ;;  %v2444_v19 = vpack.c.bf16 %v2413_v17, %v2412_v16  ;;  %v957_v16 = vld [vmem:[%s11535_s22 + $0x8] sm:$0xff] }
 0x1ee   : > { %v11466_v47 = vpop.f32.mrb[5].mxu0  ;;  %4179 = vperm.xlu0 %10907, %v957_v16  }
 0x1ef   : > { %v11468_v48 = vpop.f32.mrb[6].mxu0 }
 0x1f0   : > { %v11470_v49 = vpop.f32.mrb[7].mxu0 }
 0x1f3   : > { %9648 = vmatmul.mubr.msk.bf16.gmra.mrb[4].mxu1 %vm1114_vm2, %v1790_v18  ;;  %v2443_v18 = vpack.c.bf16 %v2411_v15, %v2410_v14  ;;  %v2437_v14 = vld [vmem:[#allocation2 + $0x11b] sm:$0xff] }
 0x1f4   : > { %9651 = vmatprep.mubr.msk.bf16.mxu1 %vm1114_vm2, %v1791_v24  ;;  %v2417_v24 = vld [vmem:[#allocation2 + $0x7b] sm:$0xff] }
 0x1f5   : > { %v11474_v50 = vpop.f32.mrb[8].mxu0  ;;  %v2446_v22 = vpack.c.bf16 %v2417_v24, %v2416_v23  ;;  %v959_v15 = vld [vmem:[%s11535_s22 + $0x18] sm:$0xff]  ;;  %v2439_v23 = vld [vmem:[#allocation2 + $0x12b] sm:$0x3f] }
 0x1f6   : > { %v11476_v51 = vpop.f32.mrb[9].mxu0  ;;  %4189 = vperm.xlu1 %10908, %v959_v15   ;;  %v2734_v24 = vld [vmem:[#allocation2 + $0x14] sm:$0xff]  ;;  %v11596_v15 = vpack.c.bf16 %v2745_v9, %v2744_v43 }
 0x1f7   : > { %v11478_v52 = vpop.f32.mrb[10].mxu0  ;;  %v975_v43 = vld [vmem:[%s11535_s22 + $0x98] sm:$0xff]  ;;  %v974_v9 = vld [vmem:[%s11535_s22 + $0x90] sm:$0xff] }
 0x1f8   : > { %v11480_v53 = vpop.f32.mrb[11].mxu0 }
 0x1fb   : > { %9652 = vmatmul.mubr.msk.bf16.gmra.mrb[8].mxu1 %vm1114_vm2, %v1792_v25  ;;  %v2445_v25 = vpack.c.bf16 %v2415_v21, %v2414_v20  ;;  %v960_v20 = vld [vmem:[%s11535_s22 + $0x20] sm:$0xff] }
 0x1fc   : > { %9655 = vmatprep.mubr.msk.bf16.mxu1 %vm1114_vm2, %v1793_v32  ;;  %v2421_v32 = vld [vmem:[#allocation2 + $0x9b] sm:$0xff]  ;;  %v2438_v21 = vld [vmem:[#allocation2 + $0x123] sm:$0xff]  ;;  %4194 = vperm.xlu0 %10907, %v960_v20   ;;  %v2749_v20 = vld [vmem:[#allocation2 + $0x8c] sm:$0xff] }
 0x1fd   : > { %v11484_v54 = vpop.f32.mrb[12].mxu0  ;;  %v2448_v35 = vpack.c.bf16 %v2421_v32, %v2420_v30  ;;  %v963_v32 = vld [vmem:[%s11535_s22 + $0x38] sm:$0xff] }
 0x1fe   : > { %v11486_v55 = vpop.f32.mrb[13].mxu0 }
 0x1ff   : > { %v11488_v56 = vpop.f32.mrb[14].mxu0 }
 0x200   : > { %v11490_v57 = vpop.f32.mrb[15].mxu0 }
 0x203   : > { %9656 = vmatmul.mubr.msk.bf16.gmra.mrb[12].mxu1 %vm1114_vm2, %v1794_v33  ;;  %v2447_v33 = vpack.c.bf16 %v2419_v29, %v2418_v27  ;;  %v992_v27 = vld [vmem:[%s13371_s18] sm:$0xff]  ;;  %v2457_v29 = vpack.c.bf16 %v2439_v23, %v2438_v21  ;;  %v2750_v21 = vld [vmem:[#allocation2 + $0x94] sm:$0xff] }
 0x204   : > { %9659 = vmatprep.mubr.msk.bf16.mxu1 %vm1114_vm2, %v1795_v39  ;;  %v2425_v39 = vld [vmem:[#allocation2 + $0xbb] sm:$0xff]  ;;  %4583 = vperm.xlu0 %10907, %v992_v27  }
 0x205   : > { %v11494_v58 = vpop.f32.mrb[16].mxu0  ;;  %v2450_v41 = vpack.c.bf16 %v2425_v39, %v2424_v38  ;;  %v2739_v38 = vld [vmem:[#allocation2 + $0x3c] sm:$0xff]  ;;  %v965_v39 = vld [vmem:[%s11535_s22 + $0x48] sm:$0xff] }
 0x206   : > { %13474 = vst [vmem:[#allocation15_spill] sm:$0xff] %v11494_v58  ;;  %v11496_v59 = vpop.f32.mrb[17].mxu0  ;;  %v2751_v23 = vld [vmem:[#allocation2 + $0x9c] sm:$0xff] }
 0x207   : > { %13475 = vst [vmem:[#allocation16_spill] sm:$0xff] %v11496_v59  ;;  %v11498_v62 = vpop.f32.mrb[18].mxu0  ;;  %v11618_v27 = vpack.c.bf16 %v2751_v23, %v2750_v21  ;;  %v1007_v21 = vld [vmem:[%s13371_s18 + $0x78] sm:$0xff]  ;;  %v1006_v23 = vld [vmem:[%s13371_s18 + $0x70] sm:$0xff] }
 0x208   : > { %13476 = vst [vmem:[#allocation17_spill] sm:$0xff] %v11498_v62  ;;  %v11500_v34 = vpop.f32.mrb[19].mxu0 }
 0x209   : > { %13477 = vst [vmem:[#allocation18_spill] sm:$0xff] %v11500_v34 }
 0x20b   : > { %9660 = vmatmul.mubr.msk.bf16.gmra.mrb[16].mxu1 %vm1114_vm2, %v1796_v40  ;;  %v2449_v40 = vpack.c.bf16 %v2423_v37, %v2422_v36  ;;  %v2737_v36 = vld [vmem:[#allocation2 + $0x2c] sm:$0xff]  ;;  %v2738_v37 = vld [vmem:[#allocation2 + $0x34] sm:$0xff] }
 0x20c   : > { %9663 = vmatprep.mubr.msk.bf16.mxu1 %vm1114_vm2, %v2126_v63  ;;  %v2451_v63 = vpack.c.bf16 %v2427_v44, %v2426_v42  ;;  %v11562_v42 = vld [vmem:[%s13361_s8 + $0x38] sm:$0xff]   ;;  %v11564_v44 = vpack.c.bf16 %v2739_v38, %v2738_v37  ;;  %v973_v37 = vld [vmem:[%s11535_s22 + $0x88] sm:$0xff]  ;;  %v972_v38 = vld [vmem:[%s11535_s22 + $0x80] sm:$0xff] }
 0x20d   : > { %v11504_v0 = vpop.f32.mrb[20].mxu0 }
 0x20e   : > { %v9863_v3 = vpop.f32.mrb[21].mxu0 }
 0x20f   : > { %v2431_v3 = vld [vmem:[#allocation2 + $0xeb] sm:$0xff] }
 0x213   : > { %9664 = vmatmul.mubr.msk.bf16.gmra.mrb[20].mxu1 %vm1114_vm2, %v2127_v61  ;;  %v2453_v61 = vpack.c.bf16 %v2431_v3, %v2430_v2  ;;  %v2742_v2 = vld [vmem:[#allocation2 + $0x54] sm:$0xff]  ;;  %v997_v3 = vld [vmem:[%s13371_s18 + $0x28] sm:$0xff] }
 0x214   : > { %9669 = vmatprep.mubr.msk.bf16.mxu1 %vm1114_vm2, %v2440_v7  ;;  %v2454_v7 = vpack.c.bf16 %v2433_v5, %v2432_v4  ;;  %v996_v4 = vld [vmem:[%s13371_s18 + $0x20] sm:$0xff] }
 0x21b   : > { %9670 = vmatmul.mubr.msk.bf16.vlgmr.msra.gmra.mrb[24].mxu1 %vm1114_vm2, %v2441_v11  ;;  %v2435_v11 = vld [vmem:[#allocation2 + $0x10b] sm:$0xff] }
 0x21c   : > { %9706 = vmatpush3.bf16.msra.mxu1 %v10914_v45  ;;  %9673 = vmatprep.mubr.msk.bf16.mxu1 %vm1114_vm2, %v2442_v13  ;;  %v2428_v45 = vld [vmem:[#allocation2 + $0xd3] sm:$0xff]  ;;  %v2455_v17 = vpack.c.bf16 %v2435_v11, %v2434_v10  ;;  %v2747_v11 = vld [vmem:[#allocation2 + $0x7c] sm:$0xff] }
 0x21d   : > { %9743 = vmatprep.subr.bf16.mxu1 %v11511_v12  ;;  %v2452_v1 = vpack.c.bf16 %v2429_v60, %v2428_v45  ;;  %v2436_v13 = vld [vmem:[#allocation2 + $0x113] sm:$0xff] }
 0x21e   : > { %v995_v45 = vld [vmem:[%s13371_s18 + $0x18] sm:$0xff]  ;;  %v994_v60 = vld [vmem:[%s13371_s18 + $0x10] sm:$0xff] }
 0x21f   : > { %v2746_v10 = vld [vmem:[#allocation2 + $0x74] sm:$0xff] }
 0x220   : > { %v11598_v16 = vpack.c.bf16 %v2747_v11, %v2746_v10  ;;  %v2760_v10 = vld [vmem:[#allocation2 + $0xe4] sm:$0xff]  ;;  %v2761_v11 = vld [vmem:[#allocation2 + $0xec] sm:$0xff] }
 0x223   : > { %9674 = vmatmul.mubr.msk.bf16.gmra.mrb[28].mxu1 %vm1114_vm2, %v2443_v18  ;;  %v2456_v18 = vpack.c.bf16 %v2437_v14, %v2436_v13  ;;  %v969_v13 = vld [vmem:[%s11535_s22 + $0x68] sm:$0xff]  ;;  %v968_v14 = vld [vmem:[%s11535_s22 + $0x60] sm:$0xff] }
 0x224   : > { %9677 = vmatprep.mubr.msk.bf16.mxu1 %vm1114_vm2, %v2444_v19  ;;  %v961_v19 = vld [vmem:[%s11535_s22 + $0x28] sm:$0xff] }
 0x225   : > { %4199 = vperm.xlu1 %10908, %v961_v19   ;;  %v2748_v19 = vld [vmem:[#allocation2 + $0x84] sm:$0xff] }
 0x22b   : > { %9678 = vmatmul.mubr.msk.bf16.gmra.mrb[32].mxu1 %vm1114_vm2, %v2445_v25  ;;  %v2735_v25 = vld [vmem:[#allocation2 + $0x1c] sm:$0xff] }
 0x22c   : > { %9681 = vmatprep.mubr.msk.bf16.mxu1 %vm1114_vm2, %v2446_v22  ;;  %v993_v22 = vld [vmem:[%s13371_s18 + $0x8] sm:$0xff]  ;;  %v2770_v30 = vpack.c.bf16 %v2735_v25, %v2734_v24  ;;  %v1000_v25 = vld [vmem:[%s13371_s18 + $0x40] sm:$0xff] }
 0x22d   : > { %4588 = vperm.xlu1 %10908, %v993_v22   ;;  %v1001_v24 = vld [vmem:[%s13371_s18 + $0x48] sm:$0xff]  ;;  %v11616_v22 = vpack.c.bf16 %v2749_v20, %v2748_v19  ;;  %v11660_v19 = vpack.c.bf16 %v2761_v11, %v2760_v10  ;;  %v982_v10 = vld [vmem:[%s11535_s22 + $0xd0] sm:$0xff] }
 0x22e   : > { %v985_v11 = vld [vmem:[%s11535_s22 + $0xe8] sm:$0xff] }
 0x231   : > { %4209 = vperm.xlu1 %10908, %v963_v32   ;;  %v2752_v32 = vld [vmem:[#allocation2 + $0xa4] sm:$0xff] }
 0x233   : > { %9682 = vmatmul.mubr.msk.bf16.gmra.mrb[36].mxu1 %vm1114_vm2, %v2447_v33  ;;  %v962_v33 = vld [vmem:[%s11535_s22 + $0x30] sm:$0xff] }
 0x234   : > { %9685 = vmatprep.mubr.msk.bf16.mxu1 %vm1114_vm2, %v2448_v35  ;;  %v2736_v35 = vld [vmem:[#allocation2 + $0x24] sm:$0xff]  ;;  %4204 = vperm.xlu0 %10907, %v962_v33   ;;  %v2753_v33 = vld [vmem:[#allocation2 + $0xac] sm:$0xff] }
 0x235   : > { %4219 = vperm.xlu1 %10908, %v965_v39   ;;  %v11628_v39 = vpack.c.bf16 %v2753_v33, %v2752_v32  ;;  %v1009_v32 = vld [vmem:[%s13371_s18 + $0x88] sm:$0xff]  ;;  %v1008_v33 = vld [vmem:[%s13371_s18 + $0x80] sm:$0xff] }
 0x239   : > { %4598 = vperm.xlu1 %10908, %v995_v45   ;;  %v1003_v45 = vld [vmem:[%s13371_s18 + $0x58] sm:$0xff] }
 0x23b   : > { %9686 = vmatmul.mubr.msk.bf16.gmra.mrb[4].mxu1 %vm1114_vm2, %v2449_v40  ;;  %v964_v40 = vld [vmem:[%s11535_s22 + $0x40] sm:$0xff] }
 0x23c   : > { %9689 = vmatprep.mubr.msk.bf16.mxu1 %vm1114_vm2, %v2450_v41  ;;  %v11557_v41 = vpack.c.bf16 %v2737_v36, %v2736_v35  ;;  %4214 = vperm.xlu0 %10907, %v964_v40   ;;  %v2754_v35 = vld [vmem:[#allocation2 + $0xb4] sm:$0xff]  ;;  %v2755_v36 = vld [vmem:[#allocation2 + $0xbc] sm:$0xff] }
 0x23d   : > { %4608 = vperm.xlu1 %10908, %v997_v3   ;;  %v11630_v40 = vpack.c.bf16 %v2755_v36, %v2754_v35  ;;  %v1005_v3 = vld [vmem:[%s13371_s18 + $0x68] sm:$0xff] }
 0x240   : > { %4593 = vperm.xlu0 %10907, %v994_v60   ;;  %v1002_v60 = vld [vmem:[%s13371_s18 + $0x50] sm:$0xff] }
 0x243   : > { %9690 = vmatmul.mubr.msk.bf16.gmra.mrb[8].mxu1 %vm1114_vm2, %v2451_v63  ;;  %v2740_v63 = vld [vmem:[#allocation2 + $0x44] sm:$0xff] }
 0x244   : > { %9693 = vmatprep.mubr.msk.bf16.mxu1 %vm1114_vm2, %v2452_v1  ;;  %v2741_v1 = vld [vmem:[#allocation2 + $0x4c] sm:$0xff]  ;;  %4603 = vperm.xlu0 %10907, %v996_v4   ;;  %v1004_v4 = vld [vmem:[%s13371_s18 + $0x60] sm:$0xff] }
 0x245   : > { %v11584_v5 = vpack.c.bf16 %v2741_v1, %v2740_v63  ;;  %v2756_v63 = vld [vmem:[#allocation2 + $0xc4] sm:$0xff]  ;;  %v2757_v1 = vld [vmem:[#allocation2 + $0xcc] sm:$0xff] }
 0x248   : > { %4224 = vperm.xlu0 %10907, %v966_v8  }
 0x24b   : > { %9694 = vmatmul.mubr.msk.bf16.gmra.mrb[12].mxu1 %vm1114_vm2, %v2453_v61 }
 0x24c   : > { %9697 = vmatprep.mubr.msk.bf16.mxu1 %vm1114_vm2, %v2454_v7  ;;  %v967_v7 = vld [vmem:[%s11535_s22 + $0x58] sm:$0xff]  ;;  %4234 = vperm.xlu0 %10907, %v968_v14  }
 0x24d   : > { %4229 = vperm.xlu1 %10908, %v967_v7   ;;  %v11648_v7 = vpack.c.bf16 %v2757_v1, %v2756_v63  ;;  %v2763_v14 = vld [vmem:[#allocation2 + $0xfc] sm:$0xff]  ;;  %v981_v63 = vld [vmem:[%s11535_s22 + $0xc8] sm:$0xff] }
 0x24e   : > { %v980_v1 = vld [vmem:[%s11535_s22 + $0xc0] sm:$0xff] }
 0x251   : > { %4239 = vperm.xlu1 %10908, %v969_v13   ;;  %v2762_v13 = vld [vmem:[#allocation2 + $0xf4] sm:$0xff] }
 0x252   : > { %v11662_v20 = vpack.c.bf16 %v2763_v14, %v2762_v13  ;;  %v984_v13 = vld [vmem:[%s11535_s22 + $0xe0] sm:$0xff]  ;;  %v986_v14 = vld [vmem:[%s11535_s22 + $0xf0] sm:$0xff] }
 0x253   : > { %9698 = vmatmul.mubr.msk.bf16.gmra.mrb[16].mxu1 %vm1114_vm2, %v2455_v17  ;;  %v999_v17 = vld [vmem:[%s13371_s18 + $0x38] sm:$0xff] }
 0x254   : > { %9701 = vmatprep.mubr.msk.bf16.mxu1 %vm1114_vm2, %v2456_v18  ;;  %v998_v18 = vld [vmem:[%s13371_s18 + $0x30] sm:$0xff] }
 0x255   : > { %4618 = vperm.xlu1 %10908, %v999_v17   ;;  %4613 = vperm.xlu0 %10907, %v998_v18   ;;  %v977_v17 = vld [vmem:[%s11535_s22 + $0xa8] sm:$0xff]  ;;  %v976_v18 = vld [vmem:[%s11535_s22 + $0xa0] sm:$0xff] }
 0x259   : > { %4628 = vperm.xlu1 %10908, %v1001_v24   ;;  %4623 = vperm.xlu0 %10907, %v1000_v25   ;;  %v2764_v24 = vld [vmem:[#allocation2 + $0x104] sm:$0xff]  ;;  %v2765_v25 = vld [vmem:[#allocation2 + $0x10c] sm:$0xff] }
 0x25a   : > { %v11680_v35 = vpack.c.bf16 %v2765_v25, %v2764_v24  ;;  %v1025_v24 = vld [vmem:[%s13371_s18 + $0x108] sm:$0xff]  ;;  %v990_v25 = vld [vmem:[%s11535_s22 + $0x110] sm:$0xff] }
 0x25b   : > { %9702 = vmatmul.mubr.msk.bf16.gmra.mrb[20].mxu1 %vm1114_vm2, %v2457_v29  ;;  %v971_v29 = vld [vmem:[%s11535_s22 + $0x78] sm:$0xff] }
 0x25c   : > { %9707 = vmatprep.mubr.msk.bf16.mxu1 %vm1114_vm2, %v2770_v30  ;;  %v970_v30 = vld [vmem:[%s11535_s22 + $0x70] sm:$0xff] }
 0x25d   : > { %4249 = vperm.xlu1 %10908, %v971_v29   ;;  %4244 = vperm.xlu0 %10907, %v970_v30   ;;  %v2766_v29 = vld [vmem:[#allocation2 + $0x114] sm:$0xff]  ;;  %v2767_v30 = vld [vmem:[#allocation2 + $0x11c] sm:$0xff] }
 0x25e   : > { %v11682_v36 = vpack.c.bf16 %v2767_v30, %v2766_v29  ;;  %v1027_v29 = vld [vmem:[%s13371_s18 + $0x118] sm:$0x3f]  ;;  %v1026_v30 = vld [vmem:[%s13371_s18 + $0x110] sm:$0xff] }
 0x261   : > { %4259 = vperm.xlu1 %10908, %v973_v37   ;;  %4254 = vperm.xlu0 %10907, %v972_v38   ;;  %v979_v37 = vld [vmem:[%s11535_s22 + $0xb8] sm:$0xff]  ;;  %v978_v38 = vld [vmem:[%s11535_s22 + $0xb0] sm:$0xff] }
 0x263   : > { %9708 = vmatmul.mubr.msk.bf16.vlgmr.msra.gmra.mrb[24].mxu1 %vm1114_vm2, %v11557_v41 }
 0x264   : > { %9744 = vmatpush3.bf16.msra.mxu1 %v11511_v12  ;;  %9711 = vmatprep.mubr.msk.bf16.mxu1 %vm1114_vm2, %v11564_v44  ;;  %v2743_v12 = vld [vmem:[#allocation2 + $0x5c] sm:$0xff] }
 0x265   : > { %9781 = vmatprep.subr.bf16.mxu1 %v11562_v42  ;;  %v11586_v61 = vpack.c.bf16 %v2743_v12, %v2742_v2  ;;  %v2758_v2 = vld [vmem:[#allocation2 + $0xd4] sm:$0xff]  ;;  %4638 = vperm.xlu1 %10908, %v1003_v45   ;;  %v2759_v12 = vld [vmem:[#allocation2 + $0xdc] sm:$0xff]  ;;  %v11690_v45 = vld [vmem:[#allocation2 + $0x124] sm:$0xff] }
 0x266   : > { %4633 = vperm.xlu0 %10907, %v1002_v60   ;;  %v11650_v8 = vpack.c.bf16 %v2759_v12, %v2758_v2  ;;  %v2769_v60 = vld [vmem:[#allocation2 + $0x12c] sm:$0x3f]  ;;  %v1011_v12 = vld [vmem:[%s13371_s18 + $0x98] sm:$0xff] }
 0x267   : > { %v2787_v2 = vpack.c.bf16 %v2769_v60, %v11690_v45 }
 0x269   : > { %4648 = vperm.xlu1 %10908, %v1005_v3   ;;  %v1010_v3 = vld [vmem:[%s13371_s18 + $0x90] sm:$0xff] }
 0x26a   : > { %4643 = vperm.xlu0 %10907, %v1004_v4   ;;  %v1013_v4 = vld [vmem:[%s13371_s18 + $0xa8] sm:$0xff] }
 0x26b   : > { %9712 = vmatmul.mubr.msk.bf16.gmra.mrb[28].mxu1 %vm1114_vm2, %v11584_v5 }
 0x26c   : > { %9715 = vmatprep.mubr.msk.bf16.mxu1 %vm1114_vm2, %v11586_v61 }
 0x26d   : > { %4269 = vperm.xlu1 %10908, %v975_v43   ;;  %v11713_v43 = vld [vmem:[%s13361_s8 + $0x40] sm:$0xff]  }
 0x26e   : > { %4264 = vperm.xlu0 %10907, %v974_v9   ;;  %v983_v9 = vld [vmem:[%s11535_s22 + $0xd8] sm:$0xff] }
 0x271   : > { %4279 = vperm.xlu1 %10908, %v977_v17   ;;  %v989_v17 = vld [vmem:[%s11535_s22 + $0x108] sm:$0xff] }
 0x272   : > { %4274 = vperm.xlu0 %10907, %v976_v18   ;;  %v988_v18 = vld [vmem:[%s11535_s22 + $0x100] sm:$0xff] }
 0x273   : > { %9716 = vmatmul.mubr.msk.bf16.gmra.mrb[32].mxu1 %vm1114_vm2, %v11596_v15 }
 0x274   : > { %9719 = vmatprep.mubr.msk.bf16.mxu1 %vm1114_vm2, %v11598_v16 }
 0x275   : > { %4658 = vperm.xlu1 %10908, %v1007_v21   ;;  %v1021_v21 = vld [vmem:[%s13371_s18 + $0xe8] sm:$0xff] }
 0x276   : > { %4653 = vperm.xlu0 %10907, %v1006_v23   ;;  %v1022_v23 = vld [vmem:[%s13371_s18 + $0xf0] sm:$0xff] }
 0x279   : > { %4668 = vperm.xlu1 %10908, %v1009_v32   ;;  %v3098_v32 = vld [vmem:[#allocation2 + $0x134] sm:$0xff] }
 0x27a   : > { %4663 = vperm.xlu0 %10907, %v1008_v33   ;;  %v3099_v33 = vld [vmem:[#allocation2 + $0x13c] sm:$0x3f] }
 0x27b   : > { %9720 = vmatmul.mubr.msk.bf16.gmra.mrb[36].mxu1 %vm1114_vm2, %v11616_v22  ;;  %v3117_v60 = vpack.c.bf16 %v3099_v33, %v3098_v32  ;;  %v3421_v32 = vld [vmem:[#allocation2 + $0xfd] sm:$0xff]  ;;  %v3422_v33 = vld [vmem:[#allocation2 + $0x105] sm:$0xff] }
 0x27c   : > { %9723 = vmatprep.mubr.msk.bf16.mxu1 %vm1114_vm2, %v11618_v27 }
 0x27d   : > { %4289 = vperm.xlu1 %10908, %v979_v37   ;;  %v3394_v37 = vld [vmem:[#allocation2 + $0x25] sm:$0xff] }
 0x27e   : > { %4284 = vperm.xlu0 %10907, %v978_v38   ;;  %v3395_v38 = vld [vmem:[#allocation2 + $0x2d] sm:$0xff] }
 0x281   : > { %4299 = vperm.xlu1 %10908, %v981_v63   ;;  %v3430_v63 = vpack.c.bf16 %v3395_v38, %v3394_v37  ;;  %v3423_v37 = vld [vmem:[#allocation2 + $0x10d] sm:$0xff] }
 0x282   : > { %4294 = vperm.xlu0 %10907, %v980_v1   ;;  %v3398_v1 = vld [vmem:[#allocation2 + $0x45] sm:$0xff] }
 0x283   : > { %9724 = vmatmul.mubr.msk.bf16.gmra.mrb[4].mxu1 %vm1114_vm2, %v11628_v39 }
 0x284   : > { %9727 = vmatprep.mubr.msk.bf16.mxu1 %vm1114_vm2, %v11630_v40 }
 0x285   : > { %4678 = vperm.xlu1 %10908, %v1011_v12  }
 0x286   : > { %4673 = vperm.xlu0 %10907, %v1010_v3   ;;  %v3401_v3 = vld [vmem:[#allocation2 + $0x5d] sm:$0xff] }
 0x289   : > { %4688 = vperm.xlu1 %10908, %v1013_v4   ;;  %v3402_v4 = vld [vmem:[#allocation2 + $0x65] sm:$0xff] }
 0x28b   : > { %9728 = vmatmul.mubr.msk.bf16.gmra.mrb[8].mxu1 %vm1114_vm2, %v11648_v7 }
 0x28c   : > { %9731 = vmatprep.mubr.msk.bf16.mxu1 %vm1114_vm2, %v11650_v8 }
 0x28d   : > { %4309 = vperm.xlu1 %10908, %v983_v9  }
 0x291   : > { %4319 = vperm.xlu1 %10908, %v985_v11   ;;  %v3405_v11 = vld [vmem:[#allocation2 + $0x7d] sm:$0xff] }
 0x293   : > { %9732 = vmatmul.mubr.msk.bf16.gmra.mrb[12].mxu1 %vm1114_vm2, %v11660_v19 }
 0x294   : > { %9735 = vmatprep.mubr.msk.bf16.mxu1 %vm1114_vm2, %v11662_v20 }
 0x29b   : > { %9736 = vmatmul.mubr.msk.bf16.gmra.mrb[16].mxu1 %vm1114_vm2, %v11680_v35 }
 0x29c   : > { %9739 = vmatprep.mubr.msk.bf16.mxu1 %vm1114_vm2, %v11682_v36 }
 0x2a3   : > { %9740 = vmatmul.mubr.msk.bf16.gmra.mrb[20].mxu1 %vm1114_vm2, %v2787_v2  ;;  %v3399_v2 = vld [vmem:[#allocation2 + $0x4d] sm:$0xff] }
 0x2a4   : > { %9745 = vmatprep.mubr.msk.bf16.mxu1 %vm1114_vm2, %v11557_v41  ;;  %v1012_v41 = vld [vmem:[%s13371_s18 + $0xa0] sm:$0xff]  ;;  %v3432_v12 = vpack.c.bf16 %v3399_v2, %v3398_v1  ;;  %v3427_v1 = vld [vmem:[#allocation2 + $0x12d] sm:$0xff] }
 0x2a5   : > { %4683 = vperm.xlu0 %10907, %v1012_v41   ;;  %v3403_v41 = vld [vmem:[#allocation2 + $0x6d] sm:$0xff] }
 0x2a9   : > { %4304 = vperm.xlu0 %10907, %v982_v10   ;;  %v3434_v10 = vpack.c.bf16 %v3403_v41, %v3402_v4  ;;  %v3725_v4 = vld [vmem:[#allocation2 + $0x2e] sm:$0xff] }
 0x2ab   : > { %9746 = vmatmul.mubr.msk.bf16.vlgmr.msra.gmra.mrb[24].mxu1 %vm1114_vm2, %v11564_v44  ;;  %v1014_v44 = vld [vmem:[%s13371_s18 + $0xb0] sm:$0xff] }
 0x2ac   : > { %9782 = vmatpush3.bf16.msra.mxu1 %v11562_v42  ;;  %9749 = vmatprep.mubr.msk.bf16.mxu1 %vm1114_vm2, %v11584_v5  ;;  %v1015_v42 = vld [vmem:[%s13371_s18 + $0xb8] sm:$0xff]  ;;  %v1017_v5 = vld [vmem:[%s13371_s18 + $0xc8] sm:$0xff] }
 0x2ad   : > { %9819 = vmatprep.subr.bf16.mxu1 %v11713_v43  ;;  %4314 = vperm.xlu0 %10907, %v984_v13   ;;  %v3406_v13 = vld [vmem:[#allocation2 + $0x85] sm:$0xff] }
 0x2ae   : > { %4698 = vperm.xlu1 %10908, %v1015_v42   ;;  %v3407_v42 = vld [vmem:[#allocation2 + $0x8d] sm:$0xff] }
 0x2b1   : > { %4693 = vperm.xlu0 %10907, %v1014_v44  }
 0x2b2   : > { %4708 = vperm.xlu1 %10908, %v1017_v5   ;;  %v3436_v5 = vpack.c.bf16 %v3407_v42, %v3406_v13  ;;  %v3729_v13 = vld [vmem:[#allocation2 + $0x4e] sm:$0xff] }
 0x2b3   : > { %9750 = vmatmul.mubr.msk.bf16.gmra.mrb[28].mxu1 %vm1114_vm2, %v11586_v61  ;;  %v1016_v61 = vld [vmem:[%s13371_s18 + $0xc0] sm:$0xff] }
 0x2b4   : > { %9753 = vmatprep.mubr.msk.bf16.mxu1 %vm1114_vm2, %v11596_v15  ;;  %v987_v15 = vld [vmem:[%s11535_s22 + $0xf8] sm:$0xff] }
 0x2b5   : > { %4703 = vperm.xlu0 %10907, %v1016_v61   ;;  %v3408_v61 = vld [vmem:[#allocation2 + $0x95] sm:$0xff] }
 0x2b6   : > { %4329 = vperm.xlu1 %10908, %v987_v15   ;;  %v3409_v15 = vld [vmem:[#allocation2 + $0x9d] sm:$0xff] }
 0x2b9   : > { %4324 = vperm.xlu0 %10907, %v986_v14   ;;  %v3410_v14 = vld [vmem:[#allocation2 + $0xa5] sm:$0xff] }
 0x2ba   : > { %4339 = vperm.xlu1 %10908, %v989_v17   ;;  %v3411_v17 = vld [vmem:[#allocation2 + $0xad] sm:$0xff] }
 0x2bb   : > { %9754 = vmatmul.mubr.msk.bf16.gmra.mrb[32].mxu1 %vm1114_vm2, %v11598_v16  ;;  %v1019_v16 = vld [vmem:[%s13371_s18 + $0xd8] sm:$0xff] }
 0x2bc   : > { %9757 = vmatprep.mubr.msk.bf16.mxu1 %vm1114_vm2, %v11616_v22  ;;  %v1018_v22 = vld [vmem:[%s13371_s18 + $0xd0] sm:$0xff] }
 0x2bd   : > { %4334 = vperm.xlu0 %10907, %v988_v18   ;;  %v3437_v18 = vpack.c.bf16 %v3409_v15, %v3408_v61  ;;  %v3730_v61 = vld [vmem:[#allocation2 + $0x56] sm:$0xff]  ;;  %v3731_v15 = vld [vmem:[#allocation2 + $0x5e] sm:$0xff] }
 0x2be   : > { %4718 = vperm.xlu1 %10908, %v1019_v16   ;;  %v3438_v16 = vpack.c.bf16 %v3411_v17, %v3410_v14  ;;  %v3732_v14 = vld [vmem:[#allocation2 + $0x66] sm:$0xff]  ;;  %v3733_v17 = vld [vmem:[#allocation2 + $0x6e] sm:$0xff] }
 0x2c1   : > { %4713 = vperm.xlu0 %10907, %v1018_v22   ;;  %v3412_v22 = vld [vmem:[#allocation2 + $0xb5] sm:$0xff] }
 0x2c2   : > { %4728 = vperm.xlu1 %10908, %v1021_v21   ;;  %v3413_v21 = vld [vmem:[#allocation2 + $0xbd] sm:$0xff] }
 0x2c3   : > { %9758 = vmatmul.mubr.msk.bf16.gmra.mrb[36].mxu1 %vm1114_vm2, %v11618_v27  ;;  %v1020_v27 = vld [vmem:[%s13371_s18 + $0xe0] sm:$0xff] }
 0x2c4   : > { %9761 = vmatprep.mubr.msk.bf16.mxu1 %vm1114_vm2, %v11628_v39  ;;  %v1023_v39 = vld [vmem:[%s13371_s18 + $0xf8] sm:$0xff] }
 0x2c5   : > { %4723 = vperm.xlu0 %10907, %v1020_v27   ;;  %v3414_v27 = vld [vmem:[#allocation2 + $0xc5] sm:$0xff] }
 0x2c6   : > { %4738 = vperm.xlu1 %10908, %v1023_v39   ;;  %v3415_v39 = vld [vmem:[#allocation2 + $0xcd] sm:$0xff] }
 0x2c9   : > { %4733 = vperm.xlu0 %10907, %v1022_v23   ;;  %v3439_v23 = vpack.c.bf16 %v3413_v21, %v3412_v22  ;;  %v3734_v22 = vld [vmem:[#allocation2 + $0x76] sm:$0xff]  ;;  %v3735_v21 = vld [vmem:[#allocation2 + $0x7e] sm:$0xff] }
 0x2ca   : > { %4748 = vperm.xlu1 %10908, %v1025_v24   ;;  %v3440_v24 = vpack.c.bf16 %v3415_v39, %v3414_v27  ;;  %v3736_v27 = vld [vmem:[#allocation2 + $0x86] sm:$0xff]  ;;  %v3737_v39 = vld [vmem:[#allocation2 + $0x8e] sm:$0xff] }
 0x2cb   : > { %9762 = vmatmul.mubr.msk.bf16.gmra.mrb[4].mxu1 %vm1114_vm2, %v11630_v40  ;;  %v1024_v40 = vld [vmem:[%s13371_s18 + $0x100] sm:$0xff] }
 0x2cc   : > { %9765 = vmatprep.mubr.msk.bf16.mxu1 %vm1114_vm2, %v11648_v7  ;;  %v991_v7 = vld [vmem:[%s11535_s22 + $0x118] sm:$0x3f]  ;;  %s689_s22 = sand.u32 1, %s10976_s25  }
 0x2cd   : > { %4743 = vperm.xlu0 %10907, %v1024_v40   ;;  %v3416_v40 = vld [vmem:[#allocation2 + $0xd5] sm:$0xff]  ;;  %s12860_s29 = smul.u32 288, %s689_s22  ;;  %s13193_s23 = scalar_lea.sflag [#allocation5], %s689_s22 }
 0x2ce   : > { %4349 = vperm.xlu1 %10908, %v991_v7   ;;  %v3417_v7 = vld [vmem:[#allocation2 + $0xdd] sm:$0xff] }
 0x2d1   : > { %4344 = vperm.xlu0 %10907, %v990_v25   ;;  %v3418_v25 = vld [vmem:[#allocation2 + $0xe5] sm:$0xff] }
 0x2d2   : > { %4758 = vperm.xlu1 %10908, %v1027_v29   ;;  %v3419_v29 = vld [vmem:[#allocation2 + $0xed] sm:$0xff] }
 0x2d3   : > { %9766 = vmatmul.mubr.msk.bf16.gmra.mrb[8].mxu1 %vm1114_vm2, %v11650_v8  ;;  %v3097_v8 = vld [vmem:[#allocation2 + $0x12c] sm:$0xff] }
 0x2d4   : > { %9769 = vmatprep.mubr.msk.bf16.mxu1 %vm1114_vm2, %v11660_v19  ;;  %v3116_v19 = vpack.c.bf16 %v3097_v8, %v11690_v45  ;;  %v3442_v8 = vpack.c.bf16 %v3419_v29, %v3418_v25  ;;  %v3739_v25 = vld [vmem:[#allocation2 + $0x9e] sm:$0xff] }
 0x2d5   : > { %4753 = vperm.xlu0 %10907, %v1026_v30   ;;  %v3441_v30 = vpack.c.bf16 %v3417_v7, %v3416_v40  ;;  %v3766_v40 = vpack.c.bf16 %v3737_v39, %v3736_v27  ;;  %v3738_v7 = vld [vmem:[#allocation2 + $0x96] sm:$0xff]  ;;  %v3756_v27 = vld [vmem:[#allocation2 + $0x126] sm:$0xff]  ;;  %v3757_v39 = vld [vmem:[#allocation2 + $0x12e] sm:$0xff] }
 0x2db   : > { %9770 = vmatmul.mubr.msk.bf16.gmra.mrb[12].mxu1 %vm1114_vm2, %v11662_v20  ;;  %v3396_v20 = vld [vmem:[#allocation2 + $0x35] sm:$0xff] }
 0x2dc   : > { %9773 = vmatprep.mubr.msk.bf16.mxu1 %vm1114_vm2, %v11680_v35  ;;  %v3397_v35 = vld [vmem:[#allocation2 + $0x3d] sm:$0xff] }
 0x2dd   : > { %v3431_v45 = vpack.c.bf16 %v3397_v35, %v3396_v20  ;;  %v3425_v20 = vld [vmem:[#allocation2 + $0x11d] sm:$0xff]  ;;  %v3426_v35 = vld [vmem:[#allocation2 + $0x125] sm:$0xff] }
 0x2e3   : > { %9774 = vmatmul.mubr.msk.bf16.gmra.mrb[16].mxu1 %vm1114_vm2, %v11682_v36  ;;  %v3400_v36 = vld [vmem:[#allocation2 + $0x55] sm:$0xff] }
 0x2e4   : > { %9777 = vmatprep.mubr.msk.bf16.mxu1 %vm1114_vm2, %v3116_v19  ;;  %v3433_v9 = vpack.c.bf16 %v3401_v3, %v3400_v36  ;;  %v3420_v19 = vld [vmem:[#allocation2 + $0xf5] sm:$0xff]  ;;  %v3429_v36 = vld [vmem:[#allocation2 + $0x13d] sm:$0x3f]  ;;  %v3724_v3 = vld [vmem:[#allocation2 + $0x26] sm:$0xff] }
 0x2e5   : > { %v3443_v38 = vpack.c.bf16 %v3421_v32, %v3420_v19  ;;  %v11916_v19 = vpop.permute.xlu0 %4174  ;;  %v3767_v32 = vpack.c.bf16 %v3739_v25, %v3738_v7 }
 0x2e6   : > { %13480 = vst [vmem:[#allocation21_spill] sm:$0xff] %v11916_v19 }
 0x2eb   : > { %9778 = vmatmul.mubr.msk.bf16.gmra.mrb[20].mxu1 %vm1114_vm2, %v3117_v60  ;;  %v3444_v60 = vpack.c.bf16 %v3423_v37, %v3422_v33 }
 0x2ec   : > { %9783 = vmatprep.mubr.msk.bf16.mxu1 %vm1114_vm2, %v3430_v63  ;;  %v3424_v63 = vld [vmem:[#allocation2 + $0x115] sm:$0xff] }
 0x2ed   : > { %v3445_v2 = vpack.c.bf16 %v3425_v20, %v3424_v63  ;;  %v11922_v63 = vpop.permute.xlu0 %4179  ;;  %v3744_v20 = vld [vmem:[#allocation2 + $0xc6] sm:$0xff] }
 0x2ee   : > { %13482 = vst [vmem:[#allocation23_spill] sm:$0xff] %v11922_v63 }
 0x2f3   : > { %9784 = vmatmul.mubr.msk.bf16.vlgmr.msra.gmra.mrb[24].mxu1 %vm1114_vm2, %v3431_v45  ;;  %v3446_v45 = vpack.c.bf16 %v3427_v1, %v3426_v35  ;;  %v3745_v35 = vld [vmem:[#allocation2 + $0xce] sm:$0xff] }
 0x2f4   : > { %9820 = vmatpush3.bf16.msra.mxu1 %v11713_v43  ;;  %9787 = vmatprep.mubr.msk.bf16.mxu1 %vm1114_vm2, %v3432_v12  ;;  %v3404_v43 = vld [vmem:[#allocation2 + $0x75] sm:$0xff] }
 0x2f5   : > { %10206 = vmatprep.subr.mxu1 %v13384_v6  ;;  %v3435_v44 = vpack.c.bf16 %v3405_v11, %v3404_v43  ;;  %v3428_v12 = vld [vmem:[#allocation2 + $0x135] sm:$0xff]  ;;  %v3727_v43 = vld [vmem:[#allocation2 + $0x3e] sm:$0xff]  ;;  %v3728_v11 = vld [vmem:[#allocation2 + $0x46] sm:$0xff] }
 0x2f6   : > { %v3447_v41 = vpack.c.bf16 %v3429_v36, %v3428_v12  ;;  %v11928_v12 = vpop.permute.xlu0 %4194  ;;  %v3746_v36 = vld [vmem:[#allocation2 + $0xd6] sm:$0xff] }
 0x2f7   : > { %13483 = vst [vmem:[#allocation24_spill] sm:$0xff] %v11928_v12 }
 0x2fb   : > { %9788 = vmatmul.mubr.msk.bf16.gmra.mrb[28].mxu1 %vm1114_vm2, %v3433_v9  ;;  %v3760_v9 = vpack.c.bf16 %v3725_v4, %v3724_v3  ;;  %v3747_v3 = vld [vmem:[#allocation2 + $0xde] sm:$0xff]  ;;  %v3748_v4 = vld [vmem:[#allocation2 + $0xe6] sm:$0xff] }
 0x2fc   : > { %9791 = vmatprep.mubr.msk.bf16.mxu1 %vm1114_vm2, %v3434_v10  ;;  %v3726_v10 = vld [vmem:[#allocation2 + $0x36] sm:$0xff] }
 0x2fd   : > { %v3761_v42 = vpack.c.bf16 %v3727_v43, %v3726_v10  ;;  %v3771_v10 = vpack.c.bf16 %v3747_v3, %v3746_v36 }
 0x303   : > { %9792 = vmatmul.mubr.msk.bf16.gmra.mrb[32].mxu1 %vm1114_vm2, %v3435_v44  ;;  %v7780_v44 = vld [vmem:[%s13364_s11] sm:$0xff] }
 0x304   : > { %9795 = vmatprep.mubr.msk.bf16.mxu1 %vm1114_vm2, %v3436_v5  ;;  %v3762_v5 = vpack.c.bf16 %v3729_v13, %v3728_v11  ;;  %v11932_v11 = vpop.permute.xlu0 %4583  ;;  %v3750_v13 = vld [vmem:[#allocation2 + $0xf6] sm:$0xff] }
 0x30b   : > { %9796 = vmatmul.mubr.msk.bf16.gmra.mrb[36].mxu1 %vm1114_vm2, %v3437_v18  ;;  %v3763_v18 = vpack.c.bf16 %v3731_v15, %v3730_v61  ;;  %v3753_v61 = vld [vmem:[#allocation2 + $0x10e] sm:$0xff]  ;;  %v11938_v15 = vpop.permute.xlu0 %4204 }
 0x30c   : > { %9799 = vmatprep.mubr.msk.bf16.mxu1 %vm1114_vm2, %v3438_v16  ;;  %v3764_v16 = vpack.c.bf16 %v3733_v17, %v3732_v14  ;;  %13486 = vst [vmem:[#allocation27_spill] sm:$0xff] %v11938_v15 }
 0x313   : > { %9800 = vmatmul.mubr.msk.bf16.gmra.mrb[4].mxu1 %vm1114_vm2, %v3439_v23  ;;  %v3765_v23 = vpack.c.bf16 %v3735_v21, %v3734_v22  ;;  %v3755_v22 = vld [vmem:[#allocation2 + $0x11e] sm:$0xff]  ;;  %v11944_v21 = vpop.permute.xlu0 %4214 }
 0x314   : > { %9803 = vmatprep.mubr.msk.bf16.mxu1 %vm1114_vm2, %v3440_v24  ;;  %v11910_v24 = vpop.permute.xlu1 %4184  ;;  %13487 = vst [vmem:[#allocation28_spill] sm:$0xff] %v11944_v21 }
 0x315   : > { %13478 = vst [vmem:[#allocation19_spill] sm:$0xff] %v11910_v24 }
 0x317   : > { %v11950_v25 = vpop.permute.xlu0 %4593 }
 0x318   : > { %v11914_v29 = vpop.permute.xlu1 %4189 }
 0x319   : > { %13479 = vst [vmem:[#allocation20_spill] sm:$0xff] %v11914_v29 }
 0x31b   : > { %9804 = vmatmul.mubr.msk.bf16.gmra.mrb[8].mxu1 %vm1114_vm2, %v3441_v30  ;;  %v3740_v30 = vld [vmem:[#allocation2 + $0xa6] sm:$0xff] }
 0x31c   : > { %9807 = vmatprep.mubr.msk.bf16.mxu1 %vm1114_vm2, %v3442_v8  ;;  %v3741_v8 = vld [vmem:[#allocation2 + $0xae] sm:$0xff]  ;;  %v11920_v37 = vpop.permute.xlu1 %4199 }
 0x31d   : > { %v3768_v33 = vpack.c.bf16 %v3741_v8, %v3740_v30  ;;  %13481 = vst [vmem:[#allocation22_spill] sm:$0xff] %v11920_v37  ;;  %v808_v30 = vld [vmem:[%s13489_s28] sm:$0x1]  ;;  %v3758_v8 = vld [vmem:[#allocation2 + $0x136] sm:$0xff]  ;;  %s12892_s28 = scalar_lea.vmem [#allocation4], %s12860_s29  ;;  %s10928_s29 = scalar_lea.vmem %s10927_s1, 9216 }
 0x31e   : > { %s8583_s24 = sshll.u32 %s12892_s28, 4  ;;  %s13189_s24 = int_to_ptr.vmem [resolvable:$true] %s8583_s24 }
 0x31f   : > { %s10922_s21 = scalar_lea.vmem %s13189_s24, 4608  ;;  %p10929_p0 = scmp.lt.s32.totalorder %s13189_s24, %s10927_s1 }
 0x320   : > { %p10923_p11 = scmp.ne.s32.totalorder %s13189_s24, %s10922_s21  ;;  %p10930_p1 = scmp.lt.s32.totalorder %s10928_s29, %s10922_s21 }
 0x322   : > { %p10924_p12 = pnand %p10923_p11, %p11141_p5  ;;  %p10931_p2 = por %p10930_p1, %p10929_p0 }
 0x323   : > { %9808 = vmatmul.mubr.msk.bf16.gmra.mrb[12].mxu1 %vm1114_vm2, %v3443_v38  ;;  %v3742_v38 = vld [vmem:[#allocation2 + $0xb6] sm:$0xff] }
 0x324   : > { %9811 = vmatprep.mubr.msk.bf16.mxu1 %vm1114_vm2, %v3444_v60  ;;  %v3743_v60 = vld [vmem:[#allocation2 + $0xbe] sm:$0xff]  ;;  %p10925_p13 = pneg %p10924_p12 }
 0x325   : > { %v3769_v1 = vpack.c.bf16 %v3743_v60, %v3742_v38 }
 0x326   : > { %p10932_p3 = pnand %p10931_p2, %p10925_p13 }
 0x32b   : > { %9812 = vmatmul.mubr.msk.bf16.gmra.mrb[16].mxu1 %vm1114_vm2, %v3445_v2  ;;  %v3770_v2 = vpack.c.bf16 %v3745_v35, %v3744_v20  ;;  %v11958_v20 = vpop.permute.xlu0 %4603 }
 0x32c   : > { %9815 = vmatprep.mubr.msk.bf16.mxu1 %vm1114_vm2, %v3446_v45  ;;  %v11924_v45 = vpop.permute.xlu1 %4588 }
 0x32f   : > { %v11969_v36 = vpop.permute.xlu0 %4224 }
 0x330   : > { %13492 = vst [vmem:[#allocation32_spill] sm:$0xff] %v11969_v36 }
 0x333   : > { %9816 = vmatmul.mubr.msk.bf16.gmra.mrb[20].mxu1 %vm1114_vm2, %v3447_v41  ;;  %v3749_v41 = vld [vmem:[#allocation2 + $0xee] sm:$0xff]  ;;  %v11974_v3 = vpop.permute.xlu0 %4234 }
 0x334   : > { %9821 = vmatprep.mubr.msk.bf16.mxu1 %vm1114_vm2, %v3760_v9  ;;  %v11930_v9 = vpop.permute.xlu1 %4209  ;;  %v3772_v43 = vpack.c.bf16 %v3749_v41, %v3748_v4  ;;  %13494 = vst [vmem:[#allocation34_spill] sm:$0xff] %v11974_v3 }
 0x335   : > { %13484 = vst [vmem:[#allocation25_spill] sm:$0xff] %v11930_v9 }
 0x337   : > { %v11978_v41 = vpop.permute.xlu0 %4613 }
 0x33b   : > { %9822 = vmatmul.mubr.msk.bf16.vlgmr.msra.gmra.mrb[24].mxu1 %vm1114_vm2, %v3761_v42  ;;  %v3751_v42 = vld [vmem:[#allocation2 + $0xfe] sm:$0xff] }
 0x33c   : > { %9825 = vmatprep.mubr.msk.bf16.mxu1 %vm1114_vm2, %v3762_v5  ;;  %10207 = vmatpush3.msra.mxu1 %v7780_v44  ;;  %v11936_v44 = vpop.permute.xlu1 %4219  ;;  %v3752_v5 = vld [vmem:[#allocation2 + $0x106] sm:$0xff]  ;;  %v3773_v14 = vpack.c.bf16 %v3751_v42, %v3750_v13 }
 0x33d   : > { %13485 = vst [vmem:[#allocation26_spill] sm:$0xff] %v11936_v44  ;;  %v3774_v17 = vpack.c.bf16 %v3753_v61, %v3752_v5 }
 0x343   : > { %9826 = vmatmul.mubr.msk.bf16.gmra.mrb[28].mxu1 %vm1114_vm2, %v3763_v18  ;;  %v11942_v18 = vpop.permute.xlu1 %4598 }
 0x344   : > { %9829 = vmatprep.mubr.msk.bf16.mxu1 %vm1114_vm2, %v3764_v16  ;;  %v3754_v16 = vld [vmem:[#allocation2 + $0x116] sm:$0xff] }
 0x347   : > { %v11946_v7 = vpop.permute.xlu1 %4608 }
 0x348   : > { %13488 = vst [vmem:[#allocation29_spill] sm:$0xff] %v11946_v7 }
 0x34b   : > { %9830 = vmatmul.mubr.msk.bf16.gmra.mrb[32].mxu1 %vm1114_vm2, %v3765_v23  ;;  %v3775_v23 = vpack.c.bf16 %v3755_v22, %v3754_v16  ;;  %v11956_v38 = vpop.permute.xlu1 %4229 }
 0x34c   : > { %9833 = vmatprep.mubr.msk.bf16.mxu1 %vm1114_vm2, %v3766_v40  ;;  %v3776_v40 = vpack.c.bf16 %v3757_v39, %v3756_v27  ;;  %13490 = vst [vmem:[#allocation30_spill] sm:$0xff] %v11956_v38 }
 0x353   : > { %9834 = vmatmul.mubr.msk.bf16.gmra.mrb[36].mxu1 %vm1114_vm2, %v3767_v32  ;;  %v3759_v32 = vld [vmem:[#allocation2 + $0x13e] sm:$0x3f] }
 0x354   : > { %9837 = vmatprep.mubr.msk.bf16.mxu1 %vm1114_vm2, %v3768_v33  ;;  %v876_v33 = vadd.f32 %v11407_v26, %v808_v30  ;;  %v3777_v60 = vpack.c.bf16 %v3759_v32, %v3758_v8  ;;  %v8907_v30 = vld [vmem:[%s13363_s10 + $0x4] sm:$0xf] }
 0x355   : > { %10848 = vmatprep.subr.msk.bf16.mxu0 %vm5082_vm5, %v8907_v30  ;;  %v5084_v32 = vsel %vm5082_vm5, %v8907_v30, 0 }
 0x356   : > { %v11963_v35 = vadd.f32 1.0, %v876_v33  ;;  %9865 = vmatpush3.bf16.msra.mxu0 %v5084_v32 }
 0x35b   : > { %9838 = vmatmul.mubr.msk.bf16.gmra.mrb[4].mxu1 %vm1114_vm2, %v3769_v1  ;;  %v11965_v1 = vpop.permute.xlu1 %4239 }
 0x35c   : > { %9841 = vmatprep.mubr.msk.bf16.mxu1 %vm1114_vm2, %v3770_v2  ;;  %13491 = vst [vmem:[#allocation31_spill] sm:$0xff] %v11965_v1  ;;  %v7779_v2 = vmul.f32 %v11963_v35, %v11963_v35 }
 0x35f   : > { %v11972_v26 = vpop.permute.xlu1 %4618 }
 0x360   : > { %13493 = vst [vmem:[#allocation33_spill] sm:$0xff] %v11972_v26 }
 0x363   : > { %9842 = vmatmul.mubr.msk.bf16.gmra.mrb[8].mxu1 %vm1114_vm2, %v3771_v10  ;;  %v11976_v4 = vpop.permute.xlu1 %4628 }
 0x364   : > { %9845 = vmatprep.mubr.msk.bf16.mxu1 %vm1114_vm2, %v3772_v43  ;;  %13495 = vst [vmem:[#allocation35_spill] sm:$0xff] %v11976_v4  ;;  %v11982_v43 = vpop.permute.xlu0 %4623 }
 0x365   : > { %13497 = vst [vmem:[#allocation37_spill] sm:$0xff] %v11982_v43 }
 0x367   : > { %v11980_v10 = vpop.permute.xlu1 %4249 }
 0x368   : > { %13496 = vst [vmem:[#allocation36_spill] sm:$0xff] %v11980_v10  ;;  %v11986_v42 = vpop.permute.xlu0 %4244 }
 0x369   : > { %13499 = vst [vmem:[#allocation39_spill] sm:$0xff] %v11986_v42 }
 0x36b   : > { %9846 = vmatmul.mubr.msk.bf16.gmra.mrb[12].mxu1 %vm1114_vm2, %v3773_v14  ;;  %v11984_v13 = vpop.permute.xlu1 %4259 }
 0x36c   : > { %9849 = vmatprep.mubr.msk.bf16.mxu1 %vm1114_vm2, %v3774_v17  ;;  %13498 = vst [vmem:[#allocation38_spill] sm:$0xff] %v11984_v13  ;;  %v11990_v61 = vpop.permute.xlu0 %4254 }
 0x36d   : > { %13501 = vst [vmem:[#allocation41_spill] sm:$0xff] %v11990_v61 }
 0x36f   : > { %v11988_v5 = vpop.permute.xlu1 %4638 }
 0x370   : > { %13500 = vst [vmem:[#allocation40_spill] sm:$0xff] %v11988_v5  ;;  %v11994_v17 = vpop.permute.xlu0 %4633 }
 0x371   : > { %13503 = vst [vmem:[#allocation43_spill] sm:$0xff] %v11994_v17 }
 0x373   : > { %9850 = vmatmul.mubr.msk.bf16.gmra.mrb[16].mxu1 %vm1114_vm2, %v3775_v23  ;;  %v11992_v14 = vpop.permute.xlu1 %4648 }
 0x374   : > { %9853 = vmatprep.mubr.msk.bf16.mxu1 %vm1114_vm2, %v3776_v40  ;;  %13502 = vst [vmem:[#allocation42_spill] sm:$0xff] %v11992_v14  ;;  %v11998_v22 = vpop.permute.xlu0 %4643 }
 0x375   : > { %13505 = vst [vmem:[#allocation45_spill] sm:$0xff] %v11998_v22 }
 0x377   : > { %v11996_v16 = vpop.permute.xlu1 %4269 }
 0x378   : > { %13504 = vst [vmem:[#allocation44_spill] sm:$0xff] %v11996_v16  ;;  %v12002_v39 = vpop.permute.xlu0 %4264 }
 0x379   : > { %13507 = vst [vmem:[#allocation47_spill] sm:$0xff] %v12002_v39 }
 0x37b   : > { %9854 = vmatmul.mubr.msk.bf16.gmra.mrb[20].mxu1 %vm1114_vm2, %v3777_v60  ;;  %v12000_v27 = vpop.permute.xlu1 %4279  ;;  %v4972_v60 = vld [vmem:[#allocation3 + $0x1] sm:$0xff] }
 0x37c   : > { %10208 = vmatprep.mubr.msk.f32.mxu1 %vm10987_vm0, %v13384_v6  ;;  %13506 = vst [vmem:[#allocation46_spill] sm:$0xff] %v12000_v27  ;;  %v12006_v40 = vpop.permute.xlu0 %4274  ;;  %v12020_v6 = vld [vmem:[%s13363_s10] sm:$0xf] }
 0x37d   : > { %13509 = vst [vmem:[#allocation49_spill] sm:$0xff] %v12006_v40  ;;  %10849 = vmatprep.subr.msk.bf16.mxu0 %vm5082_vm5, %v12020_v6 }
 0x37f   : > { %v12004_v23 = vpop.permute.xlu1 %4658 }
 0x380   : > { %13508 = vst [vmem:[#allocation48_spill] sm:$0xff] %v12004_v23  ;;  %v12015_v33 = vpop.permute.xlu0 %4653 }
 0x381   : > { %13511 = vst [vmem:[#allocation51_spill] sm:$0xff] %v12015_v33 }
 0x383   : > { %10209 = vmatmul.mubr.msk.f32.vlgmr.msra.gmra.mrb[2].mxu1 %vm4797_vm4, %v7779_v2  ;;  %v12012_v8 = vpop.permute.xlu1 %4668  ;;  %v4973_v2 = vld [vmem:[#allocation3 + $0x9] sm:$0xff] }
 0x384   : > { %13510 = vst [vmem:[#allocation50_spill] sm:$0xff] %v12012_v8  ;;  %v5008_v31 = vpack.c.bf16 %v4973_v2, %v4972_v60  ;;  %v12027_v8 = vpop.permute.xlu0 %4663 }
 0x385   : > { %13513 = vst [vmem:[#allocation53_spill] sm:$0xff] %v12027_v8 }
 0x386   : > { %9866 = vmatprep.mubr.msk.bf16.mxu0 %vm4797_vm4, %v5008_v31 }
 0x387   : > { %v12024_v14 = vpop.permute.xlu1 %4289 }
 0x388   : > { %13512 = vst [vmem:[#allocation52_spill] sm:$0xff] %v12024_v14  ;;  %v12031_v32 = vpop.permute.xlu0 %4284 }
 0x389   : > { %13515 = vst [vmem:[#allocation55_spill] sm:$0xff] %v12031_v32 }
 0x38b   : > { %v12029_v30 = vpop.permute.xlu1 %4299 }
 0x38c   : > { %13514 = vst [vmem:[#allocation54_spill] sm:$0xff] %v12029_v30  ;;  %v12035_v22 = vpop.permute.xlu0 %4294 }
 0x38d   : > { %13517 = vst [vmem:[#allocation57_spill] sm:$0xff] %v12035_v22 }
 0x38f   : > { %v12033_v23 = vpop.permute.xlu1 %4678 }
 0x390   : > { %13516 = vst [vmem:[#allocation56_spill] sm:$0xff] %v12033_v23  ;;  %v12039_v60 = vpop.permute.xlu0 %4673 }
 0x391   : > { %13519 = vst [vmem:[#allocation59_spill] sm:$0xff] %v12039_v60 }
 0x393   : > { %v12037_v33 = vpop.permute.xlu1 %4688 }
 0x394   : > { %13518 = vst [vmem:[#allocation58_spill] sm:$0xff] %v12037_v33  ;;  %v12043_v4 = vpop.permute.xlu0 %4683 }
 0x395   : > { %13521 = vst [vmem:[#allocation61_spill] sm:$0xff] %v12043_v4  ;;  %v4127_v4 = vadd.f32 1e-08, %v11504_v0  ;;  %v12083_v0 = vrot.slane %v11963_v35, %v11222_v28 }
 0x397   : > { %v12041_v2 = vpop.permute.xlu1 %4309  ;;  %10918 = vrsqrt.f32 %v4127_v4 }
 0x398   : > { %13520 = vst [vmem:[#allocation60_spill] sm:$0xff] %v12041_v2  ;;  %v12047_v31 = vpop.permute.xlu0 %4304 }
 0x399   : > { %13523 = vst [vmem:[#allocation63_spill] sm:$0xff] %v12047_v31 }
 0x39b   : > { %v12045_v34 = vpop.permute.xlu1 %4319 }
 0x39c   : > { %13522 = vst [vmem:[#allocation62_spill] sm:$0xff] %v12045_v34  ;;  %v12051_v62 = vpop.permute.xlu0 %4314 }
 0x39d   : > { %13525 = vst [vmem:[#allocation65_spill] sm:$0xff] %v12051_v62 }
 0x39f   : > { %v12049_v8 = vpop.permute.xlu1 %4698 }
 0x3a0   : > { %13524 = vst [vmem:[#allocation64_spill] sm:$0xff] %v12049_v8  ;;  %v12055_v23 = vpop.permute.xlu0 %4693 }
 0x3a1   : > { %13527 = vst [vmem:[#allocation67_spill] sm:$0xff] %v12055_v23  ;;  %v10919_v23 = vpop.eup %10918 }
 0x3a2   : > { %v12086_v4 = vrot.slane %v10919_v23, %v11222_v28 }
 0x3a3   : > { %v12053_v5 = vpop.permute.xlu1 %4708 }
 0x3a4   : > { %13526 = vst [vmem:[#allocation66_spill] sm:$0xff] %v12053_v5  ;;  %v12059_v33 = vpop.permute.xlu0 %4703 }
 0x3a5   : > { %13529 = vst [vmem:[#allocation69_spill] sm:$0xff] %v12059_v33  ;;  %v12077_v33 = vld [vmem:[%s13366_s13] ss:$0 sm:$0xff] }
 0x3a6   : > { %v4359_v26 = vmul.f32 %v12077_v33, %v11922_v63  ;;  %v12104_v23 = vmul.f32 %v12077_v33, %v11928_v12  ;;  %v12116_v63 = vmul.f32 %v12077_v33, %v11936_v44  ;;  %v12124_v12 = vmul.f32 %v12077_v33, %v11956_v38 }
 0x3a7   : > { %v12057_v43 = vpop.permute.xlu1 %4329  ;;  %v12136_v44 = vmul.f32 %v12077_v33, %v11974_v3  ;;  %v12144_v38 = vmul.f32 %v12077_v33, %v11986_v42  ;;  %v12156_v3 = vmul.f32 %v12077_v33, %v11996_v16  ;;  %v12175_v16 = vmul.f32 %v12077_v33, %v12024_v14 }
 0x3a8   : > { %13528 = vst [vmem:[#allocation68_spill] sm:$0xff] %v12057_v43  ;;  %v12064_v59 = vpop.permute.xlu0 %4324  ;;  %v12192_v14 = vmul.f32 %v12077_v33, %v12035_v22 }
 0x3a9   : > { %13531 = vst [vmem:[#allocation71_spill] sm:$0xff] %v12064_v59 }
 0x3ab   : > { %v12061_v60 = vpop.permute.xlu1 %4339 }
 0x3ac   : > { %13530 = vst [vmem:[#allocation70_spill] sm:$0xff] %v12061_v60  ;;  %v12068_v8 = vpop.permute.xlu0 %4334 }
 0x3ad   : > { %13533 = vst [vmem:[#allocation73_spill] sm:$0xff] %v12068_v8 }
 0x3af   : > { %v12066_v17 = vpop.permute.xlu1 %4718 }
 0x3b0   : > { %13532 = vst [vmem:[#allocation72_spill] sm:$0xff] %v12066_v17  ;;  %v12072_v5 = vpop.permute.xlu0 %4713  ;;  %v4358_v17 = vmul.f32 %v12077_v33, %v11916_v19 }
 0x3b1   : > { %13535 = vst [vmem:[#allocation75_spill] sm:$0xff] %v12072_v5  ;;  %v4361_v5 = vmul.f32 %v12077_v33, %v11914_v29  ;;  %v12112_v29 = vmul.f32 %v12077_v33, %v11938_v15  ;;  %v12132_v15 = vmul.f32 %v12077_v33, %v11965_v1  ;;  %v12152_v1 = vmul.f32 %v12077_v33, %v11990_v61 }
 0x3b2   : > { %v12171_v61 = vmul.f32 %v12077_v33, %v12006_v40 }
 0x3b3   : > { %v12070_v7 = vpop.permute.xlu1 %4728 }
 0x3b4   : > { %13534 = vst [vmem:[#allocation74_spill] sm:$0xff] %v12070_v7  ;;  %v4360_v7 = vmul.f32 %v12077_v33, %v11910_v24  ;;  %v12100_v35 = vpop.permute.xlu0 %4723  ;;  %v12108_v24 = vmul.f32 %v12077_v33, %v11930_v9  ;;  %v12128_v9 = vmul.f32 %v12077_v33, %v11969_v36  ;;  %v12148_v36 = vmul.f32 %v12077_v33, %v11984_v13 }
 0x3b5   : > { %13537 = vst [vmem:[#allocation77_spill] sm:$0xff] %v12100_v35  ;;  %v12167_v13 = vmul.f32 %v12077_v33, %v12000_v27 }
 0x3b6   : > { %13538 = vst [vmem:[#allocation78_spill] sm:$0xff] %v12148_v36 }
 0x3b7   : > { %v12079_v58 = vpop.permute.xlu1 %4738  ;;  %13540 = vst [vmem:[#allocation80_spill] sm:$0xff] %v12167_v13 }
 0x3b8   : > { %13536 = vst [vmem:[#allocation76_spill] sm:$0xff] %v12079_v58  ;;  %v12098_v58 = vmul.f32 %v12077_v33, %v11920_v37  ;;  %v12120_v37 = vmul.f32 %v12077_v33, %v11944_v21  ;;  %v12140_v21 = vmul.f32 %v12077_v33, %v11980_v10  ;;  %v12160_v10 = vmul.f32 %v12077_v33, %v12002_v39 }
 0x3bb   : > { %v12162_v28 = vpop.permute.xlu1 %4748 }
 0x3bc   : > { %13539 = vst [vmem:[#allocation79_spill] sm:$0xff] %v12162_v28  ;;  %v12180_v28 = vmul.f32 %v12077_v33, %v12031_v32  ;;  %v12216_v32 = vmul.f32 %v12077_v33, %v12051_v62 }
 0x40e   : > { %v9823_v19 = vpop.f32.mrb[24].mxu1 }
 0x40f   : > { %v10272_v42 = vadd.f32 %v9823_v19, %v11464_v46  ;;  %v3875_v35 = vpop.f32.mrb[25].mxu1  ;;  %v12184_v46 = vmul.f32 %v12077_v33, %v12029_v30  ;;  %v12186_v19 = vpop.permute.xlu0 %4733 }
 0x410   : > { %v10273_v39 = vadd.f32 %v3875_v35, %v11466_v47  ;;  %v9824_v36 = vpop.f32.mrb[26].mxu1  ;;  %13541 = vst [vmem:[#allocation81_spill] sm:$0xff] %v12186_v19  ;;  %v12196_v47 = vmul.f32 %v12077_v33, %v12041_v2  ;;  %v12201_v35 = vld [vmem:[%s13367_s14] ss:$0 sm:$0xff] }
 0x411   : > { %v4137_v40 = vmul.f32 %v10272_v42, %v12086_v4  ;;  %v10274_v27 = vadd.f32 %v9824_v36, %v11468_v48  ;;  %v3878_v13 = vpop.f32.mrb[27].mxu1  ;;  %v12207_v48 = vmul.f32 %v12077_v33, %v12047_v31  ;;  %v12211_v36 = vmul.f32 %v12077_v33, %v12045_v34 }
 0x412   : > { %v4135_v30 = vmul.f32 %v10273_v39, %v12086_v4  ;;  %v10275_v42 = vadd.f32 %v3878_v13, %v11470_v49  ;;  %v12220_v39 = vmul.f32 %v12077_v33, %v12057_v43  ;;  %v12225_v31 = vmul.f32 %v12077_v33, %v12064_v59 }
 0x413   : > { %13542 = vst [vmem:[#allocation82_spill] sm:$0xff] %v12211_v36  ;;  %v4396_v22 = vadd.f32 %v4360_v7, %v4137_v40  ;;  %v4138_v2 = vmul.f32 %v10274_v27, %v12086_v4  ;;  %v12229_v7 = vmul.f32 %v12077_v33, %v12061_v60  ;;  %v12231_v27 = vpop.permute.xlu1 %4349  ;;  %v12236_v43 = vmul.f32 %v12077_v33, %v12068_v8  ;;  %v12243_v34 = vpop.permute.xlu0 %4743 }
 0x414   : > { %v4394_v49 = vadd.f32 %v4358_v17, %v4135_v30  ;;  %v4136_v13 = vmul.f32 %v10275_v42, %v12086_v4  ;;  %13544 = vst [vmem:[#allocation84_spill] sm:$0xff] %v12231_v27  ;;  %v12240_v17 = vmul.f32 %v12077_v33, %v12231_v27  ;;  %13547 = vst [vmem:[#allocation87_spill] sm:$0xff] %v12243_v34 }
 0x415   : > { %13543 = vst [vmem:[#allocation83_spill] sm:$0xff] %v12229_v7  ;;  %v4439_v40 = vadd.f32 %v12201_v35, %v4396_v22  ;;  %v4397_v62 = vadd.f32 %v4361_v5, %v4138_v2  ;;  %13545 = vst [vmem:[#allocation85_spill] sm:$0xff] %v12236_v43 }
 0x416   : > { %13546 = vst [vmem:[#allocation86_spill] sm:$0xff] %v12240_v17  ;;  %v4437_v30 = vadd.f32 %v12201_v35, %v4394_v49  ;;  %v4395_v42 = vadd.f32 %v4359_v26, %v4136_v13  ;;  %v9827_v59 = vpop.f32.mrb[28].mxu1 }
 0x417   : > { %vm4475_vm6 = vcmp.ge.f32.partialorder %v4439_v40, 0.0  ;;  %v4511_v60 = vmul.f32 0.2, %v4439_v40  ;;  %v4440_v7 = vadd.f32 %v12201_v35, %v4397_v62  ;;  %v10276_v5 = vadd.f32 %v9827_v59, %v11474_v50  ;;  %v3891_v22 = vpop.f32.mrb[29].mxu1 }
 0x418   : > { %vm4473_vm7 = vcmp.ge.f32.partialorder %v4437_v30, 0.0  ;;  %v4509_v2 = vmul.f32 0.2, %v4437_v30  ;;  %v4438_v8 = vadd.f32 %v12201_v35, %v4395_v42  ;;  %v10277_v27 = vadd.f32 %v3891_v22, %v11476_v51  ;;  %v9828_v17 = vpop.f32.mrb[30].mxu1  ;;  %v12257_v22 = vpop.permute.xlu0 %4344 }
 0x419   : > { %v4547_v43 = vsel %vm4475_vm6, %v4439_v40, %v4511_v60  ;;  %vm4476_vm8 = vcmp.ge.f32.partialorder %v4440_v7, 0.0  ;;  %v4512_v26 = vmul.f32 0.2, %v4440_v7  ;;  %v4141_v49 = vmul.f32 %v10276_v5, %v12086_v4  ;;  %v3894_v13 = vpop.f32.mrb[31].mxu1 }
 0x41a   : > { %v4763_v34 = vmul.f32 %v11950_v25, %v4547_v43  ;;  %v4545_v19 = vsel %vm4473_vm7, %v4437_v30, %v4509_v2  ;;  %vm4474_vm9 = vcmp.ge.f32.partialorder %v4438_v8, 0.0  ;;  %v4510_v62 = vmul.f32 0.2, %v4438_v8 }
 0x41b   : > { %v4761_v50 = vmul.f32 %v11932_v11, %v4545_v19  ;;  %v4548_v59 = vsel %vm4476_vm8, %v4440_v7, %v4512_v26  ;;  %v4400_v36 = vadd.f32 %v12112_v29, %v4141_v49  ;;  %v4139_v42 = vmul.f32 %v10277_v27, %v12086_v4 }
 0x41c   : > { %v4846_v51 = vmul.f32 %v12083_v0, %v4763_v34  ;;  %v4764_v60 = vmul.f32 %v11942_v18, %v4548_v59  ;;  %v4546_v40 = vsel %vm4474_vm9, %v4438_v8, %v4510_v62  ;;  %v10278_v5 = vadd.f32 %v9828_v17, %v11478_v52 }
 0x41d   : > { %v4844_v43 = vmul.f32 %v12083_v0, %v4761_v50  ;;  %v4762_v30 = vmul.f32 %v11924_v45, %v4546_v40  ;;  %v4443_v19 = vadd.f32 %v12201_v35, %v4400_v36  ;;  %v4398_v7 = vadd.f32 %v12104_v23, %v4139_v42 }
 0x41e   : > { %v12265_v29 = vmul.f32 %v12077_v33, %v12257_v22  ;;  %4882 = vst.msk [vmem:[#allocation3 + $0x23] sm:$0xff] %vm4797_vm4, %v4846_v51  ;;  %v4847_v34 = vmul.f32 %v12083_v0, %v4764_v60  ;;  %v4142_v52 = vmul.f32 %v10278_v5, %v12086_v4  ;;  %v10279_v8 = vadd.f32 %v3894_v13, %v11480_v53  ;;  %v9831_v27 = vpop.f32.mrb[32].mxu1 }
 0x41f   : > { %4880 = vst.msk [vmem:[#allocation3 + $0x13] sm:$0xff] %vm4797_vm4, %v4844_v43  ;;  %v4845_v17 = vmul.f32 %v12083_v0, %v4762_v30  ;;  %vm4479_vm10 = vcmp.ge.f32.partialorder %v4443_v19, 0.0  ;;  %v4515_v36 = vmul.f32 0.2, %v4443_v19  ;;  %v4441_v23 = vadd.f32 %v12201_v35, %v4398_v7  ;;  %v3907_v2 = vpop.f32.mrb[33].mxu1 }
 0x420   : > { %4883 = vst.msk [vmem:[#allocation3 + $0x2b] sm:$0xff] %vm4797_vm4, %v4847_v34  ;;  %v4401_v33 = vadd.f32 %v12108_v24, %v4142_v52  ;;  %v4140_v26 = vmul.f32 %v10279_v8, %v12086_v4  ;;  %v10280_v49 = vadd.f32 %v9831_v27, %v11484_v54  ;;  %v10281_v53 = vadd.f32 %v3907_v2, %v11486_v55  ;;  %v9832_v13 = vpop.f32.mrb[34].mxu1 }
 0x421   : > { %4881 = vst.msk [vmem:[#allocation3 + $0x1b] sm:$0xff] %vm4797_vm4, %v4845_v17  ;;  %v4551_v62 = vsel %vm4479_vm10, %v4443_v19, %v4515_v36  ;;  %vm4477_vm11 = vcmp.ge.f32.partialorder %v4441_v23, 0.0  ;;  %v4513_v50 = vmul.f32 0.2, %v4441_v23  ;;  %v10282_v59 = vadd.f32 %v9832_v13, %v11488_v56  ;;  %v3910_v42 = vpop.f32.mrb[35].mxu1 }
 0x422   : > { %v4767_v51 = vmul.f32 %v11978_v41, %v4551_v62  ;;  %v4444_v60 = vadd.f32 %v12201_v35, %v4401_v33  ;;  %v4399_v24 = vadd.f32 %v12098_v58, %v4140_v26  ;;  %v4145_v40 = vmul.f32 %v10280_v49, %v12086_v4 }
 0x423   : > { %v4549_v54 = vsel %vm4477_vm11, %v4441_v23, %v4513_v50  ;;  %v4143_v55 = vmul.f32 %v10281_v53, %v12086_v4  ;;  %v4146_v5 = vmul.f32 %v10282_v59, %v12086_v4  ;;  %v10283_v43 = vadd.f32 %v3910_v42, %v11490_v57  ;;  %v13548_v23 = vld [vmem:[#allocation33_spill] sm:$0xff]  ;;  %v13549_v53 = vld [vmem:[#allocation15_spill] sm:$0xff] }
 0x424   : > { %v4850_v30 = vmul.f32 %v12083_v0, %v4767_v51  ;;  %v4765_v56 = vmul.f32 %v11958_v20, %v4549_v54  ;;  %vm4480_vm12 = vcmp.ge.f32.partialorder %v4444_v60, 0.0  ;;  %v4516_v19 = vmul.f32 0.2, %v4444_v60  ;;  %v13550_v51 = vld [vmem:[#allocation29_spill] sm:$0xff] }
 0x425   : > { %v4442_v7 = vadd.f32 %v12201_v35, %v4399_v24  ;;  %v4404_v34 = vadd.f32 %v12128_v9, %v4145_v40  ;;  %v4402_v58 = vadd.f32 %v12120_v37, %v4143_v55  ;;  %v4405_v52 = vadd.f32 %v12124_v12, %v4146_v5 }
 0x426   : > { %4886 = vst.msk [vmem:[#allocation3 + $0x43] sm:$0xff] %vm4797_vm4, %v4850_v30  ;;  %v4848_v8 = vmul.f32 %v12083_v0, %v4765_v56  ;;  %v4552_v27 = vsel %vm4480_vm12, %v4444_v60, %v4516_v19  ;;  %v4144_v57 = vmul.f32 %v10283_v43, %v12086_v4  ;;  %v9835_v17 = vpop.f32.mrb[36].mxu1  ;;  %v12299_v36 = vsel %vm5082_vm5, %v12020_v6, 0  ;;  %v13551_v43 = vld [vmem:[#allocation43_spill] sm:$0xff]  ;;  %v13552_v19 = vld [vmem:[#allocation16_spill] sm:$0xff] }
 0x427   : > { %v4768_v2 = vmul.f32 %v13548_v23, %v4552_v27  ;;  %vm4478_vm13 = vcmp.ge.f32.partialorder %v4442_v7, 0.0  ;;  %v4514_v9 = vmul.f32 0.2, %v4442_v7  ;;  %v4447_v37 = vadd.f32 %v12201_v35, %v4404_v34  ;;  %v3923_v33 = vpop.f32.mrb[37].mxu1  ;;  %v13553_v34 = vld [vmem:[#allocation37_spill] sm:$0xff] }
 0x428   : > { %4884 = vst.msk [vmem:[#allocation3 + $0x33] sm:$0xff] %vm4797_vm4, %v4848_v8  ;;  %v4445_v12 = vadd.f32 %v12201_v35, %v4402_v58  ;;  %v4448_v26 = vadd.f32 %v12201_v35, %v4405_v52  ;;  %v4403_v49 = vadd.f32 %v12116_v63, %v4144_v57  ;;  %v10284_v13 = vadd.f32 %v9835_v17, %v13549_v53  ;;  %v9836_v62 = vpop.f32.mrb[38].mxu1  ;;  %v13554_v57 = vld [vmem:[#allocation40_spill] sm:$0xff] }
 0x429   : > { %v4851_v6 = vmul.f32 %v12083_v0, %v4768_v2  ;;  %v4550_v50 = vsel %vm4478_vm13, %v4442_v7, %v4514_v9  ;;  %vm4483_vm14 = vcmp.ge.f32.partialorder %v4447_v37, 0.0  ;;  %v4519_v59 = vmul.f32 0.2, %v4447_v37  ;;  %v3926_v42 = vpop.f32.mrb[39].mxu1 }
 0x42a   : > { %v4766_v60 = vmul.f32 %v13550_v51, %v4550_v50  ;;  %vm4481_vm15 = vcmp.ge.f32.partialorder %v4445_v12, 0.0  ;;  %v4517_v24 = vmul.f32 0.2, %v4445_v12  ;;  %vm4484_vm0 = vcmp.ge.f32.partialorder %v4448_v26, 0.0  ;;  %v13556_v50 = vld [vmem:[#allocation18_spill] sm:$0xff] }
 0x42b   : > { %4887 = vst.msk [vmem:[#allocation3 + $0x4b] sm:$0xff] %vm4797_vm4, %v4851_v6  ;;  %v4555_v40 = vsel %vm4483_vm14, %v4447_v37, %v4519_v59  ;;  %v4520_v54 = vmul.f32 0.2, %v4448_v26  ;;  %v4446_v63 = vadd.f32 %v12201_v35, %v4403_v49  ;;  %v4149_v55 = vmul.f32 %v10284_v13, %v12086_v4  ;;  %v4975_v37 = vld [vmem:[#allocation3 + $0x19] sm:$0xff]  ;;  %v4976_v49 = vld [vmem:[#allocation3 + $0x21] sm:$0xff] }
 0x42c   : > { %v4849_v5 = vmul.f32 %v12083_v0, %v4766_v60  ;;  %v4771_v30 = vmul.f32 %v13551_v43, %v4555_v40  ;;  %v4553_v56 = vsel %vm4481_vm15, %v4445_v12, %v4517_v24  ;;  %v10285_v7 = vadd.f32 %v3923_v33, %v13552_v19  ;;  %v4977_v12 = vld [vmem:[#allocation3 + $0x29] sm:$0xff]  ;;  %v13557_v40 = vld [vmem:[#allocation35_spill] sm:$0xff] }
 0x42d   : > { %v4769_v58 = vmul.f32 %v13553_v34, %v4553_v56  ;;  %v4556_v52 = vsel %vm4484_vm0, %v4448_v26, %v4520_v54  ;;  %vm4482_vm1 = vcmp.ge.f32.partialorder %v4446_v63, 0.0  ;;  %v4518_v8 = vmul.f32 0.2, %v4446_v63  ;;  %v13555_v26 = vld [vmem:[#allocation17_spill] sm:$0xff] }
 0x42e   : > { %4885 = vst.msk [vmem:[#allocation3 + $0x3b] sm:$0xff] %vm4797_vm4, %v4849_v5  ;;  %v4854_v27 = vmul.f32 %v12083_v0, %v4771_v30  ;;  %v4772_v17 = vmul.f32 %v13554_v57, %v4556_v52  ;;  %v4408_v2 = vadd.f32 %v12144_v38, %v4149_v55  ;;  %v4147_v9 = vmul.f32 %v10285_v7, %v12086_v4  ;;  %v9839_v53 = vpop.f32.mrb[4].mxu1  ;;  %v4974_v5 = vld [vmem:[#allocation3 + $0x11] sm:$0xff] }
 0x42f   : > { %v4852_v33 = vmul.f32 %v12083_v0, %v4769_v58  ;;  %v4554_v13 = vsel %vm4482_vm1, %v4446_v63, %v4518_v8  ;;  %v10286_v6 = vadd.f32 %v9836_v62, %v13555_v26  ;;  %v10287_v59 = vadd.f32 %v3926_v42, %v13556_v50  ;;  %v3939_v60 = vpop.f32.mrb[5].mxu1 }
 0x430   : > { %4890 = vst.msk [vmem:[#allocation3 + $0x63] sm:$0xff] %vm4797_vm4, %v4854_v27  ;;  %v4855_v24 = vmul.f32 %v12083_v0, %v4772_v17  ;;  %v4770_v38 = vmul.f32 %v13557_v40, %v4554_v13  ;;  %v4451_v54 = vadd.f32 %v12201_v35, %v4408_v2  ;;  %v4406_v55 = vadd.f32 %v12136_v44, %v4147_v9  ;;  %v9840_v30 = vpop.f32.mrb[6].mxu1  ;;  %v12339_v44 = vld [vmem:[%s13363_s10 + $0x8] sm:$0xf] }
 0x431   : > { %4888 = vst.msk [vmem:[#allocation3 + $0x53] sm:$0xff] %vm4797_vm4, %v4852_v33  ;;  %v4150_v63 = vmul.f32 %v10286_v6, %v12086_v4  ;;  %v4148_v62 = vmul.f32 %v10287_v59, %v12086_v4  ;;  %v5009_v42 = vpack.c.bf16 %v4975_v37, %v4974_v5  ;;  %v5010_v56 = vpack.c.bf16 %v4977_v12, %v4976_v49  ;;  %v3942_v19 = vpop.f32.mrb[7].mxu1 }
 0x432   : > { %4891 = vst.msk [vmem:[#allocation3 + $0x6b] sm:$0xff] %vm4797_vm4, %v4855_v24  ;;  %v4853_v7 = vmul.f32 %v12083_v0, %v4770_v38  ;;  %vm4487_vm2 = vcmp.ge.f32.partialorder %v4451_v54, 0.0  ;;  %v4523_v58 = vmul.f32 0.2, %v4451_v54  ;;  %v4449_v52 = vadd.f32 %v12201_v35, %v4406_v55 }
 0x433   : > { %v4409_v8 = vadd.f32 %v12140_v21, %v4150_v63  ;;  %v4407_v27 = vadd.f32 %v12132_v15, %v4148_v62  ;;  %9867 = vmatmul.mubr.msk.bf16.vlgmr.msra.gmra.mrb[24].mxu0 %vm4797_vm4, %v5009_v42  ;;  %v4153_v17 = vmul.f32 %v9839_v53, %v12086_v4  ;;  %v4151_v2 = vmul.f32 %v12086_v4, %v3939_v60  ;;  %v13558_v21 = vld [vmem:[#allocation51_spill] sm:$0xff]  ;;  %v13559_v60 = vld [vmem:[#allocation45_spill] sm:$0xff]  ;;  %v13560_v62 = vld [vmem:[#allocation78_spill] sm:$0xff] }
 0x434   : > { %4889 = vst.msk [vmem:[#allocation3 + $0x5b] sm:$0xff] %vm4797_vm4, %v4853_v7  ;;  %v4559_v9 = vsel %vm4487_vm2, %v4451_v54, %v4523_v58  ;;  %vm4485_vm3 = vcmp.ge.f32.partialorder %v4449_v52, 0.0  ;;  %v4521_v37 = vmul.f32 0.2, %v4449_v52  ;;  %9903 = vmatpush3.bf16.msra.mxu0 %v12299_v36  ;;  %9870 = vmatprep.mubr.msk.bf16.mxu0 %vm4797_vm4, %v5010_v56  ;;  %v4154_v49 = vmul.f32 %v9840_v30, %v12086_v4 }
 0x435   : > { %v4775_v12 = vmul.f32 %v13558_v21, %v4559_v9  ;;  %v4452_v15 = vadd.f32 %v12201_v35, %v4409_v8  ;;  %v4450_v33 = vadd.f32 %v12201_v35, %v4407_v27  ;;  %v4412_v53 = vadd.f32 %v12160_v10, %v4153_v17  ;;  %10850 = vmatprep.subr.msk.bf16.mxu0 %vm5082_vm5, %v12339_v44  ;;  %v4979_v8 = vld [vmem:[#allocation3 + $0x39] sm:$0xff]  ;;  %v13562_v27 = vld [vmem:[#allocation42_spill] sm:$0xff] }
 0x436   : > { %v4557_v13 = vsel %vm4485_vm3, %v4449_v52, %v4521_v37  ;;  %v4410_v26 = vadd.f32 %v12152_v1, %v4151_v2  ;;  %v4413_v36 = vadd.f32 %v12156_v3, %v4154_v49  ;;  %v4152_v6 = vmul.f32 %v12086_v4, %v3942_v19  ;;  %v9843_v50 = vpop.f32.mrb[8].mxu1  ;;  %v13561_v19 = vld [vmem:[#allocation48_spill] sm:$0xff] }
 0x437   : > { %v4858_v59 = vmul.f32 %v12083_v0, %v4775_v12  ;;  %v4773_v24 = vmul.f32 %v13559_v60, %v4557_v13  ;;  %vm4488_vm6 = vcmp.ge.f32.partialorder %v4452_v15, 0.0  ;;  %v4524_v38 = vmul.f32 0.2, %v4452_v15  ;;  %v3955_v54 = vpop.f32.mrb[9].mxu1  ;;  %v4981_v13 = vld [vmem:[#allocation3 + $0x49] sm:$0xff] }
 0x438   : > { %vm4486_vm7 = vcmp.ge.f32.partialorder %v4450_v33, 0.0  ;;  %v4522_v10 = vmul.f32 0.2, %v4450_v33  ;;  %v4455_v55 = vadd.f32 %v12201_v35, %v4412_v53  ;;  %v4453_v5 = vadd.f32 %v12201_v35, %v4410_v26  ;;  %v9844_v30 = vpop.f32.mrb[10].mxu1  ;;  %v4980_v53 = vld [vmem:[#allocation3 + $0x41] sm:$0xff]  ;;  %v13563_v26 = vld [vmem:[#allocation59_spill] sm:$0xff] }
 0x439   : > { %4894 = vst.msk [vmem:[#allocation3 + $0x83] sm:$0xff] %vm4797_vm4, %v4858_v59  ;;  %v4856_v1 = vmul.f32 %v12083_v0, %v4773_v24  ;;  %v4560_v3 = vsel %vm4488_vm6, %v4452_v15, %v4524_v38  ;;  %v4456_v63 = vadd.f32 %v12201_v35, %v4413_v36  ;;  %v4411_v42 = vadd.f32 %v13560_v62, %v4152_v6  ;;  %v3958_v56 = vpop.f32.mrb[11].mxu1  ;;  %v4978_v15 = vld [vmem:[#allocation3 + $0x31] sm:$0xff]  ;;  %v13564_v24 = vld [vmem:[#allocation53_spill] sm:$0xff]  ;;  %v13565_v62 = vld [vmem:[#allocation56_spill] sm:$0xff] }
 0x43a   : > { %v4776_v7 = vmul.f32 %v13561_v19, %v4560_v3  ;;  %v4558_v58 = vsel %vm4486_vm7, %v4450_v33, %v4522_v10  ;;  %vm4491_vm8 = vcmp.ge.f32.partialorder %v4455_v55, 0.0  ;;  %v4527_v52 = vmul.f32 0.2, %v4455_v55 }
 0x43b   : > { %4892 = vst.msk [vmem:[#allocation3 + $0x73] sm:$0xff] %vm4797_vm4, %v4856_v1  ;;  %v4774_v17 = vmul.f32 %v13562_v27, %v4558_v58  ;;  %vm4489_vm9 = vcmp.ge.f32.partialorder %v4453_v5, 0.0  ;;  %v4525_v2 = vmul.f32 0.2, %v4453_v5  ;;  %vm4492_vm10 = vcmp.ge.f32.partialorder %v4456_v63, 0.0  ;;  %v4983_v58 = vld [vmem:[#allocation3 + $0x59] sm:$0xff] }
 0x43c   : > { %v4859_v9 = vmul.f32 %v12083_v0, %v4776_v7  ;;  %v4563_v37 = vsel %vm4491_vm8, %v4455_v55, %v4527_v52  ;;  %v4528_v49 = vmul.f32 0.2, %v4456_v63  ;;  %v4454_v12 = vadd.f32 %v12201_v35, %v4411_v42  ;;  %v4984_v52 = vld [vmem:[#allocation3 + $0x61] sm:$0xff] }
 0x43d   : > { %v4857_v33 = vmul.f32 %v12083_v0, %v4774_v17  ;;  %v4779_v36 = vmul.f32 %v13563_v26, %v4563_v37  ;;  %v4561_v6 = vsel %vm4489_vm9, %v4453_v5, %v4525_v2  ;;  %v5011_v59 = vpack.c.bf16 %v4979_v8, %v4978_v15  ;;  %v4985_v8 = vld [vmem:[#allocation3 + $0x69] sm:$0xff] }
 0x43e   : > { %4895 = vst.msk [vmem:[#allocation3 + $0x8b] sm:$0xff] %vm4797_vm4, %v4859_v9  ;;  %v4777_v38 = vmul.f32 %v13564_v24, %v4561_v6  ;;  %v4564_v10 = vsel %vm4492_vm10, %v4456_v63, %v4528_v49  ;;  %vm4490_vm11 = vcmp.ge.f32.partialorder %v4454_v12, 0.0  ;;  %v4526_v1 = vmul.f32 0.2, %v4454_v12  ;;  %v9847_v55 = vpop.f32.mrb[12].mxu1 }
 0x43f   : > { %4893 = vst.msk [vmem:[#allocation3 + $0x7b] sm:$0xff] %vm4797_vm4, %v4857_v33  ;;  %v4862_v3 = vmul.f32 %v12083_v0, %v4779_v36  ;;  %v4780_v42 = vmul.f32 %v13565_v62, %v4564_v10  ;;  %9871 = vmatmul.mubr.msk.bf16.gmra.mrb[28].mxu0 %vm4797_vm4, %v5011_v59  ;;  %v5012_v7 = vpack.c.bf16 %v4981_v13, %v4980_v53  ;;  %v3971_v17 = vpop.f32.mrb[13].mxu1  ;;  %v13566_v33 = vld [vmem:[#allocation50_spill] sm:$0xff] }
 0x440   : > { %v4157_v5 = vmul.f32 %v9843_v50, %v12086_v4  ;;  %v4860_v63 = vmul.f32 %v12083_v0, %v4777_v38  ;;  %v4562_v2 = vsel %vm4490_vm11, %v4454_v12, %v4526_v1  ;;  %v4155_v9 = vmul.f32 %v12086_v4, %v3955_v54  ;;  %v9848_v49 = vpop.f32.mrb[14].mxu1  ;;  %v4982_v36 = vld [vmem:[#allocation3 + $0x51] sm:$0xff]  ;;  %v13567_v1 = vld [vmem:[#allocation80_spill] sm:$0xff] }
 0x441   : > { %v4158_v37 = vmul.f32 %v9844_v30, %v12086_v4  ;;  %4898 = vst.msk [vmem:[#allocation3 + $0xa3] sm:$0xff] %vm4797_vm4, %v4862_v3  ;;  %v4863_v15 = vmul.f32 %v12083_v0, %v4780_v42  ;;  %v4778_v53 = vmul.f32 %v13566_v33, %v4562_v2  ;;  %9874 = vmatprep.mubr.msk.bf16.mxu0 %vm4797_vm4, %v5012_v7  ;;  %v3974_v6 = vpop.f32.mrb[15].mxu1 }
 0x442   : > { %v4416_v50 = vadd.f32 %v12180_v28, %v4157_v5  ;;  %v4156_v13 = vmul.f32 %v12086_v4, %v3958_v56  ;;  %4896 = vst.msk [vmem:[#allocation3 + $0x93] sm:$0xff] %vm4797_vm4, %v4860_v63  ;;  %v4414_v54 = vadd.f32 %v12171_v61, %v4155_v9  ;;  %v5013_v12 = vpack.c.bf16 %v4983_v58, %v4982_v36  ;;  %v13568_v9 = vld [vmem:[#allocation67_spill] sm:$0xff]  ;;  %v13570_v36 = vld [vmem:[#allocation64_spill] sm:$0xff] }
 0x443   : > { %v4417_v30 = vadd.f32 %v12175_v16, %v4158_v37  ;;  %v5014_v59 = vpack.c.bf16 %v4985_v8, %v4984_v52  ;;  %4899 = vst.msk [vmem:[#allocation3 + $0xab] sm:$0xff] %vm4797_vm4, %v4863_v15  ;;  %v4861_v38 = vmul.f32 %v12083_v0, %v4778_v53  ;;  %v4161_v56 = vmul.f32 %v9847_v55, %v12086_v4 }
 0x444   : > { %v4459_v10 = vadd.f32 %v12201_v35, %v4416_v50  ;;  %v4415_v28 = vadd.f32 %v13567_v1, %v4156_v13  ;;  %v4457_v3 = vadd.f32 %v12201_v35, %v4414_v54  ;;  %v4159_v61 = vmul.f32 %v12086_v4, %v3971_v17  ;;  %v13569_v50 = vld [vmem:[#allocation61_spill] sm:$0xff] }
 0x445   : > { %v4460_v42 = vadd.f32 %v12201_v35, %v4417_v30  ;;  %v4162_v16 = vmul.f32 %v9848_v49, %v12086_v4  ;;  %4897 = vst.msk [vmem:[#allocation3 + $0x9b] sm:$0xff] %vm4797_vm4, %v4861_v38  ;;  %v4420_v58 = vadd.f32 %v12207_v48, %v4161_v56 }
 0x446   : > { %vm4495_vm12 = vcmp.ge.f32.partialorder %v4459_v10, 0.0  ;;  %v4531_v7 = vmul.f32 0.2, %v4459_v10  ;;  %v4458_v5 = vadd.f32 %v12201_v35, %v4415_v28  ;;  %vm4493_vm13 = vcmp.ge.f32.partialorder %v4457_v3, 0.0  ;;  %v9851_v2 = vpop.f32.mrb[16].mxu1 }
 0x447   : > { %v4529_v52 = vmul.f32 0.2, %v4457_v3  ;;  %vm4496_vm14 = vcmp.ge.f32.partialorder %v4460_v42, 0.0  ;;  %v4532_v55 = vmul.f32 0.2, %v4460_v42  ;;  %9875 = vmatmul.mubr.msk.bf16.gmra.mrb[32].mxu0 %vm4797_vm4, %v5013_v12  ;;  %v4463_v17 = vadd.f32 %v12201_v35, %v4420_v58  ;;  %v3987_v53 = vpop.f32.mrb[17].mxu1 }
 0x448   : > { %v4567_v8 = vsel %vm4495_vm12, %v4459_v10, %v4531_v7  ;;  %vm4494_vm15 = vcmp.ge.f32.partialorder %v4458_v5, 0.0  ;;  %v4530_v63 = vmul.f32 0.2, %v4458_v5  ;;  %9878 = vmatprep.mubr.msk.bf16.mxu0 %vm4797_vm4, %v5014_v59  ;;  %v4418_v48 = vadd.f32 %v12192_v14, %v4159_v61  ;;  %v9852_v38 = vpop.f32.mrb[18].mxu1  ;;  %v13571_v10 = vld [vmem:[#allocation58_spill] sm:$0xff] }
 0x449   : > { %v4783_v37 = vmul.f32 %v13568_v9, %v4567_v8  ;;  %v4565_v49 = vsel %vm4493_vm13, %v4457_v3, %v4529_v52  ;;  %v4568_v15 = vsel %vm4496_vm14, %v4460_v42, %v4532_v55  ;;  %vm4499_vm0 = vcmp.ge.f32.partialorder %v4463_v17, 0.0  ;;  %v4987_v3 = vld [vmem:[#allocation3 + $0x79] sm:$0xff]  ;;  %v3990_v42 = vpop.f32.mrb[19].mxu1  ;;  %v4989_v58 = vld [vmem:[#allocation3 + $0x89] sm:$0xff] }
 0x44a   : > { %v4781_v13 = vmul.f32 %v13569_v50, %v4565_v49  ;;  %v4784_v54 = vmul.f32 %v13570_v36, %v4568_v15  ;;  %v4566_v30 = vsel %vm4494_vm15, %v4458_v5, %v4530_v63  ;;  %v4535_v28 = vmul.f32 0.2, %v4463_v17  ;;  %v4988_v5 = vld [vmem:[#allocation3 + $0x81] sm:$0xff]  ;;  %v4986_v63 = vld [vmem:[#allocation3 + $0x71] sm:$0xff] }
 0x44b   : > { %v4866_v12 = vmul.f32 %v12083_v0, %v4783_v37  ;;  %v4782_v1 = vmul.f32 %v13571_v10, %v4566_v30  ;;  %v4461_v56 = vadd.f32 %v12201_v35, %v4418_v48  ;;  %v4421_v61 = vadd.f32 %v12196_v47, %v4162_v16  ;;  %v13572_v37 = vld [vmem:[#allocation75_spill] sm:$0xff]  ;;  %v13620_v10 = vld [vmem:[#allocation60_spill] sm:$0xff] }
 0x44c   : > { %v4864_v59 = vmul.f32 %v12083_v0, %v4781_v13  ;;  %v4867_v14 = vmul.f32 %v12083_v0, %v4784_v54  ;;  %v4160_v7 = vmul.f32 %v12086_v4, %v3974_v6  ;;  %v4571_v55 = vsel %vm4499_vm0, %v4463_v17, %v4535_v28  ;;  %v4991_v54 = vld [vmem:[#allocation3 + $0x99] sm:$0xff] }
 0x44d   : > { %4902 = vst.msk [vmem:[#allocation3 + $0xc3] sm:$0xff] %vm4797_vm4, %v4866_v12  ;;  %v4865_v52 = vmul.f32 %v12083_v0, %v4782_v1  ;;  %vm4497_vm1 = vcmp.ge.f32.partialorder %v4461_v56, 0.0  ;;  %v4533_v8 = vmul.f32 0.2, %v4461_v56  ;;  %v4787_v49 = vmul.f32 %v13572_v37, %v4571_v55  ;;  %v13573_v1 = vld [vmem:[#allocation69_spill] sm:$0xff]  ;;  %v13622_v50 = vld [vmem:[#allocation63_spill] sm:$0xff] }
 0x44e   : > { %4900 = vst.msk [vmem:[#allocation3 + $0xb3] sm:$0xff] %vm4797_vm4, %v4864_v59  ;;  %4903 = vst.msk [vmem:[#allocation3 + $0xcb] sm:$0xff] %vm4797_vm4, %v4867_v14  ;;  %v4464_v47 = vadd.f32 %v12201_v35, %v4421_v61  ;;  %v4419_v6 = vadd.f32 %v12184_v46, %v4160_v7  ;;  %v5015_v16 = vpack.c.bf16 %v4987_v3, %v4986_v63  ;;  %v9855_v30 = vpop.f32.mrb[20].mxu1  ;;  %v4990_v14 = vld [vmem:[#allocation3 + $0x91] sm:$0xff]  ;;  %v4992_v61 = vld [vmem:[#allocation3 + $0xa1] sm:$0xff]  ;;  %vm4915_vm14 = vcmask 62464  }
 0x44f   : > { %4901 = vst.msk [vmem:[#allocation3 + $0xbb] sm:$0xff] %vm4797_vm4, %v4865_v52  ;;  %v4569_v15 = vsel %vm4497_vm1, %v4461_v56, %v4533_v8  ;;  %v5016_v48 = vpack.c.bf16 %v4989_v58, %v4988_v5  ;;  %v4165_v17 = vmul.f32 %v9851_v2, %v12086_v4  ;;  %v4163_v13 = vmul.f32 %v12086_v4, %v3987_v53  ;;  %v4003_v46 = vpop.f32.mrb[21].mxu1  ;;  %v4993_v7 = vld [vmem:[#allocation3 + $0xa9] sm:$0xff] }
 0x450   : > { %v4870_v12 = vmul.f32 %v12083_v0, %v4787_v49  ;;  %v4785_v28 = vmul.f32 %v13573_v1, %v4569_v15  ;;  %vm4500_vm2 = vcmp.ge.f32.partialorder %v4464_v47, 0.0  ;;  %v4536_v59 = vmul.f32 0.2, %v4464_v47  ;;  %9879 = vmatmul.mubr.msk.bf16.gmra.mrb[36].mxu0 %vm4797_vm4, %v5015_v16  ;;  %v9856_v5 = vpop.f32.mrb[22].mxu1  ;;  %v13574_v49 = vld [vmem:[#allocation72_spill] sm:$0xff]  ;;  %v13575_v15 = vld [vmem:[#allocation82_spill] sm:$0xff] }
 0x451   : > { %v4462_v3 = vadd.f32 %v12201_v35, %v4419_v6  ;;  %9882 = vmatprep.mubr.msk.bf16.mxu0 %vm4797_vm4, %v5016_v48  ;;  %v4424_v56 = vadd.f32 %v12225_v31, %v4165_v17  ;;  %v4422_v2 = vadd.f32 %v12216_v32, %v4163_v13  ;;  %v4166_v53 = vmul.f32 %v9852_v38, %v12086_v4  ;;  %v4006_v63 = vpop.f32.mrb[23].mxu1 }
 0x452   : > { %4906 = vst.msk [vmem:[#allocation3 + $0xe3] sm:$0xff] %vm4797_vm4, %v4870_v12  ;;  %v4868_v58 = vmul.f32 %v12083_v0, %v4785_v28  ;;  %v4572_v52 = vsel %vm4500_vm2, %v4464_v47, %v4536_v59  ;;  %v4164_v55 = vmul.f32 %v12086_v4, %v3990_v42  ;;  %v5017_v8 = vpack.c.bf16 %v4991_v54, %v4990_v14  ;;  %v13576_v54 = vld [vmem:[#allocation66_spill] sm:$0xff] }
 0x453   : > { %v4788_v6 = vmul.f32 %v13574_v49, %v4572_v52  ;;  %vm4498_vm3 = vcmp.ge.f32.partialorder %v4462_v3, 0.0  ;;  %v4534_v31 = vmul.f32 0.2, %v4462_v3  ;;  %v4467_v32 = vadd.f32 %v12201_v35, %v4424_v56 }
 0x454   : > { %4904 = vst.msk [vmem:[#allocation3 + $0xd3] sm:$0xff] %vm4797_vm4, %v4868_v58  ;;  %v4465_v38 = vadd.f32 %v12201_v35, %v4422_v2  ;;  %v4425_v16 = vadd.f32 %v12220_v39, %v4166_v53  ;;  %v4423_v48 = vadd.f32 %v13575_v15, %v4164_v55  ;;  %v5018_v17 = vpack.c.bf16 %v4993_v7, %v4992_v61  ;;  %v13577_v61 = vld [vmem:[#allocation81_spill] sm:$0xff] }
 0x455   : > { %v4871_v47 = vmul.f32 %v12083_v0, %v4788_v6  ;;  %v4570_v42 = vsel %vm4498_vm3, %v4462_v3, %v4534_v31  ;;  %vm4503_vm6 = vcmp.ge.f32.partialorder %v4467_v32, 0.0  ;;  %v4539_v13 = vmul.f32 0.2, %v4467_v32  ;;  %v13578_v55 = vld [vmem:[#allocation77_spill] sm:$0xff] }
 0x456   : > { %v4786_v12 = vmul.f32 %v13576_v54, %v4570_v42  ;;  %vm4501_vm7 = vcmp.ge.f32.partialorder %v4465_v38, 0.0  ;;  %v4537_v28 = vmul.f32 0.2, %v4465_v38  ;;  %v4468_v59 = vadd.f32 %v12201_v35, %v4425_v16  ;;  %v12454_v14 = vpop.f32.mrb[2].mxu1  ;;  %v13579_v16 = vld [vmem:[#allocation85_spill] sm:$0xff] }
 0x457   : > { %4907 = vst.msk [vmem:[#allocation3 + $0xeb] sm:$0xff] %vm4797_vm4, %v4871_v47  ;;  %v4575_v56 = vsel %vm4503_vm6, %v4467_v32, %v4539_v13  ;;  %v4466_v2 = vadd.f32 %v12201_v35, %v4423_v48  ;;  %v4169_v39 = vmul.f32 %v9855_v30, %v12086_v4  ;;  %v4167_v53 = vmul.f32 %v12086_v4, %v4003_v46  ;;  %v10210_v52 = vpop.f32.mrb[3].mxu1  ;;  %v4995_v48 = vld [vmem:[#allocation3 + $0xb9] sm:$0xff]  ;;  %v4997_v47 = vld [vmem:[#allocation3 + $0xc9] sm:$0xff] }
 0x458   : > { %v4869_v3 = vmul.f32 %v12083_v0, %v4786_v12  ;;  %v4791_v7 = vmul.f32 %v13577_v61, %v4575_v56  ;;  %v4573_v58 = vsel %vm4501_vm7, %v4465_v38, %v4537_v28  ;;  %vm4504_vm8 = vcmp.ge.f32.partialorder %v4468_v59, 0.0  ;;  %9883 = vmatmul.mubr.msk.bf16.gmra.mrb[40].mxu0 %vm4797_vm4, %v5017_v8  ;;  %v4996_v8 = vld [vmem:[#allocation3 + $0xc1] sm:$0xff]  ;;  %v13583_v52 = vld [vmem:[#allocation83_spill] sm:$0xff] }
 0x459   : > { %v4789_v6 = vmul.f32 %v13578_v55, %v4573_v58  ;;  %v4540_v31 = vmul.f32 0.2, %v4468_v59  ;;  %vm4502_vm9 = vcmp.ge.f32.partialorder %v4466_v2, 0.0  ;;  %v4538_v32 = vmul.f32 0.2, %v4466_v2  ;;  %9886 = vmatprep.mubr.msk.bf16.mxu0 %vm4797_vm4, %v5018_v17  ;;  %v13580_v28 = vld [vmem:[#allocation76_spill] sm:$0xff] }
 0x45a   : > { %4905 = vst.msk [vmem:[#allocation3 + $0xdb] sm:$0xff] %vm4797_vm4, %v4869_v3  ;;  %v4874_v30 = vmul.f32 %v12083_v0, %v4791_v7  ;;  %v4428_v46 = vadd.f32 %v12265_v29, %v4169_v39  ;;  %v4426_v15 = vadd.f32 %v13579_v16, %v4167_v53  ;;  %v4170_v38 = vmul.f32 %v9856_v5, %v12086_v4  ;;  %v13581_v3 = vld [vmem:[#allocation74_spill] sm:$0xff]  ;;  %v12481_v16 = vpop.permute.xlu0 %4753 }
 0x45b   : > { %v4872_v42 = vmul.f32 %v12083_v0, %v4789_v6  ;;  %v4576_v13 = vsel %vm4504_vm8, %v4468_v59, %v4540_v31  ;;  %v4574_v12 = vsel %vm4502_vm9, %v4466_v2, %v4538_v32  ;;  %v4168_v17 = vmul.f32 %v12086_v4, %v4006_v63  ;;  %v4994_v53 = vld [vmem:[#allocation3 + $0xb1] sm:$0xff]  ;;  %13584 = vst [vmem:[#allocation33_spill] sm:$0xff] %v12481_v16 }
 0x45c   : > { %4910 = vst.msk [vmem:[#allocation3 + $0x103] sm:$0xff] %vm4797_vm4, %v4874_v30  ;;  %v4792_v56 = vmul.f32 %v13580_v28, %v4576_v13  ;;  %v4790_v29 = vmul.f32 %v13581_v3, %v4574_v12  ;;  %v4471_v39 = vadd.f32 %v12201_v35, %v4428_v46  ;;  %v4469_v5 = vadd.f32 %v12201_v35, %v4426_v15  ;;  %v13582_v7 = vld [vmem:[#allocation86_spill] sm:$0xff]  ;;  %v12489_v13 = vpop.permute.xlu1 %4758  ;;  %v13613_v3 = vld [vmem:[#allocation49_spill] sm:$0xff]  ;;  %v13614_v28 = vld [vmem:[#allocation52_spill] sm:$0xff] }
 0x45d   : > { %4908 = vst.msk [vmem:[#allocation3 + $0xf3] sm:$0xff] %vm4797_vm4, %v4872_v42  ;;  %v4429_v58 = vadd.f32 %v13582_v7, %v4170_v38  ;;  %v4427_v59 = vadd.f32 %v13583_v52, %v4168_v17  ;;  %v5019_v2 = vpack.c.bf16 %v4995_v48, %v4994_v53  ;;  %v5020_v6 = vpack.c.bf16 %v4997_v47, %v4996_v8  ;;  %v13585_v47 = vld [vmem:[#allocation87_spill] sm:$0xff] }
 0x45e   : > { %v4875_v4 = vmul.f32 %v12083_v0, %v4792_v56  ;;  %v4873_v63 = vmul.f32 %v12083_v0, %v4790_v29  ;;  %vm4507_vm10 = vcmp.ge.f32.partialorder %v4471_v39, 0.0  ;;  %v4543_v31 = vmul.f32 0.2, %v4471_v39  ;;  %13586 = vst [vmem:[#allocation15_spill] sm:$0xff] %v12489_v13  ;;  %v5001_v7 = vld [vmem:[#allocation3 + $0xe9] sm:$0xff] }
 0x45f   : > { %vm4505_vm11 = vcmp.ge.f32.partialorder %v4469_v5, 0.0  ;;  %v4541_v32 = vmul.f32 0.2, %v4469_v5  ;;  %v4472_v30 = vadd.f32 %v12201_v35, %v4429_v58  ;;  %v4470_v46 = vadd.f32 %v12201_v35, %v4427_v59  ;;  %v13587_v58 = vld [vmem:[#allocation79_spill] sm:$0xff] }
 0x460   : > { %4911 = vst.msk [vmem:[#allocation3 + $0x10b] sm:$0xff] %vm4797_vm4, %v4875_v4  ;;  %4909 = vst.msk [vmem:[#allocation3 + $0xfb] sm:$0xff] %vm4797_vm4, %v4873_v63  ;;  %v4579_v15 = vsel %vm4507_vm10, %v4471_v39, %v4543_v31  ;;  %9887 = vmatmul.mubr.msk.bf16.gmra.mrb[44].mxu0 %vm4797_vm4, %v5019_v2  ;;  %v4998_v59 = vld [vmem:[#allocation3 + $0xd1] sm:$0xff]  ;;  %vm4838_vm15 = vcmask 60416  }
 0x461   : > { %v4795_v38 = vmul.f32 %v12481_v16, %v4579_v15  ;;  %v4577_v48 = vsel %vm4505_vm11, %v4469_v5, %v4541_v32  ;;  %vm4508_vm12 = vcmp.ge.f32.partialorder %v4472_v30, 0.0  ;;  %v4544_v8 = vmul.f32 0.2, %v4472_v30  ;;  %9890 = vmatprep.mubr.msk.bf16.mxu0 %vm4797_vm4, %v5020_v6  ;;  %v4999_v56 = vld [vmem:[#allocation3 + $0xd9] sm:$0xff]  ;;  %v5000_v5 = vld [vmem:[#allocation3 + $0xe1] sm:$0xff] }
 0x462   : > { %v4793_v42 = vmul.f32 %v13585_v47, %v4577_v48  ;;  %vm4506_vm13 = vcmp.ge.f32.partialorder %v4470_v46, 0.0  ;;  %v4542_v35 = vmul.f32 0.2, %v4470_v46  ;;  %v5021_v6 = vpack.c.bf16 %v4999_v56, %v4998_v59  ;;  %v4918_v48 = vld [vmem:[#allocation3 + $0x8] sm:$0xff]  ;;  %v4921_v56 = vld [vmem:[#allocation3 + $0x20] sm:$0xff]  ;;  %v4924_v59 = vld [vmem:[#allocation3 + $0x38] sm:$0xff] }
 0x463   : > { %v4878_v12 = vmul.f32 %v12083_v0, %v4795_v38  ;;  %v4580_v17 = vsel %vm4508_vm12, %v4472_v30, %v4544_v8  ;;  %v5022_v63 = vpack.c.bf16 %v5001_v7, %v5000_v5  ;;  %v5608_v5 = vsel %vm5082_vm5, %v12339_v44, 0  ;;  %v13611_v47 = vld [vmem:[#allocation46_spill] sm:$0xff] }
 0x464   : > { %v4876_v29 = vmul.f32 %v12083_v0, %v4793_v42  ;;  %v4796_v39 = vmul.f32 %v12489_v13, %v4580_v17  ;;  %v4578_v53 = vsel %vm4506_vm13, %v4470_v46, %v4542_v35  ;;  %v5002_v46 = vld [vmem:[#allocation3 + $0xf1] sm:$0xff] }
 0x465   : > { %4914 = vst.msk [vmem:[#allocation3 + $0x123] sm:$0xff] %vm4797_vm4, %v4878_v12  ;;  %v4794_v52 = vmul.f32 %v13587_v58, %v4578_v53  ;;  %v4920_v17 = vld [vmem:[#allocation3 + $0x18] sm:$0xff] }
 0x466   : > { %4912 = vst.msk [vmem:[#allocation3 + $0x113] sm:$0xff] %vm4797_vm4, %v4876_v29  ;;  %v4879_v2 = vmul.f32 %v12083_v0, %v4796_v39  ;;  %v4922_v29 = vld [vmem:[#allocation3 + $0x28] sm:$0xff]  ;;  %v4919_v39 = vld [vmem:[#allocation3 + $0x10] sm:$0xff] }
 0x467   : > { %v4877_v4 = vmul.f32 %v12083_v0, %v4794_v52  ;;  %v5003_v31 = vld [vmem:[#allocation3 + $0xf9] sm:$0xff]  ;;  %v5004_v32 = vld [vmem:[#allocation3 + $0x101] sm:$0xff]  ;;  %v5005_v30 = vld [vmem:[#allocation3 + $0x109] sm:$0xff]  ;;  %v4954_v53 = vpack.c.bf16 %v4920_v17, %v4919_v39  ;;  %v4955_v7 = vpack.c.bf16 %v4922_v29, %v4921_v56 }
 0x468   : > { %4916 = vst.msk [vmem:[#allocation3 + $0x12b] sm:$0x3f] %vm4915_vm14, %v4879_v2  ;;  %9891 = vmatmul.mubr.msk.bf16.gmra.mrb[48].mxu0 %vm4797_vm4, %v5021_v6  ;;  %v5023_v15 = vpack.c.bf16 %v5003_v31, %v5002_v46  ;;  %v5024_v38 = vpack.c.bf16 %v5005_v30, %v5004_v32  ;;  %v4917_v0 = vld [vmem:[#allocation3] sm:$0xff]  ;;  %v4926_v6 = vld [vmem:[#allocation3 + $0x48] sm:$0xff]  ;;  %v4928_v31 = vld [vmem:[#allocation3 + $0x58] sm:$0xff] }
 0x469   : > { %4913 = vst.msk [vmem:[#allocation3 + $0x11b] sm:$0xff] %vm4797_vm4, %v4877_v4  ;;  %9894 = vmatprep.mubr.msk.bf16.mxu0 %vm4797_vm4, %v5022_v63  ;;  %v4953_v35 = vpack.c.bf16 %v4918_v48, %v4917_v0  ;;  %v12512_v52 = vld [vmem:[%s13363_s10 + $0xc] sm:$0xf]  ;;  %v4923_v4 = vld [vmem:[#allocation3 + $0x30] sm:$0xff]  ;;  %v4930_v30 = vld [vmem:[#allocation3 + $0x68] sm:$0xff] }
 0x46a   : > { %v4925_v2 = vld [vmem:[#allocation3 + $0x40] sm:$0xff]  ;;  %v4956_v63 = vpack.c.bf16 %v4924_v59, %v4923_v4  ;;  %v4927_v46 = vld [vmem:[#allocation3 + $0x50] sm:$0xff]  ;;  %v4932_v0 = vld [vmem:[#allocation3 + $0x78] sm:$0xff] }
 0x46b   : > { %v4957_v44 = vpack.c.bf16 %v4926_v6, %v4925_v2  ;;  %v4929_v32 = vld [vmem:[#allocation3 + $0x60] sm:$0xff]  ;;  %v4936_v17 = vld [vmem:[#allocation3 + $0x98] sm:$0xff]  ;;  %v4938_v29 = vld [vmem:[#allocation3 + $0xa8] sm:$0xff] }
 0x46c   : > { %v4933_v48 = vld [vmem:[#allocation3 + $0x80] sm:$0xff]  ;;  %v4935_v39 = vld [vmem:[#allocation3 + $0x90] sm:$0xff]  ;;  %v4942_v2 = vld [vmem:[#allocation3 + $0xc8] sm:$0xff] }
 0x46d   : > { %v5006_v42 = vld [vmem:[#allocation3 + $0x111] sm:$0xff]  ;;  %v4937_v56 = vld [vmem:[#allocation3 + $0xa0] sm:$0xff] }
 0x46e   : > { %v4941_v59 = vld [vmem:[#allocation3 + $0xc0] sm:$0xff]  ;;  %v4939_v6 = vld [vmem:[#allocation3 + $0xb0] sm:$0xff] }
 0x46f   : > { %v5527_v58 = vld [vmem:[#allocation3 + $0xf2] sm:$0xff] }
 0x470   : > { %9895 = vmatmul.mubr.msk.bf16.gmra.mrb[52].mxu0 %vm4797_vm4, %v5023_v15  ;;  %v5007_v8 = vld [vmem:[#allocation3 + $0x119] sm:$0x3f]  ;;  %v4958_v15 = vpack.c.bf16 %v4928_v31, %v4927_v46  ;;  %v4945_v31 = vld [vmem:[#allocation3 + $0xe0] sm:$0xff] }
 0x471   : > { %9898 = vmatprep.mubr.msk.bf16.mxu0 %vm4797_vm4, %v5024_v38  ;;  %v5025_v12 = vpack.c.bf16 %v5007_v8, %v5006_v42  ;;  %v4959_v38 = vpack.c.bf16 %v4930_v30, %v4929_v32  ;;  %v4934_v8 = vld [vmem:[#allocation3 + $0x88] sm:$0xff]  ;;  %v4931_v42 = vld [vmem:[#allocation3 + $0x70] sm:$0xff] }
 0x472   : > { %v4946_v32 = vld [vmem:[#allocation3 + $0xe8] sm:$0xff]  ;;  %v4943_v30 = vld [vmem:[#allocation3 + $0xd0] sm:$0xff] }
 0x478   : > { %9899 = vmatmul.mubr.msk.bf16.gmra.mrb[56].mxu0 %vm4797_vm4, %v5025_v12  ;;  %v4961_v12 = vpack.c.bf16 %v4934_v8, %v4933_v48  ;;  %v4950_v48 = vld [vmem:[#allocation3 + $0x108] sm:$0xff]  ;;  %v4947_v8 = vld [vmem:[#allocation3 + $0xf0] sm:$0xff] }
 0x479   : > { %9904 = vmatprep.mubr.msk.bf16.mxu0 %vm4797_vm4, %v4953_v35  ;;  %v4960_v35 = vpack.c.bf16 %v4932_v0, %v4931_v42  ;;  %v4949_v0 = vld [vmem:[#allocation3 + $0x100] sm:$0xff] }
 0x480   : > { %9905 = vmatmul.mubr.msk.bf16.vlgmr.msra.gmra.mrb[24].mxu0 %vm4797_vm4, %v4954_v53  ;;  %v4962_v53 = vpack.c.bf16 %v4936_v17, %v4935_v39  ;;  %v5498_v17 = vld [vmem:[#allocation3 + $0xa] sm:$0xff] }
 0x481   : > { %9941 = vmatpush3.bf16.msra.mxu0 %v5608_v5  ;;  %9908 = vmatprep.mubr.msk.bf16.mxu0 %vm4797_vm4, %v4955_v7  ;;  %v4963_v5 = vpack.c.bf16 %v4938_v29, %v4937_v56  ;;  %v4940_v7 = vld [vmem:[#allocation3 + $0xb8] sm:$0xff]  ;;  %v4951_v29 = vld [vmem:[#allocation3 + $0x110] sm:$0xff] }
 0x482   : > { %10851 = vmatprep.subr.msk.bf16.mxu0 %vm5082_vm5, %v12512_v52  ;;  %v4964_v4 = vpack.c.bf16 %v4940_v7, %v4939_v6  ;;  %v4952_v56 = vld [vmem:[#allocation3 + $0x118] sm:$0x3f]  ;;  %v5501_v7 = vld [vmem:[#allocation3 + $0x22] sm:$0xff] }
 0x488   : > { %9909 = vmatmul.mubr.msk.bf16.gmra.mrb[28].mxu0 %vm4797_vm4, %v4956_v63  ;;  %v4965_v63 = vpack.c.bf16 %v4942_v2, %v4941_v59  ;;  %v5502_v59 = vld [vmem:[#allocation3 + $0x2a] sm:$0xff]  ;;  %v5499_v2 = vld [vmem:[#allocation3 + $0x12] sm:$0xff] }
 0x489   : > { %9912 = vmatprep.mubr.msk.bf16.mxu0 %vm4797_vm4, %v4957_v44  ;;  %v4944_v44 = vld [vmem:[#allocation3 + $0xd8] sm:$0xff] }
 0x48a   : > { %v4966_v46 = vpack.c.bf16 %v4944_v44, %v4943_v30  ;;  %v12543_v44 = vld [vmem:[%s13363_s10 + $0x10] sm:$0xf]  ;;  %v5503_v30 = vld [vmem:[#allocation3 + $0x32] sm:$0xff] }
 0x490   : > { %9913 = vmatmul.mubr.msk.bf16.gmra.mrb[32].mxu0 %vm4797_vm4, %v4958_v15  ;;  %v4967_v15 = vpack.c.bf16 %v4946_v32, %v4945_v31  ;;  %v5504_v31 = vld [vmem:[#allocation3 + $0x3a] sm:$0xff]  ;;  %v5505_v32 = vld [vmem:[#allocation3 + $0x42] sm:$0xff] }
 0x491   : > { %9916 = vmatprep.mubr.msk.bf16.mxu0 %vm4797_vm4, %v4959_v38  ;;  %v4948_v38 = vld [vmem:[#allocation3 + $0xf8] sm:$0xff] }
 0x492   : > { %v4968_v42 = vpack.c.bf16 %v4948_v38, %v4947_v8  ;;  %v5508_v38 = vld [vmem:[#allocation3 + $0x5a] sm:$0xff]  ;;  %v5507_v8 = vld [vmem:[#allocation3 + $0x52] sm:$0xff] }
 0x498   : > { %9917 = vmatmul.mubr.msk.bf16.gmra.mrb[36].mxu0 %vm4797_vm4, %v4960_v35  ;;  %v4969_v35 = vpack.c.bf16 %v4950_v48, %v4949_v0  ;;  %v5509_v0 = vld [vmem:[#allocation3 + $0x62] sm:$0xff]  ;;  %v5510_v48 = vld [vmem:[#allocation3 + $0x6a] sm:$0xff] }
 0x499   : > { %9920 = vmatprep.mubr.msk.bf16.mxu0 %vm4797_vm4, %v4961_v12  ;;  %v5497_v12 = vld [vmem:[#allocation3 + $0x2] sm:$0xff] }
 0x49a   : > { %v5533_v39 = vpack.c.bf16 %v5498_v17, %v5497_v12  ;;  %v5512_v12 = vld [vmem:[#allocation3 + $0x7a] sm:$0xff]  ;;  %v5513_v17 = vld [vmem:[#allocation3 + $0x82] sm:$0xff] }
 0x4a0   : > { %9921 = vmatmul.mubr.msk.bf16.gmra.mrb[40].mxu0 %vm4797_vm4, %v4962_v53  ;;  %v4970_v53 = vpack.c.bf16 %v4952_v56, %v4951_v29  ;;  %v5514_v56 = vld [vmem:[#allocation3 + $0x8a] sm:$0xff]  ;;  %v5511_v29 = vld [vmem:[#allocation3 + $0x72] sm:$0xff] }
 0x4a1   : > { %9924 = vmatprep.mubr.msk.bf16.mxu0 %vm4797_vm4, %v4963_v5  ;;  %v5500_v5 = vld [vmem:[#allocation3 + $0x1a] sm:$0xff] }
 0x4a2   : > { %v12534_v6 = vpack.c.bf16 %v5500_v5, %v5499_v2  ;;  %v5516_v5 = vld [vmem:[#allocation3 + $0x9a] sm:$0xff]  ;;  %v5515_v2 = vld [vmem:[#allocation3 + $0x92] sm:$0xff] }
 0x4a8   : > { %9925 = vmatmul.mubr.msk.bf16.gmra.mrb[44].mxu0 %vm4797_vm4, %v4964_v4  ;;  %v5934_v4 = vsel %vm5082_vm5, %v12512_v52, 0  ;;  %v5506_v52 = vld [vmem:[#allocation3 + $0x4a] sm:$0xff] }
 0x4a9   : > { %9928 = vmatprep.mubr.msk.bf16.mxu0 %vm4797_vm4, %v4965_v63  ;;  %v12538_v63 = vpack.c.bf16 %v5502_v59, %v5501_v7  ;;  %v5517_v7 = vld [vmem:[#allocation3 + $0xa2] sm:$0xff]  ;;  %v5518_v59 = vld [vmem:[#allocation3 + $0xaa] sm:$0xff] }
 0x4b0   : > { %9929 = vmatmul.mubr.msk.bf16.gmra.mrb[48].mxu0 %vm4797_vm4, %v4966_v46  ;;  %v5536_v46 = vpack.c.bf16 %v5504_v31, %v5503_v30  ;;  %v5543_v31 = vpack.c.bf16 %v5518_v59, %v5517_v7  ;;  %v5522_v30 = vld [vmem:[#allocation3 + $0xca] sm:$0xff]  ;;  %v5528_v7 = vld [vmem:[#allocation3 + $0xfa] sm:$0xff]  ;;  %v5529_v59 = vld [vmem:[#allocation3 + $0x102] sm:$0xff] }
 0x4b1   : > { %9932 = vmatprep.mubr.msk.bf16.mxu0 %vm4797_vm4, %v4967_v15  ;;  %v5537_v15 = vpack.c.bf16 %v5506_v52, %v5505_v32  ;;  %v5520_v32 = vld [vmem:[#allocation3 + $0xba] sm:$0xff]  ;;  %v5521_v52 = vld [vmem:[#allocation3 + $0xc2] sm:$0xff] }
 0x4b8   : > { %9933 = vmatmul.mubr.msk.bf16.gmra.mrb[52].mxu0 %vm4797_vm4, %v4968_v42  ;;  %v5538_v42 = vpack.c.bf16 %v5508_v38, %v5507_v8  ;;  %v5519_v38 = vld [vmem:[#allocation3 + $0xb2] sm:$0xff]  ;;  %v5524_v8 = vld [vmem:[#allocation3 + $0xda] sm:$0xff] }
 0x4b9   : > { %9936 = vmatprep.mubr.msk.bf16.mxu0 %vm4797_vm4, %v4969_v35  ;;  %v5539_v35 = vpack.c.bf16 %v5510_v48, %v5509_v0  ;;  %v5544_v0 = vpack.c.bf16 %v5520_v32, %v5519_v38  ;;  %v5545_v48 = vpack.c.bf16 %v5522_v30, %v5521_v52  ;;  %v5548_v32 = vpack.c.bf16 %v5528_v7, %v5527_v58  ;;  %v5532_v30 = vld [vmem:[#allocation3 + $0x11a] sm:$0x3f]  ;;  %v5531_v38 = vld [vmem:[#allocation3 + $0x112] sm:$0xff]  ;;  %v9001_v58 = vld [vmem:[%s13363_s10 + $0x14] sm:$0xf] }
 0x4ba   : > { %v5550_v13 = vpack.c.bf16 %v5532_v30, %v5531_v38  ;;  %v6159_v30 = vld [vmem:[#allocation3 + $0x63] sm:$0xff] }
 0x4c0   : > { %9937 = vmatmul.mubr.msk.bf16.gmra.mrb[56].mxu0 %vm4797_vm4, %v4970_v53  ;;  %v5541_v53 = vpack.c.bf16 %v5514_v56, %v5513_v17  ;;  %v5526_v17 = vld [vmem:[#allocation3 + $0xea] sm:$0xff]  ;;  %v5523_v56 = vld [vmem:[#allocation3 + $0xd2] sm:$0xff] }
 0x4c1   : > { %9942 = vmatprep.mubr.msk.bf16.mxu0 %vm4797_vm4, %v5533_v39  ;;  %v5540_v39 = vpack.c.bf16 %v5512_v12, %v5511_v29  ;;  %v5525_v12 = vld [vmem:[#allocation3 + $0xe2] sm:$0xff]  ;;  %v5546_v29 = vpack.c.bf16 %v5524_v8, %v5523_v56  ;;  %v6260_v8 = vsel %vm5082_vm5, %v12543_v44, 0  ;;  %v6156_v56 = vld [vmem:[#allocation3 + $0x4b] sm:$0xff] }
 0x4c8   : > { %9943 = vmatmul.mubr.msk.bf16.vlgmr.msra.gmra.mrb[24].mxu0 %vm4797_vm4, %v12534_v6 }
 0x4c9   : > { %9979 = vmatpush3.bf16.msra.mxu0 %v5934_v4  ;;  %9946 = vmatprep.mubr.msk.bf16.mxu0 %vm4797_vm4, %v12538_v63  ;;  %v5542_v4 = vpack.c.bf16 %v5516_v5, %v5515_v2  ;;  %v5547_v5 = vpack.c.bf16 %v5526_v17, %v5525_v12  ;;  %v5530_v2 = vld [vmem:[#allocation3 + $0x10a] sm:$0xff] }
 0x4ca   : > { %10852 = vmatprep.subr.msk.bf16.mxu0 %vm5082_vm5, %v12543_v44  ;;  %v5549_v52 = vpack.c.bf16 %v5530_v2, %v5529_v59  ;;  %v5858_v44 = vld [vmem:[#allocation3 + $0x12a] sm:$0x3f]  ;;  %v12597_v17 = vld [vmem:[%s13363_s10 + $0x18] sm:$0xf] }
 0x4cb   : > { %v6157_v59 = vld [vmem:[#allocation3 + $0x53] sm:$0xff] }
 0x4d0   : > { %9947 = vmatmul.mubr.msk.bf16.gmra.mrb[28].mxu0 %vm4797_vm4, %v5536_v46 }
 0x4d1   : > { %9950 = vmatprep.mubr.msk.bf16.mxu0 %vm4797_vm4, %v5537_v15 }
 0x4d8   : > { %9951 = vmatmul.mubr.msk.bf16.gmra.mrb[32].mxu0 %vm4797_vm4, %v5538_v42 }
 0x4d9   : > { %9954 = vmatprep.mubr.msk.bf16.mxu0 %vm4797_vm4, %v5539_v35 }
 0x4e0   : > { %9955 = vmatmul.mubr.msk.bf16.gmra.mrb[36].mxu0 %vm4797_vm4, %v5540_v39 }
 0x4e1   : > { %9958 = vmatprep.mubr.msk.bf16.mxu0 %vm4797_vm4, %v5541_v53 }
 0x4e8   : > { %9959 = vmatmul.mubr.msk.bf16.gmra.mrb[40].mxu0 %vm4797_vm4, %v5542_v4 }
 0x4e9   : > { %9962 = vmatprep.mubr.msk.bf16.mxu0 %vm4797_vm4, %v5543_v31 }
 0x4f0   : > { %9963 = vmatmul.mubr.msk.bf16.gmra.mrb[44].mxu0 %vm4797_vm4, %v5544_v0 }
 0x4f1   : > { %9966 = vmatprep.mubr.msk.bf16.mxu0 %vm4797_vm4, %v5545_v48 }
 0x4f8   : > { %9967 = vmatmul.mubr.msk.bf16.gmra.mrb[48].mxu0 %vm4797_vm4, %v5546_v29 }
 0x4f9   : > { %9970 = vmatprep.mubr.msk.bf16.mxu0 %vm4797_vm4, %v5547_v5 }
 0x500   : > { %9971 = vmatmul.mubr.msk.bf16.gmra.mrb[52].mxu0 %vm4797_vm4, %v5548_v32 }
 0x501   : > { %9974 = vmatprep.mubr.msk.bf16.mxu0 %vm4797_vm4, %v5549_v52 }
 0x508   : > { %9975 = vmatmul.mubr.msk.bf16.gmra.mrb[56].mxu0 %vm4797_vm4, %v5550_v13  ;;  %v5856_v13 = vld [vmem:[#allocation3 + $0x11a] sm:$0xff] }
 0x509   : > { %9980 = vmatprep.mubr.msk.bf16.mxu0 %vm4797_vm4, %v12534_v6  ;;  %v5875_v6 = vpack.c.bf16 %v5856_v13, %v5531_v38  ;;  %v6164_v13 = vld [vmem:[#allocation3 + $0x8b] sm:$0xff] }
 0x510   : > { %9981 = vmatmul.mubr.msk.bf16.vlgmr.msra.gmra.mrb[24].mxu0 %vm4797_vm4, %v12538_v63  ;;  %v5857_v63 = vld [vmem:[#allocation3 + $0x122] sm:$0xff] }
 0x511   : > { %10017 = vmatpush3.bf16.msra.mxu0 %v6260_v8  ;;  %9984 = vmatprep.mubr.msk.bf16.mxu0 %vm4797_vm4, %v5536_v46  ;;  %v6150_v46 = vld [vmem:[#allocation3 + $0x1b] sm:$0xff]  ;;  %v6161_v8 = vld [vmem:[#allocation3 + $0x73] sm:$0xff] }
 0x512   : > { %10853 = vmatprep.subr.msk.bf16.mxu0 %vm5082_vm5, %v9001_v58 }
 0x518   : > { %9985 = vmatmul.mubr.msk.bf16.gmra.mrb[28].mxu0 %vm4797_vm4, %v5537_v15  ;;  %v5876_v15 = vpack.c.bf16 %v5858_v44, %v5857_v63  ;;  %v6163_v63 = vld [vmem:[#allocation3 + $0x83] sm:$0xff] }
 0x519   : > { %9988 = vmatprep.mubr.msk.bf16.mxu0 %vm4797_vm4, %v5538_v42  ;;  %v6149_v42 = vld [vmem:[#allocation3 + $0x13] sm:$0xff]  ;;  %v6192_v44 = vpack.c.bf16 %v6164_v13, %v6163_v63 }
 0x520   : > { %9989 = vmatmul.mubr.msk.bf16.gmra.mrb[32].mxu0 %vm4797_vm4, %v5539_v35  ;;  %v6185_v35 = vpack.c.bf16 %v6150_v46, %v6149_v42  ;;  %v6165_v46 = vld [vmem:[#allocation3 + $0x93] sm:$0xff]  ;;  %v6168_v42 = vld [vmem:[#allocation3 + $0xab] sm:$0xff] }
 0x521   : > { %9992 = vmatprep.mubr.msk.bf16.mxu0 %vm4797_vm4, %v5540_v39  ;;  %v6152_v39 = vld [vmem:[#allocation3 + $0x2b] sm:$0xff] }
 0x528   : > { %9993 = vmatmul.mubr.msk.bf16.gmra.mrb[36].mxu0 %vm4797_vm4, %v5541_v53  ;;  %v6154_v53 = vld [vmem:[#allocation3 + $0x3b] sm:$0xff] }
 0x529   : > { %9996 = vmatprep.mubr.msk.bf16.mxu0 %vm4797_vm4, %v5542_v4  ;;  %v6151_v4 = vld [vmem:[#allocation3 + $0x23] sm:$0xff] }
 0x530   : > { %9997 = vmatmul.mubr.msk.bf16.gmra.mrb[40].mxu0 %vm4797_vm4, %v5543_v31  ;;  %v6186_v31 = vpack.c.bf16 %v6152_v39, %v6151_v4  ;;  %v6167_v39 = vld [vmem:[#allocation3 + $0xa3] sm:$0xff]  ;;  %v6169_v4 = vld [vmem:[#allocation3 + $0xb3] sm:$0xff] }
 0x531   : > { %10000 = vmatprep.mubr.msk.bf16.mxu0 %vm4797_vm4, %v5544_v0  ;;  %v6586_v0 = vsel %vm5082_vm5, %v9001_v58, 0 }
 0x538   : > { %10001 = vmatmul.mubr.msk.bf16.gmra.mrb[44].mxu0 %vm4797_vm4, %v5545_v48  ;;  %v6153_v48 = vld [vmem:[#allocation3 + $0x33] sm:$0xff] }
 0x539   : > { %10004 = vmatprep.mubr.msk.bf16.mxu0 %vm4797_vm4, %v5546_v29  ;;  %v6187_v12 = vpack.c.bf16 %v6154_v53, %v6153_v48  ;;  %v6158_v29 = vld [vmem:[#allocation3 + $0x5b] sm:$0xff]  ;;  %v6194_v53 = vpack.c.bf16 %v6168_v42, %v6167_v39  ;;  %v6183_v42 = vld [vmem:[#allocation3 + $0x123] sm:$0xff] }
 0x53a   : > { %v6189_v2 = vpack.c.bf16 %v6158_v29, %v6157_v59  ;;  %v6174_v48 = vld [vmem:[#allocation3 + $0xdb] sm:$0xff]  ;;  %v6173_v29 = vld [vmem:[#allocation3 + $0xd3] sm:$0xff] }
 0x53b   : > { %v6178_v59 = vld [vmem:[#allocation3 + $0xfb] sm:$0xff] }
 0x540   : > { %10005 = vmatmul.mubr.msk.bf16.gmra.mrb[48].mxu0 %vm4797_vm4, %v5547_v5  ;;  %v6155_v5 = vld [vmem:[#allocation3 + $0x43] sm:$0xff] }
 0x541   : > { %10008 = vmatprep.mubr.msk.bf16.mxu0 %vm4797_vm4, %v5548_v32  ;;  %v6188_v7 = vpack.c.bf16 %v6156_v56, %v6155_v5  ;;  %v6160_v32 = vld [vmem:[#allocation3 + $0x6b] sm:$0xff]  ;;  %v6197_v5 = vpack.c.bf16 %v6174_v48, %v6173_v29  ;;  %v12628_v29 = vld [vmem:[%s13363_s10 + $0x1c] sm:$0xf] }
 0x542   : > { %v6190_v38 = vpack.c.bf16 %v6160_v32, %v6159_v30 }
 0x548   : > { %10009 = vmatmul.mubr.msk.bf16.gmra.mrb[52].mxu0 %vm4797_vm4, %v5549_v52  ;;  %v6162_v52 = vld [vmem:[#allocation3 + $0x7b] sm:$0xff] }
 0x549   : > { %10012 = vmatprep.mubr.msk.bf16.mxu0 %vm4797_vm4, %v5875_v6  ;;  %v6191_v58 = vpack.c.bf16 %v6162_v52, %v6161_v8  ;;  %v6166_v6 = vld [vmem:[#allocation3 + $0x9b] sm:$0xff]  ;;  %v6177_v52 = vld [vmem:[#allocation3 + $0xf3] sm:$0xff] }
 0x54a   : > { %v6199_v30 = vpack.c.bf16 %v6178_v59, %v6177_v52  ;;  %v6182_v8 = vld [vmem:[#allocation3 + $0x11b] sm:$0xff] }
 0x54b   : > { %v6484_v59 = vld [vmem:[#allocation3 + $0x5c] sm:$0xff] }
 0x550   : > { %10013 = vmatmul.mubr.msk.bf16.gmra.mrb[56].mxu0 %vm4797_vm4, %v5876_v15  ;;  %v6193_v15 = vpack.c.bf16 %v6166_v6, %v6165_v46  ;;  %v6181_v6 = vld [vmem:[#allocation3 + $0x113] sm:$0xff] }
 0x551   : > { %10018 = vmatprep.mubr.msk.bf16.mxu0 %vm4797_vm4, %v6185_v35  ;;  %v6170_v35 = vld [vmem:[#allocation3 + $0xbb] sm:$0xff]  ;;  %v6201_v63 = vpack.c.bf16 %v6182_v8, %v6181_v6 }
 0x552   : > { %v6475_v46 = vld [vmem:[#allocation3 + $0x14] sm:$0xff]  ;;  %v6488_v8 = vld [vmem:[#allocation3 + $0x7c] sm:$0xff] }
 0x558   : > { %10019 = vmatmul.mubr.msk.bf16.vlgmr.msra.gmra.mrb[24].mxu0 %vm4797_vm4, %v6186_v31  ;;  %v6195_v31 = vpack.c.bf16 %v6170_v35, %v6169_v4  ;;  %v6479_v4 = vld [vmem:[#allocation3 + $0x34] sm:$0xff] }
 0x559   : > { %10055 = vmatpush3.bf16.msra.mxu0 %v6586_v0  ;;  %10022 = vmatprep.mubr.msk.bf16.mxu0 %vm4797_vm4, %v6187_v12  ;;  %v6172_v0 = vld [vmem:[#allocation3 + $0xcb] sm:$0xff]  ;;  %v6171_v12 = vld [vmem:[#allocation3 + $0xc3] sm:$0xff] }
 0x55a   : > { %10854 = vmatprep.subr.msk.bf16.mxu0 %vm5082_vm5, %v12597_v17  ;;  %v6196_v56 = vpack.c.bf16 %v6172_v0, %v6171_v12  ;;  %v6477_v0 = vld [vmem:[#allocation3 + $0x24] sm:$0xff]  ;;  %v6912_v12 = vsel %vm5082_vm5, %v12597_v17, 0  ;;  %v6482_v17 = vld [vmem:[#allocation3 + $0x4c] sm:$0xff] }
 0x560   : > { %10023 = vmatmul.mubr.msk.bf16.gmra.mrb[28].mxu0 %vm4797_vm4, %v6188_v7  ;;  %v6176_v7 = vld [vmem:[#allocation3 + $0xeb] sm:$0xff] }
 0x561   : > { %10026 = vmatprep.mubr.msk.bf16.mxu0 %vm4797_vm4, %v6189_v2  ;;  %v6175_v2 = vld [vmem:[#allocation3 + $0xe3] sm:$0xff] }
 0x562   : > { %v6198_v32 = vpack.c.bf16 %v6176_v7, %v6175_v2  ;;  %v6483_v7 = vld [vmem:[#allocation3 + $0x54] sm:$0xff]  ;;  %v6481_v2 = vld [vmem:[#allocation3 + $0x44] sm:$0xff] }
 0x563   : > { %v6515_v52 = vpack.c.bf16 %v6484_v59, %v6483_v7  ;;  %v6500_v7 = vld [vmem:[#allocation3 + $0xdc] sm:$0xff]  ;;  %v6497_v59 = vld [vmem:[#allocation3 + $0xc4] sm:$0xff] }
 0x568   : > { %10027 = vmatmul.mubr.msk.bf16.gmra.mrb[32].mxu0 %vm4797_vm4, %v6190_v38  ;;  %v6180_v38 = vld [vmem:[#allocation3 + $0x10b] sm:$0xff] }
 0x569   : > { %10030 = vmatprep.mubr.msk.bf16.mxu0 %vm4797_vm4, %v6191_v58  ;;  %v6179_v58 = vld [vmem:[#allocation3 + $0x103] sm:$0xff] }
 0x56a   : > { %v6200_v13 = vpack.c.bf16 %v6180_v38, %v6179_v58  ;;  %v6487_v38 = vld [vmem:[#allocation3 + $0x74] sm:$0xff]  ;;  %v6485_v58 = vld [vmem:[#allocation3 + $0x64] sm:$0xff] }
 0x56b   : > { %v6517_v6 = vpack.c.bf16 %v6488_v8, %v6487_v38  ;;  %v6502_v38 = vld [vmem:[#allocation3 + $0xec] sm:$0xff]  ;;  %v6503_v8 = vld [vmem:[#allocation3 + $0xf4] sm:$0xff] }
 0x570   : > { %10031 = vmatmul.mubr.msk.bf16.gmra.mrb[36].mxu0 %vm4797_vm4, %v6192_v44  ;;  %v6184_v44 = vld [vmem:[#allocation3 + $0x12b] sm:$0x3f] }
 0x571   : > { %10034 = vmatprep.mubr.msk.bf16.mxu0 %vm4797_vm4, %v6193_v15  ;;  %v6476_v15 = vld [vmem:[#allocation3 + $0x1c] sm:$0xff]  ;;  %v6202_v35 = vpack.c.bf16 %v6184_v44, %v6183_v42  ;;  %v6491_v44 = vld [vmem:[#allocation3 + $0x94] sm:$0xff] }
 0x572   : > { %v6511_v39 = vpack.c.bf16 %v6476_v15, %v6475_v46  ;;  %v6492_v46 = vld [vmem:[#allocation3 + $0x9c] sm:$0xff]  ;;  %v6489_v15 = vld [vmem:[#allocation3 + $0x84] sm:$0xff] }
 0x578   : > { %10035 = vmatmul.mubr.msk.bf16.gmra.mrb[40].mxu0 %vm4797_vm4, %v6194_v53  ;;  %v6478_v53 = vld [vmem:[#allocation3 + $0x2c] sm:$0xff] }
 0x579   : > { %10038 = vmatprep.mubr.msk.bf16.mxu0 %vm4797_vm4, %v6195_v31  ;;  %v6480_v31 = vld [vmem:[#allocation3 + $0x3c] sm:$0xff]  ;;  %v12619_v48 = vpack.c.bf16 %v6478_v53, %v6477_v0  ;;  %v6495_v53 = vld [vmem:[#allocation3 + $0xb4] sm:$0xff] }
 0x580   : > { %10039 = vmatmul.mubr.msk.bf16.gmra.mrb[44].mxu0 %vm4797_vm4, %v6196_v56  ;;  %v12623_v56 = vpack.c.bf16 %v6480_v31, %v6479_v4  ;;  %v6496_v4 = vld [vmem:[#allocation3 + $0xbc] sm:$0xff]  ;;  %v6493_v31 = vld [vmem:[#allocation3 + $0xa4] sm:$0xff] }
 0x581   : > { %10042 = vmatprep.mubr.msk.bf16.mxu0 %vm4797_vm4, %v6197_v5  ;;  %v13588_v5 = vmov 0.0  }
 0x582   : > { %4839 = vst.msk [vmem:[#allocation3 + $0x140] sm:$0xf] %vm4838_vm15, %v13588_v5  ;;  %v6498_v5 = vld [vmem:[#allocation3 + $0xcc] sm:$0xff] }
 0x588   : > { %10043 = vmatmul.mubr.msk.bf16.gmra.mrb[48].mxu0 %vm4797_vm4, %v6198_v32  ;;  %v6514_v32 = vpack.c.bf16 %v6482_v17, %v6481_v2  ;;  %v6499_v17 = vld [vmem:[#allocation3 + $0xd4] sm:$0xff]  ;;  %v6522_v2 = vpack.c.bf16 %v6498_v5, %v6497_v59 }
 0x589   : > { %10046 = vmatprep.mubr.msk.bf16.mxu0 %vm4797_vm4, %v6199_v30  ;;  %v6486_v30 = vld [vmem:[#allocation3 + $0x6c] sm:$0xff] }
 0x590   : > { %10047 = vmatmul.mubr.msk.bf16.gmra.mrb[52].mxu0 %vm4797_vm4, %v6200_v13  ;;  %v6516_v13 = vpack.c.bf16 %v6486_v30, %v6485_v58  ;;  %v6523_v30 = vpack.c.bf16 %v6500_v7, %v6499_v17  ;;  %v6504_v58 = vld [vmem:[#allocation3 + $0xfc] sm:$0xff]  ;;  %v6509_v17 = vld [vmem:[#allocation3 + $0x124] sm:$0xff]  ;;  %v6510_v7 = vld [vmem:[#allocation3 + $0x12c] sm:$0x3f] }
 0x591   : > { %10050 = vmatprep.mubr.msk.bf16.mxu0 %vm4797_vm4, %v6201_v63  ;;  %v6490_v63 = vld [vmem:[#allocation3 + $0x8c] sm:$0xff]  ;;  %v6528_v59 = vpack.c.bf16 %v6510_v7, %v6509_v17 }
 0x592   : > { %v6518_v42 = vpack.c.bf16 %v6490_v63, %v6489_v15  ;;  %v6501_v63 = vld [vmem:[#allocation3 + $0xe4] sm:$0xff]  ;;  %v6506_v15 = vld [vmem:[#allocation3 + $0x10c] sm:$0xff] }
 0x598   : > { %10051 = vmatmul.mubr.msk.bf16.gmra.mrb[56].mxu0 %vm4797_vm4, %v6202_v35  ;;  %v6519_v35 = vpack.c.bf16 %v6492_v46, %v6491_v44  ;;  %v6524_v44 = vpack.c.bf16 %v6502_v38, %v6501_v63  ;;  %v6525_v46 = vpack.c.bf16 %v6504_v58, %v6503_v8  ;;  %v7238_v38 = vsel %vm5082_vm5, %v12628_v29, 0  ;;  %v9058_v8 = vld [vmem:[%s13363_s10 + $0x20] sm:$0xf]  ;;  %v7131_v58 = vld [vmem:[#allocation3 + $0x45] sm:$0xff] }
 0x599   : > { %10056 = vmatprep.mubr.msk.bf16.mxu0 %vm4797_vm4, %v6511_v39  ;;  %v6494_v39 = vld [vmem:[#allocation3 + $0xac] sm:$0xff] }
 0x59a   : > { %v6520_v0 = vpack.c.bf16 %v6494_v39, %v6493_v31  ;;  %v6507_v39 = vld [vmem:[#allocation3 + $0x114] sm:$0xff] }
 0x5a0   : > { %10057 = vmatmul.mubr.msk.bf16.vlgmr.msra.gmra.mrb[24].mxu0 %vm4797_vm4, %v12619_v48 }
 0x5a1   : > { %10093 = vmatpush3.bf16.msra.mxu0 %v6912_v12  ;;  %10060 = vmatprep.mubr.msk.bf16.mxu0 %vm4797_vm4, %v12623_v56  ;;  %v6521_v12 = vpack.c.bf16 %v6496_v4, %v6495_v53  ;;  %v6508_v53 = vld [vmem:[#allocation3 + $0x11c] sm:$0xff]  ;;  %v6505_v4 = vld [vmem:[#allocation3 + $0x104] sm:$0xff] }
 0x5a2   : > { %10855 = vmatprep.subr.msk.bf16.mxu0 %vm5082_vm5, %v12628_v29  ;;  %v6526_v31 = vpack.c.bf16 %v6506_v15, %v6505_v4  ;;  %v6527_v5 = vpack.c.bf16 %v6508_v53, %v6507_v39  ;;  %v6835_v29 = vld [vmem:[#allocation3 + $0x134] sm:$0xff]  ;;  %v7135_v53 = vld [vmem:[#allocation3 + $0x65] sm:$0xff] }
 0x5a3   : > { %v7136_v15 = vld [vmem:[#allocation3 + $0x6d] sm:$0xff] }
 0x5a4   : > { %v7167_v4 = vpack.c.bf16 %v7136_v15, %v7135_v53  ;;  %v7153_v15 = vld [vmem:[#allocation3 + $0xf5] sm:$0xff]  ;;  %v7156_v53 = vld [vmem:[#allocation3 + $0x10d] sm:$0xff] }
 0x5a8   : > { %10061 = vmatmul.mubr.msk.bf16.gmra.mrb[28].mxu0 %vm4797_vm4, %v6514_v32 }
 0x5a9   : > { %10064 = vmatprep.mubr.msk.bf16.mxu0 %vm4797_vm4, %v6515_v52 }
 0x5b0   : > { %10065 = vmatmul.mubr.msk.bf16.gmra.mrb[32].mxu0 %vm4797_vm4, %v6516_v13 }
 0x5b1   : > { %10068 = vmatprep.mubr.msk.bf16.mxu0 %vm4797_vm4, %v6517_v6 }
 0x5b8   : > { %10069 = vmatmul.mubr.msk.bf16.gmra.mrb[36].mxu0 %vm4797_vm4, %v6518_v42 }
 0x5b9   : > { %10072 = vmatprep.mubr.msk.bf16.mxu0 %vm4797_vm4, %v6519_v35 }
 0x5c0   : > { %10073 = vmatmul.mubr.msk.bf16.gmra.mrb[40].mxu0 %vm4797_vm4, %v6520_v0 }
 0x5c1   : > { %10076 = vmatprep.mubr.msk.bf16.mxu0 %vm4797_vm4, %v6521_v12 }
 0x5c8   : > { %10077 = vmatmul.mubr.msk.bf16.gmra.mrb[44].mxu0 %vm4797_vm4, %v6522_v2 }
 0x5c9   : > { %10080 = vmatprep.mubr.msk.bf16.mxu0 %vm4797_vm4, %v6523_v30 }
 0x5d0   : > { %10081 = vmatmul.mubr.msk.bf16.gmra.mrb[48].mxu0 %vm4797_vm4, %v6524_v44 }
 0x5d1   : > { %10084 = vmatprep.mubr.msk.bf16.mxu0 %vm4797_vm4, %v6525_v46 }
 0x5d8   : > { %10085 = vmatmul.mubr.msk.bf16.gmra.mrb[52].mxu0 %vm4797_vm4, %v6526_v31 }
 0x5d9   : > { %10088 = vmatprep.mubr.msk.bf16.mxu0 %vm4797_vm4, %v6527_v5 }
 0x5e0   : > { %10089 = vmatmul.mubr.msk.bf16.gmra.mrb[56].mxu0 %vm4797_vm4, %v6528_v59  ;;  %v7139_v59 = vld [vmem:[#allocation3 + $0x85] sm:$0xff] }
 0x5e1   : > { %10094 = vmatprep.mubr.msk.bf16.mxu0 %vm4797_vm4, %v12619_v48  ;;  %v6834_v48 = vld [vmem:[#allocation3 + $0x12c] sm:$0xff] }
 0x5e8   : > { %10095 = vmatmul.mubr.msk.bf16.vlgmr.msra.gmra.mrb[24].mxu0 %vm4797_vm4, %v12623_v56  ;;  %v6853_v56 = vpack.c.bf16 %v6834_v48, %v6509_v17  ;;  %v7140_v17 = vld [vmem:[#allocation3 + $0x8d] sm:$0xff]  ;;  %v7142_v48 = vld [vmem:[#allocation3 + $0x9d] sm:$0xff] }
 0x5e9   : > { %10131 = vmatpush3.bf16.msra.mxu0 %v7238_v38  ;;  %10098 = vmatprep.mubr.msk.bf16.mxu0 %vm4797_vm4, %v6514_v32  ;;  %v6836_v32 = vld [vmem:[#allocation3 + $0x13c] sm:$0x3f]  ;;  %v7169_v38 = vpack.c.bf16 %v7140_v17, %v7139_v59  ;;  %v7159_v59 = vld [vmem:[#allocation3 + $0x125] sm:$0xff] }
 0x5ea   : > { %10856 = vmatprep.subr.msk.bf16.mxu0 %vm5082_vm5, %v9058_v8  ;;  %v7157_v17 = vld [vmem:[#allocation3 + $0x115] sm:$0xff] }
 0x5f0   : > { %10099 = vmatmul.mubr.msk.bf16.gmra.mrb[28].mxu0 %vm4797_vm4, %v6515_v52  ;;  %v6854_v52 = vpack.c.bf16 %v6836_v32, %v6835_v29  ;;  %v7143_v32 = vld [vmem:[#allocation3 + $0xa5] sm:$0xff] }
 0x5f1   : > { %10102 = vmatprep.mubr.msk.bf16.mxu0 %vm4797_vm4, %v6516_v13  ;;  %v7128_v13 = vld [vmem:[#allocation3 + $0x2d] sm:$0xff] }
 0x5f8   : > { %10103 = vmatmul.mubr.msk.bf16.gmra.mrb[32].mxu0 %vm4797_vm4, %v6517_v6  ;;  %v7127_v6 = vld [vmem:[#allocation3 + $0x25] sm:$0xff] }
 0x5f9   : > { %10106 = vmatprep.mubr.msk.bf16.mxu0 %vm4797_vm4, %v6518_v42  ;;  %v7163_v42 = vpack.c.bf16 %v7128_v13, %v7127_v6  ;;  %v7145_v13 = vld [vmem:[#allocation3 + $0xb5] sm:$0xff]  ;;  %v7146_v6 = vld [vmem:[#allocation3 + $0xbd] sm:$0xff] }
 0x600   : > { %10107 = vmatmul.mubr.msk.bf16.gmra.mrb[36].mxu0 %vm4797_vm4, %v6519_v35  ;;  %v7129_v35 = vld [vmem:[#allocation3 + $0x35] sm:$0xff] }
 0x601   : > { %10110 = vmatprep.mubr.msk.bf16.mxu0 %vm4797_vm4, %v6520_v0  ;;  %v7130_v0 = vld [vmem:[#allocation3 + $0x3d] sm:$0xff] }
 0x608   : > { %10111 = vmatmul.mubr.msk.bf16.gmra.mrb[40].mxu0 %vm4797_vm4, %v6521_v12  ;;  %v7132_v12 = vld [vmem:[#allocation3 + $0x4d] sm:$0xff] }
 0x609   : > { %10114 = vmatprep.mubr.msk.bf16.mxu0 %vm4797_vm4, %v6522_v2  ;;  %v7164_v2 = vpack.c.bf16 %v7130_v0, %v7129_v35  ;;  %v7165_v63 = vpack.c.bf16 %v7132_v12, %v7131_v58  ;;  %v7172_v35 = vpack.c.bf16 %v7146_v6, %v7145_v13  ;;  %v7147_v0 = vld [vmem:[#allocation3 + $0xc5] sm:$0xff]  ;;  %v7152_v58 = vld [vmem:[#allocation3 + $0xed] sm:$0xff] }
 0x60a   : > { %v7453_v13 = vld [vmem:[#allocation3 + $0x26] sm:$0xff] }
 0x610   : > { %10115 = vmatmul.mubr.msk.bf16.gmra.mrb[44].mxu0 %vm4797_vm4, %v6523_v30  ;;  %v7564_v30 = vsel %vm5082_vm5, %v9058_v8, 0  ;;  %v7141_v8 = vld [vmem:[#allocation3 + $0x95] sm:$0xff] }
 0x611   : > { %10118 = vmatprep.mubr.msk.bf16.mxu0 %vm4797_vm4, %v6524_v44  ;;  %v7133_v44 = vld [vmem:[#allocation3 + $0x55] sm:$0xff]  ;;  %v7170_v29 = vpack.c.bf16 %v7142_v48, %v7141_v8 }
 0x618   : > { %10119 = vmatmul.mubr.msk.bf16.gmra.mrb[48].mxu0 %vm4797_vm4, %v6525_v46  ;;  %v7134_v46 = vld [vmem:[#allocation3 + $0x5d] sm:$0xff] }
 0x619   : > { %10122 = vmatprep.mubr.msk.bf16.mxu0 %vm4797_vm4, %v6526_v31  ;;  %v7166_v39 = vpack.c.bf16 %v7134_v46, %v7133_v44  ;;  %v7137_v31 = vld [vmem:[#allocation3 + $0x75] sm:$0xff]  ;;  %v7151_v44 = vld [vmem:[#allocation3 + $0xe5] sm:$0xff] }
 0x61a   : > { %v7175_v46 = vpack.c.bf16 %v7152_v58, %v7151_v44  ;;  %v7459_v58 = vld [vmem:[#allocation3 + $0x56] sm:$0xff]  ;;  %v7462_v44 = vld [vmem:[#allocation3 + $0x6e] sm:$0xff] }
 0x620   : > { %10123 = vmatmul.mubr.msk.bf16.gmra.mrb[52].mxu0 %vm4797_vm4, %v6527_v5  ;;  %v7138_v5 = vld [vmem:[#allocation3 + $0x7d] sm:$0xff] }
 0x621   : > { %10126 = vmatprep.mubr.msk.bf16.mxu0 %vm4797_vm4, %v6853_v56  ;;  %v7168_v7 = vpack.c.bf16 %v7138_v5, %v7137_v31  ;;  %v7144_v56 = vld [vmem:[#allocation3 + $0xad] sm:$0xff]  ;;  %v7155_v31 = vld [vmem:[#allocation3 + $0x105] sm:$0xff] }
 0x622   : > { %v7177_v5 = vpack.c.bf16 %v7156_v53, %v7155_v31  ;;  %v7463_v53 = vld [vmem:[#allocation3 + $0x76] sm:$0xff]  ;;  %v7466_v31 = vld [vmem:[#allocation3 + $0x8e] sm:$0xff] }
 0x628   : > { %10127 = vmatmul.mubr.msk.bf16.gmra.mrb[56].mxu0 %vm4797_vm4, %v6854_v52  ;;  %v7171_v52 = vpack.c.bf16 %v7144_v56, %v7143_v32  ;;  %v7161_v56 = vld [vmem:[#allocation3 + $0x135] sm:$0xff] }
 0x629   : > { %10132 = vmatprep.mubr.msk.bf16.mxu0 %vm4797_vm4, %v7163_v42  ;;  %v7148_v42 = vld [vmem:[#allocation3 + $0xcd] sm:$0xff] }
 0x62a   : > { %v7173_v12 = vpack.c.bf16 %v7148_v42, %v7147_v0  ;;  %v7455_v42 = vld [vmem:[#allocation3 + $0x36] sm:$0xff]  ;;  %v7458_v0 = vld [vmem:[#allocation3 + $0x4e] sm:$0xff] }
 0x630   : > { %10133 = vmatmul.mubr.msk.bf16.vlgmr.msra.gmra.mrb[24].mxu0 %vm4797_vm4, %v7164_v2  ;;  %v7149_v2 = vld [vmem:[#allocation3 + $0xd5] sm:$0xff] }
 0x631   : > { %10169 = vmatpush3.bf16.msra.mxu0 %v7564_v30  ;;  %10136 = vmatprep.mubr.msk.bf16.mxu0 %vm4797_vm4, %v7165_v63  ;;  %v7150_v30 = vld [vmem:[#allocation3 + $0xdd] sm:$0xff] }
 0x632   : > { %v7174_v63 = vpack.c.bf16 %v7150_v30, %v7149_v2  ;;  %v7457_v2 = vld [vmem:[#allocation3 + $0x46] sm:$0xff] }
 0x633   : > { %v7491_v30 = vpack.c.bf16 %v7458_v0, %v7457_v2  ;;  %v7475_v0 = vld [vmem:[#allocation3 + $0xd6] sm:$0xff]  ;;  %v7478_v2 = vld [vmem:[#allocation3 + $0xee] sm:$0xff] }
 0x638   : > { %10137 = vmatmul.mubr.msk.bf16.gmra.mrb[28].mxu0 %vm4797_vm4, %v7166_v39  ;;  %v7154_v39 = vld [vmem:[#allocation3 + $0xfd] sm:$0xff] }
 0x639   : > { %10140 = vmatprep.mubr.msk.bf16.mxu0 %vm4797_vm4, %v7167_v4  ;;  %v7176_v4 = vpack.c.bf16 %v7154_v39, %v7153_v15  ;;  %v7461_v15 = vld [vmem:[#allocation3 + $0x66] sm:$0xff] }
 0x63a   : > { %v7493_v39 = vpack.c.bf16 %v7462_v44, %v7461_v15  ;;  %v7479_v44 = vld [vmem:[#allocation3 + $0xf6] sm:$0xff]  ;;  %v7482_v15 = vld [vmem:[#allocation3 + $0x10e] sm:$0xff] }
 0x640   : > { %10141 = vmatmul.mubr.msk.bf16.gmra.mrb[32].mxu0 %vm4797_vm4, %v7168_v7  ;;  %v7158_v7 = vld [vmem:[#allocation3 + $0x11d] sm:$0xff] }
 0x641   : > { %10144 = vmatprep.mubr.msk.bf16.mxu0 %vm4797_vm4, %v7169_v38  ;;  %v7160_v38 = vld [vmem:[#allocation3 + $0x12d] sm:$0xff]  ;;  %v7178_v8 = vpack.c.bf16 %v7158_v7, %v7157_v17 }
 0x642   : > { %v7179_v48 = vpack.c.bf16 %v7160_v38, %v7159_v59  ;;  %v7465_v17 = vld [vmem:[#allocation3 + $0x86] sm:$0xff]  ;;  %v7467_v59 = vld [vmem:[#allocation3 + $0x96] sm:$0xff]  ;;  %v7468_v38 = vld [vmem:[#allocation3 + $0x9e] sm:$0xff] }
 0x643   : > { %v7495_v7 = vpack.c.bf16 %v7466_v31, %v7465_v17  ;;  %v7483_v31 = vld [vmem:[#allocation3 + $0x116] sm:$0xff]  ;;  %v7485_v17 = vld [vmem:[#allocation3 + $0x126] sm:$0xff] }
 0x648   : > { %10145 = vmatmul.mubr.msk.bf16.gmra.mrb[36].mxu0 %vm4797_vm4, %v7170_v29  ;;  %v7162_v29 = vld [vmem:[#allocation3 + $0x13d] sm:$0x3f] }
 0x649   : > { %10148 = vmatprep.mubr.msk.bf16.mxu0 %vm4797_vm4, %v7171_v52  ;;  %v7180_v32 = vpack.c.bf16 %v7162_v29, %v7161_v56  ;;  %v7454_v52 = vld [vmem:[#allocation3 + $0x2e] sm:$0xff]  ;;  %v7469_v56 = vld [vmem:[#allocation3 + $0xa6] sm:$0xff] }
 0x64a   : > { %v7489_v6 = vpack.c.bf16 %v7454_v52, %v7453_v13  ;;  %v7472_v52 = vld [vmem:[#allocation3 + $0xbe] sm:$0xff]  ;;  %v7474_v13 = vld [vmem:[#allocation3 + $0xce] sm:$0xff] }
 0x650   : > { %10149 = vmatmul.mubr.msk.bf16.gmra.mrb[40].mxu0 %vm4797_vm4, %v7172_v35  ;;  %v7456_v35 = vld [vmem:[#allocation3 + $0x3e] sm:$0xff] }
 0x651   : > { %10152 = vmatprep.mubr.msk.bf16.mxu0 %vm4797_vm4, %v7173_v12  ;;  %v7490_v12 = vpack.c.bf16 %v7456_v35, %v7455_v42  ;;  %v7473_v42 = vld [vmem:[#allocation3 + $0xc6] sm:$0xff] }
 0x652   : > { %v7499_v35 = vpack.c.bf16 %v7474_v13, %v7473_v42  ;;  %v884_v13 = vld [vmem:[%s13360_s7] sm:$0x1] }
 0x658   : > { %10153 = vmatmul.mubr.msk.bf16.gmra.mrb[44].mxu0 %vm4797_vm4, %v7174_v63  ;;  %v7460_v63 = vld [vmem:[#allocation3 + $0x5e] sm:$0xff] }
 0x659   : > { %10156 = vmatprep.mubr.msk.bf16.mxu0 %vm4797_vm4, %v7175_v46  ;;  %v7492_v46 = vpack.c.bf16 %v7460_v63, %v7459_v58  ;;  %v7477_v58 = vld [vmem:[#allocation3 + $0xe6] sm:$0xff] }
 0x65a   : > { %v7501_v63 = vpack.c.bf16 %v7478_v2, %v7477_v58  ;;  %v13590_v2 = vld [vmem:[#allocation13_spill] sm:$0xff]  ;;  %v13591_v58 = vld [vmem:[#allocation19_spill] sm:$0xff] }
 0x660   : > { %10157 = vmatmul.mubr.msk.bf16.gmra.mrb[48].mxu0 %vm4797_vm4, %v7176_v4  ;;  %v7464_v4 = vld [vmem:[#allocation3 + $0x7e] sm:$0xff] }
 0x661   : > { %10160 = vmatprep.mubr.msk.bf16.mxu0 %vm4797_vm4, %v7177_v5  ;;  %v7494_v5 = vpack.c.bf16 %v7464_v4, %v7463_v53  ;;  %v7481_v53 = vld [vmem:[#allocation3 + $0x106] sm:$0xff] }
 0x662   : > { %v7503_v4 = vpack.c.bf16 %v7482_v15, %v7481_v53 }
 0x668   : > { %10161 = vmatmul.mubr.msk.bf16.gmra.mrb[52].mxu0 %vm4797_vm4, %v7178_v8  ;;  %v7470_v8 = vld [vmem:[#allocation3 + $0xae] sm:$0xff] }
 0x669   : > { %10164 = vmatprep.mubr.msk.bf16.mxu0 %vm4797_vm4, %v7179_v48  ;;  %v7496_v48 = vpack.c.bf16 %v7468_v38, %v7467_v59  ;;  %v7497_v29 = vpack.c.bf16 %v7470_v8, %v7469_v56  ;;  %v7487_v8 = vld [vmem:[#allocation3 + $0x136] sm:$0xff] }
 0x670   : > { %10165 = vmatmul.mubr.msk.bf16.gmra.mrb[56].mxu0 %vm4797_vm4, %v7180_v32  ;;  %v7471_v32 = vld [vmem:[#allocation3 + $0xb6] sm:$0xff] }
 0x671   : > { %10170 = vmatprep.mubr.msk.bf16.mxu0 %vm4797_vm4, %v7489_v6  ;;  %v7498_v6 = vpack.c.bf16 %v7472_v52, %v7471_v32  ;;  %v7851_v52 = vadd.f32 1e-08, %v12454_v14 }
 0x673   : > { %10920 = vrsqrt.f32 %v7851_v52  ;;  %v13601_v52 = vld [vmem:[#allocation30_spill] sm:$0xff] }
 0x678   : > { %10171 = vmatmul.mubr.msk.bf16.vlgmr.msra.gmra.mrb[24].mxu0 %vm4797_vm4, %v7490_v12  ;;  %v7476_v12 = vld [vmem:[#allocation3 + $0xde] sm:$0xff] }
 0x679   : > { %10174 = vmatprep.mubr.msk.bf16.mxu0 %vm4797_vm4, %v7491_v30  ;;  %v7500_v30 = vpack.c.bf16 %v7476_v12, %v7475_v0  ;;  %v12728_v0 = vld [vmem:[%s13368_s15] ss:$0 sm:$0xff] }
 0x67a   : > { %v7904_v14 = vmul.f32 %v12728_v0, %v13591_v58  ;;  %v12819_v55 = vmul.f32 %v12728_v0, %v13614_v28  ;;  %v13618_v28 = vld [vmem:[#allocation57_spill] sm:$0xff]  ;;  %v12843_v36 = vmul.f32 %v12728_v0, %v13620_v10 }
 0x67b   : > { %v12838_v49 = vmul.f32 %v12728_v0, %v13618_v28  ;;  %v13626_v28 = vld [vmem:[#allocation65_spill] sm:$0xff] }
 0x67c   : > { %13621 = vst [vmem:[#allocation37_spill] sm:$0xff] %v12843_v36 }
 0x67d   : > { %v10921_v12 = vpop.eup %10920  ;;  %13619 = vst [vmem:[#allocation16_spill] sm:$0xff] %v12838_v49 }
 0x680   : > { %10175 = vmatmul.mubr.msk.bf16.gmra.mrb[28].mxu0 %vm4797_vm4, %v7492_v46  ;;  %v7480_v46 = vld [vmem:[#allocation3 + $0xfe] sm:$0xff] }
 0x681   : > { %10178 = vmatprep.mubr.msk.bf16.mxu0 %vm4797_vm4, %v7493_v39  ;;  %v7502_v39 = vpack.c.bf16 %v7480_v46, %v7479_v44  ;;  %v13593_v46 = vld [vmem:[#allocation20_spill] sm:$0xff] }
 0x682   : > { %v7905_v15 = vmul.f32 %v12728_v0, %v13593_v46 }
 0x688   : > { %10179 = vmatmul.mubr.msk.bf16.gmra.mrb[32].mxu0 %vm4797_vm4, %v7494_v5  ;;  %v7484_v5 = vld [vmem:[#allocation3 + $0x11e] sm:$0xff] }
 0x689   : > { %10182 = vmatprep.mubr.msk.bf16.mxu0 %vm4797_vm4, %v7495_v7  ;;  %v7486_v7 = vld [vmem:[#allocation3 + $0x12e] sm:$0xff]  ;;  %v7504_v59 = vpack.c.bf16 %v7484_v5, %v7483_v31  ;;  %v13596_v5 = vld [vmem:[#allocation24_spill] sm:$0xff] }
 0x68a   : > { %v7505_v38 = vpack.c.bf16 %v7486_v7, %v7485_v17  ;;  %v12747_v17 = vmul.f32 %v12728_v0, %v13596_v5  ;;  %v13597_v7 = vld [vmem:[#allocation25_spill] sm:$0xff] }
 0x690   : > { %10183 = vmatmul.mubr.msk.bf16.gmra.mrb[36].mxu0 %vm4797_vm4, %v7496_v48  ;;  %v7488_v48 = vld [vmem:[#allocation3 + $0x13e] sm:$0x3f] }
 0x691   : > { %10186 = vmatprep.mubr.msk.bf16.mxu0 %vm4797_vm4, %v7497_v29  ;;  %v7506_v56 = vpack.c.bf16 %v7488_v48, %v7487_v8  ;;  %v8255_v29 = vld [vmem:[%s13365_s12] sm:$0xf]  ;;  %v13599_v48 = vld [vmem:[#allocation26_spill] sm:$0xff] }
 0x692   : > { %10857 = vmatprep.subr.msk.bf16.mxu1 %vm5082_vm5, %v8255_v29  ;;  %v8347_v32 = vsel %vm5082_vm5, %v8255_v29, 0  ;;  %v13600_v29 = vld [vmem:[#allocation28_spill] sm:$0xff] }
 0x693   : > { %10212 = vmatpush3.bf16.msra.mxu1 %v8347_v32  ;;  %v12763_v32 = vmul.f32 %v12728_v0, %v13600_v29 }
 0x698   : > { %10187 = vmatmul.mubr.msk.bf16.gmra.mrb[40].mxu0 %vm4797_vm4, %v7498_v6  ;;  %v13589_v6 = vld [vmem:[#allocation14_spill] sm:$0xff] }
 0x699   : > { %10190 = vmatprep.mubr.msk.bf16.mxu0 %vm4797_vm4, %v7499_v35  ;;  %v952_v42 = vadd.f32 %v13589_v6, %v884_v13  ;;  %v12767_v13 = vmul.f32 %v12728_v0, %v13601_v52  ;;  %v13602_v6 = vld [vmem:[#allocation32_spill] sm:$0xff]  ;;  %v13608_v52 = vld [vmem:[#allocation41_spill] sm:$0xff] }
 0x69b   : > { %v955_v35 = vadd.f32 1.0, %v952_v42  ;;  %v12771_v42 = vmul.f32 %v12728_v0, %v13602_v6  ;;  %v12798_v6 = vmul.f32 %v12728_v0, %v13608_v52  ;;  %v12815_v52 = vmul.f32 %v12728_v0, %v13613_v3  ;;  %v13616_v3 = vld [vmem:[#allocation54_spill] sm:$0xff] }
 0x69c   : > { %v12834_v54 = vmul.f32 %v12728_v0, %v13616_v3 }
 0x69e   : > { %13617 = vst [vmem:[#allocation43_spill] sm:$0xff] %v12834_v54  ;;  %v13624_v54 = vld [vmem:[#allocation62_spill] sm:$0xff] }
 0x6a0   : > { %10191 = vmatmul.mubr.msk.bf16.gmra.mrb[44].mxu0 %vm4797_vm4, %v7500_v30  ;;  %v12731_v30 = vrot.slane %v955_v35, %v13590_v2  ;;  %v13603_v35 = vld [vmem:[#allocation31_spill] sm:$0xff] }
 0x6a1   : > { %10194 = vmatprep.mubr.msk.bf16.mxu0 %vm4797_vm4, %v7501_v63  ;;  %v13592_v63 = vld [vmem:[#allocation21_spill] sm:$0xff]  ;;  %v12775_v58 = vmul.f32 %v12728_v0, %v13603_v35 }
 0x6a2   : > { %v7902_v44 = vmul.f32 %v12728_v0, %v13592_v63  ;;  %v13604_v63 = vld [vmem:[#allocation34_spill] sm:$0xff] }
 0x6a3   : > { %v12779_v46 = vmul.f32 %v12728_v0, %v13604_v63  ;;  %v13609_v63 = vld [vmem:[#allocation44_spill] sm:$0xff] }
 0x6a8   : > { %10195 = vmatmul.mubr.msk.bf16.gmra.mrb[48].mxu0 %vm4797_vm4, %v7502_v39  ;;  %v13594_v39 = vld [vmem:[#allocation23_spill] sm:$0xff] }
 0x6a9   : > { %10198 = vmatprep.mubr.msk.bf16.mxu0 %vm4797_vm4, %v7503_v4  ;;  %v7903_v53 = vmul.f32 %v12728_v0, %v13594_v39  ;;  %v13595_v4 = vld [vmem:[#allocation22_spill] sm:$0xff]  ;;  %v12782_v39 = vrot.slane %v10921_v12, %v13590_v2  ;;  %v12802_v12 = vmul.f32 %v12728_v0, %v13609_v63  ;;  %v13610_v2 = vld [vmem:[#allocation47_spill] sm:$0xff] }
 0x6aa   : > { %v12743_v31 = vmul.f32 %v12728_v0, %v13595_v4  ;;  %v13605_v4 = vld [vmem:[#allocation36_spill] sm:$0xff]  ;;  %v13615_v63 = vld [vmem:[#allocation55_spill] sm:$0xff] }
 0x6ab   : > { %v12786_v5 = vmul.f32 %v12728_v0, %v13605_v4  ;;  %v12806_v4 = vmul.f32 %v12728_v0, %v13610_v2  ;;  %v12823_v61 = vmul.f32 %v12728_v0, %v13615_v63 }
 0x6b0   : > { %10199 = vmatmul.mubr.msk.bf16.gmra.mrb[52].mxu0 %vm4797_vm4, %v7504_v59  ;;  %v12751_v59 = vmul.f32 %v12728_v0, %v13597_v7  ;;  %v13606_v7 = vld [vmem:[#allocation39_spill] sm:$0xff] }
 0x6b1   : > { %10202 = vmatprep.mubr.msk.bf16.mxu0 %vm4797_vm4, %v7505_v38  ;;  %v13598_v38 = vld [vmem:[#allocation27_spill] sm:$0xff] }
 0x6b2   : > { %v12755_v8 = vmul.f32 %v12728_v0, %v13598_v38  ;;  %v12790_v38 = vmul.f32 %v12728_v0, %v13606_v7  ;;  %v12810_v7 = vmul.f32 %v12728_v0, %v13611_v47  ;;  %v12829_v47 = vld [vmem:[%s13369_s16] ss:$0 sm:$0xff] }
 0x6b4   : > { %13612 = vst [vmem:[#allocation29_spill] sm:$0xff] %v12810_v7  ;;  %v12852_v7 = vmul.f32 %v12728_v0, %v13624_v54 }
 0x6b6   : > { %13625 = vst [vmem:[#allocation17_spill] sm:$0xff] %v12852_v7  ;;  %v13632_v7 = vld [vmem:[#allocation70_spill] sm:$0xff] }
 0x6b8   : > { %10203 = vmatmul.mubr.msk.bf16.gmra.mrb[56].mxu0 %vm4797_vm4, %v7506_v56  ;;  %v12759_v56 = vmul.f32 %v12728_v0, %v13599_v48  ;;  %v13607_v48 = vld [vmem:[#allocation38_spill] sm:$0xff] }
 0x6b9   : > { %v12794_v29 = vmul.f32 %v12728_v0, %v13607_v48 }
 0x74b   : > { %v10172_v35 = vpop.f32.mrb[24].mxu0 }
 0x74c   : > { %v7861_v48 = vmul.f32 %v10172_v35, %v12782_v39  ;;  %v7600_v16 = vpop.f32.mrb[25].mxu0 }
 0x74d   : > { %v7859_v35 = vmul.f32 %v12782_v39, %v7600_v16  ;;  %v10173_v2 = vpop.f32.mrb[26].mxu0  ;;  %v12847_v16 = vmul.f32 %v12728_v0, %v13622_v50 }
 0x74e   : > { %v7940_v63 = vadd.f32 %v7904_v14, %v7861_v48  ;;  %v7862_v1 = vmul.f32 %v10173_v2, %v12782_v39  ;;  %v7603_v37 = vpop.f32.mrb[27].mxu0  ;;  %v12856_v14 = vmul.f32 %v12728_v0, %v13626_v28  ;;  %v13628_v2 = vld [vmem:[#allocation68_spill] sm:$0xff]  ;;  %v12874_v28 = vmul.f32 %v12728_v0, %v13632_v7 }
 0x74f   : > { %13623 = vst [vmem:[#allocation40_spill] sm:$0xff] %v12847_v16  ;;  %v7938_v9 = vadd.f32 %v7902_v44, %v7859_v35  ;;  %v7860_v3 = vmul.f32 %v12782_v39, %v7603_v37  ;;  %v12865_v50 = vmul.f32 %v12728_v0, %v13628_v2  ;;  %v13630_v44 = vld [vmem:[#allocation71_spill] sm:$0xff] }
 0x750   : > { %13627 = vst [vmem:[#allocation18_spill] sm:$0xff] %v12856_v14  ;;  %v7983_v10 = vadd.f32 %v12829_v47, %v7940_v63  ;;  %v7941_v48 = vadd.f32 %v7905_v15, %v7862_v1  ;;  %v12869_v37 = vmul.f32 %v12728_v0, %v13630_v44  ;;  %13633 = vst [vmem:[#allocation45_spill] sm:$0xff] %v12874_v28  ;;  %v13634_v1 = vld [vmem:[#allocation73_spill] sm:$0xff] }
 0x751   : > { %13629 = vst [vmem:[#allocation35_spill] sm:$0xff] %v12865_v50  ;;  %v7981_v54 = vadd.f32 %v12829_v47, %v7938_v9  ;;  %v7939_v35 = vadd.f32 %v7903_v53, %v7860_v3  ;;  %v12879_v15 = vmul.f32 %v12728_v0, %v13634_v1 }
 0x752   : > { %13631 = vst [vmem:[#allocation51_spill] sm:$0xff] %v12869_v37  ;;  %vm8019_vm5 = vcmp.ge.f32.partialorder %v7983_v10, 0.0  ;;  %v8055_v14 = vmul.f32 0.2, %v7983_v10  ;;  %v7984_v63 = vadd.f32 %v12829_v47, %v7941_v48 }
 0x753   : > { %13635 = vst [vmem:[#allocation78_spill] sm:$0xff] %v12879_v15  ;;  %vm8017_vm0 = vcmp.ge.f32.partialorder %v7981_v54, 0.0  ;;  %v8053_v2 = vmul.f32 0.2, %v7981_v54  ;;  %v7982_v44 = vadd.f32 %v12829_v47, %v7939_v35  ;;  %v10176_v50 = vpop.f32.mrb[28].mxu0 }
 0x754   : > { %v8091_v37 = vsel %vm8019_vm5, %v7983_v10, %v8055_v14  ;;  %vm8020_vm1 = vcmp.ge.f32.partialorder %v7984_v63, 0.0  ;;  %v8056_v9 = vmul.f32 0.2, %v7984_v63  ;;  %v7865_v53 = vmul.f32 %v10176_v50, %v12782_v39  ;;  %v7616_v7 = vpop.f32.mrb[29].mxu0  ;;  %v13636_v10 = vld [vmem:[#allocation84_spill] sm:$0xff] }
 0x755   : > { %v8127_v3 = vmul.f32 %v8091_v37, %v11950_v25  ;;  %v8089_v28 = vsel %vm8017_vm0, %v7981_v54, %v8053_v2  ;;  %vm8018_vm2 = vcmp.ge.f32.partialorder %v7982_v44, 0.0  ;;  %v8054_v48 = vmul.f32 0.2, %v7982_v44  ;;  %v10177_v36 = vpop.f32.mrb[30].mxu0 }
 0x756   : > { %v8125_v1 = vmul.f32 %v8089_v28, %v11932_v11  ;;  %v8092_v15 = vsel %vm8020_vm1, %v7984_v63, %v8056_v9  ;;  %v7944_v49 = vadd.f32 %v12755_v8, %v7865_v53  ;;  %v7863_v35 = vmul.f32 %v12782_v39, %v7616_v7  ;;  %v7619_v14 = vpop.f32.mrb[31].mxu0 }
 0x757   : > { %v12889_v16 = vmul.f32 %v12728_v0, %v13636_v10  ;;  %8163 = vst.msk [vmem:[%s12892_s28 + $0x10] sm:$0xff] %vm4797_vm4, %v8127_v3  ;;  %v8128_v11 = vmul.f32 %v8092_v15, %v11942_v18  ;;  %v8090_v25 = vsel %vm8018_vm2, %v7982_v44, %v8054_v48  ;;  %v7866_v8 = vmul.f32 %v10177_v36, %v12782_v39 }
 0x758   : > { %8161 = vst.msk [vmem:[%s12892_s28] sm:$0xff] %vm4797_vm4, %v8125_v1  ;;  %v8126_v50 = vmul.f32 %v8090_v25, %v11924_v45  ;;  %v7987_v37 = vadd.f32 %v12829_v47, %v7944_v49  ;;  %v7942_v54 = vadd.f32 %v12747_v17, %v7863_v35  ;;  %v7864_v28 = vmul.f32 %v12782_v39, %v7619_v14 }
 0x759   : > { %v12906_v63 = vmul.f32 %v12728_v0, %v12257_v22  ;;  %v8203_v2 = vmul.f32 %v12731_v30, %v8127_v3  ;;  %8164 = vst.msk [vmem:[%s12892_s28 + $0x18] sm:$0xff] %vm4797_vm4, %v8128_v11  ;;  %v8204_v18 = vmul.f32 %v12731_v30, %v8128_v11  ;;  %v7945_v36 = vadd.f32 %v12751_v59, %v7866_v8 }
 0x75a   : > { %8162 = vst.msk [vmem:[%s12892_s28 + $0x8] sm:$0xff] %vm4797_vm4, %v8126_v50  ;;  %vm8023_vm3 = vcmp.ge.f32.partialorder %v7987_v37, 0.0  ;;  %v8059_v45 = vmul.f32 0.2, %v7987_v37  ;;  %v7985_v49 = vadd.f32 %v12829_v47, %v7942_v54  ;;  %v7943_v17 = vadd.f32 %v12743_v31, %v7864_v28 }
 0x75b   : > { %v7988_v15 = vadd.f32 %v12829_v47, %v7945_v36  ;;  %v10180_v22 = vpop.f32.mrb[32].mxu0  ;;  %v8201_v0 = vmul.f32 %v12731_v30, %v8125_v1  ;;  %v8202_v44 = vmul.f32 %v12731_v30, %v8126_v50  ;;  %v8238_v9 = vpack.c.bf16 %v8204_v18, %v8203_v2 }
 0x75c   : > { %v8095_v53 = vsel %vm8023_vm3, %v7987_v37, %v8059_v45  ;;  %vm8021_vm6 = vcmp.ge.f32.partialorder %v7985_v49, 0.0  ;;  %v8057_v59 = vmul.f32 0.2, %v7985_v49  ;;  %v7986_v7 = vadd.f32 %v12829_v47, %v7943_v17  ;;  %v7632_v3 = vpop.f32.mrb[33].mxu0 }
 0x75d   : > { %v8131_v48 = vmul.f32 %v8095_v53, %v11978_v41  ;;  %vm8024_vm7 = vcmp.ge.f32.partialorder %v7988_v15, 0.0  ;;  %v8060_v35 = vmul.f32 0.2, %v7988_v15  ;;  %v7869_v31 = vmul.f32 %v10180_v22, %v12782_v39  ;;  %v10181_v14 = vpop.f32.mrb[34].mxu0 }
 0x75e   : > { %v8093_v10 = vsel %vm8021_vm6, %v7985_v49, %v8057_v59  ;;  %vm8022_vm8 = vcmp.ge.f32.partialorder %v7986_v7, 0.0  ;;  %v8058_v1 = vmul.f32 0.2, %v7986_v7  ;;  %v7867_v11 = vmul.f32 %v12782_v39, %v7632_v3  ;;  %v7635_v25 = vpop.f32.mrb[35].mxu0 }
 0x75f   : > { %8167 = vst.msk [vmem:[%s12892_s28 + $0x30] sm:$0xff] %vm4797_vm4, %v8131_v48  ;;  %v8129_v8 = vmul.f32 %v8093_v10, %v11958_v20  ;;  %v8096_v50 = vsel %vm8024_vm7, %v7988_v15, %v8060_v35  ;;  %v7948_v41 = vadd.f32 %v12771_v42, %v7869_v31  ;;  %v7870_v37 = vmul.f32 %v10181_v14, %v12782_v39 }
 0x760   : > { %v8132_v54 = vmul.f32 %v8096_v50, %v13548_v23  ;;  %v8094_v28 = vsel %vm8022_vm8, %v7986_v7, %v8058_v1  ;;  %v7946_v2 = vadd.f32 %v12763_v32, %v7867_v11  ;;  %v7868_v18 = vmul.f32 %v12782_v39, %v7635_v25 }
 0x761   : > { %8165 = vst.msk [vmem:[%s12892_s28 + $0x20] sm:$0xff] %vm4797_vm4, %v8129_v8  ;;  %v8130_v36 = vmul.f32 %v8094_v28, %v13550_v51  ;;  %v7991_v45 = vadd.f32 %v12829_v47, %v7948_v41  ;;  %v7949_v20 = vadd.f32 %v12767_v13, %v7870_v37  ;;  %v8237_v49 = vpack.c.bf16 %v8202_v44, %v8201_v0 }
 0x762   : > { %8168 = vst.msk [vmem:[%s12892_s28 + $0x38] sm:$0xff] %vm4797_vm4, %v8132_v54  ;;  %v7989_v42 = vadd.f32 %v12829_v47, %v7946_v2  ;;  %v7947_v23 = vadd.f32 %v12759_v56, %v7868_v18  ;;  %v8205_v17 = vmul.f32 %v12731_v30, %v8129_v8  ;;  %v12943_v32 = vmul.f32 %v12731_v30, %v8131_v48 }
 0x763   : > { %8166 = vst.msk [vmem:[%s12892_s28 + $0x28] sm:$0xff] %vm4797_vm4, %v8130_v36  ;;  %vm8027_vm9 = vcmp.ge.f32.partialorder %v7991_v45, 0.0  ;;  %v8063_v51 = vmul.f32 0.2, %v7991_v45  ;;  %v7992_v15 = vadd.f32 %v12829_v47, %v7949_v20  ;;  %10213 = vmatprep.mubr.msk.bf16.mxu1 %vm4797_vm4, %v8237_v49  ;;  %v10184_v13 = vpop.f32.mrb[36].mxu0  ;;  %v8206_v22 = vmul.f32 %v12731_v30, %v8130_v36 }
 0x764   : > { %vm8025_vm10 = vcmp.ge.f32.partialorder %v7989_v42, 0.0  ;;  %v8061_v0 = vmul.f32 0.2, %v7989_v42  ;;  %v7990_v56 = vadd.f32 %v12829_v47, %v7947_v23  ;;  %10214 = vmatmul.mubr.msk.bf16.vlgmr.msra.gmra.mrb[40].mxu1 %vm4797_vm4, %v8238_v9  ;;  %v7873_v44 = vmul.f32 %v10184_v13, %v12782_v39  ;;  %v7648_v53 = vpop.f32.mrb[37].mxu0 }
 0x765   : > { %v8099_v59 = vsel %vm8027_vm9, %v7991_v45, %v8063_v51  ;;  %vm8028_vm11 = vcmp.ge.f32.partialorder %v7992_v15, 0.0  ;;  %v8064_v7 = vmul.f32 0.2, %v7992_v15  ;;  %v7871_v3 = vmul.f32 %v12782_v39, %v7648_v53  ;;  %v10185_v48 = vpop.f32.mrb[38].mxu0 }
 0x766   : > { %v8135_v35 = vmul.f32 %v8099_v59, %v13551_v43  ;;  %v8097_v31 = vsel %vm8025_vm10, %v7989_v42, %v8061_v0  ;;  %vm8026_vm12 = vcmp.ge.f32.partialorder %v7990_v56, 0.0  ;;  %v8062_v14 = vmul.f32 0.2, %v7990_v56  ;;  %v7651_v10 = vpop.f32.mrb[39].mxu0 }
 0x767   : > { %v8133_v9 = vmul.f32 %v8097_v31, %v13553_v34  ;;  %v8100_v1 = vsel %vm8028_vm11, %v7992_v15, %v8064_v7  ;;  %v7952_v11 = vadd.f32 %v12790_v38, %v7873_v44  ;;  %v7950_v25 = vadd.f32 %v12779_v46, %v7871_v3 }
 0x768   : > { %8171 = vst.msk [vmem:[%s12892_s28 + $0x50] sm:$0xff] %vm4797_vm4, %v8135_v35  ;;  %v8136_v8 = vmul.f32 %v8100_v1, %v13554_v57  ;;  %v8098_v50 = vsel %vm8026_vm12, %v7990_v56, %v8062_v14  ;;  %v7874_v43 = vmul.f32 %v10185_v48, %v12782_v39  ;;  %v7872_v41 = vmul.f32 %v12782_v39, %v7651_v10 }
 0x769   : > { %8169 = vst.msk [vmem:[%s12892_s28 + $0x40] sm:$0xff] %vm4797_vm4, %v8133_v9  ;;  %v8134_v37 = vmul.f32 %v8098_v50, %v13557_v40  ;;  %v7995_v34 = vadd.f32 %v12829_v47, %v7952_v11  ;;  %v7993_v38 = vadd.f32 %v12829_v47, %v7950_v25  ;;  %v8239_v28 = vpack.c.bf16 %v8206_v22, %v8205_v17 }
 0x76a   : > { %8172 = vst.msk [vmem:[%s12892_s28 + $0x58] sm:$0xff] %vm4797_vm4, %v8136_v8  ;;  %v7953_v46 = vadd.f32 %v12786_v5, %v7874_v43  ;;  %v7951_v57 = vadd.f32 %v12775_v58, %v7872_v41  ;;  %v8208_v2 = vmul.f32 %v12731_v30, %v8132_v54  ;;  %v8209_v18 = vmul.f32 %v12731_v30, %v8133_v9 }
 0x76b   : > { %8170 = vst.msk [vmem:[%s12892_s28 + $0x48] sm:$0xff] %vm4797_vm4, %v8134_v37  ;;  %vm8031_vm13 = vcmp.ge.f32.partialorder %v7995_v34, 0.0  ;;  %v8067_v36 = vmul.f32 0.2, %v7995_v34  ;;  %vm8029_vm15 = vcmp.ge.f32.partialorder %v7993_v38, 0.0  ;;  %10217 = vmatprep.mubr.msk.bf16.mxu1 %vm4797_vm4, %v8239_v28  ;;  %v10188_v49 = vpop.f32.mrb[40].mxu0  ;;  %v8210_v58 = vmul.f32 %v12731_v30, %v8134_v37 }
 0x76c   : > { %v8065_v40 = vmul.f32 0.2, %v7993_v38  ;;  %v7996_v45 = vadd.f32 %v12829_v47, %v7953_v46  ;;  %v7994_v20 = vadd.f32 %v12829_v47, %v7951_v57  ;;  %v8240_v5 = vpack.c.bf16 %v8208_v2, %v12943_v32  ;;  %v7664_v17 = vpop.f32.mrb[41].mxu0 }
 0x76d   : > { %v8103_v54 = vsel %vm8031_vm13, %v7995_v34, %v8067_v36  ;;  %v7877_v23 = vmul.f32 %v10188_v49, %v12782_v39  ;;  %v8211_v51 = vmul.f32 %v12731_v30, %v8135_v35  ;;  %v10189_v32 = vpop.f32.mrb[42].mxu0  ;;  %v7875_v44 = vmul.f32 %v12782_v39, %v7664_v17 }
 0x76e   : > { %v8101_v42 = vsel %vm8029_vm15, %v7993_v38, %v8065_v40  ;;  %v12984_v15 = vmul.f32 %v8103_v54, %v13558_v21  ;;  %vm8032_vm5 = vcmp.ge.f32.partialorder %v7996_v45, 0.0  ;;  %v8068_v22 = vmul.f32 0.2, %v7996_v45  ;;  %10218 = vmatmul.mubr.msk.bf16.gmra.mrb[44].mxu1 %vm4797_vm4, %v8240_v5  ;;  %v7667_v53 = vpop.f32.mrb[43].mxu0 }
 0x76f   : > { %v8137_v13 = vmul.f32 %v8101_v42, %v13559_v60  ;;  %vm8030_vm0 = vcmp.ge.f32.partialorder %v7994_v20, 0.0  ;;  %v8066_v0 = vmul.f32 0.2, %v7994_v20  ;;  %v7956_v56 = vadd.f32 %v12806_v4, %v7877_v23 }
 0x770   : > { %8175 = vst.msk [vmem:[%s12892_s28 + $0x70] sm:$0xff] %vm4797_vm4, %v12984_v15  ;;  %v8104_v21 = vsel %vm8032_vm5, %v7996_v45, %v8068_v22  ;;  %v7878_v60 = vmul.f32 %v10189_v32, %v12782_v39  ;;  %v7876_v59 = vmul.f32 %v12782_v39, %v7667_v53  ;;  %v8241_v7 = vpack.c.bf16 %v8210_v58, %v8209_v18  ;;  %v13638_v53 = vld [vmem:[#allocation67_spill] sm:$0xff] }
 0x771   : > { %8173 = vst.msk [vmem:[%s12892_s28 + $0x60] sm:$0xff] %vm4797_vm4, %v8137_v13  ;;  %v12998_v3 = vmul.f32 %v8104_v21, %v13561_v19  ;;  %v8102_v4 = vsel %vm8030_vm0, %v7994_v20, %v8066_v0  ;;  %v7999_v48 = vadd.f32 %v12829_v47, %v7956_v56  ;;  %v7954_v35 = vadd.f32 %v12798_v6, %v7875_v44 }
 0x772   : > { %v8138_v31 = vmul.f32 %v8102_v4, %v13562_v27  ;;  %v7957_v14 = vadd.f32 %v12802_v12, %v7878_v60  ;;  %v7955_v10 = vadd.f32 %v12794_v29, %v7876_v59  ;;  %10221 = vmatprep.mubr.msk.bf16.mxu1 %vm4797_vm4, %v8241_v7  ;;  %v8212_v9 = vmul.f32 %v12731_v30, %v8136_v8  ;;  %v13639_v60 = vld [vmem:[#allocation61_spill] sm:$0xff] }
 0x773   : > { %8176 = vst.msk [vmem:[%s12892_s28 + $0x78] sm:$0xff] %vm4797_vm4, %v12998_v3  ;;  %vm8035_vm1 = vcmp.ge.f32.partialorder %v7999_v48, 0.0  ;;  %v8071_v19 = vmul.f32 0.2, %v7999_v48  ;;  %v7997_v1 = vadd.f32 %v12829_v47, %v7954_v35  ;;  %v10192_v11 = vpop.f32.mrb[44].mxu0  ;;  %v8213_v6 = vmul.f32 %v12731_v30, %v8137_v13  ;;  %v13640_v35 = vld [vmem:[#allocation40_spill] sm:$0xff] }
 0x774   : > { %8174 = vst.msk [vmem:[%s12892_s28 + $0x68] sm:$0xff] %vm4797_vm4, %v8138_v31  ;;  %v8000_v27 = vadd.f32 %v12829_v47, %v7957_v14  ;;  %v7998_v29 = vadd.f32 %v12829_v47, %v7955_v10  ;;  %v8242_v12 = vpack.c.bf16 %v8212_v9, %v8211_v51  ;;  %v7881_v25 = vmul.f32 %v10192_v11, %v12782_v39  ;;  %v7680_v8 = vpop.f32.mrb[45].mxu0 }
 0x775   : > { %v8107_v50 = vsel %vm8035_vm1, %v7999_v48, %v8071_v19  ;;  %vm8033_vm2 = vcmp.ge.f32.partialorder %v7997_v1, 0.0  ;;  %v8069_v43 = vmul.f32 0.2, %v7997_v1  ;;  %v7879_v41 = vmul.f32 %v12782_v39, %v7680_v8  ;;  %v10193_v37 = vpop.f32.mrb[46].mxu0  ;;  %v13643_v8 = vld [vmem:[#allocation16_spill] sm:$0xff] }
 0x776   : > { %v13019_v34 = vmul.f32 %v8107_v50, %v13563_v26  ;;  %vm8036_vm3 = vcmp.ge.f32.partialorder %v8000_v27, 0.0  ;;  %v8072_v38 = vmul.f32 0.2, %v8000_v27  ;;  %vm8034_vm6 = vcmp.ge.f32.partialorder %v7998_v29, 0.0  ;;  %10222 = vmatmul.mubr.msk.bf16.gmra.mrb[48].mxu1 %vm4797_vm4, %v8242_v12  ;;  %v7683_v28 = vpop.f32.mrb[47].mxu0  ;;  %v13642_v12 = vld [vmem:[#allocation58_spill] sm:$0xff] }
 0x777   : > { %v8105_v46 = vsel %vm8033_vm2, %v7997_v1, %v8069_v43  ;;  %v8070_v57 = vmul.f32 0.2, %v7998_v29  ;;  %v7960_v2 = vadd.f32 %v12823_v61, %v7881_v25  ;;  %v7958_v18 = vadd.f32 %v12815_v52, %v7879_v41  ;;  %v13641_v1 = vld [vmem:[#allocation64_spill] sm:$0xff]  ;;  %v13644_v43 = vld [vmem:[#allocation37_spill] sm:$0xff] }
 0x778   : > { %8179 = vst.msk [vmem:[%s12892_s28 + $0x90] sm:$0xff] %vm4797_vm4, %v13019_v34  ;;  %v8141_v26 = vmul.f32 %v8105_v46, %v13564_v24  ;;  %v8108_v36 = vsel %vm8036_vm3, %v8000_v27, %v8072_v38  ;;  %v7882_v40 = vmul.f32 %v10193_v37, %v12782_v39  ;;  %v7880_v45 = vmul.f32 %v12782_v39, %v7683_v28  ;;  %v13637_v24 = vld [vmem:[#allocation29_spill] sm:$0xff]  ;;  %v13645_v37 = vld [vmem:[#allocation43_spill] sm:$0xff] }
 0x779   : > { %v8144_v20 = vmul.f32 %v8108_v36, %v13565_v62  ;;  %v8106_v5 = vsel %vm8034_vm6, %v7998_v29, %v8070_v57  ;;  %v8003_v49 = vadd.f32 %v12829_v47, %v7960_v2  ;;  %v8001_v61 = vadd.f32 %v12829_v47, %v7958_v18 }
 0x77a   : > { %8177 = vst.msk [vmem:[%s12892_s28 + $0x80] sm:$0xff] %vm4797_vm4, %v8141_v26  ;;  %v8142_v52 = vmul.f32 %v8106_v5, %v13566_v33  ;;  %v7961_v58 = vadd.f32 %v12819_v55, %v7882_v40  ;;  %v7959_v54 = vadd.f32 %v13637_v24, %v7880_v45  ;;  %v8214_v42 = vmul.f32 %v12731_v30, %v8138_v31 }
 0x77b   : > { %8180 = vst.msk [vmem:[%s12892_s28 + $0x98] sm:$0xff] %vm4797_vm4, %v8144_v20  ;;  %vm8039_vm7 = vcmp.ge.f32.partialorder %v8003_v49, 0.0  ;;  %v8075_v23 = vmul.f32 0.2, %v8003_v49  ;;  %vm8037_vm8 = vcmp.ge.f32.partialorder %v8001_v61, 0.0  ;;  %v8215_v33 = vmul.f32 %v12731_v30, %v12984_v15  ;;  %v10196_v55 = vpop.f32.mrb[48].mxu0 }
 0x77c   : > { %v8073_v62 = vmul.f32 0.2, %v8001_v61  ;;  %8178 = vst.msk [vmem:[%s12892_s28 + $0x88] sm:$0xff] %vm4797_vm4, %v8142_v52  ;;  %v8004_v17 = vadd.f32 %v12829_v47, %v7961_v58  ;;  %v8002_v51 = vadd.f32 %v12829_v47, %v7959_v54  ;;  %v8243_v13 = vpack.c.bf16 %v8214_v42, %v8213_v6  ;;  %v7696_v44 = vpop.f32.mrb[49].mxu0  ;;  %v13646_v58 = vld [vmem:[#allocation75_spill] sm:$0xff] }
 0x77d   : > { %v8111_v22 = vsel %vm8039_vm7, %v8003_v49, %v8075_v23  ;;  %v8216_v0 = vmul.f32 %v12731_v30, %v12998_v3  ;;  %v7885_v56 = vmul.f32 %v10196_v55, %v12782_v39  ;;  %v10197_v15 = vpop.f32.mrb[50].mxu0  ;;  %v7883_v10 = vmul.f32 %v12782_v39, %v7696_v44 }
 0x77e   : > { %v8109_v32 = vsel %vm8037_vm8, %v8001_v61, %v8073_v62  ;;  %v13051_v21 = vmul.f32 %v8111_v22, %v13638_v53  ;;  %vm8040_vm9 = vcmp.ge.f32.partialorder %v8004_v17, 0.0  ;;  %v8076_v7 = vmul.f32 0.2, %v8004_v17  ;;  %10225 = vmatprep.mubr.msk.bf16.mxu1 %vm4797_vm4, %v8243_v13  ;;  %v7699_v3 = vpop.f32.mrb[51].mxu0 }
 0x77f   : > { %v13054_v59 = vmul.f32 %v8109_v32, %v13639_v60  ;;  %vm8038_vm10 = vcmp.ge.f32.partialorder %v8002_v51, 0.0  ;;  %v8074_v4 = vmul.f32 0.2, %v8002_v51  ;;  %v8244_v48 = vpack.c.bf16 %v8216_v0, %v8215_v33  ;;  %v13648_v33 = vld [vmem:[#allocation18_spill] sm:$0xff]  ;;  %v13649_v32 = vld [vmem:[#allocation69_spill] sm:$0xff]  ;;  %v13650_v60 = vld [vmem:[#allocation72_spill] sm:$0xff] }
 0x780   : > { %v7964_v31 = vadd.f32 %v13640_v35, %v7885_v56  ;;  %8183 = vst.msk [vmem:[%s12892_s28 + $0xb0] sm:$0xff] %vm4797_vm4, %v13051_v21  ;;  %v8112_v14 = vsel %vm8040_vm9, %v8004_v17, %v8076_v7  ;;  %v7886_v9 = vmul.f32 %v10197_v15, %v12782_v39  ;;  %v7884_v19 = vmul.f32 %v12782_v39, %v7699_v3  ;;  %v13651_v15 = vld [vmem:[#allocation66_spill] sm:$0xff] }
 0x781   : > { %8181 = vst.msk [vmem:[%s12892_s28 + $0xa0] sm:$0xff] %vm4797_vm4, %v13054_v59  ;;  %v13068_v11 = vmul.f32 %v8112_v14, %v13641_v1  ;;  %v8110_v6 = vsel %vm8038_vm10, %v8002_v51, %v8074_v4  ;;  %10226 = vmatmul.mubr.msk.bf16.gmra.mrb[52].mxu1 %vm4797_vm4, %v8244_v48  ;;  %v8217_v29 = vmul.f32 %v12731_v30, %v8141_v26  ;;  %v13647_v51 = vld [vmem:[#allocation51_spill] sm:$0xff]  ;;  %v13653_v14 = vld [vmem:[#allocation17_spill] sm:$0xff] }
 0x782   : > { %v8007_v27 = vadd.f32 %v12829_v47, %v7964_v31  ;;  %v8146_v25 = vmul.f32 %v8110_v6, %v13642_v12  ;;  %v7962_v50 = vadd.f32 %v13643_v8, %v7883_v10  ;;  %v7965_v41 = vadd.f32 %v13644_v43, %v7886_v9  ;;  %v13652_v31 = vld [vmem:[#allocation35_spill] sm:$0xff] }
 0x783   : > { %v7963_v38 = vadd.f32 %v13645_v37, %v7884_v19  ;;  %8184 = vst.msk [vmem:[%s12892_s28 + $0xb8] sm:$0xff] %vm4797_vm4, %v13068_v11  ;;  %v8218_v46 = vmul.f32 %v12731_v30, %v8142_v52  ;;  %v8219_v57 = vmul.f32 %v12731_v30, %v13019_v34  ;;  %v10200_v2 = vpop.f32.mrb[52].mxu0  ;;  %v8220_v40 = vmul.f32 %v12731_v30, %v8144_v20 }
 0x784   : > { %vm8043_vm11 = vcmp.ge.f32.partialorder %v8007_v27, 0.0  ;;  %v8079_v28 = vmul.f32 0.2, %v8007_v27  ;;  %8182 = vst.msk [vmem:[%s12892_s28 + $0xa8] sm:$0xff] %vm4797_vm4, %v8146_v25  ;;  %v8005_v18 = vadd.f32 %v12829_v47, %v7962_v50  ;;  %v8008_v26 = vadd.f32 %v12829_v47, %v7965_v41  ;;  %v7712_v45 = vpop.f32.mrb[53].mxu0 }
 0x785   : > { %v8006_v36 = vadd.f32 %v12829_v47, %v7963_v38  ;;  %v8245_v49 = vpack.c.bf16 %v8218_v46, %v8217_v29  ;;  %v7889_v61 = vmul.f32 %v10200_v2, %v12782_v39  ;;  %v7887_v52 = vmul.f32 %v12782_v39, %v7712_v45  ;;  %v10201_v34 = vpop.f32.mrb[54].mxu0 }
 0x786   : > { %v8115_v5 = vsel %vm8043_vm11, %v8007_v27, %v8079_v28  ;;  %vm8041_vm12 = vcmp.ge.f32.partialorder %v8005_v18, 0.0  ;;  %v8077_v54 = vmul.f32 0.2, %v8005_v18  ;;  %vm8044_vm13 = vcmp.ge.f32.partialorder %v8008_v26, 0.0  ;;  %v7715_v42 = vpop.f32.mrb[55].mxu0  ;;  %v13654_v28 = vld [vmem:[#allocation81_spill] sm:$0xff] }
 0x787   : > { %v13092_v24 = vmul.f32 %v8115_v5, %v13646_v58  ;;  %v8080_v23 = vmul.f32 0.2, %v8008_v26  ;;  %vm8042_vm15 = vcmp.ge.f32.partialorder %v8006_v36, 0.0  ;;  %v8078_v62 = vmul.f32 0.2, %v8006_v36  ;;  %10229 = vmatprep.mubr.msk.bf16.mxu1 %vm4797_vm4, %v8245_v49 }
 0x788   : > { %v8246_v20 = vpack.c.bf16 %v8220_v40, %v8219_v57  ;;  %v8113_v17 = vsel %vm8041_vm12, %v8005_v18, %v8077_v54  ;;  %v7968_v13 = vadd.f32 %v13647_v51, %v7889_v61  ;;  %v7966_v55 = vadd.f32 %v13648_v33, %v7887_v52  ;;  %v13655_v57 = vld [vmem:[#allocation77_spill] sm:$0xff]  ;;  %v13656_v61 = vld [vmem:[#allocation76_spill] sm:$0xff]  ;;  %v13657_v54 = vld [vmem:[#allocation74_spill] sm:$0xff] }
 0x789   : > { %8187 = vst.msk [vmem:[%s12892_s28 + $0xd0] sm:$0xff] %vm4797_vm4, %v13092_v24  ;;  %v7890_v22 = vmul.f32 %v10201_v34, %v12782_v39  ;;  %v8149_v0 = vmul.f32 %v8113_v17, %v13649_v32  ;;  %v8116_v56 = vsel %vm8044_vm13, %v8008_v26, %v8080_v23  ;;  %v8114_v44 = vsel %vm8042_vm15, %v8006_v36, %v8078_v62  ;;  %v13658_v23 = vld [vmem:[#allocation78_spill] sm:$0xff]  ;;  %v13659_v17 = vld [vmem:[#allocation45_spill] sm:$0xff] }
 0x78a   : > { %10230 = vmatmul.mubr.msk.bf16.gmra.mrb[56].mxu1 %vm4797_vm4, %v8246_v20  ;;  %v7888_v53 = vmul.f32 %v12782_v39, %v7715_v42  ;;  %v8152_v7 = vmul.f32 %v8116_v56, %v13650_v60  ;;  %v8150_v4 = vmul.f32 %v8114_v44, %v13651_v15  ;;  %v8011_v48 = vadd.f32 %v12829_v47, %v7968_v13  ;;  %v13660_v60 = vld [vmem:[#allocation33_spill] sm:$0xff] }
 0x78b   : > { %v8009_v35 = vadd.f32 %v12829_v47, %v7966_v55  ;;  %8185 = vst.msk [vmem:[%s12892_s28 + $0xc0] sm:$0xff] %vm4797_vm4, %v8149_v0  ;;  %v7969_v3 = vadd.f32 %v13652_v31, %v7890_v22  ;;  %v8221_v9 = vmul.f32 %v12731_v30, %v13054_v59  ;;  %v8222_v19 = vmul.f32 %v12731_v30, %v8146_v25  ;;  %v10204_v1 = vpop.f32.mrb[56].mxu0 }
 0x78c   : > { %v7967_v10 = vadd.f32 %v13653_v14, %v7888_v53  ;;  %8188 = vst.msk [vmem:[%s12892_s28 + $0xd8] sm:$0xff] %vm4797_vm4, %v8152_v7  ;;  %8186 = vst.msk [vmem:[%s12892_s28 + $0xc8] sm:$0xff] %vm4797_vm4, %v8150_v4  ;;  %vm8047_vm5 = vcmp.ge.f32.partialorder %v8011_v48, 0.0  ;;  %v8083_v6 = vmul.f32 0.2, %v8011_v48  ;;  %v8223_v50 = vmul.f32 %v12731_v30, %v13051_v21  ;;  %v7728_v59 = vpop.f32.mrb[57].mxu0 }
 0x78d   : > { %vm8045_vm0 = vcmp.ge.f32.partialorder %v8009_v35, 0.0  ;;  %v8081_v27 = vmul.f32 0.2, %v8009_v35  ;;  %v8012_v29 = vadd.f32 %v12829_v47, %v7969_v3  ;;  %v8247_v8 = vpack.c.bf16 %v8222_v19, %v8221_v9  ;;  %v10205_v38 = vpop.f32.mrb[58].mxu0  ;;  %v13661_v14 = vld [vmem:[#allocation87_spill] sm:$0xff] }
 0x78e   : > { %v8010_v12 = vadd.f32 %v12829_v47, %v7967_v10  ;;  %v8119_v25 = vsel %vm8047_vm5, %v8011_v48, %v8083_v6  ;;  %v8224_v41 = vmul.f32 %v12731_v30, %v13068_v11  ;;  %v7893_v37 = vmul.f32 %v10204_v1, %v12782_v39  ;;  %v7731_v21 = vpop.f32.mrb[59].mxu0  ;;  %v13662_v1 = vld [vmem:[#allocation15_spill] sm:$0xff] }
 0x78f   : > { %v8117_v43 = vsel %vm8045_vm0, %v8009_v35, %v8081_v27  ;;  %v8155_v46 = vmul.f32 %v8119_v25, %v13654_v28  ;;  %vm8048_vm1 = vcmp.ge.f32.partialorder %v8012_v29, 0.0  ;;  %v8084_v18 = vmul.f32 0.2, %v8012_v29  ;;  %10233 = vmatprep.mubr.msk.bf16.mxu1 %vm4797_vm4, %v8247_v8  ;;  %v13663_v27 = vld [vmem:[#allocation79_spill] sm:$0xff] }
 0x790   : > { %v8153_v2 = vmul.f32 %v8117_v43, %v13655_v57  ;;  %vm8046_vm2 = vcmp.ge.f32.partialorder %v8010_v12, 0.0  ;;  %v8082_v26 = vmul.f32 0.2, %v8010_v12  ;;  %v8248_v36 = vpack.c.bf16 %v8224_v41, %v8223_v50 }
 0x791   : > { %v7972_v40 = vadd.f32 %v12906_v63, %v7893_v37  ;;  %8191 = vst.msk [vmem:[%s12892_s28 + $0xf0] sm:$0xff] %vm4797_vm4, %v8155_v46  ;;  %v8120_v11 = vsel %vm8048_vm1, %v8012_v29, %v8084_v18  ;;  %v7891_v45 = vmul.f32 %v12782_v39, %v7728_v59  ;;  %v7894_v5 = vmul.f32 %v10205_v38, %v12782_v39 }
 0x792   : > { %8189 = vst.msk [vmem:[%s12892_s28 + $0xe0] sm:$0xff] %vm4797_vm4, %v8153_v2  ;;  %v7892_v49 = vmul.f32 %v12782_v39, %v7731_v21  ;;  %v8156_v52 = vmul.f32 %v8120_v11, %v13656_v61  ;;  %v8118_v34 = vsel %vm8046_vm2, %v8010_v12, %v8082_v26  ;;  %10234 = vmatmul.mubr.msk.bf16.gmra.mrb[60].mxu1 %vm4797_vm4, %v8248_v36 }
 0x793   : > { %v8015_v63 = vadd.f32 %v12829_v47, %v7972_v40  ;;  %v8225_v58 = vmul.f32 %v12731_v30, %v8149_v0  ;;  %v8154_v42 = vmul.f32 %v8118_v34, %v13657_v54  ;;  %v7970_v62 = vadd.f32 %v13658_v23, %v7891_v45 }
 0x794   : > { %v7973_v20 = vadd.f32 %v12889_v16, %v7894_v5  ;;  %v7971_v51 = vadd.f32 %v13659_v17, %v7892_v49  ;;  %8192 = vst.msk [vmem:[%s12892_s28 + $0xf8] sm:$0xff] %vm4797_vm4, %v8156_v52  ;;  %v8226_v13 = vmul.f32 %v12731_v30, %v8150_v4  ;;  %v8227_v33 = vmul.f32 %v12731_v30, %v13092_v24 }
 0x795   : > { %vm8051_vm3 = vcmp.ge.f32.partialorder %v8015_v63, 0.0  ;;  %v8087_v39 = vmul.f32 0.2, %v8015_v63  ;;  %8190 = vst.msk [vmem:[%s12892_s28 + $0xe8] sm:$0xff] %vm4797_vm4, %v8154_v42  ;;  %v8013_v55 = vadd.f32 %v12829_v47, %v7970_v62  ;;  %v8228_v32 = vmul.f32 %v12731_v30, %v8152_v7 }
 0x796   : > { %v8016_v22 = vadd.f32 %v12829_v47, %v7973_v20  ;;  %v8014_v16 = vadd.f32 %v12829_v47, %v7971_v51  ;;  %v8249_v56 = vpack.c.bf16 %v8226_v13, %v8225_v58  ;;  %v8229_v44 = vmul.f32 %v12731_v30, %v8153_v2 }
 0x797   : > { %v8123_v0 = vsel %vm8051_vm3, %v8015_v63, %v8087_v39  ;;  %v8230_v53 = vmul.f32 %v12731_v30, %v8154_v42  ;;  %vm8049_vm6 = vcmp.ge.f32.partialorder %v8013_v55, 0.0  ;;  %v8085_v24 = vmul.f32 0.2, %v8013_v55 }
 0x798   : > { %v8159_v15 = vmul.f32 %v8123_v0, %v13660_v60  ;;  %vm8052_vm7 = vcmp.ge.f32.partialorder %v8016_v22, 0.0  ;;  %v8088_v4 = vmul.f32 0.2, %v8016_v22  ;;  %vm8050_vm8 = vcmp.ge.f32.partialorder %v8014_v16, 0.0  ;;  %10237 = vmatprep.mubr.msk.bf16.mxu1 %vm4797_vm4, %v8249_v56 }
 0x799   : > { %v8086_v48 = vmul.f32 0.2, %v8014_v16  ;;  %v8250_v47 = vpack.c.bf16 %v8228_v32, %v8227_v33  ;;  %v8121_v7 = vsel %vm8049_vm6, %v8013_v55, %v8085_v24  ;;  %v8251_v35 = vpack.c.bf16 %v8230_v53, %v8229_v44 }
 0x79a   : > { %8195 = vst.msk [vmem:[%s12892_s28 + $0x110] sm:$0xff] %vm4797_vm4, %v8159_v15  ;;  %v8231_v31 = vmul.f32 %v12731_v30, %v8155_v46  ;;  %v8232_v3 = vmul.f32 %v12731_v30, %v8156_v52  ;;  %v8157_v10 = vmul.f32 %v8121_v7, %v13661_v14  ;;  %v8124_v9 = vsel %vm8052_vm7, %v8016_v22, %v8088_v4 }
 0x79b   : > { %v8122_v19 = vsel %vm8050_vm8, %v8014_v16, %v8086_v48  ;;  %10238 = vmatmul.mubr.msk.bf16.gmra.mrb[64].mxu1 %vm4797_vm4, %v8250_v47  ;;  %v8160_v6 = vmul.f32 %v8124_v9, %v13662_v1  ;;  %v8235_v59 = vmul.f32 %v12731_v30, %v8159_v15 }
 0x79c   : > { %v8158_v29 = vmul.f32 %v8122_v19, %v13663_v27  ;;  %10241 = vmatprep.mubr.msk.bf16.mxu1 %vm4797_vm4, %v8251_v35  ;;  %v8252_v12 = vpack.c.bf16 %v8232_v3, %v8231_v31  ;;  %8193 = vst.msk [vmem:[%s12892_s28 + $0x100] sm:$0xff] %vm4797_vm4, %v8157_v10  ;;  %v8233_v8 = vmul.f32 %v12731_v30, %v8157_v10 }
 0x79d   : > { %8196 = vst.msk [vmem:[%s12892_s28 + $0x118] sm:$0x3f] %vm4915_vm14, %v8160_v6  ;;  %v8236_v25 = vmul.f32 %v12731_v30, %v8160_v6 }
 0x79e   : > { %8194 = vst.msk [vmem:[%s12892_s28 + $0x108] sm:$0xff] %vm4797_vm4, %v8158_v29  ;;  %v8234_v50 = vmul.f32 %v12731_v30, %v8158_v29 }
 0x79f   : > { %v8254_v41 = vpack.c.bf16 %v8236_v25, %v8235_v59 }
 0x7a0   : > { %v8253_v43 = vpack.c.bf16 %v8234_v50, %v8233_v8 }
 0x7a3   : > { %10242 = vmatmul.mubr.msk.bf16.gmra.mrb[68].mxu1 %vm4797_vm4, %v8252_v12 }
 0x7a4   : > { %10245 = vmatprep.mubr.msk.bf16.mxu1 %vm4797_vm4, %v8253_v43 }
 0x7ab   : > { %10246 = vmatmul.mubr.msk.bf16.gmra.mrb[72].mxu1 %vm4797_vm4, %v8254_v41 }
 0x7ac   : > { %10935 = shalt.err (!%p10932_p3)
}
 0x7ad   : > { %s10936_s22 = scalar_lea.hbm %s13187_s27, 4608  ;;  %s10940_s2 = scalar_lea.hbm %s13373_s20, 9216 }
 0x7ae   : > { %p10937_p4 = scmp.ne.s32.totalorder %s13187_s27, %s10936_s22  ;;  %p10941_p9 = scmp.lt.u32.totalorder %s13187_s27, %s13373_s20 }
 0x7af   : > { %p10942_p10 = scmp.lt.u32.totalorder %s10940_s2, %s10936_s22  ;;  %p10944_p12 = scmp.lt.u32.totalorder %s10936_s22, %s13187_s27 }
 0x7b0   : > { %p10938_p7 = pnand %p10937_p4, %p11141_p5 }
 0x7b1   : > { %p10943_p11 = por %p10942_p10, %p10941_p9 }
 0x7b2   : > { %p10939_p8 = pneg %p10938_p7 }
 0x7b3   : > { %p10945_p13 = por %p10944_p12, %p10943_p11 }
 0x7b5   : > { %p10946_p0 = pnand %p10945_p13, %p10939_p8 }
 0x7b7   : > { %10949 = shalt.err (!%p10946_p0)
}
 0x7b8   : > { %s10991_s21 = smov 128   ;;  %s10992_s1 = smov 8   ;;  %vm8526_vm4 = vcmask 23552   ;;  %vm8562_vm14 = vcmask 21504  }
 0x7b9   : > { %10862 = dma.vmem_to_hbm [thread:$0]  (%p11141_p5), %s13189_s24, 4608, %s13187_s27, %s13193_s23, %s10991_s21, %s10991_s21, %s10992_s1  }
 0x7ba   : > { %s13221_s30 = scalar_lea.vmem %s13372_s19, %s11527_s26  ;;  %s13664_s0 = sld [smem:[#allocation94_spill]] }
 0x7bb   : > { %v8258_v30 = vld [vmem:[%s13221_s30 + $0x10] sm:$0xff]  ;;  %v8256_v37 = vld [vmem:[%s13221_s30] sm:$0xff]  ;;  %v8259_v28 = vld [vmem:[%s13221_s30 + $0x18] sm:$0xff] }
 0x7bc   : > { %v8257_v2 = vld [vmem:[%s13221_s30 + $0x8] sm:$0xff]  ;;  %v8262_v11 = vld [vmem:[%s13221_s30 + $0x30] sm:$0xff]  ;;  %v8260_v45 = vld [vmem:[%s13221_s30 + $0x20] sm:$0xff] }
 0x7bd   : > { %v8263_v49 = vld [vmem:[%s13221_s30 + $0x38] sm:$0xff]  ;;  %v8261_v34 = vld [vmem:[%s13221_s30 + $0x28] sm:$0xff]  ;;  %v8266_v62 = vld [vmem:[%s13221_s30 + $0x50] sm:$0xff] }
 0x7be   : > { %v8264_v20 = vld [vmem:[%s13221_s30 + $0x40] sm:$0xff]  ;;  %v8267_v51 = vld [vmem:[%s13221_s30 + $0x58] sm:$0xff]  ;;  %v8265_v33 = vld [vmem:[%s13221_s30 + $0x48] sm:$0xff] }
 0x7bf   : > { %v8270_v56 = vld [vmem:[%s13221_s30 + $0x70] sm:$0xff]  ;;  %v8268_v44 = vld [vmem:[%s13221_s30 + $0x60] sm:$0xff]  ;;  %v8271_v60 = vld [vmem:[%s13221_s30 + $0x78] sm:$0xff] }
 0x7c0   : > { %s13229_s3 = scalar_lea.vmem %s13664_s0, %s11527_s26  ;;  %v8269_v4 = vld [vmem:[%s13221_s30 + $0x68] sm:$0xff]  ;;  %v8274_v3 = vld [vmem:[%s13221_s30 + $0x90] sm:$0xff]  ;;  %v8272_v14 = vld [vmem:[%s13221_s30 + $0x80] sm:$0xff] }
 0x7c1   : > { %v8275_v9 = vld [vmem:[%s13221_s30 + $0x98] sm:$0xff]  ;;  %v8273_v6 = vld [vmem:[%s13221_s30 + $0x88] sm:$0xff]  ;;  %v8278_v59 = vld [vmem:[%s13221_s30 + $0xb0] sm:$0xff] }
 0x7c2   : > { %v8276_v25 = vld [vmem:[%s13221_s30 + $0xa0] sm:$0xff]  ;;  %v8279_v41 = vld [vmem:[%s13221_s30 + $0xb8] sm:$0xff] }
 0x837   : > { %v10215_v38 = vpop.f32.mrb[40].mxu1 }
 0x838   : > { %v8392_v46 = vadd.f32 %v10215_v38, %v8258_v30  ;;  %v8383_v57 = vpop.f32.mrb[41].mxu1  ;;  %v8277_v38 = vld [vmem:[%s13221_s30 + $0xa8] sm:$0xff] }
 0x839   : > { %v8384_v18 = vadd.f32 %v8383_v57, %v8256_v37  ;;  %v10216_v21 = vpop.f32.mrb[42].mxu1 }
 0x83a   : > { %8529 = vst.msk [vmem:[%s13229_s3 + $0x10] sm:$0xff] %vm8526_vm4, %v8392_v46  ;;  %v8395_v26 = vadd.f32 %v10216_v21, %v8259_v28  ;;  %v8386_v36 = vpop.f32.mrb[43].mxu1  ;;  %v8282_v21 = vld [vmem:[%s13221_s30 + $0xd0] sm:$0xff] }
 0x83b   : > { %8527 = vst.msk [vmem:[%s13229_s3] sm:$0xff] %vm8526_vm4, %v8384_v18  ;;  %v8387_v40 = vadd.f32 %v8386_v36, %v8257_v2 }
 0x83c   : > { %8530 = vst.msk [vmem:[%s13229_s3 + $0x18] sm:$0xff] %vm8526_vm4, %v8395_v26  ;;  %v8280_v26 = vld [vmem:[%s13221_s30 + $0xc0] sm:$0xff] }
 0x83d   : > { %8528 = vst.msk [vmem:[%s13229_s3 + $0x8] sm:$0xff] %vm8526_vm4, %v8387_v40  ;;  %v8283_v40 = vld [vmem:[%s13221_s30 + $0xd8] sm:$0xff] }
 0x841   : > { %v10219_v5 = vpop.f32.mrb[44].mxu1 }
 0x842   : > { %v8408_v61 = vadd.f32 %v10219_v5, %v8262_v11  ;;  %v8399_v52 = vpop.f32.mrb[45].mxu1  ;;  %v8281_v5 = vld [vmem:[%s13221_s30 + $0xc8] sm:$0xff] }
 0x843   : > { %v8400_v63 = vadd.f32 %v8399_v52, %v8260_v45  ;;  %v10220_v58 = vpop.f32.mrb[46].mxu1 }
 0x844   : > { %8533 = vst.msk [vmem:[%s13229_s3 + $0x30] sm:$0xff] %vm8526_vm4, %v8408_v61  ;;  %v8411_v54 = vadd.f32 %v10220_v58, %v8263_v49  ;;  %v8402_v42 = vpop.f32.mrb[47].mxu1  ;;  %v8286_v58 = vld [vmem:[%s13221_s30 + $0xf0] sm:$0xff] }
 0x845   : > { %8531 = vst.msk [vmem:[%s13229_s3 + $0x20] sm:$0xff] %vm8526_vm4, %v8400_v63  ;;  %v8403_v23 = vadd.f32 %v8402_v42, %v8261_v34 }
 0x846   : > { %8534 = vst.msk [vmem:[%s13229_s3 + $0x38] sm:$0xff] %vm8526_vm4, %v8411_v54  ;;  %v8284_v54 = vld [vmem:[%s13221_s30 + $0xe0] sm:$0xff] }
 0x847   : > { %8532 = vst.msk [vmem:[%s13229_s3 + $0x28] sm:$0xff] %vm8526_vm4, %v8403_v23  ;;  %v8287_v23 = vld [vmem:[%s13221_s30 + $0xf8] sm:$0xff] }
 0x849   : > { %v10223_v17 = vpop.f32.mrb[48].mxu1 }
 0x84a   : > { %v8424_v39 = vadd.f32 %v10223_v17, %v8266_v62  ;;  %v8415_v13 = vpop.f32.mrb[49].mxu1  ;;  %v8285_v17 = vld [vmem:[%s13221_s30 + $0xe8] sm:$0xff] }
 0x84b   : > { %v8416_v55 = vadd.f32 %v8415_v13, %v8264_v20  ;;  %v10224_v22 = vpop.f32.mrb[50].mxu1 }
 0x84c   : > { %8537 = vst.msk [vmem:[%s13229_s3 + $0x50] sm:$0xff] %vm8526_vm4, %v8424_v39  ;;  %v8427_v16 = vadd.f32 %v10224_v22, %v8267_v51  ;;  %v8418_v32 = vpop.f32.mrb[51].mxu1  ;;  %v8290_v22 = vld [vmem:[%s13221_s30 + $0x110] sm:$0xff] }
 0x84d   : > { %8535 = vst.msk [vmem:[%s13229_s3 + $0x40] sm:$0xff] %vm8526_vm4, %v8416_v55  ;;  %v8419_v0 = vadd.f32 %v8418_v32, %v8265_v33 }
 0x84e   : > { %8538 = vst.msk [vmem:[%s13229_s3 + $0x58] sm:$0xff] %vm8526_vm4, %v8427_v16  ;;  %v8288_v16 = vld [vmem:[%s13221_s30 + $0x100] sm:$0xff] }
 0x84f   : > { %8536 = vst.msk [vmem:[%s13229_s3 + $0x48] sm:$0xff] %vm8526_vm4, %v8419_v0  ;;  %v8291_v0 = vld [vmem:[%s13221_s30 + $0x118] sm:$0x3f] }
 0x854   : > { %v10227_v53 = vpop.f32.mrb[52].mxu1 }
 0x855   : > { %v8440_v15 = vadd.f32 %v10227_v53, %v8270_v56  ;;  %v8431_v24 = vpop.f32.mrb[53].mxu1  ;;  %v8289_v53 = vld [vmem:[%s13221_s30 + $0x108] sm:$0xff] }
 0x856   : > { %v8432_v48 = vadd.f32 %v8431_v24, %v8268_v44  ;;  %v10228_v47 = vpop.f32.mrb[54].mxu1 }
 0x857   : > { %8541 = vst.msk [vmem:[%s13229_s3 + $0x70] sm:$0xff] %vm8526_vm4, %v8440_v15  ;;  %v8443_v7 = vadd.f32 %v10228_v47, %v8271_v60  ;;  %v8434_v35 = vpop.f32.mrb[55].mxu1 }
 0x858   : > { %8539 = vst.msk [vmem:[%s13229_s3 + $0x60] sm:$0xff] %vm8526_vm4, %v8432_v48  ;;  %v8435_v31 = vadd.f32 %v8434_v35, %v8269_v4 }
 0x859   : > { %8542 = vst.msk [vmem:[%s13229_s3 + $0x78] sm:$0xff] %vm8526_vm4, %v8443_v7 }
 0x85a   : > { %8540 = vst.msk [vmem:[%s13229_s3 + $0x68] sm:$0xff] %vm8526_vm4, %v8435_v31 }
 0x85d   : > { %v10231_v10 = vpop.f32.mrb[56].mxu1 }
 0x85e   : > { %v8456_v19 = vadd.f32 %v10231_v10, %v8274_v3  ;;  %v8447_v1 = vpop.f32.mrb[57].mxu1 }
 0x85f   : > { %v8448_v27 = vadd.f32 %v8447_v1, %v8272_v14  ;;  %v10232_v29 = vpop.f32.mrb[58].mxu1 }
 0x860   : > { %8545 = vst.msk [vmem:[%s13229_s3 + $0x90] sm:$0xff] %vm8526_vm4, %v8456_v19  ;;  %v8459_v12 = vadd.f32 %v10232_v29, %v8275_v9  ;;  %v8450_v8 = vpop.f32.mrb[59].mxu1 }
 0x861   : > { %8543 = vst.msk [vmem:[%s13229_s3 + $0x80] sm:$0xff] %vm8526_vm4, %v8448_v27  ;;  %v8451_v50 = vadd.f32 %v8450_v8, %v8273_v6 }
 0x862   : > { %8546 = vst.msk [vmem:[%s13229_s3 + $0x98] sm:$0xff] %vm8526_vm4, %v8459_v12 }
 0x863   : > { %8544 = vst.msk [vmem:[%s13229_s3 + $0x88] sm:$0xff] %vm8526_vm4, %v8451_v50 }
 0x865   : > { %v10235_v43 = vpop.f32.mrb[60].mxu1 }
 0x866   : > { %v8472_v30 = vadd.f32 %v10235_v43, %v8278_v59  ;;  %v8463_v37 = vpop.f32.mrb[61].mxu1 }
 0x867   : > { %v8464_v28 = vadd.f32 %v8463_v37, %v8276_v25  ;;  %v10236_v46 = vpop.f32.mrb[62].mxu1 }
 0x868   : > { %8549 = vst.msk [vmem:[%s13229_s3 + $0xb0] sm:$0xff] %vm8526_vm4, %v8472_v30  ;;  %v8475_v57 = vadd.f32 %v10236_v46, %v8279_v41  ;;  %v8466_v2 = vpop.f32.mrb[63].mxu1 }
 0x869   : > { %8547 = vst.msk [vmem:[%s13229_s3 + $0xa0] sm:$0xff] %vm8526_vm4, %v8464_v28  ;;  %v8467_v18 = vadd.f32 %v8466_v2, %v8277_v38 }
 0x86a   : > { %8550 = vst.msk [vmem:[%s13229_s3 + $0xb8] sm:$0xff] %vm8526_vm4, %v8475_v57 }
 0x86b   : > { %8548 = vst.msk [vmem:[%s13229_s3 + $0xa8] sm:$0xff] %vm8526_vm4, %v8467_v18 }
 0x86e   : > { %v10239_v36 = vpop.f32.mrb[64].mxu1 }
 0x86f   : > { %v8488_v11 = vadd.f32 %v10239_v36, %v8282_v21  ;;  %v8479_v45 = vpop.f32.mrb[65].mxu1 }
 0x870   : > { %v8480_v49 = vadd.f32 %v8479_v45, %v8280_v26  ;;  %v10240_v61 = vpop.f32.mrb[66].mxu1 }
 0x871   : > { %8553 = vst.msk [vmem:[%s13229_s3 + $0xd0] sm:$0xff] %vm8526_vm4, %v8488_v11  ;;  %v8491_v52 = vadd.f32 %v10240_v61, %v8283_v40  ;;  %v8482_v34 = vpop.f32.mrb[67].mxu1 }
 0x872   : > { %8551 = vst.msk [vmem:[%s13229_s3 + $0xc0] sm:$0xff] %vm8526_vm4, %v8480_v49  ;;  %v8483_v63 = vadd.f32 %v8482_v34, %v8281_v5 }
 0x873   : > { %8554 = vst.msk [vmem:[%s13229_s3 + $0xd8] sm:$0xff] %vm8526_vm4, %v8491_v52 }
 0x874   : > { %8552 = vst.msk [vmem:[%s13229_s3 + $0xc8] sm:$0xff] %vm8526_vm4, %v8483_v63 }
 0x876   : > { %v10243_v42 = vpop.f32.mrb[68].mxu1 }
 0x877   : > { %v8504_v62 = vadd.f32 %v10243_v42, %v8286_v58  ;;  %v8495_v20 = vpop.f32.mrb[69].mxu1 }
 0x878   : > { %v8496_v51 = vadd.f32 %v8495_v20, %v8284_v54  ;;  %v10244_v39 = vpop.f32.mrb[70].mxu1 }
 0x879   : > { %8557 = vst.msk [vmem:[%s13229_s3 + $0xf0] sm:$0xff] %vm8526_vm4, %v8504_v62  ;;  %v8507_v13 = vadd.f32 %v10244_v39, %v8287_v23  ;;  %v8498_v33 = vpop.f32.mrb[71].mxu1 }
 0x87a   : > { %8555 = vst.msk [vmem:[%s13229_s3 + $0xe0] sm:$0xff] %vm8526_vm4, %v8496_v51  ;;  %v8499_v55 = vadd.f32 %v8498_v33, %v8285_v17 }
 0x87b   : > { %8558 = vst.msk [vmem:[%s13229_s3 + $0xf8] sm:$0xff] %vm8526_vm4, %v8507_v13 }
 0x87c   : > { %8556 = vst.msk [vmem:[%s13229_s3 + $0xe8] sm:$0xff] %vm8526_vm4, %v8499_v55 }
 0x87e   : > { %v10247_v32 = vpop.f32.mrb[72].mxu1 }
 0x87f   : > { %v8520_v56 = vadd.f32 %v10247_v32, %v8290_v22  ;;  %v8511_v44 = vpop.f32.mrb[73].mxu1 }
 0x880   : > { %v8512_v60 = vadd.f32 %v8511_v44, %v8288_v16  ;;  %v10248_v15 = vpop.f32.mrb[74].mxu1 }
 0x881   : > { %8561 = vst.msk [vmem:[%s13229_s3 + $0x110] sm:$0xff] %vm8526_vm4, %v8520_v56  ;;  %v8523_v24 = vadd.f32 %v10248_v15, %v8291_v0  ;;  %v8514_v4 = vpop.f32.mrb[75].mxu1 }
 0x882   : > { %8559 = vst.msk [vmem:[%s13229_s3 + $0x100] sm:$0xff] %vm8526_vm4, %v8512_v60  ;;  %v8515_v48 = vadd.f32 %v8514_v4, %v8289_v53 }
 0x883   : > { %8563 = vst.msk [vmem:[%s13229_s3 + $0x118] sm:$0x3f] %vm8562_vm14, %v8523_v24 }
 0x884   : > { %8560 = vst.msk [vmem:[%s13229_s3 + $0x108] sm:$0xff] %vm8526_vm4, %v8515_v48 }
 0x885 PF: > { %s13665_s5 = sld [smem:[#allocation9_spill]]  ;;  %s13666_s26 = sld [smem:[#allocation7_spill]] }
 0x88b   : > { %p10868_p5 = scmp.ge.s32.totalorder %s13665_s5, 2  ;;  %s8601_s27 = sand.u32 1, %s13666_s26  }
 0x88c   : > { %s8602_s23 = scalar_lea.sflag [#allocation5], %s8601_s27 }
 0x88d   : > { %p10865_p1 = pnand %p10868_p5, %p11145_p6 }
 0x88f   : > { %10967 = dma.done.wait (!%p10865_p1), %s8602_s23, 4608  }
 0x890   : > { %10969 = vsyncadd (!%p10865_p1), %s8602_s23, 4294962688  ;;  %s13668_s27 = sld [smem:[#allocation10_spill]]  ;;  %s13669_s21 = sld [smem:[#allocation8_spill]] }
 0x891   : > { %s13670_s26 = sld [smem:[#allocation11_spill]]  ;;  %s13671_s2 = smov %s10976_s25 }
 0x896   : > { %p32_p2 = scmp.ge.s32.totalorder %s13668_s27, 4   ;;  %s13672_s25 = smov %s13669_s21 }
 0x898   :  { %34 = sbr.rel (!%p32_p2) target bundleno = 11 (0xb), region = 172 }
 0x89f   :  { %8615 = vsyncpa [#allocation5], 1 }
 0x8a0   :  { %8617 = vsyncpa [#allocation5 + $0x1], 1 }

</bundles_post_ra>
